<compile_context>
chip_gen: v7x
topology: tpu7x:2x2x1
jax: 0.10.0
libtpu: 0.0.40
codegen_flags: <defaults>
</compile_context>

<pallas_src>
import functools

import jax
import jax.numpy as jnp
from jax.experimental import pallas as pl
from jax.experimental.pallas import tpu as pltpu


def _self_attention_kernel(xq_ref, xkv_ref, wqkv_ref, wout_ref, o_ref,
                           q_scr, m_scr, l_scr, acc_scr, *kv_cache,
                           heads, scale, cache_kv):
    qi = pl.program_id(1)
    ki = pl.program_id(2)
    nk = pl.num_programs(2)

    tq, d = q_scr.shape
    tk = xkv_ref.shape[1]
    hd = d // heads
    cdt = q_scr.dtype                       # MXU operand dtype; accum is f32
    approx = bool(cdt == jnp.dtype(jnp.bfloat16))

    @pl.when(ki == 0)
    def _init():
        # Project Q once per (batch, q-tile) and fold the softmax scale here
        # (d**-0.5 with the FULL feature dim, exactly like the PyTorch module).
        q = jnp.dot(xq_ref[0].astype(cdt), wqkv_ref[:, 0:d],
                    preferred_element_type=jnp.float32)
        q_scr[...] = (q * scale).astype(cdt)
        m_scr[...] = jnp.full(m_scr.shape, -jnp.inf, dtype=jnp.float32)
        l_scr[...] = jnp.zeros(l_scr.shape, dtype=jnp.float32)
        acc_scr[...] = jnp.zeros(acc_scr.shape, dtype=jnp.float32)

    def project_kv():
        xkv = xkv_ref[0].astype(cdt)
        kf = jnp.dot(xkv, wqkv_ref[:, d:2 * d],
                     preferred_element_type=jnp.float32).astype(cdt)
        vf = jnp.dot(xkv, wqkv_ref[:, 2 * d:3 * d],
                     preferred_element_type=jnp.float32).astype(cdt)
        return kf, vf

    if cache_kv:
        k_cache, v_cache = kv_cache
        row = pl.multiple_of(ki * tk, tk)

        @pl.when(qi == 0)
        def _fill_cache():
            # The kv axis sweeps fully at qi == 0: project K/V once per batch
            # and keep them VMEM-resident for all later q-tiles.
            kf, vf = project_kv()
            k_cache[pl.ds(row, tk), :] = kf
            v_cache[pl.ds(row, tk), :] = vf

        k = k_cache[pl.ds(row, tk), :]
        v = v_cache[pl.ds(row, tk), :]
    else:
        k, v = project_kv()

    # Online-softmax (flash) update; heads are a statically unrolled loop, the
    # PV partials accumulate into per-head lane slices of one (tq, d) buffer.
    for h in range(heads):
        sl = slice(h * hd, (h + 1) * hd)
        qh = q_scr[:, sl]                     # (tq, hd), pre-scaled
        kh = k[:, sl]                         # (tk, hd)
        vh = v[:, sl]                         # (tk, hd)

        # QK^T without materializing kh.T: contract the last dims on the MXU.
        s = jax.lax.dot_general(
            qh, kh, dimension_numbers=(((1,), (1,)), ((), ())),
            preferred_element_type=jnp.float32)          # (tq, tk), f32

        m_prev = m_scr[h]                                 # (tq, 1) f32
        m_new = jnp.maximum(m_prev, jnp.max(s, axis=-1, keepdims=True))
        alpha = jnp.exp(m_prev - m_new)
        p = jnp.exp(s - m_new)                            # unnormalized probs
        l_scr[h] = alpha * l_scr[h] + jnp.sum(p, axis=-1, keepdims=True)
        acc_scr[:, sl] = alpha * acc_scr[:, sl] + jnp.dot(
            p.astype(cdt), vh, preferred_element_type=jnp.float32)
        m_scr[h] = m_new

    @pl.when(ki == nk - 1)
    def _finalize():
        # Deferred normalization: scale each head slice by 1/l, stage the
        # result into q_scr (Q is dead now, same lane-dense layout), then do
        # ONE fused (tq, d) x (d, d) output projection and a single
        # lane-dense store with an explicit cast to the output dtype.
        for h in range(heads):
            sl = slice(h * hd, (h + 1) * hd)
            inv_l = pl.reciprocal(l_scr[h], approx=approx)    # (tq, 1)
            q_scr[:, sl] = (acc_scr[:, sl] * inv_l).astype(cdt)
        out = jnp.dot(q_scr[...], wout_ref[...],
                      preferred_element_type=jnp.float32)
        o_ref[0] = out.astype(o_ref.dtype)


def _pick_tile(n, target):
    """Largest multiple of 8 that divides n and is <= target (or n itself)."""
    if n <= target:
        return n
    best = None
    for t in range(8, target + 1, 8):
        if n % t == 0:
            best = t
    return best if best is not None else n


def self_attention(x, w_qkv, w_out, *, heads, tq=None, tk=None,
                   compute_dtype=jnp.bfloat16, use_kv_cache=True,
                   vmem_limit_bytes=None):
    b, n, d = x.shape
    assert d % heads == 0, "feature dim must be divisible by heads"
    assert w_qkv.shape == (d, 3 * d) and w_out.shape == (d, d)

    if tq is None:
        tq = _pick_tile(n, 256)
    if tk is None:
        tk = _pick_tile(n, 512)
    assert n % tq == 0 and n % tk == 0, "sequence length must divide the tiles"

    # MXU operands in compute_dtype (bf16 by default, the MXU-native dtype);
    # f32 accumulation and f32 softmax stats are kept inside the kernel.
    compute_dtype = jnp.dtype(compute_dtype)
    w_qkv_c = w_qkv.astype(compute_dtype)
    w_out_c = w_out.astype(compute_dtype)

    # Generation-aware VMEM budget (v7x: 64 MiB/TC, v5e/v6e: 128 MiB).
    if vmem_limit_bytes is None:
        try:
            vmem_limit_bytes = int(
                0.75 * pltpu.get_tpu_info().vmem_capacity_bytes)
        except Exception:
            vmem_limit_bytes = 32 * 1024 * 1024

    # Decide whether the VMEM K/V cache fits; otherwise fall back to
    # recomputing K/V per kv tile (the v2 behaviour).
    cdt_b = compute_dtype.itemsize
    x_b = x.dtype.itemsize
    cache_bytes = 2 * n * d * cdt_b
    weight_bytes = 2 * (w_qkv_c.size + w_out_c.size) * cdt_b     # 2x buffered
    tile_bytes = 2 * ((tq + tk) * d * x_b + tq * d * x_b)        # in/out tiles
    scratch_bytes = tq * d * cdt_b + 2 * heads * tq * 128 * 4 + tq * d * 4
    cache_kv = bool(use_kv_cache) and (
        cache_bytes + weight_bytes + tile_bytes + scratch_bytes
        <= int(0.8 * vmem_limit_bytes))

    kernel = functools.partial(
        _self_attention_kernel, heads=heads, scale=float(d) ** -0.5,
        cache_kv=cache_kv)
    grid = (b, n // tq, n // tk)

    scratch = [
        pltpu.VMEM((tq, d), compute_dtype),          # Q tile / staged output
        pltpu.VMEM((heads, tq, 1), jnp.float32),     # running max m
        pltpu.VMEM((heads, tq, 1), jnp.float32),     # running sum l
        pltpu.VMEM((tq, d), jnp.float32),            # lane-dense PV accum
    ]
    if cache_kv:
        scratch += [pltpu.VMEM((n, d), compute_dtype),   # K cache
                    pltpu.VMEM((n, d), compute_dtype)]   # V cache

    if cache_kv:
        # xkv is only needed while qi == 0; a constant block index for qi > 0
        # lets the pipeliner skip re-DMAing x for every later q-tile.
        xkv_index = lambda bi, qi, ki: (bi, jnp.where(qi == 0, ki, 0), 0)
        # qi > 0 reuses the K/V cache filled at qi == 0, so the q axis must be
        # sequential; batch can still be split across TensorCores.
        dims = ("parallel", "arbitrary", "arbitrary")
    else:
        xkv_index = lambda bi, qi, ki: (bi, ki, 0)
        dims = ("parallel", "parallel", "arbitrary")

    cost = pl.CostEstimate(
        flops=int(2 * b * n * d * (4 * d + 2 * n)),
        transcendentals=int(b * heads * n * n),
        bytes_accessed=int(3 * x.size * x_b
                           + (w_qkv_c.size + w_out_c.size) * cdt_b))

    return pl.pallas_call(
        kernel,
        out_shape=jax.ShapeDtypeStruct((b, n, d), x.dtype),
        grid_spec=pltpu.PrefetchScalarGridSpec(
            num_scalar_prefetch=0,
            grid=grid,
            in_specs=[
                # q-side tile of x
                pl.BlockSpec((1, tq, d), lambda bi, qi, ki: (bi, qi, 0)),
                # kv-side tile of x
                pl.BlockSpec((1, tk, d), xkv_index),
                # weights: constant index_map -> fetched once, VMEM-resident
                pl.BlockSpec((d, 3 * d), lambda bi, qi, ki: (0, 0)),
                pl.BlockSpec((d, d), lambda bi, qi, ki: (0, 0)),
            ],
            out_specs=pl.BlockSpec((1, tq, d), lambda bi, qi, ki: (bi, qi, 0)),
            scratch_shapes=scratch),
        compiler_params=pltpu.CompilerParams(
            dimension_semantics=dims,
            vmem_limit_bytes=int(vmem_limit_bytes)),
        cost_estimate=cost,
    )(x, x, w_qkv_c, w_out_c)


def self_attention_ref(x, w_qkv, w_out, *, heads):
    # Pure-JAX reference mirroring the PyTorch forward exactly (f32).
    b, n, d = x.shape
    qkv = x @ w_qkv
    q, k, v = jnp.split(qkv, 3, axis=-1)

    def to_heads(t):
        return t.reshape(b, n, heads, d // heads).transpose(0, 2, 1, 3)

    q, k, v = map(to_heads, (q, k, v))
    wei = (q @ k.transpose(0, 1, 3, 2)) * d ** (-0.5)
    wei = jax.nn.softmax(wei, axis=-1)
    out = (wei @ v).transpose(0, 2, 1, 3).reshape(b, n, d)
    return out @ w_out


if __name__ == "__main__":
    def run_case(B, N, D, heads, tq=None, tk=None,
                 compute_dtype=jnp.bfloat16, use_kv_cache=True, tol=2.5e-2):
        key = jax.random.PRNGKey(0)
        kx, kqkv, kout = jax.random.split(key, 3)
        x = jax.random.normal(kx, (B, N, D), dtype=jnp.float32)
        w_qkv = jax.random.normal(kqkv, (D, 3 * D), dtype=jnp.float32) * (D ** -0.5)
        w_out = jax.random.normal(kout, (D, D), dtype=jnp.float32) * (D ** -0.5)

        out = self_attention(x, w_qkv, w_out, heads=heads, tq=tq, tk=tk,
                             compute_dtype=compute_dtype,
                             use_kv_cache=use_kv_cache)
        out = jax.block_until_ready(out)
        ref = self_attention_ref(x, w_qkv, w_out, heads=heads)
        assert out.shape == (B, N, D)
        err = float(jnp.max(jnp.abs(out.astype(jnp.float32) - ref)))
        assert err < tol, f"mismatch vs reference, max abs err {err}"

    # Lane-aligned fast path (head_dim = 128): bf16 MXU operands, K/V VMEM
    # cache, multi-tile flash accumulation across both q and kv grid axes,
    # fused output projection.
    run_case(B=2, N=256, D=512, heads=4, tq=128, tk=128,
             compute_dtype=jnp.bfloat16, use_kv_cache=True, tol=2.5e-2)
    # Exact f32 path with the per-tile K/V recompute fallback (cache disabled)
    # at the module's default heads=8 (head_dim = 4), checked tightly.
    run_case(B=2, N=8, D=32, heads=8,
             compute_dtype=jnp.float32, use_kv_cache=False, tol=1e-4)

    print("KERNEL_OK")
</pallas_src>

<mosaic_0001>
module attributes {stable_mosaic.version = 11 : i64} {
  func.func @_self_attention_kernel(%arg0: i32, %arg1: i32, %arg2: i32, %arg3: memref<1x128x512xf32, #tpu.memory_space<vmem>>, %arg4: memref<1x128x512xf32, #tpu.memory_space<vmem>>, %arg5: memref<512x1536xbf16, #tpu.memory_space<vmem>>, %arg6: memref<512x512xbf16, #tpu.memory_space<vmem>>, %arg7: memref<1x128x512xf32, #tpu.memory_space<vmem>>, %arg8: memref<128x512xbf16, #tpu.memory_space<vmem>>, %arg9: memref<4x128x1xf32, #tpu.memory_space<vmem>>, %arg10: memref<4x128x1xf32, #tpu.memory_space<vmem>>, %arg11: memref<128x512xf32, #tpu.memory_space<vmem>>, %arg12: memref<256x512xbf16, #tpu.memory_space<vmem>>, %arg13: memref<256x512xbf16, #tpu.memory_space<vmem>>) attributes {dimension_semantics = [#tpu.dimension_semantics<parallel>, #tpu.dimension_semantics<arbitrary>, #tpu.dimension_semantics<arbitrary>], iteration_bounds = array<i64: 2, 2, 2>, scalar_prefetch = 0 : i64, scratch_operands = 6 : i64, tpu.core_type = #tpu.core_type<tc>, window_params = [{transform_indices = @transform_0, window_bounds = array<i64: 1, 128, 512>}, {transform_indices = @transform_1, window_bounds = array<i64: 1, 128, 512>}, {pipeline_mode = #tpu.pipeline_mode<synchronous>, transform_indices = @transform_2, window_bounds = array<i64: 512, 1536>}, {pipeline_mode = #tpu.pipeline_mode<synchronous>, transform_indices = @transform_3, window_bounds = array<i64: 512, 512>}, {transform_indices = @transform_4, window_bounds = array<i64: 1, 128, 512>}]} {
    %c0_i32 = arith.constant 0 : i32
    %0 = arith.cmpi eq, %arg2, %c0_i32 : i32
    %1 = arith.extui %0 : i1 to i32
    %c0_i32_0 = arith.constant 0 : i32
    %2 = arith.cmpi ne, %1, %c0_i32_0 : i32
    scf.if %2 {
      %c0_86 = arith.constant 0 : index
      %c0_87 = arith.constant 0 : index
      %c0_88 = arith.constant 0 : index
      %147 = vector.load %arg3[%c0_86, %c0_87, %c0_88] : memref<1x128x512xf32, #tpu.memory_space<vmem>>, vector<1x128x512xf32>
      %148 = vector.shape_cast %147 : vector<1x128x512xf32> to vector<128x512xf32>
      %149 = arith.truncf %148 : vector<128x512xf32> to vector<128x512xbf16>
      %c0_89 = arith.constant 0 : index
      %c0_90 = arith.constant 0 : index
      %150 = vector.load %arg5[%c0_89, %c0_90] : memref<512x1536xbf16, #tpu.memory_space<vmem>>, vector<512x512xbf16>
      %cst_91 = arith.constant dense<0.000000e+00> : vector<128x512xf32>
      %151 = tpu.matmul %149, %150, %cst_91 {dimension_numbers = #tpu.dot_dimension_numbers<[1], [0], [0], [1], [0, 0, 1, 1], [], []>} : vector<128x512xbf16>, vector<512x512xbf16>, vector<128x512xf32> -> vector<128x512xf32>
      %cst_92 = arith.constant 0.0441941731 : f32
      %152 = vector.broadcast %cst_92 : f32 to vector<128x512xf32>
      %153 = arith.mulf %151, %152 : vector<128x512xf32>
      %154 = arith.truncf %153 : vector<128x512xf32> to vector<128x512xbf16>
      %c0_93 = arith.constant 0 : index
      %c0_94 = arith.constant 0 : index
      %155 = vector.load %arg8[%c0_93, %c0_94] : memref<128x512xbf16, #tpu.memory_space<vmem>>, vector<128x512xbf16>
      tpu.vector_store %arg8[%c0_93, %c0_94], %154 {strides = array<i32>} : memref<128x512xbf16, #tpu.memory_space<vmem>>, vector<128x512xbf16>,
      %cst_95 = arith.constant 0xFF800000 : f32
      %156 = vector.broadcast %cst_95 : f32 to vector<4x128x1xf32>
      %c0_96 = arith.constant 0 : index
      %c0_97 = arith.constant 0 : index
      %c0_98 = arith.constant 0 : index
      %157 = vector.load %arg9[%c0_96, %c0_97, %c0_98] : memref<4x128x1xf32, #tpu.memory_space<vmem>>, vector<4x128x1xf32>
      tpu.vector_store %arg9[%c0_96, %c0_97, %c0_98], %156 {strides = array<i32>} : memref<4x128x1xf32, #tpu.memory_space<vmem>>, vector<4x128x1xf32>,
      %cst_99 = arith.constant 0.000000e+00 : f32
      %158 = vector.broadcast %cst_99 : f32 to vector<4x128x1xf32>
      %c0_100 = arith.constant 0 : index
      %c0_101 = arith.constant 0 : index
      %c0_102 = arith.constant 0 : index
      %159 = vector.load %arg10[%c0_100, %c0_101, %c0_102] : memref<4x128x1xf32, #tpu.memory_space<vmem>>, vector<4x128x1xf32>
      tpu.vector_store %arg10[%c0_100, %c0_101, %c0_102], %158 {strides = array<i32>} : memref<4x128x1xf32, #tpu.memory_space<vmem>>, vector<4x128x1xf32>,
      %cst_103 = arith.constant 0.000000e+00 : f32
      %160 = vector.broadcast %cst_103 : f32 to vector<128x512xf32>
      %c0_104 = arith.constant 0 : index
      %c0_105 = arith.constant 0 : index
      %161 = vector.load %arg11[%c0_104, %c0_105] : memref<128x512xf32, #tpu.memory_space<vmem>>, vector<128x512xf32>
      tpu.vector_store %arg11[%c0_104, %c0_105], %160 {strides = array<i32>} : memref<128x512xf32, #tpu.memory_space<vmem>>, vector<128x512xf32>,
    } else {
    }
    %c128_i32 = arith.constant 128 : i32
    %3 = arith.muli %arg2, %c128_i32 : i32
    %4 = tpu.assume_multiple %3, 128 : i32
    %c0_i32_1 = arith.constant 0 : i32
    %5 = arith.cmpi eq, %arg1, %c0_i32_1 : i32
    %6 = arith.extui %5 : i1 to i32
    %c0_i32_2 = arith.constant 0 : i32
    %7 = arith.cmpi ne, %6, %c0_i32_2 : i32
    scf.if %7 {
      %c0_86 = arith.constant 0 : index
      %c0_87 = arith.constant 0 : index
      %c0_88 = arith.constant 0 : index
      %147 = vector.load %arg4[%c0_86, %c0_87, %c0_88] : memref<1x128x512xf32, #tpu.memory_space<vmem>>, vector<1x128x512xf32>
      %148 = vector.shape_cast %147 : vector<1x128x512xf32> to vector<128x512xf32>
      %149 = arith.truncf %148 : vector<128x512xf32> to vector<128x512xbf16>
      %c0_89 = arith.constant 0 : index
      %c512 = arith.constant 512 : index
      %150 = vector.load %arg5[%c0_89, %c512] : memref<512x1536xbf16, #tpu.memory_space<vmem>>, vector<512x512xbf16>
      %cst_90 = arith.constant dense<0.000000e+00> : vector<128x512xf32>
      %151 = tpu.matmul %149, %150, %cst_90 {dimension_numbers = #tpu.dot_dimension_numbers<[1], [0], [0], [1], [0, 0, 1, 1], [], []>} : vector<128x512xbf16>, vector<512x512xbf16>, vector<128x512xf32> -> vector<128x512xf32>
      %152 = arith.truncf %151 : vector<128x512xf32> to vector<128x512xbf16>
      %c0_91 = arith.constant 0 : index
      %c1024 = arith.constant 1024 : index
      %153 = vector.load %arg5[%c0_91, %c1024] : memref<512x1536xbf16, #tpu.memory_space<vmem>>, vector<512x512xbf16>
      %cst_92 = arith.constant dense<0.000000e+00> : vector<128x512xf32>
      %154 = tpu.matmul %149, %153, %cst_92 {dimension_numbers = #tpu.dot_dimension_numbers<[1], [0], [0], [1], [0, 0, 1, 1], [], []>} : vector<128x512xbf16>, vector<512x512xbf16>, vector<128x512xf32> -> vector<128x512xf32>
      %155 = arith.truncf %154 : vector<128x512xf32> to vector<128x512xbf16>
      %156 = arith.index_cast %4 : i32 to index
      %c0_93 = arith.constant 0 : index
      %157 = vector.load %arg12[%156, %c0_93] : memref<256x512xbf16, #tpu.memory_space<vmem>>, vector<128x512xbf16>
      tpu.vector_store %arg12[%156, %c0_93], %152 {strides = array<i32>} : memref<256x512xbf16, #tpu.memory_space<vmem>>, vector<128x512xbf16>,
      %158 = arith.index_cast %4 : i32 to index
      %c0_94 = arith.constant 0 : index
      %159 = vector.load %arg13[%158, %c0_94] : memref<256x512xbf16, #tpu.memory_space<vmem>>, vector<128x512xbf16>
      tpu.vector_store %arg13[%158, %c0_94], %155 {strides = array<i32>} : memref<256x512xbf16, #tpu.memory_space<vmem>>, vector<128x512xbf16>,
    } else {
    }
    %8 = arith.index_cast %4 : i32 to index
    %c0 = arith.constant 0 : index
    %9 = vector.load %arg12[%8, %c0] : memref<256x512xbf16, #tpu.memory_space<vmem>>, vector<128x512xbf16>
    %10 = arith.index_cast %4 : i32 to index
    %c0_3 = arith.constant 0 : index
    %11 = vector.load %arg13[%10, %c0_3] : memref<256x512xbf16, #tpu.memory_space<vmem>>, vector<128x512xbf16>
    %c0_4 = arith.constant 0 : index
    %c0_5 = arith.constant 0 : index
    %12 = vector.load %arg8[%c0_4, %c0_5] : memref<128x512xbf16, #tpu.memory_space<vmem>>, vector<128x128xbf16>
    %13 = vector.extract_strided_slice %9 {offsets = [0, 0], sizes = [128, 128], strides = [1, 1]} : vector<128x512xbf16> to vector<128x128xbf16>
    %14 = vector.extract_strided_slice %11 {offsets = [0, 0], sizes = [128, 128], strides = [1, 1]} : vector<128x512xbf16> to vector<128x128xbf16>
    %cst = arith.constant dense<0.000000e+00> : vector<128x128xf32>
    %15 = tpu.matmul %12, %13, %cst {dimension_numbers = #tpu.dot_dimension_numbers<[1], [1], [0], [0], [0, 0, 1, 0], [], []>} : vector<128x128xbf16>, vector<128x128xbf16>, vector<128x128xf32> -> vector<128x128xf32>
    %c0_6 = arith.constant 0 : index
    %c0_7 = arith.constant 0 : index
    %c0_8 = arith.constant 0 : index
    %16 = vector.load %arg9[%c0_6, %c0_7, %c0_8] : memref<4x128x1xf32, #tpu.memory_space<vmem>>, vector<1x128x1xf32>
    %17 = vector.shape_cast %16 : vector<1x128x1xf32> to vector<128x1xf32>
    %cst_9 = arith.constant dense<0xFF800000> : vector<128xf32>
    %18 = vector.multi_reduction <maximumf>, %15, %cst_9 [1] : vector<128x128xf32> to vector<128xf32>
    %19 = vector.shape_cast %18 : vector<128xf32> to vector<128x1xf32>
    %20 = arith.maximumf %17, %19 : vector<128x1xf32>
    %21 = arith.subf %17, %20 : vector<128x1xf32>
    %22 = math.exp %21 : vector<128x1xf32>
    %23 = vector.broadcast %20 : vector<128x1xf32> to vector<128x128xf32>
    %24 = arith.subf %15, %23 : vector<128x128xf32>
    %25 = math.exp %24 : vector<128x128xf32>
    %c0_10 = arith.constant 0 : index
    %c0_11 = arith.constant 0 : index
    %c0_12 = arith.constant 0 : index
    %26 = vector.load %arg10[%c0_10, %c0_11, %c0_12] : memref<4x128x1xf32, #tpu.memory_space<vmem>>, vector<1x128x1xf32>
    %27 = vector.shape_cast %26 : vector<1x128x1xf32> to vector<128x1xf32>
    %28 = arith.mulf %22, %27 : vector<128x1xf32>
    %cst_13 = arith.constant dense<0.000000e+00> : vector<128xf32>
    %29 = vector.multi_reduction <add>, %25, %cst_13 [1] : vector<128x128xf32> to vector<128xf32>
    %30 = vector.shape_cast %29 : vector<128xf32> to vector<128x1xf32>
    %31 = arith.addf %28, %30 : vector<128x1xf32>
    %c0_14 = arith.constant 0 : index
    %c0_15 = arith.constant 0 : index
    %c0_16 = arith.constant 0 : index
    %32 = vector.load %arg10[%c0_14, %c0_15, %c0_16] : memref<4x128x1xf32, #tpu.memory_space<vmem>>, vector<1x128x1xf32>
    %33 = vector.shape_cast %32 : vector<1x128x1xf32> to vector<128x1xf32>
    %34 = vector.shape_cast %31 : vector<128x1xf32> to vector<1x128x1xf32>
    tpu.vector_store %arg10[%c0_14, %c0_15, %c0_16], %34 {strides = array<i32>} : memref<4x128x1xf32, #tpu.memory_space<vmem>>, vector<1x128x1xf32>,
    %c0_17 = arith.constant 0 : index
    %c0_18 = arith.constant 0 : index
    %35 = vector.load %arg11[%c0_17, %c0_18] : memref<128x512xf32, #tpu.memory_space<vmem>>, vector<128x128xf32>
    %36 = vector.broadcast %22 : vector<128x1xf32> to vector<128x128xf32>
    %37 = arith.mulf %36, %35 : vector<128x128xf32>
    %38 = arith.truncf %25 : vector<128x128xf32> to vector<128x128xbf16>
    %cst_19 = arith.constant dense<0.000000e+00> : vector<128x128xf32>
    %39 = tpu.matmul %38, %14, %cst_19 {dimension_numbers = #tpu.dot_dimension_numbers<[1], [0], [0], [1], [0, 0, 1, 1], [], []>} : vector<128x128xbf16>, vector<128x128xbf16>, vector<128x128xf32> -> vector<128x128xf32>
    %40 = arith.addf %37, %39 : vector<128x128xf32>
    %c0_20 = arith.constant 0 : index
    %c0_21 = arith.constant 0 : index
    %41 = vector.load %arg11[%c0_20, %c0_21] : memref<128x512xf32, #tpu.memory_space<vmem>>, vector<128x128xf32>
    tpu.vector_store %arg11[%c0_20, %c0_21], %40 {strides = array<i32>} : memref<128x512xf32, #tpu.memory_space<vmem>>, vector<128x128xf32>,
    %c0_22 = arith.constant 0 : index
    %c0_23 = arith.constant 0 : index
    %c0_24 = arith.constant 0 : index
    %42 = vector.load %arg9[%c0_22, %c0_23, %c0_24] : memref<4x128x1xf32, #tpu.memory_space<vmem>>, vector<1x128x1xf32>
    %43 = vector.shape_cast %42 : vector<1x128x1xf32> to vector<128x1xf32>
    %44 = vector.shape_cast %20 : vector<128x1xf32> to vector<1x128x1xf32>
    tpu.vector_store %arg9[%c0_22, %c0_23, %c0_24], %44 {strides = array<i32>} : memref<4x128x1xf32, #tpu.memory_space<vmem>>, vector<1x128x1xf32>,
    %c0_25 = arith.constant 0 : index
    %c128 = arith.constant 128 : index
    %45 = vector.load %arg8[%c0_25, %c128] : memref<128x512xbf16, #tpu.memory_space<vmem>>, vector<128x128xbf16>
    %46 = vector.extract_strided_slice %9 {offsets = [0, 128], sizes = [128, 128], strides = [1, 1]} : vector<128x512xbf16> to vector<128x128xbf16>
    %47 = vector.extract_strided_slice %11 {offsets = [0, 128], sizes = [128, 128], strides = [1, 1]} : vector<128x512xbf16> to vector<128x128xbf16>
    %cst_26 = arith.constant dense<0.000000e+00> : vector<128x128xf32>
    %48 = tpu.matmul %45, %46, %cst_26 {dimension_numbers = #tpu.dot_dimension_numbers<[1], [1], [0], [0], [0, 0, 1, 0], [], []>} : vector<128x128xbf16>, vector<128x128xbf16>, vector<128x128xf32> -> vector<128x128xf32>
    %c1 = arith.constant 1 : index
    %c0_27 = arith.constant 0 : index
    %c0_28 = arith.constant 0 : index
    %49 = vector.load %arg9[%c1, %c0_27, %c0_28] : memref<4x128x1xf32, #tpu.memory_space<vmem>>, vector<1x128x1xf32>
    %50 = vector.shape_cast %49 : vector<1x128x1xf32> to vector<128x1xf32>
    %cst_29 = arith.constant dense<0xFF800000> : vector<128xf32>
    %51 = vector.multi_reduction <maximumf>, %48, %cst_29 [1] : vector<128x128xf32> to vector<128xf32>
    %52 = vector.shape_cast %51 : vector<128xf32> to vector<128x1xf32>
    %53 = arith.maximumf %50, %52 : vector<128x1xf32>
    %54 = arith.subf %50, %53 : vector<128x1xf32>
    %55 = math.exp %54 : vector<128x1xf32>
    %56 = vector.broadcast %53 : vector<128x1xf32> to vector<128x128xf32>
    %57 = arith.subf %48, %56 : vector<128x128xf32>
    %58 = math.exp %57 : vector<128x128xf32>
    %c1_30 = arith.constant 1 : index
    %c0_31 = arith.constant 0 : index
    %c0_32 = arith.constant 0 : index
    %59 = vector.load %arg10[%c1_30, %c0_31, %c0_32] : memref<4x128x1xf32, #tpu.memory_space<vmem>>, vector<1x128x1xf32>
    %60 = vector.shape_cast %59 : vector<1x128x1xf32> to vector<128x1xf32>
    %61 = arith.mulf %55, %60 : vector<128x1xf32>
    %cst_33 = arith.constant dense<0.000000e+00> : vector<128xf32>
    %62 = vector.multi_reduction <add>, %58, %cst_33 [1] : vector<128x128xf32> to vector<128xf32>
    %63 = vector.shape_cast %62 : vector<128xf32> to vector<128x1xf32>
    %64 = arith.addf %61, %63 : vector<128x1xf32>
    %c1_34 = arith.constant 1 : index
    %c0_35 = arith.constant 0 : index
    %c0_36 = arith.constant 0 : index
    %65 = vector.load %arg10[%c1_34, %c0_35, %c0_36] : memref<4x128x1xf32, #tpu.memory_space<vmem>>, vector<1x128x1xf32>
    %66 = vector.shape_cast %65 : vector<1x128x1xf32> to vector<128x1xf32>
    %67 = vector.shape_cast %64 : vector<128x1xf32> to vector<1x128x1xf32>
    tpu.vector_store %arg10[%c1_34, %c0_35, %c0_36], %67 {strides = array<i32>} : memref<4x128x1xf32, #tpu.memory_space<vmem>>, vector<1x128x1xf32>,
    %c0_37 = arith.constant 0 : index
    %c128_38 = arith.constant 128 : index
    %68 = vector.load %arg11[%c0_37, %c128_38] : memref<128x512xf32, #tpu.memory_space<vmem>>, vector<128x128xf32>
    %69 = vector.broadcast %55 : vector<128x1xf32> to vector<128x128xf32>
    %70 = arith.mulf %69, %68 : vector<128x128xf32>
    %71 = arith.truncf %58 : vector<128x128xf32> to vector<128x128xbf16>
    %cst_39 = arith.constant dense<0.000000e+00> : vector<128x128xf32>
    %72 = tpu.matmul %71, %47, %cst_39 {dimension_numbers = #tpu.dot_dimension_numbers<[1], [0], [0], [1], [0, 0, 1, 1], [], []>} : vector<128x128xbf16>, vector<128x128xbf16>, vector<128x128xf32> -> vector<128x128xf32>
    %73 = arith.addf %70, %72 : vector<128x128xf32>
    %c0_40 = arith.constant 0 : index
    %c128_41 = arith.constant 128 : index
    %74 = vector.load %arg11[%c0_40, %c128_41] : memref<128x512xf32, #tpu.memory_space<vmem>>, vector<128x128xf32>
    tpu.vector_store %arg11[%c0_40, %c128_41], %73 {strides = array<i32>} : memref<128x512xf32, #tpu.memory_space<vmem>>, vector<128x128xf32>,
    %c1_42 = arith.constant 1 : index
    %c0_43 = arith.constant 0 : index
    %c0_44 = arith.constant 0 : index
    %75 = vector.load %arg9[%c1_42, %c0_43, %c0_44] : memref<4x128x1xf32, #tpu.memory_space<vmem>>, vector<1x128x1xf32>
    %76 = vector.shape_cast %75 : vector<1x128x1xf32> to vector<128x1xf32>
    %77 = vector.shape_cast %53 : vector<128x1xf32> to vector<1x128x1xf32>
    tpu.vector_store %arg9[%c1_42, %c0_43, %c0_44], %77 {strides = array<i32>} : memref<4x128x1xf32, #tpu.memory_space<vmem>>, vector<1x128x1xf32>,
    %c0_45 = arith.constant 0 : index
    %c256 = arith.constant 256 : index
    %78 = vector.load %arg8[%c0_45, %c256] : memref<128x512xbf16, #tpu.memory_space<vmem>>, vector<128x128xbf16>
    %79 = vector.extract_strided_slice %9 {offsets = [0, 256], sizes = [128, 128], strides = [1, 1]} : vector<128x512xbf16> to vector<128x128xbf16>
    %80 = vector.extract_strided_slice %11 {offsets = [0, 256], sizes = [128, 128], strides = [1, 1]} : vector<128x512xbf16> to vector<128x128xbf16>
    %cst_46 = arith.constant dense<0.000000e+00> : vector<128x128xf32>
    %81 = tpu.matmul %78, %79, %cst_46 {dimension_numbers = #tpu.dot_dimension_numbers<[1], [1], [0], [0], [0, 0, 1, 0], [], []>} : vector<128x128xbf16>, vector<128x128xbf16>, vector<128x128xf32> -> vector<128x128xf32>
    %c2 = arith.constant 2 : index
    %c0_47 = arith.constant 0 : index
    %c0_48 = arith.constant 0 : index
    %82 = vector.load %arg9[%c2, %c0_47, %c0_48] : memref<4x128x1xf32, #tpu.memory_space<vmem>>, vector<1x128x1xf32>
    %83 = vector.shape_cast %82 : vector<1x128x1xf32> to vector<128x1xf32>
    %cst_49 = arith.constant dense<0xFF800000> : vector<128xf32>
    %84 = vector.multi_reduction <maximumf>, %81, %cst_49 [1] : vector<128x128xf32> to vector<128xf32>
    %85 = vector.shape_cast %84 : vector<128xf32> to vector<128x1xf32>
    %86 = arith.maximumf %83, %85 : vector<128x1xf32>
    %87 = arith.subf %83, %86 : vector<128x1xf32>
    %88 = math.exp %87 : vector<128x1xf32>
    %89 = vector.broadcast %86 : vector<128x1xf32> to vector<128x128xf32>
    %90 = arith.subf %81, %89 : vector<128x128xf32>
    %91 = math.exp %90 : vector<128x128xf32>
    %c2_50 = arith.constant 2 : index
    %c0_51 = arith.constant 0 : index
    %c0_52 = arith.constant 0 : index
    %92 = vector.load %arg10[%c2_50, %c0_51, %c0_52] : memref<4x128x1xf32, #tpu.memory_space<vmem>>, vector<1x128x1xf32>
    %93 = vector.shape_cast %92 : vector<1x128x1xf32> to vector<128x1xf32>
    %94 = arith.mulf %88, %93 : vector<128x1xf32>
    %cst_53 = arith.constant dense<0.000000e+00> : vector<128xf32>
    %95 = vector.multi_reduction <add>, %91, %cst_53 [1] : vector<128x128xf32> to vector<128xf32>
    %96 = vector.shape_cast %95 : vector<128xf32> to vector<128x1xf32>
    %97 = arith.addf %94, %96 : vector<128x1xf32>
    %c2_54 = arith.constant 2 : index
    %c0_55 = arith.constant 0 : index
    %c0_56 = arith.constant 0 : index
    %98 = vector.load %arg10[%c2_54, %c0_55, %c0_56] : memref<4x128x1xf32, #tpu.memory_space<vmem>>, vector<1x128x1xf32>
    %99 = vector.shape_cast %98 : vector<1x128x1xf32> to vector<128x1xf32>
    %100 = vector.shape_cast %97 : vector<128x1xf32> to vector<1x128x1xf32>
    tpu.vector_store %arg10[%c2_54, %c0_55, %c0_56], %100 {strides = array<i32>} : memref<4x128x1xf32, #tpu.memory_space<vmem>>, vector<1x128x1xf32>,
    %c0_57 = arith.constant 0 : index
    %c256_58 = arith.constant 256 : index
    %101 = vector.load %arg11[%c0_57, %c256_58] : memref<128x512xf32, #tpu.memory_space<vmem>>, vector<128x128xf32>
    %102 = vector.broadcast %88 : vector<128x1xf32> to vector<128x128xf32>
    %103 = arith.mulf %102, %101 : vector<128x128xf32>
    %104 = arith.truncf %91 : vector<128x128xf32> to vector<128x128xbf16>
    %cst_59 = arith.constant dense<0.000000e+00> : vector<128x128xf32>
    %105 = tpu.matmul %104, %80, %cst_59 {dimension_numbers = #tpu.dot_dimension_numbers<[1], [0], [0], [1], [0, 0, 1, 1], [], []>} : vector<128x128xbf16>, vector<128x128xbf16>, vector<128x128xf32> -> vector<128x128xf32>
    %106 = arith.addf %103, %105 : vector<128x128xf32>
    %c0_60 = arith.constant 0 : index
    %c256_61 = arith.constant 256 : index
    %107 = vector.load %arg11[%c0_60, %c256_61] : memref<128x512xf32, #tpu.memory_space<vmem>>, vector<128x128xf32>
    tpu.vector_store %arg11[%c0_60, %c256_61], %106 {strides = array<i32>} : memref<128x512xf32, #tpu.memory_space<vmem>>, vector<128x128xf32>,
    %c2_62 = arith.constant 2 : index
    %c0_63 = arith.constant 0 : index
    %c0_64 = arith.constant 0 : index
    %108 = vector.load %arg9[%c2_62, %c0_63, %c0_64] : memref<4x128x1xf32, #tpu.memory_space<vmem>>, vector<1x128x1xf32>
    %109 = vector.shape_cast %108 : vector<1x128x1xf32> to vector<128x1xf32>
    %110 = vector.shape_cast %86 : vector<128x1xf32> to vector<1x128x1xf32>
    tpu.vector_store %arg9[%c2_62, %c0_63, %c0_64], %110 {strides = array<i32>} : memref<4x128x1xf32, #tpu.memory_space<vmem>>, vector<1x128x1xf32>,
    %c0_65 = arith.constant 0 : index
    %c384 = arith.constant 384 : index
    %111 = vector.load %arg8[%c0_65, %c384] : memref<128x512xbf16, #tpu.memory_space<vmem>>, vector<128x128xbf16>
    %112 = vector.extract_strided_slice %9 {offsets = [0, 384], sizes = [128, 128], strides = [1, 1]} : vector<128x512xbf16> to vector<128x128xbf16>
    %113 = vector.extract_strided_slice %11 {offsets = [0, 384], sizes = [128, 128], strides = [1, 1]} : vector<128x512xbf16> to vector<128x128xbf16>
    %cst_66 = arith.constant dense<0.000000e+00> : vector<128x128xf32>
    %114 = tpu.matmul %111, %112, %cst_66 {dimension_numbers = #tpu.dot_dimension_numbers<[1], [1], [0], [0], [0, 0, 1, 0], [], []>} : vector<128x128xbf16>, vector<128x128xbf16>, vector<128x128xf32> -> vector<128x128xf32>
    %c3 = arith.constant 3 : index
    %c0_67 = arith.constant 0 : index
    %c0_68 = arith.constant 0 : index
    %115 = vector.load %arg9[%c3, %c0_67, %c0_68] : memref<4x128x1xf32, #tpu.memory_space<vmem>>, vector<1x128x1xf32>
    %116 = vector.shape_cast %115 : vector<1x128x1xf32> to vector<128x1xf32>
    %cst_69 = arith.constant dense<0xFF800000> : vector<128xf32>
    %117 = vector.multi_reduction <maximumf>, %114, %cst_69 [1] : vector<128x128xf32> to vector<128xf32>
    %118 = vector.shape_cast %117 : vector<128xf32> to vector<128x1xf32>
    %119 = arith.maximumf %116, %118 : vector<128x1xf32>
    %120 = arith.subf %116, %119 : vector<128x1xf32>
    %121 = math.exp %120 : vector<128x1xf32>
    %122 = vector.broadcast %119 : vector<128x1xf32> to vector<128x128xf32>
    %123 = arith.subf %114, %122 : vector<128x128xf32>
    %124 = math.exp %123 : vector<128x128xf32>
    %c3_70 = arith.constant 3 : index
    %c0_71 = arith.constant 0 : index
    %c0_72 = arith.constant 0 : index
    %125 = vector.load %arg10[%c3_70, %c0_71, %c0_72] : memref<4x128x1xf32, #tpu.memory_space<vmem>>, vector<1x128x1xf32>
    %126 = vector.shape_cast %125 : vector<1x128x1xf32> to vector<128x1xf32>
    %127 = arith.mulf %121, %126 : vector<128x1xf32>
    %cst_73 = arith.constant dense<0.000000e+00> : vector<128xf32>
    %128 = vector.multi_reduction <add>, %124, %cst_73 [1] : vector<128x128xf32> to vector<128xf32>
    %129 = vector.shape_cast %128 : vector<128xf32> to vector<128x1xf32>
    %130 = arith.addf %127, %129 : vector<128x1xf32>
    %c3_74 = arith.constant 3 : index
    %c0_75 = arith.constant 0 : index
    %c0_76 = arith.constant 0 : index
    %131 = vector.load %arg10[%c3_74, %c0_75, %c0_76] : memref<4x128x1xf32, #tpu.memory_space<vmem>>, vector<1x128x1xf32>
    %132 = vector.shape_cast %131 : vector<1x128x1xf32> to vector<128x1xf32>
    %133 = vector.shape_cast %130 : vector<128x1xf32> to vector<1x128x1xf32>
    tpu.vector_store %arg10[%c3_74, %c0_75, %c0_76], %133 {strides = array<i32>} : memref<4x128x1xf32, #tpu.memory_space<vmem>>, vector<1x128x1xf32>,
    %c0_77 = arith.constant 0 : index
    %c384_78 = arith.constant 384 : index
    %134 = vector.load %arg11[%c0_77, %c384_78] : memref<128x512xf32, #tpu.memory_space<vmem>>, vector<128x128xf32>
    %135 = vector.broadcast %121 : vector<128x1xf32> to vector<128x128xf32>
    %136 = arith.mulf %135, %134 : vector<128x128xf32>
    %137 = arith.truncf %124 : vector<128x128xf32> to vector<128x128xbf16>
    %cst_79 = arith.constant dense<0.000000e+00> : vector<128x128xf32>
    %138 = tpu.matmul %137, %113, %cst_79 {dimension_numbers = #tpu.dot_dimension_numbers<[1], [0], [0], [1], [0, 0, 1, 1], [], []>} : vector<128x128xbf16>, vector<128x128xbf16>, vector<128x128xf32> -> vector<128x128xf32>
    %139 = arith.addf %136, %138 : vector<128x128xf32>
    %c0_80 = arith.constant 0 : index
    %c384_81 = arith.constant 384 : index
    %140 = vector.load %arg11[%c0_80, %c384_81] : memref<128x512xf32, #tpu.memory_space<vmem>>, vector<128x128xf32>
    tpu.vector_store %arg11[%c0_80, %c384_81], %139 {strides = array<i32>} : memref<128x512xf32, #tpu.memory_space<vmem>>, vector<128x128xf32>,
    %c3_82 = arith.constant 3 : index
    %c0_83 = arith.constant 0 : index
    %c0_84 = arith.constant 0 : index
    %141 = vector.load %arg9[%c3_82, %c0_83, %c0_84] : memref<4x128x1xf32, #tpu.memory_space<vmem>>, vector<1x128x1xf32>
    %142 = vector.shape_cast %141 : vector<1x128x1xf32> to vector<128x1xf32>
    %143 = vector.shape_cast %119 : vector<128x1xf32> to vector<1x128x1xf32>
    tpu.vector_store %arg9[%c3_82, %c0_83, %c0_84], %143 {strides = array<i32>} : memref<4x128x1xf32, #tpu.memory_space<vmem>>, vector<1x128x1xf32>,
    %c1_i32 = arith.constant 1 : i32
    %144 = arith.cmpi eq, %arg2, %c1_i32 : i32
    %145 = arith.extui %144 : i1 to i32
    %c0_i32_85 = arith.constant 0 : i32
    %146 = arith.cmpi ne, %145, %c0_i32_85 : i32
    scf.if %146 {
      %c0_86 = arith.constant 0 : index
      %c0_87 = arith.constant 0 : index
      %c0_88 = arith.constant 0 : index
      %147 = vector.load %arg10[%c0_86, %c0_87, %c0_88] : memref<4x128x1xf32, #tpu.memory_space<vmem>>, vector<1x128x1xf32>
      %148 = vector.shape_cast %147 : vector<1x128x1xf32> to vector<128x1xf32>
      %149 = tpu.reciprocal %148 {approx = true} : vector<128x1xf32> -> vector<128x1xf32>
      %c0_89 = arith.constant 0 : index
      %c0_90 = arith.constant 0 : index
      %150 = vector.load %arg11[%c0_89, %c0_90] : memref<128x512xf32, #tpu.memory_space<vmem>>, vector<128x128xf32>
      %151 = vector.broadcast %149 : vector<128x1xf32> to vector<128x128xf32>
      %152 = arith.mulf %150, %151 : vector<128x128xf32>
      %153 = arith.truncf %152 : vector<128x128xf32> to vector<128x128xbf16>
      %c0_91 = arith.constant 0 : index
      %c0_92 = arith.constant 0 : index
      %154 = vector.load %arg8[%c0_91, %c0_92] : memref<128x512xbf16, #tpu.memory_space<vmem>>, vector<128x128xbf16>
      tpu.vector_store %arg8[%c0_91, %c0_92], %153 {strides = array<i32>} : memref<128x512xbf16, #tpu.memory_space<vmem>>, vector<128x128xbf16>,
      %c1_93 = arith.constant 1 : index
      %c0_94 = arith.constant 0 : index
      %c0_95 = arith.constant 0 : index
      %155 = vector.load %arg10[%c1_93, %c0_94, %c0_95] : memref<4x128x1xf32, #tpu.memory_space<vmem>>, vector<1x128x1xf32>
      %156 = vector.shape_cast %155 : vector<1x128x1xf32> to vector<128x1xf32>
      %157 = tpu.reciprocal %156 {approx = true} : vector<128x1xf32> -> vector<128x1xf32>
      %c0_96 = arith.constant 0 : index
      %c128_97 = arith.constant 128 : index
      %158 = vector.load %arg11[%c0_96, %c128_97] : memref<128x512xf32, #tpu.memory_space<vmem>>, vector<128x128xf32>
      %159 = vector.broadcast %157 : vector<128x1xf32> to vector<128x128xf32>
      %160 = arith.mulf %158, %159 : vector<128x128xf32>
      %161 = arith.truncf %160 : vector<128x128xf32> to vector<128x128xbf16>
      %c0_98 = arith.constant 0 : index
      %c128_99 = arith.constant 128 : index
      %162 = vector.load %arg8[%c0_98, %c128_99] : memref<128x512xbf16, #tpu.memory_space<vmem>>, vector<128x128xbf16>
      tpu.vector_store %arg8[%c0_98, %c128_99], %161 {strides = array<i32>} : memref<128x512xbf16, #tpu.memory_space<vmem>>, vector<128x128xbf16>,
      %c2_100 = arith.constant 2 : index
      %c0_101 = arith.constant 0 : index
      %c0_102 = arith.constant 0 : index
      %163 = vector.load %arg10[%c2_100, %c0_101, %c0_102] : memref<4x128x1xf32, #tpu.memory_space<vmem>>, vector<1x128x1xf32>
      %164 = vector.shape_cast %163 : vector<1x128x1xf32> to vector<128x1xf32>
      %165 = tpu.reciprocal %164 {approx = true} : vector<128x1xf32> -> vector<128x1xf32>
      %c0_103 = arith.constant 0 : index
      %c256_104 = arith.constant 256 : index
      %166 = vector.load %arg11[%c0_103, %c256_104] : memref<128x512xf32, #tpu.memory_space<vmem>>, vector<128x128xf32>
      %167 = vector.broadcast %165 : vector<128x1xf32> to vector<128x128xf32>
      %168 = arith.mulf %166, %167 : vector<128x128xf32>
      %169 = arith.truncf %168 : vector<128x128xf32> to vector<128x128xbf16>
      %c0_105 = arith.constant 0 : index
      %c256_106 = arith.constant 256 : index
      %170 = vector.load %arg8[%c0_105, %c256_106] : memref<128x512xbf16, #tpu.memory_space<vmem>>, vector<128x128xbf16>
      tpu.vector_store %arg8[%c0_105, %c256_106], %169 {strides = array<i32>} : memref<128x512xbf16, #tpu.memory_space<vmem>>, vector<128x128xbf16>,
      %c3_107 = arith.constant 3 : index
      %c0_108 = arith.constant 0 : index
      %c0_109 = arith.constant 0 : index
      %171 = vector.load %arg10[%c3_107, %c0_108, %c0_109] : memref<4x128x1xf32, #tpu.memory_space<vmem>>, vector<1x128x1xf32>
      %172 = vector.shape_cast %171 : vector<1x128x1xf32> to vector<128x1xf32>
      %173 = tpu.reciprocal %172 {approx = true} : vector<128x1xf32> -> vector<128x1xf32>
      %c0_110 = arith.constant 0 : index
      %c384_111 = arith.constant 384 : index
      %174 = vector.load %arg11[%c0_110, %c384_111] : memref<128x512xf32, #tpu.memory_space<vmem>>, vector<128x128xf32>
      %175 = vector.broadcast %173 : vector<128x1xf32> to vector<128x128xf32>
      %176 = arith.mulf %174, %175 : vector<128x128xf32>
      %177 = arith.truncf %176 : vector<128x128xf32> to vector<128x128xbf16>
      %c0_112 = arith.constant 0 : index
      %c384_113 = arith.constant 384 : index
      %178 = vector.load %arg8[%c0_112, %c384_113] : memref<128x512xbf16, #tpu.memory_space<vmem>>, vector<128x128xbf16>
      tpu.vector_store %arg8[%c0_112, %c384_113], %177 {strides = array<i32>} : memref<128x512xbf16, #tpu.memory_space<vmem>>, vector<128x128xbf16>,
      %c0_114 = arith.constant 0 : index
      %c0_115 = arith.constant 0 : index
      %179 = vector.load %arg8[%c0_114, %c0_115] : memref<128x512xbf16, #tpu.memory_space<vmem>>, vector<128x512xbf16>
      %c0_116 = arith.constant 0 : index
      %c0_117 = arith.constant 0 : index
      %180 = vector.load %arg6[%c0_116, %c0_117] : memref<512x512xbf16, #tpu.memory_space<vmem>>, vector<512x512xbf16>
      %cst_118 = arith.constant dense<0.000000e+00> : vector<128x512xf32>
      %181 = tpu.matmul %179, %180, %cst_118 {dimension_numbers = #tpu.dot_dimension_numbers<[1], [0], [0], [1], [0, 0, 1, 1], [], []>} : vector<128x512xbf16>, vector<512x512xbf16>, vector<128x512xf32> -> vector<128x512xf32>
      %c0_119 = arith.constant 0 : index
      %c0_120 = arith.constant 0 : index
      %c0_121 = arith.constant 0 : index
      %182 = vector.load %arg7[%c0_119, %c0_120, %c0_121] : memref<1x128x512xf32, #tpu.memory_space<vmem>>, vector<1x128x512xf32>
      %183 = vector.shape_cast %182 : vector<1x128x512xf32> to vector<128x512xf32>
      %184 = vector.shape_cast %181 : vector<128x512xf32> to vector<1x128x512xf32>
      tpu.vector_store %arg7[%c0_119, %c0_120, %c0_121], %184 {strides = array<i32>} : memref<1x128x512xf32, #tpu.memory_space<vmem>>, vector<1x128x512xf32>,
    } else {
    }
    return
  }
  func.func @transform_0(%arg0: i32, %arg1: i32, %arg2: i32) -> (i32, i32, i32) {
    %c0_i32 = arith.constant 0 : i32
    %c0_i32_0 = arith.constant 0 : i32
    return %arg0, %arg1, %c0_i32 : i32, i32, i32
  }
  func.func @transform_1(%arg0: i32, %arg1: i32, %arg2: i32) -> (i32, i32, i32) {
    %c0_i32 = arith.constant 0 : i32
    %0 = arith.cmpi eq, %arg1, %c0_i32 : i32
    %c0_i32_0 = arith.constant 0 : i32
    %1 = arith.select %0, %arg2, %c0_i32_0 : i32
    %c0_i32_1 = arith.constant 0 : i32
    %c0_i32_2 = arith.constant 0 : i32
    return %arg0, %1, %c0_i32_1 : i32, i32, i32
  }
  func.func @transform_2(%arg0: i32, %arg1: i32, %arg2: i32) -> (i32, i32) {
    %c0_i32 = arith.constant 0 : i32
    %c0_i32_0 = arith.constant 0 : i32
    %c0_i32_1 = arith.constant 0 : i32
    return %c0_i32, %c0_i32_0 : i32, i32
  }
  func.func @transform_3(%arg0: i32, %arg1: i32, %arg2: i32) -> (i32, i32) {
    %c0_i32 = arith.constant 0 : i32
    %c0_i32_0 = arith.constant 0 : i32
    %c0_i32_1 = arith.constant 0 : i32
    return %c0_i32, %c0_i32_0 : i32, i32
  }
  func.func @transform_4(%arg0: i32, %arg1: i32, %arg2: i32) -> (i32, i32, i32) {
    %c0_i32 = arith.constant 0 : i32
    %c0_i32_0 = arith.constant 0 : i32
    return %arg0, %arg1, %c0_i32 : i32, i32, i32
  }
}

</mosaic_0001>

<bundles_post_ra>
// kernel: tpu_custom_call.1
= control target key start
LH: loop header
LB: loop body
LE: loop exit
PB: predicated region body
PF: predicated region fallthrough
CT: control target
= control target key end

     0   :  { %s15629_s0 = inlined_call_operand.hbm [shape: f32[2,256,512], index: 0, kind: input, shape index: {}]   ;;  %s15630_s1 = inlined_call_operand.hbm [shape: f32[2,256,512], index: 1, kind: input, shape index: {}]   ;;  %s15631_s2 = inlined_call_operand.hbm [shape: bf16[512,1536], index: 2, kind: input, shape index: {}]   ;;  %s15632_s3 = inlined_call_operand.hbm [shape: bf16[512,512], index: 3, kind: input, shape index: {}]   ;;  %s15633_s4 = inlined_call_operand.hbm [shape: f32[2,256,512], index: 4, kind: output, shape index: {}]  }
   0x1   :  { %15766 = sst [smem:[#allocation150_spill]] %s15631_s2 }
   0x2   :  { %15767 = sst [smem:[#allocation151_spill]] %s15632_s3 }
   0x3   :  { %15768 = sst [smem:[#allocation152_spill]] %s15633_s4 }
   0x4   :  { %9 = vsyncpa [#allocation9], 0 }
   0x5   :  { %11 = vsyncpa [#allocation9 + $0x1], 0 }
   0x6   :  { %12 = vsyncpa [#allocation12], 0 }
   0x7   :  { %14 = vsyncpa [#allocation12 + $0x1], 0 }
   0x8   :  { %15 = vsyncpa [#allocation15], 0 }
   0x9   :  { %16 = vsyncpa [#allocation10], 0 }
   0xa   :  { %18 = vsyncpa [#allocation10 + $0x1], 0  ;;  %s12493_s15 = smov 0   ;;  %s12495_s16 = smov 0  }
   0xb   :  { %s12497_s17 = smov 0   ;;  %s12499_s18 = smov 0  }
   0xc   :  { %s12501_s19 = smov 0   ;;  %s12503_s20 = smov 0  }
   0xd   :  { %s12505_s21 = smov 0   ;;  %s12507_s22 = smov 0  }
   0xe   :  { %s12509_s23 = smov 0   ;;  %s12511_s24 = smov 0  }
   0xf   :  { %s12513_s25 = smov 0   ;;  %s12515_s26 = smov 0  }
  0x10   :  { %s12517_s27 = smov 0  }
  0x11 LB: > { %15769 = sst [smem:[#allocation22_spill]] %s12413_s18  ;;  %s12557_s28 = sadd.s32 4294967295, %s12449_s27   ;;  %s12449_s27 = sphi %s12517_s27, %s24_s27   ;;  %s12445_s26 = sphi %s12515_s26, %s16217_s26   ;;  %s12441_s25 = sphi %s12513_s25, %s16216_s25   ;;  %s12437_s24 = sphi %s12511_s24, %s16206_s24   ;;  %s12433_s23 = sphi %s12509_s23, %s16215_s23   ;;  %s12429_s22 = sphi %s12507_s22, %s16214_s22   ;;  %s12425_s21 = sphi %s12505_s21, %s16205_s21   ;;  %s12421_s20 = sphi %s12503_s20, %s16213_s20   ;;  %s12417_s19 = sphi %s12501_s19, %s16212_s19   ;;  %s12413_s18 = sphi %s12499_s18, %s16211_s18   ;;  %s12409_s17 = sphi %s12497_s17, %s16210_s17   ;;  %s12405_s16 = sphi %s12495_s16, %s16209_s16   ;;  %s12401_s15 = sphi %s12493_s15, %s16208_s15  }
  0x12   : > { %15770 = sst [smem:[#allocation23_spill]] %s12425_s21  ;;  %s9674_s29 = sadd.s32 4294967294, %s12449_s27  }
  0x13   : > { %15771 = sst [smem:[#allocation24_spill]] %s12429_s22  ;;  %p65_p0 = scmp.ne.s32.totalorder %s12417_s19, %s12413_s18 }
  0x14   : > { %15772 = sst [smem:[#allocation25_spill]] %s12433_s23  ;;  %p15636_p1 = scmp.eq.s32.totalorder %s12557_s28, 0 }
  0x15   : > { %15773 = sst [smem:[#allocation26_spill]] %s12437_s24  ;;  %p97_p2 = scmp.ne.s32.totalorder %s12405_s16, %s12401_s15 }
  0x16   : > { %p12567_p4 = por %p15636_p1, %p65_p0  ;;  %p171_p5 = scmp.eq.s32.totalorder %s9674_s29, 7 }
  0x17   : > { %p12573_p6 = por %p97_p2, %p15636_p1  ;;  %p9675_p7 = scmp.ge.s32.totalorder %s12449_s27, 1 }
  0x18   : > { %s15774_s30 = scalar_select %p12567_p4, 1, 0 }
  0x19   : > { %s15775_s5 = scalar_select %p12573_p6, 1, 0 }
  0x1a   : > { %p12578_p8 = por %p171_p5, %p65_p0  ;;  %p178_p9 = scmp.lt.s32.totalorder %s12449_s27, 9 }
  0x1b   : > { %15776 = sst [smem:[#allocation27_spill]] %s15775_s5  ;;  %s12451_s8 = smov [#allocation13]  }
  0x1c   : > { %s15777_s6 = scalar_select %p12578_p8, 1, 0 }
  0x1d   : > { %p12583_p10 = pnand %p9675_p7, %p178_p9  ;;  %s190_s9 = sshll.u32 %s12451_s8, 4  ;;  %s191_s9 = int_to_ptr.vmem [resolvable:$true] %s190_s9 }
  0x1e   : > { %15778 = sst [smem:[#allocation28_spill]] %s15777_s6  ;;  %s12452_s11 = smov [#allocation14]  }
  0x1f   : > { %s15779_s7 = scalar_select %p12583_p10, 1, 0 }
  0x20   : > { %p10885_p11 = pneg %p12583_p10  ;;  %s203_s12 = sshll.u32 %s12452_s11, 4  ;;  %s12595_s12 = int_to_ptr.vmem [resolvable:$true] %s203_s12 }
  0x21   : > { %s15781_s2 = sld [smem:[#allocation150_spill]] }
  0x22   : > { %p12591_p12 = pnand %p10885_p11, %p15636_p1 }
  0x24   : > { %p12185_p0 = pneg %p12591_p12 }
  0x27   : > { %s12183_s15 = scalar_lea.hbm %s15781_s2, 49152 }
  0x28   : > { %p12184_p13 = scmp.ne.s32.totalorder %s15781_s2, %s12183_s15  ;;  %p12190_p7 = scmp.lt.u32.totalorder %s12183_s15, %s15781_s2 }
  0x2a   : > { %p12186_p2 = pnand %p12185_p0, %p12184_p13 }
  0x2c   : > { %p12187_p5 = pneg %p12186_p2 }
  0x2e   : > { %p12192_p9 = pnand %p12190_p7, %p12187_p5 }
  0x30   : > { %12195 = shalt.err (!%p12192_p9)
}
  0x31   : > { %s12196_s11 = scalar_lea.vmem %s191_s9, 49152  ;;  %p12204_p8 = scmp.lt.s32.totalorder %s191_s9, %s191_s9 }
  0x32   : > { %p12197_p11 = scmp.ne.s32.totalorder %s191_s9, %s12196_s11  ;;  %p12205_p6 = scmp.lt.s32.totalorder %s12196_s11, %s12196_s11 }
  0x34   : > { %p12199_p1 = pnand %p12197_p11, %p12185_p0  ;;  %p12206_p4 = por %p12205_p6, %p12204_p8 }
  0x36   : > { %p12200_p3 = pneg %p12199_p1 }
  0x38   : > { %p12207_p10 = pnand %p12206_p4, %p12200_p3 }
  0x3a   : > { %12210 = shalt.err (!%p12207_p10)
}
  0x3b   : > { %s12453_s13 = smov 768   ;;  %s12454_s14 = smov 48  }
  0x3c   : > { %10888 = dma.hbm_to_vmem [thread:$0]  (!%p12591_p12), %s15781_s2, 49152, %s191_s9, [#allocation12], %s12453_s13, %s12453_s13, %s12454_s14  }
  0x3d   : > { %s15782_s3 = sld [smem:[#allocation151_spill]] }
  0x43   : > { %s12211_s8 = scalar_lea.hbm %s15782_s3, 16384 }
  0x44   : > { %p12212_p1 = scmp.ne.s32.totalorder %s15782_s3, %s12211_s8  ;;  %p12218_p6 = scmp.lt.u32.totalorder %s12211_s8, %s15782_s3 }
  0x46   : > { %p12214_p3 = pnand %p12212_p1, %p12185_p0 }
  0x48   : > { %p12215_p4 = pneg %p12214_p3 }
  0x4a   : > { %p12220_p8 = pnand %p12218_p6, %p12215_p4 }
  0x4c   : > { %12223 = shalt.err (!%p12220_p8)
}
  0x4d   : > { %s12224_s9 = scalar_lea.vmem %s12595_s12, 16384  ;;  %p12232_p5 = scmp.lt.s32.totalorder %s12595_s12, %s12595_s12 }
  0x4e   : > { %p12225_p10 = scmp.ne.s32.totalorder %s12595_s12, %s12224_s9  ;;  %p12233_p7 = scmp.lt.s32.totalorder %s12224_s9, %s12224_s9 }
  0x50   : > { %p12227_p13 = pnand %p12225_p10, %p12185_p0  ;;  %p12234_p9 = por %p12233_p7, %p12232_p5 }
  0x52   : > { %p12228_p2 = pneg %p12227_p13 }
  0x54   : > { %p12235_p11 = pnand %p12234_p9, %p12228_p2 }
  0x56   : > { %12238 = shalt.err (!%p12235_p11)
}
  0x57   : > { %s12455_s4 = smov 256   ;;  %s12456_s22 = smov 16  }
  0x58   : > { %10891 = dma.hbm_to_vmem [thread:$0]  (!%p12591_p12), %s15782_s3, 16384, %s12595_s12, [#allocation15], %s12455_s4, %s12455_s4, %s12456_s22  }
  0x59   : > { %s36_s14 = sadd.s32 1, %s12437_s24  ;;  %s39_s18 = sadd.s32 1, %s12441_s25 }
  0x5a   : > { %p37_p0 = scmp.ge.s32.totalorder %s36_s14, 2  ;;  %s43_s6 = sadd.s32 1, %s12445_s26 }
  0x5b   : > { %s52_s15 = sadd.s32 1, %s12421_s20  ;;  %p59_p1 = scmp.ne.s32.totalorder %s12421_s20, %s12417_s19 }
  0x5c   : > { %s16219_s14 = smov (%p37_p0, %s36_s14), 0  ;;  %s16221_s18 = smov (!%p37_p0, %s39_s18), %s12441_s25 }
  0x5d   : > { %15783 = sst [smem:[#allocation29_spill]] %s16219_s14  ;;  %p15650_p3 = scmp.eq.s32.totalorder %s12449_s27, 0 }
  0x5e   : > { %p75_p4 = scmp.eq.s32.totalorder %s12441_s25, 0  ;;  %p41_p6 = scmp.ge.s32.totalorder %s16221_s18, 2 }
  0x5f   : > { %p15784_p8 = scmp.eq.s32.totalorder %s12557_s28, 7  ;;  %p12663_p10 = por %p15650_p3, %p59_p1 }
  0x60   : > { %p15649_p13 = scmp.lt.s32.totalorder %s12449_s27, 8  ;;  %s16223_s18 = smov (%p41_p6, %s16221_s18), 0 }
  0x61   : > { %p12657_p12 = por %p15784_p8, %p59_p1  ;;  %15788 = sst [smem:[#allocation31_spill]] %s16223_s18 }
  0x62   : > { %s16225_s6 = smov (!%p41_p6, %s43_s6), %s12445_s26  ;;  %s48_s29 = ssub.s32 %s12441_s25, %s16223_s18 }
  0x63   : > { %s15785_s10 = scalar_select %p12657_p12, 1, 0 }
  0x64   : > { %p77_p2 = scmp.eq.s32.totalorder %s16223_s18, 0  ;;  %p45_p5 = scmp.ge.s32.totalorder %s16225_s6, 2 }
  0x65   : > { %15786 = sst [smem:[#allocation30_spill]] %s15785_s10  ;;  %s217_s8 = sand.u32 1, %s12421_s20  }
  0x66   : > { %s12676_s11 = scalar_select %p75_p4, %s12437_s24, 0 }
  0x67   : > { %s16227_s6 = smov (%p45_p5, %s16225_s6), 0  ;;  %s9679_s2 = sshll.u32 %s217_s8, 9 }
  0x68   : > { %s78_s9 = scalar_select %p77_p2, %s16219_s14, 0 }
  0x69   : > { %s47_s4 = ssub.s32 %s12445_s26, %s16227_s6  ;;  %s10224_s18 = sshll.u32 %s12441_s25, 6 }
  0x6a   : > { %s49_s22 = sor.u32 %s48_s29, %s47_s4  ;;  %s80_s23 = ssub.s32 %s12676_s11, %s78_s9 }
  0x6b   : > { %p50_p7 = scmp.eq.s32.totalorder %s49_s22, 0  ;;  %s12684_s13 = sor.u32 %s80_s23, %s47_s4 }
  0x6c   : > { %s9682_s24 = sshll.u32 %s12445_s26, 7  ;;  %s221_s10 = scalar_lea.vmem [#allocation8], %s9679_s2 }
  0x6d   : > { %s12688_s3 = scalar_select %p50_p7, %s12421_s20, %s52_s15  }
  0x6e   : > { %s231_s21 = sshll.u32 %s221_s10, 4  ;;  %s228_s5 = sadd.s32 %s10224_s18, %s9682_s24  ;;  %s12694_s21 = int_to_ptr.vmem [resolvable:$true] %s231_s21 }
  0x6f   : > { %s9683_s14 = sshll.u32 %s228_s5, 7  ;;  %p12700_p11 = pnand %p15649_p13, %p12663_p10 }
  0x70   : > { %s12707_s15 = scalar_lea.hbm %s15629_s0, %s9683_s14  ;;  %s12709_s2 = scalar_lea.sflag [#allocation9], %s217_s8 }
  0x71   : > { %s12239_s5 = scalar_lea.hbm %s12707_s15, 8192  ;;  %p12241_p1 = pneg %p12700_p11 }
  0x72   : > { %p12240_p0 = scmp.ne.s32.totalorder %s12707_s15, %s12239_s5  ;;  %s12244_s12 = scalar_lea.hbm %s15629_s0, 32768 }
  0x73   : > { %p12245_p8 = scmp.lt.u32.totalorder %s12707_s15, %s15629_s0  ;;  %p12246_p10 = scmp.lt.u32.totalorder %s12244_s12, %s12239_s5 }
  0x74   : > { %p12242_p4 = pnand %p12241_p1, %p12240_p0  ;;  %p12248_p5 = scmp.lt.u32.totalorder %s12239_s5, %s12707_s15 }
  0x75   : > { %p12247_p2 = por %p12246_p10, %p12245_p8 }
  0x76   : > { %p12243_p6 = pneg %p12242_p4 }
  0x77   : > { %p12249_p7 = por %p12248_p5, %p12247_p2 }
  0x79   : > { %p12250_p13 = pnand %p12249_p7, %p12243_p6 }
  0x7b   : > { %12253 = shalt.err (!%p12250_p13)
}
  0x7c   : > { %s12254_s8 = scalar_lea.vmem %s12694_s21, 8192  ;;  %s12457_s23 = smov [#allocation8]  }
  0x7d   : > { %p12255_p0 = scmp.ne.s32.totalorder %s12694_s21, %s12254_s8  ;;  %s12259_s9 = sshll.u32 %s12457_s23, 4  ;;  %s12260_s9 = int_to_ptr.vmem [resolvable:$false] %s12259_s9 }
  0x7e   : > { %s12261_s4 = scalar_lea.vmem %s12260_s9, 16384  ;;  %p12262_p9 = scmp.lt.s32.totalorder %s12694_s21, %s12260_s9 }
  0x7f   : > { %p12257_p4 = pnand %p12255_p0, %p12241_p1  ;;  %p12263_p8 = scmp.lt.s32.totalorder %s12261_s4, %s12254_s8 }
  0x81   : > { %p12258_p3 = pneg %p12257_p4  ;;  %p12264_p10 = por %p12263_p8, %p12262_p9 }
  0x83   : > { %p12265_p2 = pnand %p12264_p10, %p12258_p3 }
  0x85   : > { %12268 = shalt.err (!%p12265_p2)
}
  0x86   : > { %s12458_s5 = smov 512   ;;  %s12459_s18 = smov 32  }
  0x87   : > { %10895 = dma.hbm_to_vmem [thread:$0]  (!%p12700_p11), %s12707_s15, 8192, %s12694_s21, %s12709_s2, %s12458_s5, %s12458_s5, %s12459_s18  }
  0x88   : > { %s10225_s10 = sshll.u32 %s12676_s11, 6  ;;  %s84_s14 = sadd.s32 1, %s12409_s17 }
  0x89   : > { %s254_s12 = sadd.s32 %s10225_s10, %s9682_s24  ;;  %p91_p3 = scmp.ne.s32.totalorder %s12409_s17, %s12405_s16 }
  0x8a   : > { %s9688_s22 = sshll.u32 %s254_s12, 7  ;;  %p15790_p13 = scmp.eq.s32.totalorder %s12684_s13, 0 }
  0x8b   : > { %p15791_p9 = scmp.eq.s32.totalorder %s12449_s27, 0  ;;  %s241_s23 = sand.u32 1, %s12449_s27  }
  0x8c   : > { %s12749_s8 = scalar_select %p15790_p13, %s12409_s17, %s84_s14  }
  0x8d   : > { %p93_p1 = por %p91_p3, %p15791_p9  ;;  %s12757_s29 = scalar_lea.hbm %s15630_s1, %s9688_s22 }
  0x8e   : > { %s243_s21 = sand.u32 1, %s12409_s17   ;;  %p15792_p11 = scmp.lt.s32.totalorder %s12449_s27, 8 }
  0x8f   : > { %s9684_s24 = sshll.u32 %s243_s21, 9  ;;  %s12768_s2 = scalar_lea.sflag [#allocation12], %s241_s23 }
  0x90   : > { %p12762_p6 = pnand %p15792_p11, %p93_p1  ;;  %s245_s13 = scalar_lea.vmem [#allocation11], %s9684_s24 }
  0x91   : > { %s257_s15 = sshll.u32 %s245_s13, 4  ;;  %s12269_s10 = scalar_lea.hbm %s12757_s29, 8192  ;;  %s12766_s15 = int_to_ptr.vmem [resolvable:$true] %s257_s15 }
  0x92   : > { %p12270_p5 = scmp.ne.s32.totalorder %s12757_s29, %s12269_s10  ;;  %p12271_p7 = pneg %p12762_p6 }
  0x93   : > { %s12274_s22 = scalar_lea.hbm %s15630_s1, 32768  ;;  %p12275_p8 = scmp.lt.u32.totalorder %s12757_s29, %s15630_s1 }
  0x94   : > { %p12272_p0 = pnand %p12271_p7, %p12270_p5  ;;  %p12276_p10 = scmp.lt.u32.totalorder %s12274_s22, %s12269_s10 }
  0x95   : > { %p12278_p3 = scmp.lt.u32.totalorder %s12269_s10, %s12757_s29 }
  0x96   : > { %p12273_p4 = pneg %p12272_p0  ;;  %p12277_p2 = por %p12276_p10, %p12275_p8 }
  0x98   : > { %p12279_p13 = por %p12278_p3, %p12277_p2 }
  0x9a   : > { %p12280_p9 = pnand %p12279_p13, %p12273_p4 }
  0x9c   : > { %12283 = shalt.err (!%p12280_p9)
}
  0x9d   : > { %s12284_s23 = scalar_lea.vmem %s12766_s15, 8192  ;;  %s12460_s21 = smov [#allocation11]  }
  0x9e   : > { %p12285_p1 = scmp.ne.s32.totalorder %s12766_s15, %s12284_s23  ;;  %s12289_s24 = sshll.u32 %s12460_s21, 4  ;;  %s12290_s24 = int_to_ptr.vmem [resolvable:$false] %s12289_s24 }
  0x9f   : > { %s12291_s13 = scalar_lea.vmem %s12290_s24, 16384  ;;  %p12292_p0 = scmp.lt.s32.totalorder %s12766_s15, %s12290_s24 }
  0xa0   : > { %p12287_p11 = pnand %p12285_p1, %p12271_p7  ;;  %p12293_p8 = scmp.lt.s32.totalorder %s12291_s13, %s12284_s23 }
  0xa2   : > { %p12288_p5 = pneg %p12287_p11  ;;  %p12294_p10 = por %p12293_p8, %p12292_p0 }
  0xa4   : > { %p12295_p2 = pnand %p12294_p10, %p12288_p5 }
  0xa6   : > { %12298 = shalt.err (!%p12295_p2)
}
  0xa7   : > { %10898 = dma.hbm_to_vmem [thread:$0]  (!%p12762_p6), %s12757_s29, 8192, %s12766_s15, %s12768_s2, %s12458_s5, %s12458_s5, %s12459_s18  }
  0xa8   : > { %p15794_p7 = scmp.ne.s32.totalorder %s15779_s7, 0 }
  0xaa   : > { %269 = sbr.rel (%p15794_p7) target bundleno = 4175 (0x104f), region = 36 }
  0xb1   : > { %s12802_s10 = sand.u32 1, %s12417_s19   ;;  %p15795_p4 = scmp.ne.s32.totalorder %s15774_s30, 0 }
  0xb2   : > { %s9690_s12 = sshll.u32 %s12802_s10, 9  ;;  %s272_s14 = scalar_lea.sflag [#allocation9], %s12802_s10 }
  0xb3   : > { %s12806_s22 = scalar_lea.vmem [#allocation8], %s9690_s12 }
  0xb4   : > { %12380 = dma.done.wait (%p15795_p4), %s272_s14, 8192  }
  0xb5   : > { %12382 = vsyncadd (%p15795_p4), %s272_s14, 4294959104  ;;  %s15796_s5 = sld [smem:[#allocation27_spill]]  ;;  %s280_s7 = sand.u32 1, %s12557_s28  }
  0xb6   : > { %s282_s18 = sand.u32 1, %s12405_s16   ;;  %s281_s11 = scalar_lea.sflag [#allocation12], %s280_s7 }
  0xb7   : > { %s9691_s29 = sshll.u32 %s282_s18, 9 }
  0xb8   : > { %s12814_s15 = scalar_lea.vmem [#allocation11], %s9691_s29 }
  0xbb   : > { %p15797_p6 = scmp.ne.s32.totalorder %s15796_s5, 0 }
  0xbd   : > { %12384 = dma.done.wait (%p15797_p6), %s281_s11, 8192  }
  0xbe   : > { %12386 = vsyncadd (%p15797_p6), %s281_s11, 4294959104  ;;  %p15798_p3 = scmp.eq.s32.totalorder %s12557_s28, 0 }
  0xc0   : > { %12388 = dma.done.wait (%p15798_p3), [#allocation12], 49152   ;;  %p15799_p13 = pmov %p15798_p3 }
  0xc1   : > { %p15800_p9 = pmov %p15798_p3 }
  0xc2   : > { %12390 = vsyncadd (%p15799_p13), [#allocation12], 4294918144 }
  0xc3   : > { %12392 = dma.done.wait (%p15800_p9), [#allocation15], 16384   ;;  %p15801_p1 = pmov %p15798_p3 }
  0xc4   : > { %s12828_s30 = scalar_lea.vmem [#allocation16], %s9690_s12  ;;  %s15802_s2 = sld [smem:[#allocation23_spill]] }
  0xc5   : > { %12394 = vsyncadd (%p15801_p1), [#allocation15], 4294950912 }
  0xca   : > { %p9695_p11 = scmp.ne.s32.totalorder %s15802_s2, 0 }
  0xcb   : > { %v11027_v0 = vld [vmem:[#allocation13 + $0x4] ss:$48 sps:$4 sm:$0xff] (!%p9695_p11)   ;;  %v11029_v1 = vld [vmem:[#allocation13 + $0xc] ss:$48 sps:$4 sm:$0xff] (!%p9695_p11)   ;;  %v11031_v2 = vld [vmem:[#allocation13] ss:$48 sps:$4 sm:$0xff] (!%p9695_p11)  }
  0xcc   : > { %331 = sbr.rel (%p9695_p11) target bundleno = 608 (0x260), region = 56  ;;  %1196 = vmatprep.subr.bf16.mxu0 (!%p9695_p11), %v11027_v0  ;;  %v11032_v3 = vld [vmem:[#allocation13 + $0x8] ss:$48 sps:$4 sm:$0xff] (!%p9695_p11)   ;;  %1422 = vmatprep.subr.bf16.mxu1 (!%p9695_p11), %v11029_v1  ;;  %v11033_v4 = vld [vmem:[#allocation13 + $0x64] ss:$48 sps:$4 sm:$0xff] (!%p9695_p11)   ;;  %vm1776_vm0 = vcmask (!%p9695_p11), 7168  }
  0xcd   : > { %1197 = vmatpush1.bf16.msra.mxu0 (!%p9695_p11), %v11031_v2  ;;  %1423 = vmatpush1.bf16.msra.mxu1 (!%p9695_p11), %v11032_v3  ;;  %v11035_v5 = vld [vmem:[#allocation13 + $0x6c] ss:$48 sps:$4 sm:$0xff] (!%p9695_p11)   ;;  %v11037_v6 = vld [vmem:[#allocation13 + $0x60] ss:$48 sps:$4 sm:$0xff] (!%p9695_p11)   ;;  %v11038_v7 = vld [vmem:[#allocation13 + $0x68] ss:$48 sps:$4 sm:$0xff] (!%p9695_p11)  }
  0xce   : > { %1198 = vmatprep.subr.bf16.mxu0 (!%p9695_p11), %v11033_v4  ;;  %1424 = vmatprep.subr.bf16.mxu1 (!%p9695_p11), %v11035_v5  ;;  %v11039_v8 = vld [vmem:[#allocation13 + $0xc4] ss:$48 sps:$4 sm:$0xff] (!%p9695_p11)   ;;  %v11041_v9 = vld [vmem:[#allocation13 + $0xcc] ss:$48 sps:$4 sm:$0xff] (!%p9695_p11)   ;;  %v11043_v10 = vld [vmem:[#allocation13 + $0xc0] ss:$48 sps:$4 sm:$0xff] (!%p9695_p11)  }
  0xcf   : > { %v11044_v11 = vld [vmem:[#allocation13 + $0xc8] ss:$48 sps:$4 sm:$0xff] (!%p9695_p11)   ;;  %v11045_v12 = vld [vmem:[#allocation13 + $0x124] ss:$48 sps:$4 sm:$0xff] (!%p9695_p11)   ;;  %v11047_v13 = vld [vmem:[#allocation13 + $0x12c] ss:$48 sps:$4 sm:$0xff] (!%p9695_p11)  }
  0xd0   : > { %v11049_v14 = vld [vmem:[#allocation13 + $0x120] ss:$48 sps:$4 sm:$0xff] (!%p9695_p11)   ;;  %v11050_v15 = vld [vmem:[#allocation13 + $0x128] ss:$48 sps:$4 sm:$0xff] (!%p9695_p11)   ;;  %v11051_v16 = vld [vmem:[#allocation13 + $0x184] ss:$48 sps:$4 sm:$0xff] (!%p9695_p11)  }
  0xd1   : > { %1199 = vmatpush1.bf16.msra.mxu0 (!%p9695_p11), %v11037_v6  ;;  %1425 = vmatpush1.bf16.msra.mxu1 (!%p9695_p11), %v11038_v7  ;;  %v11053_v17 = vld [vmem:[#allocation13 + $0x18c] ss:$48 sps:$4 sm:$0xff] (!%p9695_p11)   ;;  %v11055_v18 = vld [vmem:[#allocation13 + $0x180] ss:$48 sps:$4 sm:$0xff] (!%p9695_p11)   ;;  %v11056_v19 = vld [vmem:[#allocation13 + $0x188] ss:$48 sps:$4 sm:$0xff] (!%p9695_p11)  }
  0xd2   : > { %1200 = vmatprep.subr.bf16.mxu0 (!%p9695_p11), %v11039_v8  ;;  %1426 = vmatprep.subr.bf16.mxu1 (!%p9695_p11), %v11041_v9  ;;  %v11057_v20 = vld [vmem:[#allocation13 + $0x1e4] ss:$48 sps:$4 sm:$0xff] (!%p9695_p11)   ;;  %v11059_v21 = vld [vmem:[#allocation13 + $0x1ec] ss:$48 sps:$4 sm:$0xff] (!%p9695_p11)   ;;  %v11061_v22 = vld [vmem:[#allocation13 + $0x1e0] ss:$48 sps:$4 sm:$0xff] (!%p9695_p11)  }
  0xd3   : > { %v11062_v23 = vld [vmem:[#allocation13 + $0x1e8] ss:$48 sps:$4 sm:$0xff]   ;;  %v11063_v24 = vld [vmem:[#allocation13 + $0x244] ss:$48 sps:$4 sm:$0xff]   ;;  %v11065_v25 = vld [vmem:[#allocation13 + $0x24c] ss:$48 sps:$4 sm:$0xff]  }
  0xd4   : > { %v11067_v26 = vld [vmem:[#allocation13 + $0x240] ss:$48 sps:$4 sm:$0xff]   ;;  %v11068_v27 = vld [vmem:[#allocation13 + $0x248] ss:$48 sps:$4 sm:$0xff]   ;;  %v11069_v28 = vld [vmem:[#allocation13 + $0x2a4] ss:$48 sps:$4 sm:$0xff]  }
  0xd5   : > { %1201 = vmatpush1.bf16.msra.mxu0 %v11043_v10  ;;  %1427 = vmatpush1.bf16.msra.mxu1 %v11044_v11  ;;  %v11071_v29 = vld [vmem:[#allocation13 + $0x2ac] ss:$48 sps:$4 sm:$0xff]   ;;  %v11073_v30 = vld [vmem:[#allocation13 + $0x2a0] ss:$48 sps:$4 sm:$0xff]   ;;  %v11074_v31 = vld [vmem:[#allocation13 + $0x2a8] ss:$48 sps:$4 sm:$0xff]  }
  0xd6   : > { %1202 = vmatprep.subr.bf16.mxu0 %v11045_v12  ;;  %1428 = vmatprep.subr.bf16.mxu1 %v11047_v13  ;;  %v11075_v32 = vld [vmem:[#allocation13 + $0x304] ss:$48 sps:$4 sm:$0xff]   ;;  %v11077_v33 = vld [vmem:[#allocation13 + $0x30c] ss:$48 sps:$4 sm:$0xff]   ;;  %v11079_v34 = vld [vmem:[#allocation13 + $0x300] ss:$48 sps:$4 sm:$0xff]  }
  0xd7   : > { %v11080_v35 = vld [vmem:[#allocation13 + $0x308] ss:$48 sps:$4 sm:$0xff]   ;;  %v11081_v36 = vld [vmem:[#allocation13 + $0x364] ss:$48 sps:$4 sm:$0xff]   ;;  %v11083_v37 = vld [vmem:[#allocation13 + $0x36c] ss:$48 sps:$4 sm:$0xff]  }
  0xd8   : > { %v11085_v38 = vld [vmem:[#allocation13 + $0x360] ss:$48 sps:$4 sm:$0xff]   ;;  %v11086_v39 = vld [vmem:[#allocation13 + $0x368] ss:$48 sps:$4 sm:$0xff]   ;;  %v11087_v40 = vld [vmem:[#allocation13 + $0x3c4] ss:$48 sps:$4 sm:$0xff]  }
  0xd9   : > { %1203 = vmatpush1.bf16.msra.mxu0 %v11049_v14  ;;  %1429 = vmatpush1.bf16.msra.mxu1 %v11050_v15  ;;  %v11089_v41 = vld [vmem:[#allocation13 + $0x3cc] ss:$48 sps:$4 sm:$0xff]   ;;  %v11091_v42 = vld [vmem:[#allocation13 + $0x3c0] ss:$48 sps:$4 sm:$0xff]   ;;  %v11092_v43 = vld [vmem:[#allocation13 + $0x3c8] ss:$48 sps:$4 sm:$0xff]  }
  0xda   : > { %1204 = vmatprep.subr.bf16.mxu0 %v11051_v16  ;;  %1430 = vmatprep.subr.bf16.mxu1 %v11053_v17  ;;  %v11093_v44 = vld [vmem:[#allocation13 + $0x424] ss:$48 sps:$4 sm:$0xff]   ;;  %v11095_v45 = vld [vmem:[#allocation13 + $0x42c] ss:$48 sps:$4 sm:$0xff]   ;;  %v11097_v47 = vld [vmem:[#allocation13 + $0x420] ss:$48 sps:$4 sm:$0xff]  }
  0xdb   : > { %v333_v46 = vld [vmem:[%s12806_s22 + $0x8] sm:$0xff]  ;;  %v11099_v50 = vld [vmem:[#allocation13 + $0x484] ss:$48 sps:$4 sm:$0xff]   ;;  %v11103_v53 = vld [vmem:[#allocation13 + $0x480] ss:$48 sps:$4 sm:$0xff]  }
  0xdc   : > { %v11098_v48 = vld [vmem:[#allocation13 + $0x428] ss:$48 sps:$4 sm:$0xff]   ;;  %v11101_v52 = vld [vmem:[#allocation13 + $0x48c] ss:$48 sps:$4 sm:$0xff]   ;;  %v11105_v55 = vld [vmem:[#allocation13 + $0x4e4] ss:$48 sps:$4 sm:$0xff]  }
  0xdd   : > { %1205 = vmatpush1.bf16.msra.mxu0 %v11055_v18  ;;  %1431 = vmatpush1.bf16.msra.mxu1 %v11056_v19  ;;  %v337_v49 = vld [vmem:[%s12806_s22 + $0x28] sm:$0xff]  ;;  %v11109_v57 = vld [vmem:[#allocation13 + $0x4e0] ss:$48 sps:$4 sm:$0xff]   ;;  %v11111_v59 = vld [vmem:[#allocation13 + $0x544] ss:$48 sps:$4 sm:$0xff]  }
  0xde   : > { %1206 = vmatprep.subr.bf16.mxu0 %v11057_v20  ;;  %1432 = vmatprep.subr.bf16.mxu1 %v11059_v21  ;;  %v397_v51 = vpack.c.bf16 %v337_v49, %v333_v46  ;;  %v11104_v54 = vld [vmem:[#allocation13 + $0x488] ss:$48 sps:$4 sm:$0xff]   ;;  %v11107_v56 = vld [vmem:[#allocation13 + $0x4ec] ss:$48 sps:$4 sm:$0xff]   ;;  %v11115_v61 = vld [vmem:[#allocation13 + $0x540] ss:$48 sps:$4 sm:$0xff]  }
  0xdf   : > { %v11110_v58 = vld [vmem:[#allocation13 + $0x4e8] ss:$48 sps:$4 sm:$0xff]   ;;  %v11113_v60 = vld [vmem:[#allocation13 + $0x54c] ss:$48 sps:$4 sm:$0xff]   ;;  %v11117_v63 = vld [vmem:[#allocation13 + $0x5a4] ss:$48 sps:$4 sm:$0xff]  }
  0xe0   : > { %1228 = vmatprep.mubr.bf16.mxu0 %v397_v51  ;;  %1454 = vmatprep.mubr.bf16.mxu1 %v397_v51  ;;  %v11116_v62 = vld [vmem:[#allocation13 + $0x548] ss:$48 sps:$4 sm:$0xff]   ;;  %v11119_v0 = vld [vmem:[#allocation13 + $0x5ac] ss:$48 sps:$4 sm:$0xff]   ;;  %v11121_v1 = vld [vmem:[#allocation13 + $0x5a0] ss:$48 sps:$4 sm:$0xff]  }
  0xe1   : > { %1207 = vmatpush1.bf16.msra.mxu0 %v11061_v22  ;;  %1433 = vmatpush1.bf16.msra.mxu1 %v11062_v23  ;;  %v11122_v2 = vld [vmem:[#allocation13 + $0x5a8] ss:$48 sps:$4 sm:$0xff]   ;;  %v332_v3 = vld [vmem:[%s12806_s22] sm:$0xff]  ;;  %v11128_v6 = vld [vmem:[#allocation13 + $0x60c] ss:$48 sps:$4 sm:$0xff]  }
  0xe2   : > { %1208 = vmatprep.subr.bf16.mxu0 %v11063_v24  ;;  %1434 = vmatprep.subr.bf16.mxu1 %v11065_v25  ;;  %v336_v4 = vld [vmem:[%s12806_s22 + $0x20] sm:$0xff]  ;;  %v11126_v9 = vld [vmem:[#allocation13 + $0x608] ss:$48 sps:$4 sm:$0xff]   ;;  %v11134_v13 = vld [vmem:[#allocation13 + $0x66c] ss:$48 sps:$4 sm:$0xff]  }
  0xe3   : > { %v11125_v5 = vld [vmem:[#allocation13 + $0x604] ss:$48 sps:$4 sm:$0xff]   ;;  %v11123_v7 = vld [vmem:[#allocation13 + $0x600] ss:$48 sps:$4 sm:$0xff]   ;;  %v396_v8 = vpack.c.bf16 %v336_v4, %v332_v3  ;;  %v341_v10 = vld [vmem:[%s12806_s22 + $0x48] sm:$0xff] }
  0xe4   : > { %v345_v11 = vld [vmem:[%s12806_s22 + $0x68] sm:$0xff]  ;;  %v11131_v12 = vld [vmem:[#allocation13 + $0x664] ss:$48 sps:$4 sm:$0xff]   ;;  %v11129_v14 = vld [vmem:[#allocation13 + $0x660] ss:$48 sps:$4 sm:$0xff]  }
  0xe5   : > { %1209 = vmatpush1.bf16.msra.mxu0 %v11067_v26  ;;  %1435 = vmatpush1.bf16.msra.mxu1 %v11068_v27  ;;  %v401_v15 = vpack.c.bf16 %v345_v11, %v341_v10  ;;  %v11132_v16 = vld [vmem:[#allocation13 + $0x668] ss:$48 sps:$4 sm:$0xff]   ;;  %v340_v17 = vld [vmem:[%s12806_s22 + $0x40] sm:$0xff]  ;;  %v11140_v20 = vld [vmem:[#allocation13 + $0x6cc] ss:$48 sps:$4 sm:$0xff]  }
  0xe6   : > { %1210 = vmatprep.subr.bf16.mxu0 %v11069_v28  ;;  %1436 = vmatprep.subr.bf16.mxu1 %v11071_v29  ;;  %v344_v18 = vld [vmem:[%s12806_s22 + $0x60] sm:$0xff]  ;;  %v11138_v22 = vld [vmem:[#allocation13 + $0x6c8] ss:$48 sps:$4 sm:$0xff]   ;;  %v11146_v27 = vld [vmem:[#allocation13 + $0x72c] ss:$48 sps:$4 sm:$0xff]  }
  0xe7   : > { %v11137_v19 = vld [vmem:[#allocation13 + $0x6c4] ss:$48 sps:$4 sm:$0xff]   ;;  %v11135_v21 = vld [vmem:[#allocation13 + $0x6c0] ss:$48 sps:$4 sm:$0xff]   ;;  %v400_v23 = vpack.c.bf16 %v344_v18, %v340_v17  ;;  %v349_v24 = vld [vmem:[%s12806_s22 + $0x88] sm:$0xff] }
  0xe8   : > { %v353_v25 = vld [vmem:[%s12806_s22 + $0xa8] sm:$0xff]  ;;  %v11143_v26 = vld [vmem:[#allocation13 + $0x724] ss:$48 sps:$4 sm:$0xff]   ;;  %v11141_v29 = vld [vmem:[#allocation13 + $0x720] ss:$48 sps:$4 sm:$0xff]  }
  0xe9   : > { %1211 = vmatpush1.bf16.msra.mxu0 %v11073_v30  ;;  %1437 = vmatpush1.bf16.msra.mxu1 %v11074_v31  ;;  %v405_v28 = vpack.c.bf16 %v353_v25, %v349_v24  ;;  %v11144_v30 = vld [vmem:[#allocation13 + $0x728] ss:$48 sps:$4 sm:$0xff]   ;;  %v348_v31 = vld [vmem:[%s12806_s22 + $0x80] sm:$0xff] }
  0xea   : > { %1212 = vmatprep.subr.bf16.mxu0 %v11075_v32  ;;  %1438 = vmatprep.subr.bf16.mxu1 %v11077_v33  ;;  %v352_v32 = vld [vmem:[%s12806_s22 + $0xa0] sm:$0xff]  ;;  %v365_v51 = vld [vmem:[%s12806_s22 + $0x108] sm:$0xff] }
  0xeb   : > { %v11149_v33 = vld [vmem:[#allocation13 + $0x784] ss:$48 sps:$4 sm:$0xff]   ;;  %v11159_v49 = vld [vmem:[#allocation13 + $0x840] ss:$48 sps:$4 sm:$0xff]   ;;  %v11174_v3 = vld [vmem:[#allocation13 + $0x908] ss:$48 sps:$4 sm:$0xff]  }
  0xec   : > { %v360_v46 = vld [vmem:[%s12806_s22 + $0xe0] sm:$0xff]  ;;  %v11186_v17 = vld [vmem:[#allocation13 + $0x9c8] ss:$48 sps:$4 sm:$0xff]  }
  0xed   : > { %1213 = vmatpush1.bf16.msra.mxu0 %v11079_v34  ;;  %1439 = vmatpush1.bf16.msra.mxu1 %v11080_v35  ;;  %v11152_v34 = vld [vmem:[#allocation13 + $0x78c] ss:$48 sps:$4 sm:$0xff]   ;;  %v11147_v35 = vld [vmem:[#allocation13 + $0x780] ss:$48 sps:$4 sm:$0xff]   ;;  %v11179_v4 = vld [vmem:[#allocation13 + $0x964] ss:$48 sps:$4 sm:$0xff]  }
  0xee   : > { %1214 = vmatprep.subr.bf16.mxu0 %v11081_v36  ;;  %1440 = vmatprep.subr.bf16.mxu1 %v11083_v37  ;;  %v11150_v36 = vld [vmem:[#allocation13 + $0x788] ss:$48 sps:$4 sm:$0xff]   ;;  %v404_v37 = vpack.c.bf16 %v352_v32, %v348_v31  ;;  %v376_v10 = vld [vmem:[%s12806_s22 + $0x160] sm:$0xff] }
  0xef   : > { %v11185_v11 = vld [vmem:[#allocation13 + $0x9c4] ss:$48 sps:$4 sm:$0xff]   ;;  %v11198_v31 = vld [vmem:[#allocation13 + $0xa88] ss:$48 sps:$4 sm:$0xff]  }
  0xf0   : > { %v11191_v18 = vld [vmem:[#allocation13 + $0xa24] ss:$48 sps:$4 sm:$0xff]  }
  0xf1   : > { %1215 = vmatpush1.bf16.msra.mxu0 %v11085_v38  ;;  %1441 = vmatpush1.bf16.msra.mxu1 %v11086_v39  ;;  %v357_v38 = vld [vmem:[%s12806_s22 + $0xc8] sm:$0xff]  ;;  %v384_v24 = vld [vmem:[%s12806_s22 + $0x1a0] sm:$0xff] }
  0xf2   : > { %1216 = vmatprep.subr.bf16.mxu0 %v11087_v40  ;;  %1442 = vmatprep.subr.bf16.mxu1 %v11089_v41  ;;  %v361_v39 = vld [vmem:[%s12806_s22 + $0xe8] sm:$0xff]  ;;  %v11155_v40 = vld [vmem:[#allocation13 + $0x7e4] ss:$48 sps:$4 sm:$0xff]  }
  0xf3   : > { %v11158_v41 = vld [vmem:[#allocation13 + $0x7ec] ss:$48 sps:$4 sm:$0xff]   ;;  %v11197_v25 = vld [vmem:[#allocation13 + $0xa84] ss:$48 sps:$4 sm:$0xff]  }
  0xf4   : > { %v11203_v32 = vld [vmem:[#allocation13 + $0xae4] ss:$48 sps:$4 sm:$0xff]  }
  0xf5   : > { %1217 = vmatpush1.bf16.msra.mxu0 %v11091_v42  ;;  %1443 = vmatpush1.bf16.msra.mxu1 %v11092_v43  ;;  %v11153_v42 = vld [vmem:[#allocation13 + $0x7e0] ss:$48 sps:$4 sm:$0xff]   ;;  %v409_v43 = vpack.c.bf16 %v361_v39, %v357_v38  ;;  %v11209_v39 = vld [vmem:[#allocation13 + $0xb44] ss:$48 sps:$4 sm:$0xff]  }
  0xf6   : > { %1218 = vmatprep.subr.bf16.mxu0 %v11093_v44  ;;  %1444 = vmatprep.subr.bf16.mxu1 %v11095_v45  ;;  %v11156_v44 = vld [vmem:[#allocation13 + $0x7e8] ss:$48 sps:$4 sm:$0xff]   ;;  %v356_v45 = vld [vmem:[%s12806_s22 + $0xc0] sm:$0xff] }
  0xf7   : > { %v392_v38 = vld [vmem:[%s12806_s22 + $0x1e0] sm:$0xff] }
  0xf9   : > { %1219 = vmatpush1.bf16.msra.mxu0 %v11097_v47  ;;  %1445 = vmatpush1.bf16.msra.mxu1 %v11098_v48  ;;  %v11161_v47 = vld [vmem:[#allocation13 + $0x844] ss:$48 sps:$4 sm:$0xff]   ;;  %v11164_v48 = vld [vmem:[#allocation13 + $0x84c] ss:$48 sps:$4 sm:$0xff]  }
  0xfa   : > { %1220 = vmatprep.subr.bf16.mxu0 %v11099_v50  ;;  %1446 = vmatprep.subr.bf16.mxu1 %v11101_v52  ;;  %v408_v50 = vpack.c.bf16 %v360_v46, %v356_v45  ;;  %v369_v52 = vld [vmem:[%s12806_s22 + $0x128] sm:$0xff]  ;;  %v11215_v46 = vld [vmem:[#allocation13 + $0xba4] ss:$48 sps:$4 sm:$0xff]  }
  0xfb   : > { %v11210_v45 = vld [vmem:[#allocation13 + $0xb48] ss:$48 sps:$4 sm:$0xff]  }
  0xfd   : > { %1221 = vmatpush1.bf16.msra.mxu0 %v11103_v53  ;;  %1447 = vmatpush1.bf16.msra.mxu1 %v11104_v54  ;;  %v11162_v53 = vld [vmem:[#allocation13 + $0x848] ss:$48 sps:$4 sm:$0xff]   ;;  %v11167_v54 = vld [vmem:[#allocation13 + $0x8a4] ss:$48 sps:$4 sm:$0xff]  }
  0xfe   : > { %1222 = vmatprep.subr.bf16.mxu0 %v11105_v55  ;;  %1448 = vmatprep.subr.bf16.mxu1 %v11107_v56  ;;  %v11170_v55 = vld [vmem:[#allocation13 + $0x8ac] ss:$48 sps:$4 sm:$0xff]   ;;  %v11165_v56 = vld [vmem:[#allocation13 + $0x8a0] ss:$48 sps:$4 sm:$0xff]  }
 0x101   : > { %1223 = vmatpush1.bf16.msra.mxu0 %v11109_v57  ;;  %1449 = vmatpush1.bf16.msra.mxu1 %v11110_v58  ;;  %v11168_v57 = vld [vmem:[#allocation13 + $0x8a8] ss:$48 sps:$4 sm:$0xff]   ;;  %v413_v58 = vpack.c.bf16 %v369_v52, %v365_v51  ;;  %v334_v51 = vld [vmem:[%s12806_s22 + $0x10] sm:$0xff] }
 0x102   : > { %1224 = vmatprep.subr.bf16.mxu0 %v11111_v59  ;;  %1450 = vmatprep.subr.bf16.mxu1 %v11113_v60  ;;  %v364_v59 = vld [vmem:[%s12806_s22 + $0x100] sm:$0xff]  ;;  %v338_v52 = vld [vmem:[%s12806_s22 + $0x30] sm:$0xff] }
 0x103   : > { %v368_v60 = vld [vmem:[%s12806_s22 + $0x120] sm:$0xff] }
 0x105   : > { %1225 = vmatpush1.bf16.msra.mxu0 %v11115_v61  ;;  %1451 = vmatpush1.bf16.msra.mxu1 %v11116_v62  ;;  %v11173_v61 = vld [vmem:[#allocation13 + $0x904] ss:$48 sps:$4 sm:$0xff]   ;;  %v11176_v62 = vld [vmem:[#allocation13 + $0x90c] ss:$48 sps:$4 sm:$0xff]  }
 0x106   : > { %1226 = vmatprep.subr.bf16.mxu0 %v11117_v63  ;;  %1452 = vmatprep.subr.bf16.mxu1 %v11119_v0  ;;  %v412_v63 = vpack.c.bf16 %v368_v60, %v364_v59  ;;  %v373_v0 = vld [vmem:[%s12806_s22 + $0x148] sm:$0xff]  ;;  %v351_v59 = vld [vmem:[%s12806_s22 + $0x98] sm:$0xff] }
 0x107   : > { %v355_v60 = vld [vmem:[%s12806_s22 + $0xb8] sm:$0xff] }
 0x109   : > { %1227 = vmatpush1.bf16.msra.mxu0 %v11121_v1  ;;  %1453 = vmatpush1.bf16.msra.mxu1 %v11122_v2  ;;  %v377_v1 = vld [vmem:[%s12806_s22 + $0x168] sm:$0xff]  ;;  %v11171_v2 = vld [vmem:[#allocation13 + $0x900] ss:$48 sps:$4 sm:$0xff]  }
 0x10a   : > { %1309 = vmatprep.subr.bf16.mxu0 %v11125_v5  ;;  %1535 = vmatprep.subr.bf16.mxu1 %v11128_v6  ;;  %v11182_v5 = vld [vmem:[#allocation13 + $0x96c] ss:$48 sps:$4 sm:$0xff]   ;;  %v417_v6 = vpack.c.bf16 %v377_v1, %v373_v0  ;;  %v354_v0 = vld [vmem:[%s12806_s22 + $0xb0] sm:$0xff] }
 0x10b   : > { %v359_v1 = vld [vmem:[%s12806_s22 + $0xd8] sm:$0xff] }
 0x10c   : > { %1229 = vmatmul.mubr.bf16.vlgmr.msra.gmra.mrb[0].mxu0 %v396_v8  ;;  %1455 = vmatmul.mubr.bf16.vlgmr.msra.gmra.mrb[0].mxu1 %v396_v8  ;;  %v11180_v8 = vld [vmem:[#allocation13 + $0x968] ss:$48 sps:$4 sm:$0xff]  }
 0x10d   : > { %1310 = vmatpush1.bf16.msra.mxu0 %v11123_v7  ;;  %1536 = vmatpush1.bf16.msra.mxu1 %v11126_v9  ;;  %v11177_v7 = vld [vmem:[#allocation13 + $0x960] ss:$48 sps:$4 sm:$0xff]  }
 0x10e   : > { %1311 = vmatprep.subr.bf16.mxu0 %v11131_v12  ;;  %1537 = vmatprep.subr.bf16.mxu1 %v11134_v13  ;;  %v372_v9 = vld [vmem:[%s12806_s22 + $0x140] sm:$0xff]  ;;  %v11188_v12 = vld [vmem:[#allocation13 + $0x9cc] ss:$48 sps:$4 sm:$0xff]  }
 0x10f   : > { %1238 = vmatprep.mubr.bf16.mxu0 %v401_v15  ;;  %1464 = vmatprep.mubr.bf16.mxu1 %v401_v15  ;;  %v416_v13 = vpack.c.bf16 %v376_v10, %v372_v9  ;;  %v385_v15 = vld [vmem:[%s12806_s22 + $0x1a8] sm:$0xff] }
 0x111   : > { %1312 = vmatpush1.bf16.msra.mxu0 %v11129_v14  ;;  %1538 = vmatpush1.bf16.msra.mxu1 %v11132_v16  ;;  %v381_v14 = vld [vmem:[%s12806_s22 + $0x188] sm:$0xff]  ;;  %v11183_v16 = vld [vmem:[#allocation13 + $0x9c0] ss:$48 sps:$4 sm:$0xff]  }
 0x112   : > { %1313 = vmatprep.subr.bf16.mxu0 %v11137_v19  ;;  %1539 = vmatprep.subr.bf16.mxu1 %v11140_v20  ;;  %v11194_v19 = vld [vmem:[#allocation13 + $0xa2c] ss:$48 sps:$4 sm:$0xff]   ;;  %v421_v20 = vpack.c.bf16 %v385_v15, %v381_v14 }
 0x113   : > { %v379_v14 = vld [vmem:[%s12806_s22 + $0x178] sm:$0xff] }
 0x114   : > { %1239 = vmatmul.mubr.bf16.gmra.mrb[4].mxu0 %v400_v23  ;;  %1465 = vmatmul.mubr.bf16.gmra.mrb[4].mxu1 %v400_v23  ;;  %v380_v23 = vld [vmem:[%s12806_s22 + $0x180] sm:$0xff] }
 0x115   : > { %1314 = vmatpush1.bf16.msra.mxu0 %v11135_v21  ;;  %1540 = vmatpush1.bf16.msra.mxu1 %v11138_v22  ;;  %v11189_v21 = vld [vmem:[#allocation13 + $0xa20] ss:$48 sps:$4 sm:$0xff]   ;;  %v11192_v22 = vld [vmem:[#allocation13 + $0xa28] ss:$48 sps:$4 sm:$0xff]  }
 0x116   : > { %1315 = vmatprep.subr.bf16.mxu0 %v11143_v26  ;;  %1541 = vmatprep.subr.bf16.mxu1 %v11146_v27  ;;  %v11200_v26 = vld [vmem:[#allocation13 + $0xa8c] ss:$48 sps:$4 sm:$0xff]   ;;  %v420_v27 = vpack.c.bf16 %v384_v24, %v380_v23  ;;  %v382_v23 = vld [vmem:[%s12806_s22 + $0x190] sm:$0xff] }
 0x117   : > { %1248 = vmatprep.mubr.bf16.mxu0 %v405_v28  ;;  %1474 = vmatprep.mubr.bf16.mxu1 %v405_v28  ;;  %v389_v28 = vld [vmem:[%s12806_s22 + $0x1c8] sm:$0xff]  ;;  %v386_v24 = vld [vmem:[%s12806_s22 + $0x1b0] sm:$0xff] }
 0x119   : > { %1316 = vmatpush1.bf16.msra.mxu0 %v11141_v29  ;;  %1542 = vmatpush1.bf16.msra.mxu1 %v11144_v30  ;;  %v393_v29 = vld [vmem:[%s12806_s22 + $0x1e8] sm:$0xff]  ;;  %v11195_v30 = vld [vmem:[#allocation13 + $0xa80] ss:$48 sps:$4 sm:$0xff]  }
 0x11a   : > { %1317 = vmatprep.subr.bf16.mxu0 %v11149_v33  ;;  %1543 = vmatprep.subr.bf16.mxu1 %v11152_v34  ;;  %v11206_v33 = vld [vmem:[#allocation13 + $0xaec] ss:$48 sps:$4 sm:$0xff]   ;;  %v425_v34 = vpack.c.bf16 %v393_v29, %v389_v28  ;;  %v390_v29 = vld [vmem:[%s12806_s22 + $0x1d0] sm:$0xff] }
 0x11c   : > { %1249 = vmatmul.mubr.bf16.gmra.mrb[8].mxu0 %v404_v37  ;;  %1475 = vmatmul.mubr.bf16.gmra.mrb[8].mxu1 %v404_v37  ;;  %v388_v37 = vld [vmem:[%s12806_s22 + $0x1c0] sm:$0xff] }
 0x11d   : > { %1318 = vmatpush1.bf16.msra.mxu0 %v11147_v35  ;;  %1544 = vmatpush1.bf16.msra.mxu1 %v11150_v36  ;;  %v11201_v35 = vld [vmem:[#allocation13 + $0xae0] ss:$48 sps:$4 sm:$0xff]   ;;  %v11204_v36 = vld [vmem:[#allocation13 + $0xae8] ss:$48 sps:$4 sm:$0xff]  }
 0x11e   : > { %1319 = vmatprep.subr.bf16.mxu0 %v11155_v40  ;;  %1545 = vmatprep.subr.bf16.mxu1 %v11158_v41  ;;  %v11212_v40 = vld [vmem:[#allocation13 + $0xb4c] ss:$48 sps:$4 sm:$0xff]   ;;  %v424_v41 = vpack.c.bf16 %v392_v38, %v388_v37 }
 0x11f   : > { %1258 = vmatprep.mubr.bf16.mxu0 %v409_v43  ;;  %1484 = vmatprep.mubr.bf16.mxu1 %v409_v43  ;;  %v339_v43 = vld [vmem:[%s12806_s22 + $0x38] sm:$0xff] }
 0x121   : > { %1320 = vmatpush1.bf16.msra.mxu0 %v11153_v42  ;;  %1546 = vmatpush1.bf16.msra.mxu1 %v11156_v44  ;;  %v335_v42 = vld [vmem:[%s12806_s22 + $0x18] sm:$0xff]  ;;  %v11207_v44 = vld [vmem:[#allocation13 + $0xb40] ss:$48 sps:$4 sm:$0xff]  }
 0x122   : > { %1321 = vmatprep.subr.bf16.mxu0 %v11161_v47  ;;  %1547 = vmatprep.subr.bf16.mxu1 %v11164_v48  ;;  %v11218_v47 = vld [vmem:[#allocation13 + $0xbac] ss:$48 sps:$4 sm:$0xff]   ;;  %v399_v48 = vpack.c.bf16 %v339_v43, %v335_v42 }
 0x124   : > { %1259 = vmatmul.mubr.bf16.gmra.mrb[12].mxu0 %v408_v50  ;;  %1485 = vmatmul.mubr.bf16.gmra.mrb[12].mxu1 %v408_v50  ;;  %v11216_v50 = vld [vmem:[#allocation13 + $0xba8] ss:$48 sps:$4 sm:$0xff]  }
 0x125   : > { %1322 = vmatpush1.bf16.msra.mxu0 %v11159_v49  ;;  %1548 = vmatpush1.bf16.msra.mxu1 %v11162_v53  ;;  %v11213_v49 = vld [vmem:[#allocation13 + $0xba0] ss:$48 sps:$4 sm:$0xff]   ;;  %v343_v53 = vld [vmem:[%s12806_s22 + $0x58] sm:$0xff] }
 0x126   : > { %1323 = vmatprep.subr.bf16.mxu0 %v11167_v54  ;;  %1549 = vmatprep.subr.bf16.mxu1 %v11170_v55  ;;  %v347_v54 = vld [vmem:[%s12806_s22 + $0x78] sm:$0xff]  ;;  %v398_v55 = vpack.c.bf16 %v338_v52, %v334_v51 }
 0x127   : > { %1268 = vmatprep.mubr.bf16.mxu0 %v413_v58  ;;  %1494 = vmatprep.mubr.bf16.mxu1 %v413_v58  ;;  %v346_v58 = vld [vmem:[%s12806_s22 + $0x70] sm:$0xff] }
 0x129   : > { %1324 = vmatpush1.bf16.msra.mxu0 %v11165_v56  ;;  %1550 = vmatpush1.bf16.msra.mxu1 %v11168_v57  ;;  %v403_v56 = vpack.c.bf16 %v347_v54, %v343_v53  ;;  %v342_v57 = vld [vmem:[%s12806_s22 + $0x50] sm:$0xff] }
 0x12a   : > { %1325 = vmatprep.subr.bf16.mxu0 %v11173_v61  ;;  %1551 = vmatprep.subr.bf16.mxu1 %v11176_v62  ;;  %v402_v61 = vpack.c.bf16 %v346_v58, %v342_v57  ;;  %v407_v62 = vpack.c.bf16 %v355_v60, %v351_v59 }
 0x12c   : > { %1269 = vmatmul.mubr.bf16.gmra.mrb[16].mxu0 %v412_v63  ;;  %1495 = vmatmul.mubr.bf16.gmra.mrb[16].mxu1 %v412_v63  ;;  %v350_v63 = vld [vmem:[%s12806_s22 + $0x90] sm:$0xff] }
 0x12d   : > { %1326 = vmatpush1.bf16.msra.mxu0 %v11171_v2  ;;  %1552 = vmatpush1.bf16.msra.mxu1 %v11174_v3  ;;  %v363_v2 = vld [vmem:[%s12806_s22 + $0xf8] sm:$0xff]  ;;  %v406_v3 = vpack.c.bf16 %v354_v0, %v350_v63 }
 0x12e   : > { %1327 = vmatprep.subr.bf16.mxu0 %v11179_v4  ;;  %1553 = vmatprep.subr.bf16.mxu1 %v11182_v5  ;;  %v411_v4 = vpack.c.bf16 %v363_v2, %v359_v1  ;;  %v358_v5 = vld [vmem:[%s12806_s22 + $0xd0] sm:$0xff] }
 0x12f   : > { %1278 = vmatprep.mubr.bf16.mxu0 %v417_v6  ;;  %1504 = vmatprep.mubr.bf16.mxu1 %v417_v6  ;;  %v362_v6 = vld [vmem:[%s12806_s22 + $0xf0] sm:$0xff] }
 0x130   : > { %v410_v9 = vpack.c.bf16 %v362_v6, %v358_v5 }
 0x131   : > { %1328 = vmatpush1.bf16.msra.mxu0 %v11177_v7  ;;  %1554 = vmatpush1.bf16.msra.mxu1 %v11180_v8  ;;  %v367_v7 = vld [vmem:[%s12806_s22 + $0x118] sm:$0xff] }
 0x132   : > { %1329 = vmatprep.subr.bf16.mxu0 %v11185_v11  ;;  %1555 = vmatprep.subr.bf16.mxu1 %v11188_v12  ;;  %v371_v8 = vld [vmem:[%s12806_s22 + $0x138] sm:$0xff]  ;;  %v366_v11 = vld [vmem:[%s12806_s22 + $0x110] sm:$0xff] }
 0x133   : > { %v415_v10 = vpack.c.bf16 %v371_v8, %v367_v7  ;;  %v370_v12 = vld [vmem:[%s12806_s22 + $0x130] sm:$0xff] }
 0x134   : > { %1279 = vmatmul.mubr.bf16.gmra.mrb[20].mxu0 %v416_v13  ;;  %1505 = vmatmul.mubr.bf16.gmra.mrb[20].mxu1 %v416_v13  ;;  %v375_v13 = vld [vmem:[%s12806_s22 + $0x158] sm:$0xff]  ;;  %v414_v15 = vpack.c.bf16 %v370_v12, %v366_v11 }
 0x135   : > { %1330 = vmatpush1.bf16.msra.mxu0 %v11183_v16  ;;  %1556 = vmatpush1.bf16.msra.mxu1 %v11186_v17  ;;  %v419_v16 = vpack.c.bf16 %v379_v14, %v375_v13  ;;  %v374_v17 = vld [vmem:[%s12806_s22 + $0x150] sm:$0xff] }
 0x136   : > { %1331 = vmatprep.subr.bf16.mxu0 %v11191_v18  ;;  %1557 = vmatprep.subr.bf16.mxu1 %v11194_v19  ;;  %v378_v18 = vld [vmem:[%s12806_s22 + $0x170] sm:$0xff]  ;;  %v383_v19 = vld [vmem:[%s12806_s22 + $0x198] sm:$0xff] }
 0x137   : > { %1288 = vmatprep.mubr.bf16.mxu0 %v421_v20  ;;  %1514 = vmatprep.mubr.bf16.mxu1 %v421_v20  ;;  %v387_v20 = vld [vmem:[%s12806_s22 + $0x1b8] sm:$0xff] }
 0x139   : > { %1332 = vmatpush1.bf16.msra.mxu0 %v11189_v21  ;;  %1558 = vmatpush1.bf16.msra.mxu1 %v11192_v22  ;;  %v418_v21 = vpack.c.bf16 %v378_v18, %v374_v17  ;;  %v423_v22 = vpack.c.bf16 %v387_v20, %v383_v19 }
 0x13a   : > { %1333 = vmatprep.subr.bf16.mxu0 %v11197_v25  ;;  %1559 = vmatprep.subr.bf16.mxu1 %v11200_v26  ;;  %v391_v25 = vld [vmem:[%s12806_s22 + $0x1d8] sm:$0xff] }
 0x13b   : > { %v395_v26 = vld [vmem:[%s12806_s22 + $0x1f8] sm:$0xff] }
 0x13c   : > { %1289 = vmatmul.mubr.bf16.gmra.mrb[24].mxu0 %v420_v27  ;;  %1515 = vmatmul.mubr.bf16.gmra.mrb[24].mxu1 %v420_v27  ;;  %v422_v27 = vpack.c.bf16 %v386_v24, %v382_v23  ;;  %v427_v28 = vpack.c.bf16 %v395_v26, %v391_v25 }
 0x13d   : > { %1334 = vmatpush1.bf16.msra.mxu0 %v11195_v30  ;;  %1560 = vmatpush1.bf16.msra.mxu1 %v11198_v31  ;;  %v394_v30 = vld [vmem:[%s12806_s22 + $0x1f0] sm:$0xff] }
 0x13e   : > { %1335 = vmatprep.subr.bf16.mxu0 %v11203_v32  ;;  %1561 = vmatprep.subr.bf16.mxu1 %v11206_v33  ;;  %v426_v31 = vpack.c.bf16 %v394_v30, %v390_v29  ;;  %v12461_v32 = vmov -inf   ;;  %v12462_v33 = vmov 0.0  }
 0x13f   : > { %1298 = vmatprep.mubr.bf16.mxu0 %v425_v34  ;;  %1524 = vmatprep.mubr.bf16.mxu1 %v425_v34  ;;  %1777 = vst.msk [vmem:[#allocation3] sm:$0xff] %vm1776_vm0, %v12461_v32  ;;  %1778 = vst.msk [vmem:[#allocation3 + $0x8] sm:$0xff] %vm1776_vm0, %v12461_v32 }
 0x140   : > { %1779 = vst.msk [vmem:[#allocation3 + $0x10] sm:$0xff] %vm1776_vm0, %v12461_v32  ;;  %1780 = vst.msk [vmem:[#allocation3 + $0x18] sm:$0xff] %vm1776_vm0, %v12461_v32 }
 0x141   : > { %1336 = vmatpush1.bf16.msra.mxu0 %v11201_v35  ;;  %1562 = vmatpush1.bf16.msra.mxu1 %v11204_v36  ;;  %1781 = vst.msk [vmem:[#allocation3 + $0x20] sm:$0xff] %vm1776_vm0, %v12461_v32  ;;  %1782 = vst.msk [vmem:[#allocation3 + $0x28] sm:$0xff] %vm1776_vm0, %v12461_v32 }
 0x142   : > { %1337 = vmatprep.subr.bf16.mxu0 %v11209_v39  ;;  %1563 = vmatprep.subr.bf16.mxu1 %v11212_v40  ;;  %1783 = vst.msk [vmem:[#allocation3 + $0x30] sm:$0xff] %vm1776_vm0, %v12461_v32  ;;  %1784 = vst.msk [vmem:[#allocation3 + $0x38] sm:$0xff] %vm1776_vm0, %v12461_v32 }
 0x143   : > { %1785 = vst.msk [vmem:[#allocation3 + $0x40] sm:$0xff] %vm1776_vm0, %v12461_v32  ;;  %1786 = vst.msk [vmem:[#allocation3 + $0x48] sm:$0xff] %vm1776_vm0, %v12461_v32 }
 0x144   : > { %1299 = vmatmul.mubr.bf16.gmra.mrb[28].mxu0 %v424_v41  ;;  %1525 = vmatmul.mubr.bf16.gmra.mrb[28].mxu1 %v424_v41  ;;  %1787 = vst.msk [vmem:[#allocation3 + $0x50] sm:$0xff] %vm1776_vm0, %v12461_v32  ;;  %1788 = vst.msk [vmem:[#allocation3 + $0x58] sm:$0xff] %vm1776_vm0, %v12461_v32 }
 0x145   : > { %1338 = vmatpush1.bf16.msra.mxu0 %v11207_v44  ;;  %1564 = vmatpush1.bf16.msra.mxu1 %v11210_v45  ;;  %1789 = vst.msk [vmem:[#allocation3 + $0x60] sm:$0xff] %vm1776_vm0, %v12461_v32  ;;  %1790 = vst.msk [vmem:[#allocation3 + $0x68] sm:$0xff] %vm1776_vm0, %v12461_v32 }
 0x146   : > { %1339 = vmatprep.subr.bf16.mxu0 %v11215_v46  ;;  %1565 = vmatprep.subr.bf16.mxu1 %v11218_v47  ;;  %1791 = vst.msk [vmem:[#allocation3 + $0x70] sm:$0xff] %vm1776_vm0, %v12461_v32  ;;  %1792 = vst.msk [vmem:[#allocation3 + $0x78] sm:$0xff] %vm1776_vm0, %v12461_v32 }
 0x147   : > { %1341 = vmatprep.mubr.bf16.mxu0 %v399_v48  ;;  %1567 = vmatprep.mubr.bf16.mxu1 %v399_v48  ;;  %1793 = vst.msk [vmem:[#allocation3 + $0x80] sm:$0xff] %vm1776_vm0, %v12461_v32  ;;  %1794 = vst.msk [vmem:[#allocation3 + $0x88] sm:$0xff] %vm1776_vm0, %v12461_v32 }
 0x148   : > { %1795 = vst.msk [vmem:[#allocation3 + $0x90] sm:$0xff] %vm1776_vm0, %v12461_v32  ;;  %1796 = vst.msk [vmem:[#allocation3 + $0x98] sm:$0xff] %vm1776_vm0, %v12461_v32 }
 0x149   : > { %1340 = vmatpush1.bf16.msra.mxu0 %v11213_v49  ;;  %1566 = vmatpush1.bf16.msra.mxu1 %v11216_v50  ;;  %1797 = vst.msk [vmem:[#allocation3 + $0xa0] sm:$0xff] %vm1776_vm0, %v12461_v32  ;;  %1798 = vst.msk [vmem:[#allocation3 + $0xa8] sm:$0xff] %vm1776_vm0, %v12461_v32 }
 0x14a   : > { %1799 = vst.msk [vmem:[#allocation3 + $0xb0] sm:$0xff] %vm1776_vm0, %v12461_v32  ;;  %1800 = vst.msk [vmem:[#allocation3 + $0xb8] sm:$0xff] %vm1776_vm0, %v12461_v32 }
 0x14b   : > { %1801 = vst.msk [vmem:[#allocation3 + $0xc0] sm:$0xff] %vm1776_vm0, %v12461_v32  ;;  %1802 = vst.msk [vmem:[#allocation3 + $0xc8] sm:$0xff] %vm1776_vm0, %v12461_v32 }
 0x14c   : > { %1342 = vmatmul.mubr.bf16.vlgmr.msra.gmra.mrb[0].mxu0 %v398_v55  ;;  %1568 = vmatmul.mubr.bf16.vlgmr.msra.gmra.mrb[0].mxu1 %v398_v55  ;;  %1803 = vst.msk [vmem:[#allocation3 + $0xd0] sm:$0xff] %vm1776_vm0, %v12461_v32  ;;  %1804 = vst.msk [vmem:[#allocation3 + $0xd8] sm:$0xff] %vm1776_vm0, %v12461_v32 }
 0x14d   : > { %1351 = vmatprep.mubr.bf16.mxu0 %v403_v56  ;;  %1577 = vmatprep.mubr.bf16.mxu1 %v403_v56  ;;  %1805 = vst.msk [vmem:[#allocation3 + $0xe0] sm:$0xff] %vm1776_vm0, %v12461_v32  ;;  %1806 = vst.msk [vmem:[#allocation3 + $0xe8] sm:$0xff] %vm1776_vm0, %v12461_v32 }
 0x14e   : > { %1807 = vst.msk [vmem:[#allocation3 + $0xf0] sm:$0xff] %vm1776_vm0, %v12461_v32  ;;  %1808 = vst.msk [vmem:[#allocation3 + $0xf8] sm:$0xff] %vm1776_vm0, %v12461_v32 }
 0x14f   : > { %1809 = vst.msk [vmem:[#allocation3 + $0x100] sm:$0xff] %vm1776_vm0, %v12461_v32  ;;  %1810 = vst.msk [vmem:[#allocation3 + $0x108] sm:$0xff] %vm1776_vm0, %v12461_v32 }
 0x150   : > { %1811 = vst.msk [vmem:[#allocation3 + $0x110] sm:$0xff] %vm1776_vm0, %v12461_v32  ;;  %1812 = vst.msk [vmem:[#allocation3 + $0x118] sm:$0xff] %vm1776_vm0, %v12461_v32 }
 0x151   : > { %1813 = vst.msk [vmem:[#allocation3 + $0x120] sm:$0xff] %vm1776_vm0, %v12461_v32  ;;  %1814 = vst.msk [vmem:[#allocation3 + $0x128] sm:$0xff] %vm1776_vm0, %v12461_v32 }
 0x152   : > { %1815 = vst.msk [vmem:[#allocation3 + $0x130] sm:$0xff] %vm1776_vm0, %v12461_v32  ;;  %1816 = vst.msk [vmem:[#allocation3 + $0x138] sm:$0xff] %vm1776_vm0, %v12461_v32 }
 0x153   : > { %1817 = vst.msk [vmem:[#allocation3 + $0x140] sm:$0xff] %vm1776_vm0, %v12461_v32  ;;  %1818 = vst.msk [vmem:[#allocation3 + $0x148] sm:$0xff] %vm1776_vm0, %v12461_v32 }
 0x154   : > { %1352 = vmatmul.mubr.bf16.gmra.mrb[4].mxu0 %v402_v61  ;;  %1578 = vmatmul.mubr.bf16.gmra.mrb[4].mxu1 %v402_v61  ;;  %1819 = vst.msk [vmem:[#allocation3 + $0x150] sm:$0xff] %vm1776_vm0, %v12461_v32  ;;  %1820 = vst.msk [vmem:[#allocation3 + $0x158] sm:$0xff] %vm1776_vm0, %v12461_v32 }
 0x155   : > { %1361 = vmatprep.mubr.bf16.mxu0 %v407_v62  ;;  %1587 = vmatprep.mubr.bf16.mxu1 %v407_v62  ;;  %1821 = vst.msk [vmem:[#allocation3 + $0x160] sm:$0xff] %vm1776_vm0, %v12461_v32  ;;  %1822 = vst.msk [vmem:[#allocation3 + $0x168] sm:$0xff] %vm1776_vm0, %v12461_v32 }
 0x156   : > { %1823 = vst.msk [vmem:[#allocation3 + $0x170] sm:$0xff] %vm1776_vm0, %v12461_v32  ;;  %1824 = vst.msk [vmem:[#allocation3 + $0x178] sm:$0xff] %vm1776_vm0, %v12461_v32 }
 0x157   : > { %1825 = vst.msk [vmem:[#allocation3 + $0x180] sm:$0xff] %vm1776_vm0, %v12461_v32  ;;  %1826 = vst.msk [vmem:[#allocation3 + $0x188] sm:$0xff] %vm1776_vm0, %v12461_v32 }
 0x158   : > { %1827 = vst.msk [vmem:[#allocation3 + $0x190] sm:$0xff] %vm1776_vm0, %v12461_v32  ;;  %1828 = vst.msk [vmem:[#allocation3 + $0x198] sm:$0xff] %vm1776_vm0, %v12461_v32 }
 0x159   : > { %1829 = vst.msk [vmem:[#allocation3 + $0x1a0] sm:$0xff] %vm1776_vm0, %v12461_v32  ;;  %1830 = vst.msk [vmem:[#allocation3 + $0x1a8] sm:$0xff] %vm1776_vm0, %v12461_v32 }
 0x15a   : > { %1831 = vst.msk [vmem:[#allocation3 + $0x1b0] sm:$0xff] %vm1776_vm0, %v12461_v32  ;;  %1832 = vst.msk [vmem:[#allocation3 + $0x1b8] sm:$0xff] %vm1776_vm0, %v12461_v32 }
 0x15b   : > { %1833 = vst.msk [vmem:[#allocation3 + $0x1c0] sm:$0xff] %vm1776_vm0, %v12461_v32  ;;  %1834 = vst.msk [vmem:[#allocation3 + $0x1c8] sm:$0xff] %vm1776_vm0, %v12461_v32 }
 0x15c   : > { %1362 = vmatmul.mubr.bf16.gmra.mrb[8].mxu0 %v406_v3  ;;  %1588 = vmatmul.mubr.bf16.gmra.mrb[8].mxu1 %v406_v3  ;;  %1835 = vst.msk [vmem:[#allocation3 + $0x1d0] sm:$0xff] %vm1776_vm0, %v12461_v32  ;;  %1836 = vst.msk [vmem:[#allocation3 + $0x1d8] sm:$0xff] %vm1776_vm0, %v12461_v32 }
 0x15d   : > { %1371 = vmatprep.mubr.bf16.mxu0 %v411_v4  ;;  %1597 = vmatprep.mubr.bf16.mxu1 %v411_v4  ;;  %1837 = vst.msk [vmem:[#allocation3 + $0x1e0] sm:$0xff] %vm1776_vm0, %v12461_v32  ;;  %1838 = vst.msk [vmem:[#allocation3 + $0x1e8] sm:$0xff] %vm1776_vm0, %v12461_v32 }
 0x15e   : > { %1839 = vst.msk [vmem:[#allocation3 + $0x1f0] sm:$0xff] %vm1776_vm0, %v12461_v32  ;;  %1840 = vst.msk [vmem:[#allocation3 + $0x1f8] sm:$0xff] %vm1776_vm0, %v12461_v32 }
 0x15f   : > { %1841 = vst.msk [vmem:[#allocation4] sm:$0xff] %vm1776_vm0, %v12462_v33  ;;  %1842 = vst.msk [vmem:[#allocation4 + $0x8] sm:$0xff] %vm1776_vm0, %v12462_v33 }
 0x160   : > { %1843 = vst.msk [vmem:[#allocation4 + $0x10] sm:$0xff] %vm1776_vm0, %v12462_v33  ;;  %1844 = vst.msk [vmem:[#allocation4 + $0x18] sm:$0xff] %vm1776_vm0, %v12462_v33 }
 0x161   : > { %1845 = vst.msk [vmem:[#allocation4 + $0x20] sm:$0xff] %vm1776_vm0, %v12462_v33  ;;  %1846 = vst.msk [vmem:[#allocation4 + $0x28] sm:$0xff] %vm1776_vm0, %v12462_v33 }
 0x162   : > { %1847 = vst.msk [vmem:[#allocation4 + $0x30] sm:$0xff] %vm1776_vm0, %v12462_v33  ;;  %1848 = vst.msk [vmem:[#allocation4 + $0x38] sm:$0xff] %vm1776_vm0, %v12462_v33 }
 0x163   : > { %1849 = vst.msk [vmem:[#allocation4 + $0x40] sm:$0xff] %vm1776_vm0, %v12462_v33  ;;  %1850 = vst.msk [vmem:[#allocation4 + $0x48] sm:$0xff] %vm1776_vm0, %v12462_v33 }
 0x164   : > { %1372 = vmatmul.mubr.bf16.gmra.mrb[12].mxu0 %v410_v9  ;;  %1598 = vmatmul.mubr.bf16.gmra.mrb[12].mxu1 %v410_v9  ;;  %1851 = vst.msk [vmem:[#allocation4 + $0x50] sm:$0xff] %vm1776_vm0, %v12462_v33  ;;  %1852 = vst.msk [vmem:[#allocation4 + $0x58] sm:$0xff] %vm1776_vm0, %v12462_v33 }
 0x165   : > { %1381 = vmatprep.mubr.bf16.mxu0 %v415_v10  ;;  %1607 = vmatprep.mubr.bf16.mxu1 %v415_v10  ;;  %1853 = vst.msk [vmem:[#allocation4 + $0x60] sm:$0xff] %vm1776_vm0, %v12462_v33  ;;  %1854 = vst.msk [vmem:[#allocation4 + $0x68] sm:$0xff] %vm1776_vm0, %v12462_v33 }
 0x166   : > { %1855 = vst.msk [vmem:[#allocation4 + $0x70] sm:$0xff] %vm1776_vm0, %v12462_v33  ;;  %1856 = vst.msk [vmem:[#allocation4 + $0x78] sm:$0xff] %vm1776_vm0, %v12462_v33 }
 0x167   : > { %1857 = vst.msk [vmem:[#allocation4 + $0x80] sm:$0xff] %vm1776_vm0, %v12462_v33  ;;  %1858 = vst.msk [vmem:[#allocation4 + $0x88] sm:$0xff] %vm1776_vm0, %v12462_v33 }
 0x168   : > { %1859 = vst.msk [vmem:[#allocation4 + $0x90] sm:$0xff] %vm1776_vm0, %v12462_v33  ;;  %1860 = vst.msk [vmem:[#allocation4 + $0x98] sm:$0xff] %vm1776_vm0, %v12462_v33 }
 0x169   : > { %1861 = vst.msk [vmem:[#allocation4 + $0xa0] sm:$0xff] %vm1776_vm0, %v12462_v33  ;;  %1862 = vst.msk [vmem:[#allocation4 + $0xa8] sm:$0xff] %vm1776_vm0, %v12462_v33 }
 0x16a   : > { %1863 = vst.msk [vmem:[#allocation4 + $0xb0] sm:$0xff] %vm1776_vm0, %v12462_v33  ;;  %1864 = vst.msk [vmem:[#allocation4 + $0xb8] sm:$0xff] %vm1776_vm0, %v12462_v33 }
 0x16b   : > { %1865 = vst.msk [vmem:[#allocation4 + $0xc0] sm:$0xff] %vm1776_vm0, %v12462_v33  ;;  %1866 = vst.msk [vmem:[#allocation4 + $0xc8] sm:$0xff] %vm1776_vm0, %v12462_v33 }
 0x16c   : > { %1382 = vmatmul.mubr.bf16.gmra.mrb[16].mxu0 %v414_v15  ;;  %1608 = vmatmul.mubr.bf16.gmra.mrb[16].mxu1 %v414_v15  ;;  %1867 = vst.msk [vmem:[#allocation4 + $0xd0] sm:$0xff] %vm1776_vm0, %v12462_v33  ;;  %1868 = vst.msk [vmem:[#allocation4 + $0xd8] sm:$0xff] %vm1776_vm0, %v12462_v33 }
 0x16d   : > { %1391 = vmatprep.mubr.bf16.mxu0 %v419_v16  ;;  %1617 = vmatprep.mubr.bf16.mxu1 %v419_v16  ;;  %1869 = vst.msk [vmem:[#allocation4 + $0xe0] sm:$0xff] %vm1776_vm0, %v12462_v33  ;;  %1870 = vst.msk [vmem:[#allocation4 + $0xe8] sm:$0xff] %vm1776_vm0, %v12462_v33 }
 0x16e   : > { %1871 = vst.msk [vmem:[#allocation4 + $0xf0] sm:$0xff] %vm1776_vm0, %v12462_v33  ;;  %1872 = vst.msk [vmem:[#allocation4 + $0xf8] sm:$0xff] %vm1776_vm0, %v12462_v33 }
 0x16f   : > { %1873 = vst.msk [vmem:[#allocation4 + $0x100] sm:$0xff] %vm1776_vm0, %v12462_v33  ;;  %1874 = vst.msk [vmem:[#allocation4 + $0x108] sm:$0xff] %vm1776_vm0, %v12462_v33 }
 0x170   : > { %1875 = vst.msk [vmem:[#allocation4 + $0x110] sm:$0xff] %vm1776_vm0, %v12462_v33  ;;  %1876 = vst.msk [vmem:[#allocation4 + $0x118] sm:$0xff] %vm1776_vm0, %v12462_v33 }
 0x171   : > { %1877 = vst.msk [vmem:[#allocation4 + $0x120] sm:$0xff] %vm1776_vm0, %v12462_v33  ;;  %1878 = vst.msk [vmem:[#allocation4 + $0x128] sm:$0xff] %vm1776_vm0, %v12462_v33 }
 0x172   : > { %1879 = vst.msk [vmem:[#allocation4 + $0x130] sm:$0xff] %vm1776_vm0, %v12462_v33  ;;  %1880 = vst.msk [vmem:[#allocation4 + $0x138] sm:$0xff] %vm1776_vm0, %v12462_v33 }
 0x173   : > { %1881 = vst.msk [vmem:[#allocation4 + $0x140] sm:$0xff] %vm1776_vm0, %v12462_v33  ;;  %1882 = vst.msk [vmem:[#allocation4 + $0x148] sm:$0xff] %vm1776_vm0, %v12462_v33 }
 0x174   : > { %1392 = vmatmul.mubr.bf16.gmra.mrb[20].mxu0 %v418_v21  ;;  %1618 = vmatmul.mubr.bf16.gmra.mrb[20].mxu1 %v418_v21  ;;  %1883 = vst.msk [vmem:[#allocation4 + $0x150] sm:$0xff] %vm1776_vm0, %v12462_v33  ;;  %1884 = vst.msk [vmem:[#allocation4 + $0x158] sm:$0xff] %vm1776_vm0, %v12462_v33 }
 0x175   : > { %1401 = vmatprep.mubr.bf16.mxu0 %v423_v22  ;;  %1627 = vmatprep.mubr.bf16.mxu1 %v423_v22  ;;  %1885 = vst.msk [vmem:[#allocation4 + $0x160] sm:$0xff] %vm1776_vm0, %v12462_v33  ;;  %1886 = vst.msk [vmem:[#allocation4 + $0x168] sm:$0xff] %vm1776_vm0, %v12462_v33 }
 0x176   : > { %1887 = vst.msk [vmem:[#allocation4 + $0x170] sm:$0xff] %vm1776_vm0, %v12462_v33  ;;  %1888 = vst.msk [vmem:[#allocation4 + $0x178] sm:$0xff] %vm1776_vm0, %v12462_v33 }
 0x177   : > { %1889 = vst.msk [vmem:[#allocation4 + $0x180] sm:$0xff] %vm1776_vm0, %v12462_v33  ;;  %1890 = vst.msk [vmem:[#allocation4 + $0x188] sm:$0xff] %vm1776_vm0, %v12462_v33 }
 0x178   : > { %1891 = vst.msk [vmem:[#allocation4 + $0x190] sm:$0xff] %vm1776_vm0, %v12462_v33  ;;  %1892 = vst.msk [vmem:[#allocation4 + $0x198] sm:$0xff] %vm1776_vm0, %v12462_v33 }
 0x179   : > { %1893 = vst.msk [vmem:[#allocation4 + $0x1a0] sm:$0xff] %vm1776_vm0, %v12462_v33  ;;  %1894 = vst.msk [vmem:[#allocation4 + $0x1a8] sm:$0xff] %vm1776_vm0, %v12462_v33 }
 0x17a   : > { %1895 = vst.msk [vmem:[#allocation4 + $0x1b0] sm:$0xff] %vm1776_vm0, %v12462_v33  ;;  %1896 = vst.msk [vmem:[#allocation4 + $0x1b8] sm:$0xff] %vm1776_vm0, %v12462_v33 }
 0x17b   : > { %1897 = vst.msk [vmem:[#allocation4 + $0x1c0] sm:$0xff] %vm1776_vm0, %v12462_v33  ;;  %1898 = vst.msk [vmem:[#allocation4 + $0x1c8] sm:$0xff] %vm1776_vm0, %v12462_v33 }
 0x17c   : > { %1402 = vmatmul.mubr.bf16.gmra.mrb[24].mxu0 %v422_v27  ;;  %1628 = vmatmul.mubr.bf16.gmra.mrb[24].mxu1 %v422_v27  ;;  %1899 = vst.msk [vmem:[#allocation4 + $0x1d0] sm:$0xff] %vm1776_vm0, %v12462_v33  ;;  %1900 = vst.msk [vmem:[#allocation4 + $0x1d8] sm:$0xff] %vm1776_vm0, %v12462_v33 }
 0x17d   : > { %1411 = vmatprep.mubr.bf16.mxu0 %v427_v28  ;;  %1637 = vmatprep.mubr.bf16.mxu1 %v427_v28  ;;  %1901 = vst.msk [vmem:[#allocation4 + $0x1e0] sm:$0xff] %vm1776_vm0, %v12462_v33  ;;  %1902 = vst.msk [vmem:[#allocation4 + $0x1e8] sm:$0xff] %vm1776_vm0, %v12462_v33 }
 0x17e   : > { %1903 = vst.msk [vmem:[#allocation4 + $0x1f0] sm:$0xff] %vm1776_vm0, %v12462_v33  ;;  %1904 = vst.msk [vmem:[#allocation4 + $0x1f8] sm:$0xff] %vm1776_vm0, %v12462_v33 }
 0x17f   : > { %1905 = vst [vmem:[#allocation5] sm:$0xff] %v12462_v33  ;;  %1906 = vst [vmem:[#allocation5 + $0x8] sm:$0xff] %v12462_v33 }
 0x180   : > { %1907 = vst [vmem:[#allocation5 + $0x10] sm:$0xff] %v12462_v33  ;;  %1908 = vst [vmem:[#allocation5 + $0x18] sm:$0xff] %v12462_v33 }
 0x181   : > { %1909 = vst [vmem:[#allocation5 + $0x20] sm:$0xff] %v12462_v33  ;;  %1910 = vst [vmem:[#allocation5 + $0x28] sm:$0xff] %v12462_v33 }
 0x182   : > { %1911 = vst [vmem:[#allocation5 + $0x30] sm:$0xff] %v12462_v33  ;;  %1912 = vst [vmem:[#allocation5 + $0x38] sm:$0xff] %v12462_v33 }
 0x183   : > { %1913 = vst [vmem:[#allocation5 + $0x40] sm:$0xff] %v12462_v33  ;;  %1914 = vst [vmem:[#allocation5 + $0x48] sm:$0xff] %v12462_v33 }
 0x184   : > { %1412 = vmatmul.mubr.bf16.gmra.mrb[28].mxu0 %v426_v31  ;;  %1638 = vmatmul.mubr.bf16.gmra.mrb[28].mxu1 %v426_v31  ;;  %1915 = vst [vmem:[#allocation5 + $0x50] sm:$0xff] %v12462_v33  ;;  %1916 = vst [vmem:[#allocation5 + $0x58] sm:$0xff] %v12462_v33 }
 0x185   : > { %1917 = vst [vmem:[#allocation5 + $0x60] sm:$0xff] %v12462_v33  ;;  %1918 = vst [vmem:[#allocation5 + $0x68] sm:$0xff] %v12462_v33 }
 0x186   : > { %1919 = vst [vmem:[#allocation5 + $0x70] sm:$0xff] %v12462_v33  ;;  %1920 = vst [vmem:[#allocation5 + $0x78] sm:$0xff] %v12462_v33 }
 0x187   : > { %1921 = vst [vmem:[#allocation5 + $0x80] sm:$0xff] %v12462_v33  ;;  %1922 = vst [vmem:[#allocation5 + $0x88] sm:$0xff] %v12462_v33 }
 0x188   : > { %1923 = vst [vmem:[#allocation5 + $0x90] sm:$0xff] %v12462_v33  ;;  %1924 = vst [vmem:[#allocation5 + $0x98] sm:$0xff] %v12462_v33 }
 0x189   : > { %1925 = vst [vmem:[#allocation5 + $0xa0] sm:$0xff] %v12462_v33  ;;  %1926 = vst [vmem:[#allocation5 + $0xa8] sm:$0xff] %v12462_v33 }
 0x18a   : > { %1927 = vst [vmem:[#allocation5 + $0xb0] sm:$0xff] %v12462_v33  ;;  %1928 = vst [vmem:[#allocation5 + $0xb8] sm:$0xff] %v12462_v33 }
 0x18b   : > { %1929 = vst [vmem:[#allocation5 + $0xc0] sm:$0xff] %v12462_v33  ;;  %1930 = vst [vmem:[#allocation5 + $0xc8] sm:$0xff] %v12462_v33 }
 0x18c   : > { %1931 = vst [vmem:[#allocation5 + $0xd0] sm:$0xff] %v12462_v33  ;;  %1932 = vst [vmem:[#allocation5 + $0xd8] sm:$0xff] %v12462_v33 }
 0x18d   : > { %1933 = vst [vmem:[#allocation5 + $0xe0] sm:$0xff] %v12462_v33  ;;  %1934 = vst [vmem:[#allocation5 + $0xe8] sm:$0xff] %v12462_v33 }
 0x18e   : > { %1935 = vst [vmem:[#allocation5 + $0xf0] sm:$0xff] %v12462_v33  ;;  %1936 = vst [vmem:[#allocation5 + $0xf8] sm:$0xff] %v12462_v33 }
 0x18f   : > { %1937 = vst [vmem:[#allocation5 + $0x100] sm:$0xff] %v12462_v33  ;;  %1938 = vst [vmem:[#allocation5 + $0x108] sm:$0xff] %v12462_v33 }
 0x190   : > { %1939 = vst [vmem:[#allocation5 + $0x110] sm:$0xff] %v12462_v33  ;;  %1940 = vst [vmem:[#allocation5 + $0x118] sm:$0xff] %v12462_v33 }
 0x191   : > { %1941 = vst [vmem:[#allocation5 + $0x120] sm:$0xff] %v12462_v33  ;;  %1942 = vst [vmem:[#allocation5 + $0x128] sm:$0xff] %v12462_v33 }
 0x192   : > { %1943 = vst [vmem:[#allocation5 + $0x130] sm:$0xff] %v12462_v33  ;;  %1944 = vst [vmem:[#allocation5 + $0x138] sm:$0xff] %v12462_v33 }
 0x193   : > { %1945 = vst [vmem:[#allocation5 + $0x140] sm:$0xff] %v12462_v33  ;;  %1946 = vst [vmem:[#allocation5 + $0x148] sm:$0xff] %v12462_v33 }
 0x194   : > { %1947 = vst [vmem:[#allocation5 + $0x150] sm:$0xff] %v12462_v33  ;;  %1948 = vst [vmem:[#allocation5 + $0x158] sm:$0xff] %v12462_v33 }
 0x195   : > { %1949 = vst [vmem:[#allocation5 + $0x160] sm:$0xff] %v12462_v33  ;;  %1950 = vst [vmem:[#allocation5 + $0x168] sm:$0xff] %v12462_v33 }
 0x196   : > { %1951 = vst [vmem:[#allocation5 + $0x170] sm:$0xff] %v12462_v33  ;;  %1952 = vst [vmem:[#allocation5 + $0x178] sm:$0xff] %v12462_v33 }
 0x197   : > { %1953 = vst [vmem:[#allocation5 + $0x180] sm:$0xff] %v12462_v33  ;;  %1954 = vst [vmem:[#allocation5 + $0x188] sm:$0xff] %v12462_v33 }
 0x198   : > { %1955 = vst [vmem:[#allocation5 + $0x190] sm:$0xff] %v12462_v33  ;;  %1956 = vst [vmem:[#allocation5 + $0x198] sm:$0xff] %v12462_v33 }
 0x199   : > { %1957 = vst [vmem:[#allocation5 + $0x1a0] sm:$0xff] %v12462_v33  ;;  %1958 = vst [vmem:[#allocation5 + $0x1a8] sm:$0xff] %v12462_v33 }
 0x19a   : > { %1959 = vst [vmem:[#allocation5 + $0x1b0] sm:$0xff] %v12462_v33  ;;  %1960 = vst [vmem:[#allocation5 + $0x1b8] sm:$0xff] %v12462_v33 }
 0x19b   : > { %1961 = vst [vmem:[#allocation5 + $0x1c0] sm:$0xff] %v12462_v33  ;;  %1962 = vst [vmem:[#allocation5 + $0x1c8] sm:$0xff] %v12462_v33 }
 0x19c   : > { %1963 = vst [vmem:[#allocation5 + $0x1d0] sm:$0xff] %v12462_v33  ;;  %1964 = vst [vmem:[#allocation5 + $0x1d8] sm:$0xff] %v12462_v33 }
 0x19d   : > { %1965 = vst [vmem:[#allocation5 + $0x1e0] sm:$0xff] %v12462_v33  ;;  %1966 = vst [vmem:[#allocation5 + $0x1e8] sm:$0xff] %v12462_v33 }
 0x19e   : > { %1967 = vst [vmem:[#allocation5 + $0x1f0] sm:$0xff] %v12462_v33  ;;  %1968 = vst [vmem:[#allocation5 + $0x1f8] sm:$0xff] %v12462_v33 }
 0x21f   : > { %v1343_v34 = vpop.f32.mrb[0].mxu0  ;;  %v1569_v35 = vpop.f32.mrb[0].mxu1 }
 0x220   : > { %v1648_v36 = vmul.f32 0.044194173, %v1343_v34  ;;  %v1345_v37 = vpop.f32.mrb[1].mxu0  ;;  %v1571_v38 = vpop.f32.mrb[1].mxu1  ;;  %v1650_v39 = vmul.f32 0.044194173, %v1569_v35 }
 0x221   : > { %v1649_v40 = vmul.f32 0.044194173, %v1345_v37  ;;  %v1347_v41 = vpop.f32.mrb[2].mxu0  ;;  %v1573_v42 = vpop.f32.mrb[2].mxu1  ;;  %v1651_v47 = vmul.f32 0.044194173, %v1571_v38 }
 0x222   : > { %v1652_v43 = vmul.f32 0.044194173, %v1347_v41  ;;  %v1654_v44 = vmul.f32 0.044194173, %v1573_v42  ;;  %v1349_v45 = vpop.f32.mrb[3].mxu0  ;;  %v1575_v46 = vpop.f32.mrb[3].mxu1 }
 0x223   : > { %v1653_v48 = vmul.f32 0.044194173, %v1349_v45  ;;  %v1655_v49 = vmul.f32 0.044194173, %v1575_v46 }
 0x224   : > { %v1712_v50 = vpack.c.bf16 %v1652_v43, %v1648_v36  ;;  %v1714_v51 = vpack.c.bf16 %v1654_v44, %v1650_v39 }
 0x225   : > { %v1713_v52 = vpack.c.bf16 %v1653_v48, %v1649_v40  ;;  %v1715_v53 = vpack.c.bf16 %v1655_v49, %v1651_v47 }
 0x226   : > { %1744 = vst [vmem:[#allocation2] sm:$0xff] %v1712_v50  ;;  %1746 = vst [vmem:[#allocation2 + $0x10] sm:$0xff] %v1714_v51 }
 0x227   : > { %1745 = vst [vmem:[#allocation2 + $0x8] sm:$0xff] %v1713_v52  ;;  %1747 = vst [vmem:[#allocation2 + $0x18] sm:$0xff] %v1715_v53  ;;  %v1353_v54 = vpop.f32.mrb[4].mxu0  ;;  %v1579_v55 = vpop.f32.mrb[4].mxu1 }
 0x228   : > { %v1656_v56 = vmul.f32 0.044194173, %v1353_v54  ;;  %v1355_v57 = vpop.f32.mrb[5].mxu0  ;;  %v1581_v58 = vpop.f32.mrb[5].mxu1  ;;  %v1658_v59 = vmul.f32 0.044194173, %v1579_v55 }
 0x229   : > { %v1657_v60 = vmul.f32 0.044194173, %v1355_v57  ;;  %v1357_v61 = vpop.f32.mrb[6].mxu0  ;;  %v1583_v62 = vpop.f32.mrb[6].mxu1  ;;  %v1659_v3 = vmul.f32 0.044194173, %v1581_v58 }
 0x22a   : > { %v1660_v63 = vmul.f32 0.044194173, %v1357_v61  ;;  %v1662_v0 = vmul.f32 0.044194173, %v1583_v62  ;;  %v1359_v1 = vpop.f32.mrb[7].mxu0  ;;  %v1585_v2 = vpop.f32.mrb[7].mxu1 }
 0x22b   : > { %v1661_v4 = vmul.f32 0.044194173, %v1359_v1  ;;  %v1663_v5 = vmul.f32 0.044194173, %v1585_v2 }
 0x22c   : > { %v1716_v6 = vpack.c.bf16 %v1660_v63, %v1656_v56  ;;  %v1718_v7 = vpack.c.bf16 %v1662_v0, %v1658_v59 }
 0x22d   : > { %v1717_v8 = vpack.c.bf16 %v1661_v4, %v1657_v60  ;;  %v1719_v9 = vpack.c.bf16 %v1663_v5, %v1659_v3 }
 0x22e   : > { %1748 = vst [vmem:[#allocation2 + $0x20] sm:$0xff] %v1716_v6  ;;  %1750 = vst [vmem:[#allocation2 + $0x30] sm:$0xff] %v1718_v7 }
 0x22f   : > { %1749 = vst [vmem:[#allocation2 + $0x28] sm:$0xff] %v1717_v8  ;;  %1751 = vst [vmem:[#allocation2 + $0x38] sm:$0xff] %v1719_v9  ;;  %v1363_v10 = vpop.f32.mrb[8].mxu0  ;;  %v1589_v11 = vpop.f32.mrb[8].mxu1 }
 0x230   : > { %v1664_v12 = vmul.f32 0.044194173, %v1363_v10  ;;  %v1365_v13 = vpop.f32.mrb[9].mxu0  ;;  %v1591_v14 = vpop.f32.mrb[9].mxu1  ;;  %v1666_v15 = vmul.f32 0.044194173, %v1589_v11 }
 0x231   : > { %v1665_v16 = vmul.f32 0.044194173, %v1365_v13  ;;  %v1367_v17 = vpop.f32.mrb[10].mxu0  ;;  %v1593_v18 = vpop.f32.mrb[10].mxu1  ;;  %v1667_v23 = vmul.f32 0.044194173, %v1591_v14 }
 0x232   : > { %v1668_v19 = vmul.f32 0.044194173, %v1367_v17  ;;  %v1670_v20 = vmul.f32 0.044194173, %v1593_v18  ;;  %v1369_v21 = vpop.f32.mrb[11].mxu0  ;;  %v1595_v22 = vpop.f32.mrb[11].mxu1 }
 0x233   : > { %v1669_v24 = vmul.f32 0.044194173, %v1369_v21  ;;  %v1671_v25 = vmul.f32 0.044194173, %v1595_v22 }
 0x234   : > { %v1720_v26 = vpack.c.bf16 %v1668_v19, %v1664_v12  ;;  %v1722_v27 = vpack.c.bf16 %v1670_v20, %v1666_v15 }
 0x235   : > { %v1721_v28 = vpack.c.bf16 %v1669_v24, %v1665_v16  ;;  %v1723_v29 = vpack.c.bf16 %v1671_v25, %v1667_v23 }
 0x236   : > { %1752 = vst [vmem:[#allocation2 + $0x40] sm:$0xff] %v1720_v26  ;;  %1754 = vst [vmem:[#allocation2 + $0x50] sm:$0xff] %v1722_v27 }
 0x237   : > { %1753 = vst [vmem:[#allocation2 + $0x48] sm:$0xff] %v1721_v28  ;;  %1755 = vst [vmem:[#allocation2 + $0x58] sm:$0xff] %v1723_v29  ;;  %v1373_v30 = vpop.f32.mrb[12].mxu0  ;;  %v1599_v31 = vpop.f32.mrb[12].mxu1 }
 0x238   : > { %v1672_v32 = vmul.f32 0.044194173, %v1373_v30  ;;  %v1375_v33 = vpop.f32.mrb[13].mxu0  ;;  %v1601_v34 = vpop.f32.mrb[13].mxu1  ;;  %v1674_v35 = vmul.f32 0.044194173, %v1599_v31 }
 0x239   : > { %v1673_v36 = vmul.f32 0.044194173, %v1375_v33  ;;  %v1377_v37 = vpop.f32.mrb[14].mxu0  ;;  %v1603_v38 = vpop.f32.mrb[14].mxu1  ;;  %v1675_v43 = vmul.f32 0.044194173, %v1601_v34 }
 0x23a   : > { %v1676_v39 = vmul.f32 0.044194173, %v1377_v37  ;;  %v1678_v40 = vmul.f32 0.044194173, %v1603_v38  ;;  %v1379_v41 = vpop.f32.mrb[15].mxu0  ;;  %v1605_v42 = vpop.f32.mrb[15].mxu1 }
 0x23b   : > { %v1677_v44 = vmul.f32 0.044194173, %v1379_v41  ;;  %v1679_v45 = vmul.f32 0.044194173, %v1605_v42 }
 0x23c   : > { %v1724_v46 = vpack.c.bf16 %v1676_v39, %v1672_v32  ;;  %v1726_v47 = vpack.c.bf16 %v1678_v40, %v1674_v35 }
 0x23d   : > { %v1725_v48 = vpack.c.bf16 %v1677_v44, %v1673_v36  ;;  %v1727_v49 = vpack.c.bf16 %v1679_v45, %v1675_v43 }
 0x23e   : > { %1756 = vst [vmem:[#allocation2 + $0x60] sm:$0xff] %v1724_v46  ;;  %1758 = vst [vmem:[#allocation2 + $0x70] sm:$0xff] %v1726_v47 }
 0x23f   : > { %1757 = vst [vmem:[#allocation2 + $0x68] sm:$0xff] %v1725_v48  ;;  %1759 = vst [vmem:[#allocation2 + $0x78] sm:$0xff] %v1727_v49  ;;  %v1383_v50 = vpop.f32.mrb[16].mxu0  ;;  %v1609_v51 = vpop.f32.mrb[16].mxu1 }
 0x240   : > { %v1680_v52 = vmul.f32 0.044194173, %v1383_v50  ;;  %v1385_v53 = vpop.f32.mrb[17].mxu0  ;;  %v1611_v54 = vpop.f32.mrb[17].mxu1  ;;  %v1682_v55 = vmul.f32 0.044194173, %v1609_v51 }
 0x241   : > { %v1681_v56 = vmul.f32 0.044194173, %v1385_v53  ;;  %v1387_v57 = vpop.f32.mrb[18].mxu0  ;;  %v1613_v58 = vpop.f32.mrb[18].mxu1  ;;  %v1683_v63 = vmul.f32 0.044194173, %v1611_v54 }
 0x242   : > { %v1684_v59 = vmul.f32 0.044194173, %v1387_v57  ;;  %v1686_v60 = vmul.f32 0.044194173, %v1613_v58  ;;  %v1389_v61 = vpop.f32.mrb[19].mxu0  ;;  %v1615_v62 = vpop.f32.mrb[19].mxu1 }
 0x243   : > { %v1685_v0 = vmul.f32 0.044194173, %v1389_v61  ;;  %v1687_v1 = vmul.f32 0.044194173, %v1615_v62 }
 0x244   : > { %v1728_v2 = vpack.c.bf16 %v1684_v59, %v1680_v52  ;;  %v1730_v3 = vpack.c.bf16 %v1686_v60, %v1682_v55 }
 0x245   : > { %v1729_v4 = vpack.c.bf16 %v1685_v0, %v1681_v56  ;;  %v1731_v5 = vpack.c.bf16 %v1687_v1, %v1683_v63 }
 0x246   : > { %1760 = vst [vmem:[#allocation2 + $0x80] sm:$0xff] %v1728_v2  ;;  %1762 = vst [vmem:[#allocation2 + $0x90] sm:$0xff] %v1730_v3 }
 0x247   : > { %1761 = vst [vmem:[#allocation2 + $0x88] sm:$0xff] %v1729_v4  ;;  %1763 = vst [vmem:[#allocation2 + $0x98] sm:$0xff] %v1731_v5  ;;  %v1393_v6 = vpop.f32.mrb[20].mxu0  ;;  %v1619_v7 = vpop.f32.mrb[20].mxu1 }
 0x248   : > { %v1688_v8 = vmul.f32 0.044194173, %v1393_v6  ;;  %v1395_v9 = vpop.f32.mrb[21].mxu0  ;;  %v1621_v10 = vpop.f32.mrb[21].mxu1  ;;  %v1690_v11 = vmul.f32 0.044194173, %v1619_v7 }
 0x249   : > { %v1689_v12 = vmul.f32 0.044194173, %v1395_v9  ;;  %v1397_v13 = vpop.f32.mrb[22].mxu0  ;;  %v1623_v14 = vpop.f32.mrb[22].mxu1  ;;  %v1691_v19 = vmul.f32 0.044194173, %v1621_v10 }
 0x24a   : > { %v1692_v15 = vmul.f32 0.044194173, %v1397_v13  ;;  %v1694_v16 = vmul.f32 0.044194173, %v1623_v14  ;;  %v1399_v17 = vpop.f32.mrb[23].mxu0  ;;  %v1625_v18 = vpop.f32.mrb[23].mxu1 }
 0x24b   : > { %v1693_v20 = vmul.f32 0.044194173, %v1399_v17  ;;  %v1695_v21 = vmul.f32 0.044194173, %v1625_v18 }
 0x24c   : > { %v1732_v22 = vpack.c.bf16 %v1692_v15, %v1688_v8  ;;  %v1734_v23 = vpack.c.bf16 %v1694_v16, %v1690_v11 }
 0x24d   : > { %v1733_v24 = vpack.c.bf16 %v1693_v20, %v1689_v12  ;;  %v1735_v25 = vpack.c.bf16 %v1695_v21, %v1691_v19 }
 0x24e   : > { %1764 = vst [vmem:[#allocation2 + $0xa0] sm:$0xff] %v1732_v22  ;;  %1766 = vst [vmem:[#allocation2 + $0xb0] sm:$0xff] %v1734_v23 }
 0x24f   : > { %1765 = vst [vmem:[#allocation2 + $0xa8] sm:$0xff] %v1733_v24  ;;  %1767 = vst [vmem:[#allocation2 + $0xb8] sm:$0xff] %v1735_v25  ;;  %v1403_v26 = vpop.f32.mrb[24].mxu0  ;;  %v1629_v27 = vpop.f32.mrb[24].mxu1 }
 0x250   : > { %v1696_v28 = vmul.f32 0.044194173, %v1403_v26  ;;  %v1405_v29 = vpop.f32.mrb[25].mxu0  ;;  %v1631_v30 = vpop.f32.mrb[25].mxu1  ;;  %v1698_v31 = vmul.f32 0.044194173, %v1629_v27 }
 0x251   : > { %v1697_v32 = vmul.f32 0.044194173, %v1405_v29  ;;  %v1407_v33 = vpop.f32.mrb[26].mxu0  ;;  %v1633_v34 = vpop.f32.mrb[26].mxu1  ;;  %v1699_v39 = vmul.f32 0.044194173, %v1631_v30 }
 0x252   : > { %v1700_v35 = vmul.f32 0.044194173, %v1407_v33  ;;  %v1702_v36 = vmul.f32 0.044194173, %v1633_v34  ;;  %v1409_v37 = vpop.f32.mrb[27].mxu0  ;;  %v1635_v38 = vpop.f32.mrb[27].mxu1 }
 0x253   : > { %v1701_v40 = vmul.f32 0.044194173, %v1409_v37  ;;  %v1703_v41 = vmul.f32 0.044194173, %v1635_v38 }
 0x254   : > { %v1736_v42 = vpack.c.bf16 %v1700_v35, %v1696_v28  ;;  %v1738_v43 = vpack.c.bf16 %v1702_v36, %v1698_v31 }
 0x255   : > { %v1737_v44 = vpack.c.bf16 %v1701_v40, %v1697_v32  ;;  %v1739_v45 = vpack.c.bf16 %v1703_v41, %v1699_v39 }
 0x256   : > { %1768 = vst [vmem:[#allocation2 + $0xc0] sm:$0xff] %v1736_v42  ;;  %1770 = vst [vmem:[#allocation2 + $0xd0] sm:$0xff] %v1738_v43 }
 0x257   : > { %1769 = vst [vmem:[#allocation2 + $0xc8] sm:$0xff] %v1737_v44  ;;  %1771 = vst [vmem:[#allocation2 + $0xd8] sm:$0xff] %v1739_v45  ;;  %v1413_v46 = vpop.f32.mrb[28].mxu0  ;;  %v1639_v47 = vpop.f32.mrb[28].mxu1 }
 0x258   : > { %v1704_v48 = vmul.f32 0.044194173, %v1413_v46  ;;  %v1415_v49 = vpop.f32.mrb[29].mxu0  ;;  %v1641_v50 = vpop.f32.mrb[29].mxu1  ;;  %v1706_v51 = vmul.f32 0.044194173, %v1639_v47 }
 0x259   : > { %v1705_v52 = vmul.f32 0.044194173, %v1415_v49  ;;  %v1417_v53 = vpop.f32.mrb[30].mxu0  ;;  %v1643_v54 = vpop.f32.mrb[30].mxu1  ;;  %v1707_v59 = vmul.f32 0.044194173, %v1641_v50 }
 0x25a   : > { %v1708_v55 = vmul.f32 0.044194173, %v1417_v53  ;;  %v1710_v56 = vmul.f32 0.044194173, %v1643_v54  ;;  %v1419_v57 = vpop.f32.mrb[31].mxu0  ;;  %v1645_v58 = vpop.f32.mrb[31].mxu1 }
 0x25b   : > { %v1709_v60 = vmul.f32 0.044194173, %v1419_v57  ;;  %v1711_v61 = vmul.f32 0.044194173, %v1645_v58 }
 0x25c   : > { %v1740_v62 = vpack.c.bf16 %v1708_v55, %v1704_v48  ;;  %v1742_v63 = vpack.c.bf16 %v1710_v56, %v1706_v51 }
 0x25d   : > { %v1741_v0 = vpack.c.bf16 %v1709_v60, %v1705_v52  ;;  %v1743_v1 = vpack.c.bf16 %v1711_v61, %v1707_v59 }
 0x25e   : > { %1772 = vst [vmem:[#allocation2 + $0xe0] sm:$0xff] %v1740_v62  ;;  %1774 = vst [vmem:[#allocation2 + $0xf0] sm:$0xff] %v1742_v63 }
 0x25f   : > { %1773 = vst [vmem:[#allocation2 + $0xe8] sm:$0xff] %v1741_v0  ;;  %1775 = vst [vmem:[#allocation2 + $0xf8] sm:$0xff] %v1743_v1 }
 0x260 PF: > { %s15803_s28 = sld [smem:[#allocation23_spill]]  ;;  %s15804_s4 = sld [smem:[#allocation24_spill]] }
 0x266   : > { %s9824_s9 = sshll.u32 %s15803_s28, 7  ;;  %p9825_p5 = scmp.ne.s32.totalorder %s15804_s4, 0 }
 0x267   : > { %v11219_v2 = vld [vmem:[#allocation13 + $0x14] ss:$48 sps:$4 sm:$0xff] (!%p9825_p5)   ;;  %v11221_v3 = vld [vmem:[#allocation13 + $0x1c] ss:$48 sps:$4 sm:$0xff] (!%p9825_p5)   ;;  %v11223_v4 = vld [vmem:[#allocation13 + $0x10] ss:$48 sps:$4 sm:$0xff] (!%p9825_p5)  }
 0x268   : > { %1973 = sbr.rel (%p9825_p5) target bundleno = 1146 (0x47a), region = 60  ;;  %2838 = vmatprep.subr.bf16.mxu0 (!%p9825_p5), %v11219_v2  ;;  %v11224_v5 = vld [vmem:[#allocation13 + $0x18] ss:$48 sps:$4 sm:$0xff] (!%p9825_p5)   ;;  %3064 = vmatprep.subr.bf16.mxu1 (!%p9825_p5), %v11221_v3  ;;  %v11225_v6 = vld [vmem:[#allocation13 + $0x74] ss:$48 sps:$4 sm:$0xff] (!%p9825_p5)   ;;  %s13475_s21 = sshra.s32 (!%p9825_p5), %s9824_s9, 4 }
 0x269   : > { %2839 = vmatpush1.bf16.msra.mxu0 (!%p9825_p5), %v11223_v4  ;;  %3065 = vmatpush1.bf16.msra.mxu1 (!%p9825_p5), %v11224_v5  ;;  %v11227_v7 = vld [vmem:[#allocation13 + $0x7c] ss:$48 sps:$4 sm:$0xff] (!%p9825_p5)   ;;  %v11229_v8 = vld [vmem:[#allocation13 + $0x70] ss:$48 sps:$4 sm:$0xff] (!%p9825_p5)   ;;  %v11230_v9 = vld [vmem:[#allocation13 + $0x78] ss:$48 sps:$4 sm:$0xff] (!%p9825_p5)  }
 0x26a   : > { %2840 = vmatprep.subr.bf16.mxu0 (!%p9825_p5), %v11225_v6  ;;  %3066 = vmatprep.subr.bf16.mxu1 (!%p9825_p5), %v11227_v7  ;;  %v11231_v10 = vld [vmem:[#allocation13 + $0xd4] ss:$48 sps:$4 sm:$0xff] (!%p9825_p5)   ;;  %v11233_v11 = vld [vmem:[#allocation13 + $0xdc] ss:$48 sps:$4 sm:$0xff] (!%p9825_p5)   ;;  %v11235_v12 = vld [vmem:[#allocation13 + $0xd0] ss:$48 sps:$4 sm:$0xff] (!%p9825_p5)  }
 0x26b   : > { %v11236_v13 = vld [vmem:[#allocation13 + $0xd8] ss:$48 sps:$4 sm:$0xff] (!%p9825_p5)   ;;  %v11237_v14 = vld [vmem:[#allocation13 + $0x134] ss:$48 sps:$4 sm:$0xff] (!%p9825_p5)   ;;  %v11239_v15 = vld [vmem:[#allocation13 + $0x13c] ss:$48 sps:$4 sm:$0xff] (!%p9825_p5)  }
 0x26c   : > { %v11241_v16 = vld [vmem:[#allocation13 + $0x130] ss:$48 sps:$4 sm:$0xff] (!%p9825_p5)   ;;  %v11242_v17 = vld [vmem:[#allocation13 + $0x138] ss:$48 sps:$4 sm:$0xff] (!%p9825_p5)   ;;  %v11243_v18 = vld [vmem:[#allocation13 + $0x194] ss:$48 sps:$4 sm:$0xff] (!%p9825_p5)  }
 0x26d   : > { %2841 = vmatpush1.bf16.msra.mxu0 (!%p9825_p5), %v11229_v8  ;;  %3067 = vmatpush1.bf16.msra.mxu1 (!%p9825_p5), %v11230_v9  ;;  %v11245_v19 = vld [vmem:[#allocation13 + $0x19c] ss:$48 sps:$4 sm:$0xff] (!%p9825_p5)   ;;  %v11247_v20 = vld [vmem:[#allocation13 + $0x190] ss:$48 sps:$4 sm:$0xff] (!%p9825_p5)   ;;  %v11248_v21 = vld [vmem:[#allocation13 + $0x198] ss:$48 sps:$4 sm:$0xff] (!%p9825_p5)  }
 0x26e   : > { %2842 = vmatprep.subr.bf16.mxu0 (!%p9825_p5), %v11231_v10  ;;  %3068 = vmatprep.subr.bf16.mxu1 (!%p9825_p5), %v11233_v11  ;;  %v11249_v22 = vld [vmem:[#allocation13 + $0x1f4] ss:$48 sps:$4 sm:$0xff] (!%p9825_p5)   ;;  %v11251_v23 = vld [vmem:[#allocation13 + $0x1fc] ss:$48 sps:$4 sm:$0xff] (!%p9825_p5)   ;;  %v11253_v24 = vld [vmem:[#allocation13 + $0x1f0] ss:$48 sps:$4 sm:$0xff] (!%p9825_p5)  }
 0x26f   : > { %v11254_v25 = vld [vmem:[#allocation13 + $0x1f8] ss:$48 sps:$4 sm:$0xff]   ;;  %v11255_v26 = vld [vmem:[#allocation13 + $0x254] ss:$48 sps:$4 sm:$0xff]   ;;  %v11257_v27 = vld [vmem:[#allocation13 + $0x25c] ss:$48 sps:$4 sm:$0xff]  }
 0x270   : > { %v11259_v28 = vld [vmem:[#allocation13 + $0x250] ss:$48 sps:$4 sm:$0xff]   ;;  %v11260_v29 = vld [vmem:[#allocation13 + $0x258] ss:$48 sps:$4 sm:$0xff]   ;;  %v11261_v30 = vld [vmem:[#allocation13 + $0x2b4] ss:$48 sps:$4 sm:$0xff]  }
 0x271   : > { %2843 = vmatpush1.bf16.msra.mxu0 %v11235_v12  ;;  %3069 = vmatpush1.bf16.msra.mxu1 %v11236_v13  ;;  %v11263_v31 = vld [vmem:[#allocation13 + $0x2bc] ss:$48 sps:$4 sm:$0xff]   ;;  %v11265_v32 = vld [vmem:[#allocation13 + $0x2b0] ss:$48 sps:$4 sm:$0xff]   ;;  %v11266_v33 = vld [vmem:[#allocation13 + $0x2b8] ss:$48 sps:$4 sm:$0xff]  }
 0x272   : > { %2844 = vmatprep.subr.bf16.mxu0 %v11237_v14  ;;  %3070 = vmatprep.subr.bf16.mxu1 %v11239_v15  ;;  %v11267_v34 = vld [vmem:[#allocation13 + $0x314] ss:$48 sps:$4 sm:$0xff]   ;;  %v11269_v35 = vld [vmem:[#allocation13 + $0x31c] ss:$48 sps:$4 sm:$0xff]   ;;  %v11271_v36 = vld [vmem:[#allocation13 + $0x310] ss:$48 sps:$4 sm:$0xff]  }
 0x273   : > { %v11272_v37 = vld [vmem:[#allocation13 + $0x318] ss:$48 sps:$4 sm:$0xff]   ;;  %v11273_v38 = vld [vmem:[#allocation13 + $0x374] ss:$48 sps:$4 sm:$0xff]   ;;  %v11275_v39 = vld [vmem:[#allocation13 + $0x37c] ss:$48 sps:$4 sm:$0xff]  }
 0x274   : > { %v11277_v40 = vld [vmem:[#allocation13 + $0x370] ss:$48 sps:$4 sm:$0xff]   ;;  %v11278_v41 = vld [vmem:[#allocation13 + $0x378] ss:$48 sps:$4 sm:$0xff]   ;;  %v11279_v42 = vld [vmem:[#allocation13 + $0x3d4] ss:$48 sps:$4 sm:$0xff]  }
 0x275   : > { %2845 = vmatpush1.bf16.msra.mxu0 %v11241_v16  ;;  %3071 = vmatpush1.bf16.msra.mxu1 %v11242_v17  ;;  %v11281_v43 = vld [vmem:[#allocation13 + $0x3dc] ss:$48 sps:$4 sm:$0xff]   ;;  %v11283_v44 = vld [vmem:[#allocation13 + $0x3d0] ss:$48 sps:$4 sm:$0xff]   ;;  %v11284_v45 = vld [vmem:[#allocation13 + $0x3d8] ss:$48 sps:$4 sm:$0xff]  }
 0x276   : > { %2846 = vmatprep.subr.bf16.mxu0 %v11243_v18  ;;  %3072 = vmatprep.subr.bf16.mxu1 %v11245_v19  ;;  %v11285_v46 = vld [vmem:[#allocation13 + $0x434] ss:$48 sps:$4 sm:$0xff]   ;;  %v11287_v47 = vld [vmem:[#allocation13 + $0x43c] ss:$48 sps:$4 sm:$0xff]   ;;  %v11289_v49 = vld [vmem:[#allocation13 + $0x430] ss:$48 sps:$4 sm:$0xff]  }
 0x277   : > { %v1975_v48 = vld [vmem:[%s12814_s15 + $0x8] sm:$0xff]  ;;  %v11291_v52 = vld [vmem:[#allocation13 + $0x494] ss:$48 sps:$4 sm:$0xff]   ;;  %v11295_v55 = vld [vmem:[#allocation13 + $0x490] ss:$48 sps:$4 sm:$0xff]   ;;  %s10226_s24 = sshll.u32 %s13475_s21, 5 }
 0x278   : > { %v11290_v50 = vld [vmem:[#allocation13 + $0x438] ss:$48 sps:$4 sm:$0xff]   ;;  %v11293_v54 = vld [vmem:[#allocation13 + $0x49c] ss:$48 sps:$4 sm:$0xff]   ;;  %v11297_v57 = vld [vmem:[#allocation13 + $0x4f4] ss:$48 sps:$4 sm:$0xff]  }
 0x279   : > { %2847 = vmatpush1.bf16.msra.mxu0 %v11247_v20  ;;  %3073 = vmatpush1.bf16.msra.mxu1 %v11248_v21  ;;  %v1979_v51 = vld [vmem:[%s12814_s15 + $0x28] sm:$0xff]  ;;  %v11301_v59 = vld [vmem:[#allocation13 + $0x4f0] ss:$48 sps:$4 sm:$0xff]   ;;  %v11303_v61 = vld [vmem:[#allocation13 + $0x554] ss:$48 sps:$4 sm:$0xff]   ;;  %s13480_s13 = scalar_lea.vmem [#allocation6], %s10226_s24 }
 0x27a   : > { %2848 = vmatprep.subr.bf16.mxu0 %v11249_v22  ;;  %3074 = vmatprep.subr.bf16.mxu1 %v11251_v23  ;;  %v13219_v53 = vpack.c.bf16 %v1979_v51, %v1975_v48  ;;  %v11296_v56 = vld [vmem:[#allocation13 + $0x498] ss:$48 sps:$4 sm:$0xff]   ;;  %v11299_v58 = vld [vmem:[#allocation13 + $0x4fc] ss:$48 sps:$4 sm:$0xff]   ;;  %v11307_v63 = vld [vmem:[#allocation13 + $0x550] ss:$48 sps:$4 sm:$0xff]  }
 0x27b   : > { %v11302_v60 = vld [vmem:[#allocation13 + $0x4f8] ss:$48 sps:$4 sm:$0xff]   ;;  %v11305_v62 = vld [vmem:[#allocation13 + $0x55c] ss:$48 sps:$4 sm:$0xff]   ;;  %v11309_v1 = vld [vmem:[#allocation13 + $0x5b4] ss:$48 sps:$4 sm:$0xff]  }
 0x27c   : > { %2870 = vmatprep.mubr.bf16.mxu0 %v13219_v53  ;;  %3096 = vmatprep.mubr.bf16.mxu1 %v13219_v53  ;;  %v11308_v0 = vld [vmem:[#allocation13 + $0x558] ss:$48 sps:$4 sm:$0xff]   ;;  %v11311_v2 = vld [vmem:[#allocation13 + $0x5bc] ss:$48 sps:$4 sm:$0xff]   ;;  %v11313_v3 = vld [vmem:[#allocation13 + $0x5b0] ss:$48 sps:$4 sm:$0xff]  }
 0x27d   : > { %2849 = vmatpush1.bf16.msra.mxu0 %v11253_v24  ;;  %3075 = vmatpush1.bf16.msra.mxu1 %v11254_v25  ;;  %v11314_v4 = vld [vmem:[#allocation13 + $0x5b8] ss:$48 sps:$4 sm:$0xff]   ;;  %v1974_v5 = vld [vmem:[%s12814_s15] sm:$0xff]  ;;  %v11320_v8 = vld [vmem:[#allocation13 + $0x61c] ss:$48 sps:$4 sm:$0xff]   ;;  %s13516_s12 = scalar_lea.vmem [#allocation7], %s10226_s24 }
 0x27e   : > { %2850 = vmatprep.subr.bf16.mxu0 %v11255_v26  ;;  %3076 = vmatprep.subr.bf16.mxu1 %v11257_v27  ;;  %v1978_v6 = vld [vmem:[%s12814_s15 + $0x20] sm:$0xff]  ;;  %v11318_v11 = vld [vmem:[#allocation13 + $0x618] ss:$48 sps:$4 sm:$0xff]   ;;  %v11326_v15 = vld [vmem:[#allocation13 + $0x67c] ss:$48 sps:$4 sm:$0xff]  }
 0x27f   : > { %v11317_v7 = vld [vmem:[#allocation13 + $0x614] ss:$48 sps:$4 sm:$0xff]   ;;  %v11315_v9 = vld [vmem:[#allocation13 + $0x610] ss:$48 sps:$4 sm:$0xff]   ;;  %v13225_v10 = vpack.c.bf16 %v1978_v6, %v1974_v5  ;;  %v1983_v12 = vld [vmem:[%s12814_s15 + $0x48] sm:$0xff] }
 0x280   : > { %v1987_v13 = vld [vmem:[%s12814_s15 + $0x68] sm:$0xff]  ;;  %v11323_v14 = vld [vmem:[#allocation13 + $0x674] ss:$48 sps:$4 sm:$0xff]   ;;  %v11321_v16 = vld [vmem:[#allocation13 + $0x670] ss:$48 sps:$4 sm:$0xff]  }
 0x281   : > { %2851 = vmatpush1.bf16.msra.mxu0 %v11259_v28  ;;  %3077 = vmatpush1.bf16.msra.mxu1 %v11260_v29  ;;  %v13229_v17 = vpack.c.bf16 %v1987_v13, %v1983_v12  ;;  %v11324_v18 = vld [vmem:[#allocation13 + $0x678] ss:$48 sps:$4 sm:$0xff]   ;;  %v1982_v19 = vld [vmem:[%s12814_s15 + $0x40] sm:$0xff]  ;;  %v11332_v22 = vld [vmem:[#allocation13 + $0x6dc] ss:$48 sps:$4 sm:$0xff]  }
 0x282   : > { %2852 = vmatprep.subr.bf16.mxu0 %v11261_v30  ;;  %3078 = vmatprep.subr.bf16.mxu1 %v11263_v31  ;;  %v1986_v20 = vld [vmem:[%s12814_s15 + $0x60] sm:$0xff]  ;;  %v11330_v24 = vld [vmem:[#allocation13 + $0x6d8] ss:$48 sps:$4 sm:$0xff]   ;;  %v11338_v29 = vld [vmem:[#allocation13 + $0x73c] ss:$48 sps:$4 sm:$0xff]  }
 0x283   : > { %v11329_v21 = vld [vmem:[#allocation13 + $0x6d4] ss:$48 sps:$4 sm:$0xff]   ;;  %v11327_v23 = vld [vmem:[#allocation13 + $0x6d0] ss:$48 sps:$4 sm:$0xff]   ;;  %v13237_v25 = vpack.c.bf16 %v1986_v20, %v1982_v19  ;;  %v1991_v26 = vld [vmem:[%s12814_s15 + $0x88] sm:$0xff] }
 0x284   : > { %v1995_v27 = vld [vmem:[%s12814_s15 + $0xa8] sm:$0xff]  ;;  %v11335_v28 = vld [vmem:[#allocation13 + $0x734] ss:$48 sps:$4 sm:$0xff]   ;;  %v11333_v31 = vld [vmem:[#allocation13 + $0x730] ss:$48 sps:$4 sm:$0xff]  }
 0x285   : > { %2853 = vmatpush1.bf16.msra.mxu0 %v11265_v32  ;;  %3079 = vmatpush1.bf16.msra.mxu1 %v11266_v33  ;;  %v13241_v30 = vpack.c.bf16 %v1995_v27, %v1991_v26  ;;  %v11336_v32 = vld [vmem:[#allocation13 + $0x738] ss:$48 sps:$4 sm:$0xff]   ;;  %v1990_v33 = vld [vmem:[%s12814_s15 + $0x80] sm:$0xff] }
 0x286   : > { %2854 = vmatprep.subr.bf16.mxu0 %v11267_v34  ;;  %3080 = vmatprep.subr.bf16.mxu1 %v11269_v35  ;;  %v1994_v34 = vld [vmem:[%s12814_s15 + $0xa0] sm:$0xff]  ;;  %v11366_v6 = vld [vmem:[#allocation13 + $0x918] ss:$48 sps:$4 sm:$0xff]  }
 0x287   : > { %v11341_v35 = vld [vmem:[#allocation13 + $0x794] ss:$48 sps:$4 sm:$0xff]   ;;  %v11351_v51 = vld [vmem:[#allocation13 + $0x850] ss:$48 sps:$4 sm:$0xff]   ;;  %v11378_v20 = vld [vmem:[#allocation13 + $0x9d8] ss:$48 sps:$4 sm:$0xff]  }
 0x288   : > { %v2002_v48 = vld [vmem:[%s12814_s15 + $0xe0] sm:$0xff] }
 0x289   : > { %2855 = vmatpush1.bf16.msra.mxu0 %v11271_v36  ;;  %3081 = vmatpush1.bf16.msra.mxu1 %v11272_v37  ;;  %v11344_v36 = vld [vmem:[#allocation13 + $0x79c] ss:$48 sps:$4 sm:$0xff]   ;;  %v11339_v37 = vld [vmem:[#allocation13 + $0x790] ss:$48 sps:$4 sm:$0xff]  }
 0x28a   : > { %2856 = vmatprep.subr.bf16.mxu0 %v11273_v38  ;;  %3082 = vmatprep.subr.bf16.mxu1 %v11275_v39  ;;  %v11342_v38 = vld [vmem:[#allocation13 + $0x798] ss:$48 sps:$4 sm:$0xff]   ;;  %v13249_v39 = vpack.c.bf16 %v1994_v34, %v1990_v33  ;;  %v11363_v5 = vld [vmem:[#allocation13 + $0x910] ss:$48 sps:$4 sm:$0xff]   ;;  %v11392_v33 = vld [vmem:[#allocation13 + $0xa9c] ss:$48 sps:$4 sm:$0xff]  }
 0x28b   : > { %v2014_v13 = vld [vmem:[%s12814_s15 + $0x140] sm:$0xff] }
 0x28c   : > { %v11381_v26 = vld [vmem:[#allocation13 + $0xa30] ss:$48 sps:$4 sm:$0xff]  }
 0x28d   : > { %2857 = vmatpush1.bf16.msra.mxu0 %v11277_v40  ;;  %3083 = vmatpush1.bf16.msra.mxu1 %v11278_v41  ;;  %v1999_v40 = vld [vmem:[%s12814_s15 + $0xc8] sm:$0xff]  ;;  %v11387_v34 = vld [vmem:[#allocation13 + $0xa90] ss:$48 sps:$4 sm:$0xff]  }
 0x28e   : > { %2858 = vmatprep.subr.bf16.mxu0 %v11279_v42  ;;  %3084 = vmatprep.subr.bf16.mxu1 %v11281_v43  ;;  %v2003_v41 = vld [vmem:[%s12814_s15 + $0xe8] sm:$0xff]  ;;  %v11347_v42 = vld [vmem:[#allocation13 + $0x7f4] ss:$48 sps:$4 sm:$0xff]  }
 0x28f   : > { %v11350_v43 = vld [vmem:[#allocation13 + $0x7fc] ss:$48 sps:$4 sm:$0xff]  }
 0x291   : > { %2859 = vmatpush1.bf16.msra.mxu0 %v11283_v44  ;;  %3085 = vmatpush1.bf16.msra.mxu1 %v11284_v45  ;;  %v11345_v44 = vld [vmem:[#allocation13 + $0x7f0] ss:$48 sps:$4 sm:$0xff]   ;;  %v13253_v45 = vpack.c.bf16 %v2003_v41, %v1999_v40  ;;  %v11395_v40 = vld [vmem:[#allocation13 + $0xaf4] ss:$48 sps:$4 sm:$0xff]   ;;  %v11398_v41 = vld [vmem:[#allocation13 + $0xafc] ss:$48 sps:$4 sm:$0xff]  }
 0x292   : > { %2860 = vmatprep.subr.bf16.mxu0 %v11285_v46  ;;  %3086 = vmatprep.subr.bf16.mxu1 %v11287_v47  ;;  %v11348_v46 = vld [vmem:[#allocation13 + $0x7f8] ss:$48 sps:$4 sm:$0xff]   ;;  %v1998_v47 = vld [vmem:[%s12814_s15 + $0xc0] sm:$0xff] }
 0x295   : > { %2861 = vmatpush1.bf16.msra.mxu0 %v11289_v49  ;;  %3087 = vmatpush1.bf16.msra.mxu1 %v11290_v50  ;;  %v11353_v49 = vld [vmem:[#allocation13 + $0x854] ss:$48 sps:$4 sm:$0xff]   ;;  %v11356_v50 = vld [vmem:[#allocation13 + $0x85c] ss:$48 sps:$4 sm:$0xff]  }
 0x296   : > { %2862 = vmatprep.subr.bf16.mxu0 %v11291_v52  ;;  %3088 = vmatprep.subr.bf16.mxu1 %v11293_v54  ;;  %v13261_v52 = vpack.c.bf16 %v2002_v48, %v1998_v47  ;;  %v2007_v54 = vld [vmem:[%s12814_s15 + $0x108] sm:$0xff]  ;;  %v2034_v47 = vld [vmem:[%s12814_s15 + $0x1e0] sm:$0xff] }
 0x297   : > { %v11401_v48 = vld [vmem:[#allocation13 + $0xb54] ss:$48 sps:$4 sm:$0xff]  }
 0x299   : > { %2863 = vmatpush1.bf16.msra.mxu0 %v11295_v55  ;;  %3089 = vmatpush1.bf16.msra.mxu1 %v11296_v56  ;;  %v2011_v55 = vld [vmem:[%s12814_s15 + $0x128] sm:$0xff] }
 0x29a   : > { %2864 = vmatprep.subr.bf16.mxu0 %v11297_v57  ;;  %3090 = vmatprep.subr.bf16.mxu1 %v11299_v58  ;;  %v11354_v56 = vld [vmem:[#allocation13 + $0x858] ss:$48 sps:$4 sm:$0xff]   ;;  %v11359_v57 = vld [vmem:[#allocation13 + $0x8b4] ss:$48 sps:$4 sm:$0xff]   ;;  %v11362_v58 = vld [vmem:[#allocation13 + $0x8bc] ss:$48 sps:$4 sm:$0xff]  }
 0x29d   : > { %2865 = vmatpush1.bf16.msra.mxu0 %v11301_v59  ;;  %3091 = vmatpush1.bf16.msra.mxu1 %v11302_v60  ;;  %v11357_v59 = vld [vmem:[#allocation13 + $0x8b0] ss:$48 sps:$4 sm:$0xff]   ;;  %v11360_v60 = vld [vmem:[#allocation13 + $0x8b8] ss:$48 sps:$4 sm:$0xff]  }
 0x29e   : > { %2866 = vmatprep.subr.bf16.mxu0 %v11303_v61  ;;  %3092 = vmatprep.subr.bf16.mxu1 %v11305_v62  ;;  %v13265_v61 = vpack.c.bf16 %v2011_v55, %v2007_v54  ;;  %v2006_v62 = vld [vmem:[%s12814_s15 + $0x100] sm:$0xff]  ;;  %v1977_v55 = vld [vmem:[%s12814_s15 + $0x18] sm:$0xff] }
 0x2a1   : > { %2867 = vmatpush1.bf16.msra.mxu0 %v11307_v63  ;;  %3093 = vmatpush1.bf16.msra.mxu1 %v11308_v0  ;;  %v2010_v63 = vld [vmem:[%s12814_s15 + $0x120] sm:$0xff] }
 0x2a2   : > { %2868 = vmatprep.subr.bf16.mxu0 %v11309_v1  ;;  %3094 = vmatprep.subr.bf16.mxu1 %v11311_v2  ;;  %v11365_v0 = vld [vmem:[#allocation13 + $0x914] ss:$48 sps:$4 sm:$0xff]   ;;  %v11368_v1 = vld [vmem:[#allocation13 + $0x91c] ss:$48 sps:$4 sm:$0xff]   ;;  %v13273_v2 = vpack.c.bf16 %v2010_v63, %v2006_v62  ;;  %v11408_v62 = vld [vmem:[#allocation13 + $0xbb8] ss:$48 sps:$4 sm:$0xff]  }
 0x2a3   : > { %v1976_v63 = vld [vmem:[%s12814_s15 + $0x10] sm:$0xff] }
 0x2a5   : > { %2869 = vmatpush1.bf16.msra.mxu0 %v11313_v3  ;;  %3095 = vmatpush1.bf16.msra.mxu1 %v11314_v4  ;;  %v2015_v3 = vld [vmem:[%s12814_s15 + $0x148] sm:$0xff] }
 0x2a6   : > { %2951 = vmatprep.subr.bf16.mxu0 %v11317_v7  ;;  %3177 = vmatprep.subr.bf16.mxu1 %v11320_v8  ;;  %v2019_v4 = vld [vmem:[%s12814_s15 + $0x168] sm:$0xff]  ;;  %v11371_v7 = vld [vmem:[#allocation13 + $0x974] ss:$48 sps:$4 sm:$0xff]  }
 0x2a7   : > { %v11374_v8 = vld [vmem:[#allocation13 + $0x97c] ss:$48 sps:$4 sm:$0xff]   ;;  %v13277_v12 = vpack.c.bf16 %v2019_v4, %v2015_v3  ;;  %v11411_v4 = vld [vmem:[#allocation13 + $0x20] ss:$48 sps:$4 sm:$0xff]  }
 0x2a8   : > { %2871 = vmatmul.mubr.bf16.vlgmr.msra.gmra.mrb[0].mxu0 %v13225_v10  ;;  %3097 = vmatmul.mubr.bf16.vlgmr.msra.gmra.mrb[0].mxu1 %v13225_v10  ;;  %v11416_v3 = vld [vmem:[#allocation13 + $0x2c] ss:$48 sps:$4 sm:$0xff]  }
 0x2a9   : > { %2952 = vmatpush1.bf16.msra.mxu0 %v11315_v9  ;;  %3178 = vmatpush1.bf16.msra.mxu1 %v11318_v11  ;;  %v11369_v9 = vld [vmem:[#allocation13 + $0x970] ss:$48 sps:$4 sm:$0xff]   ;;  %v11372_v11 = vld [vmem:[#allocation13 + $0x978] ss:$48 sps:$4 sm:$0xff]  }
 0x2aa   : > { %2953 = vmatprep.subr.bf16.mxu0 %v11323_v14  ;;  %3179 = vmatprep.subr.bf16.mxu1 %v11326_v15  ;;  %v2018_v14 = vld [vmem:[%s12814_s15 + $0x160] sm:$0xff] }
 0x2ab   : > { %2880 = vmatprep.mubr.bf16.mxu0 %v13229_v17  ;;  %3106 = vmatprep.mubr.bf16.mxu1 %v13229_v17  ;;  %v11377_v15 = vld [vmem:[#allocation13 + $0x9d4] ss:$48 sps:$4 sm:$0xff]   ;;  %v13285_v19 = vpack.c.bf16 %v2018_v14, %v2014_v13  ;;  %v11417_v13 = vld [vmem:[#allocation13 + $0x80] ss:$48 sps:$4 sm:$0xff]   ;;  %v11420_v14 = vld [vmem:[#allocation13 + $0x88] ss:$48 sps:$4 sm:$0xff]  }
 0x2ad   : > { %2954 = vmatpush1.bf16.msra.mxu0 %v11321_v16  ;;  %3180 = vmatpush1.bf16.msra.mxu1 %v11324_v18  ;;  %v11380_v16 = vld [vmem:[#allocation13 + $0x9dc] ss:$48 sps:$4 sm:$0xff]   ;;  %v11375_v18 = vld [vmem:[#allocation13 + $0x9d0] ss:$48 sps:$4 sm:$0xff]  }
 0x2ae   : > { %2955 = vmatprep.subr.bf16.mxu0 %v11329_v21  ;;  %3181 = vmatprep.subr.bf16.mxu1 %v11332_v22  ;;  %v2023_v21 = vld [vmem:[%s12814_s15 + $0x188] sm:$0xff] }
 0x2af   : > { %v2027_v22 = vld [vmem:[%s12814_s15 + $0x1a8] sm:$0xff] }
 0x2b0   : > { %2881 = vmatmul.mubr.bf16.gmra.mrb[4].mxu0 %v13237_v25  ;;  %3107 = vmatmul.mubr.bf16.gmra.mrb[4].mxu1 %v13237_v25  ;;  %v13289_v27 = vpack.c.bf16 %v2027_v22, %v2023_v21  ;;  %v11428_v21 = vld [vmem:[#allocation13 + $0xec] ss:$48 sps:$4 sm:$0xff]  }
 0x2b1   : > { %2956 = vmatpush1.bf16.msra.mxu0 %v11327_v23  ;;  %3182 = vmatpush1.bf16.msra.mxu1 %v11330_v24  ;;  %v11383_v23 = vld [vmem:[#allocation13 + $0xa34] ss:$48 sps:$4 sm:$0xff]   ;;  %v11386_v24 = vld [vmem:[#allocation13 + $0xa3c] ss:$48 sps:$4 sm:$0xff]  }
 0x2b2   : > { %2957 = vmatprep.subr.bf16.mxu0 %v11335_v28  ;;  %3183 = vmatprep.subr.bf16.mxu1 %v11338_v29  ;;  %v11384_v28 = vld [vmem:[#allocation13 + $0xa38] ss:$48 sps:$4 sm:$0xff]   ;;  %v2022_v29 = vld [vmem:[%s12814_s15 + $0x180] sm:$0xff] }
 0x2b3   : > { %2890 = vmatprep.mubr.bf16.mxu0 %v13241_v30  ;;  %3116 = vmatprep.mubr.bf16.mxu1 %v13241_v30 }
 0x2b5   : > { %2958 = vmatpush1.bf16.msra.mxu0 %v11333_v31  ;;  %3184 = vmatpush1.bf16.msra.mxu1 %v11336_v32  ;;  %v2026_v31 = vld [vmem:[%s12814_s15 + $0x1a0] sm:$0xff] }
 0x2b6   : > { %2959 = vmatprep.subr.bf16.mxu0 %v11341_v35  ;;  %3185 = vmatprep.subr.bf16.mxu1 %v11344_v36  ;;  %v11389_v32 = vld [vmem:[#allocation13 + $0xa94] ss:$48 sps:$4 sm:$0xff]   ;;  %v11390_v35 = vld [vmem:[#allocation13 + $0xa98] ss:$48 sps:$4 sm:$0xff]   ;;  %v13297_v36 = vpack.c.bf16 %v2026_v31, %v2022_v29  ;;  %v11434_v31 = vld [vmem:[#allocation13 + $0x14c] ss:$48 sps:$4 sm:$0xff]  }
 0x2b7   : > { %v11431_v29 = vld [vmem:[#allocation13 + $0x144] ss:$48 sps:$4 sm:$0xff]  }
 0x2b8   : > { %2891 = vmatmul.mubr.bf16.gmra.mrb[8].mxu0 %v13249_v39  ;;  %3117 = vmatmul.mubr.bf16.gmra.mrb[8].mxu1 %v13249_v39 }
 0x2b9   : > { %2960 = vmatpush1.bf16.msra.mxu0 %v11339_v37  ;;  %3186 = vmatpush1.bf16.msra.mxu1 %v11342_v38  ;;  %v2031_v37 = vld [vmem:[%s12814_s15 + $0x1c8] sm:$0xff] }
 0x2ba   : > { %2961 = vmatprep.subr.bf16.mxu0 %v11347_v42  ;;  %3187 = vmatprep.subr.bf16.mxu1 %v11350_v43  ;;  %v2035_v38 = vld [vmem:[%s12814_s15 + $0x1e8] sm:$0xff]  ;;  %v11393_v43 = vld [vmem:[#allocation13 + $0xaf0] ss:$48 sps:$4 sm:$0xff]  }
 0x2bb   : > { %2900 = vmatprep.mubr.bf16.mxu0 %v13253_v45  ;;  %3126 = vmatprep.mubr.bf16.mxu1 %v13253_v45  ;;  %v13301_v42 = vpack.c.bf16 %v2035_v38, %v2031_v37  ;;  %v1996_v37 = vld [vmem:[%s12814_s15 + $0xb0] sm:$0xff] }
 0x2bc   : > { %v11437_v38 = vld [vmem:[#allocation13 + $0x1a4] ss:$48 sps:$4 sm:$0xff]  }
 0x2bd   : > { %2962 = vmatpush1.bf16.msra.mxu0 %v11345_v44  ;;  %3188 = vmatpush1.bf16.msra.mxu1 %v11348_v46  ;;  %v11396_v44 = vld [vmem:[#allocation13 + $0xaf8] ss:$48 sps:$4 sm:$0xff]   ;;  %v2030_v46 = vld [vmem:[%s12814_s15 + $0x1c0] sm:$0xff] }
 0x2be   : > { %2963 = vmatprep.subr.bf16.mxu0 %v11353_v49  ;;  %3189 = vmatprep.subr.bf16.mxu1 %v11356_v50  ;;  %v11404_v49 = vld [vmem:[#allocation13 + $0xb5c] ss:$48 sps:$4 sm:$0xff]   ;;  %v11399_v50 = vld [vmem:[#allocation13 + $0xb50] ss:$48 sps:$4 sm:$0xff]   ;;  %v13309_v54 = vpack.c.bf16 %v2034_v47, %v2030_v46 }
 0x2bf   : > { %v2001_v46 = vld [vmem:[%s12814_s15 + $0xd8] sm:$0xff] }
 0x2c0   : > { %2901 = vmatmul.mubr.bf16.gmra.mrb[12].mxu0 %v13261_v52  ;;  %3127 = vmatmul.mubr.bf16.gmra.mrb[12].mxu1 %v13261_v52  ;;  %v2005_v47 = vld [vmem:[%s12814_s15 + $0xf8] sm:$0xff] }
 0x2c1   : > { %2964 = vmatpush1.bf16.msra.mxu0 %v11351_v51  ;;  %3190 = vmatpush1.bf16.msra.mxu1 %v11354_v56  ;;  %v11402_v51 = vld [vmem:[#allocation13 + $0xb58] ss:$48 sps:$4 sm:$0xff]  }
 0x2c2   : > { %2965 = vmatprep.subr.bf16.mxu0 %v11359_v57  ;;  %3191 = vmatprep.subr.bf16.mxu1 %v11362_v58  ;;  %v1981_v56 = vld [vmem:[%s12814_s15 + $0x38] sm:$0xff]  ;;  %v11407_v57 = vld [vmem:[#allocation13 + $0xbb4] ss:$48 sps:$4 sm:$0xff]  }
 0x2c3   : > { %2910 = vmatprep.mubr.bf16.mxu0 %v13265_v61  ;;  %3136 = vmatprep.mubr.bf16.mxu1 %v13265_v61  ;;  %v11410_v58 = vld [vmem:[#allocation13 + $0xbbc] ss:$48 sps:$4 sm:$0xff]  }
 0x2c5   : > { %2966 = vmatpush1.bf16.msra.mxu0 %v11357_v59  ;;  %3192 = vmatpush1.bf16.msra.mxu1 %v11360_v60  ;;  %v11405_v59 = vld [vmem:[#allocation13 + $0xbb0] ss:$48 sps:$4 sm:$0xff]   ;;  %v13313_v60 = vpack.c.bf16 %v1981_v56, %v1977_v55  ;;  %v13349_v55 = vpack.c.bf16 %v2005_v47, %v2001_v46  ;;  %v2025_v46 = vld [vmem:[%s12814_s15 + $0x198] sm:$0xff] }
 0x2c6   : > { %2967 = vmatprep.subr.bf16.mxu0 %v11365_v0  ;;  %3193 = vmatprep.subr.bf16.mxu1 %v11368_v1  ;;  %v1980_v0 = vld [vmem:[%s12814_s15 + $0x30] sm:$0xff]  ;;  %v2029_v47 = vld [vmem:[%s12814_s15 + $0x1b8] sm:$0xff] }
 0x2c7   : > { %v11413_v1 = vld [vmem:[#allocation13 + $0x24] ss:$48 sps:$4 sm:$0xff]  }
 0x2c8   : > { %2911 = vmatmul.mubr.bf16.gmra.mrb[16].mxu0 %v13273_v2  ;;  %3137 = vmatmul.mubr.bf16.gmra.mrb[16].mxu1 %v13273_v2  ;;  %v2000_v56 = vld [vmem:[%s12814_s15 + $0xd0] sm:$0xff] }
 0x2c9   : > { %2968 = vmatpush1.bf16.msra.mxu0 %v11363_v5  ;;  %3194 = vmatpush1.bf16.msra.mxu1 %v11366_v6  ;;  %v13321_v5 = vpack.c.bf16 %v1980_v0, %v1976_v63  ;;  %v1985_v6 = vld [vmem:[%s12814_s15 + $0x58] sm:$0xff] }
 0x2ca   : > { %2969 = vmatprep.subr.bf16.mxu0 %v11371_v7  ;;  %3195 = vmatprep.subr.bf16.mxu1 %v11374_v8  ;;  %v1989_v7 = vld [vmem:[%s12814_s15 + $0x78] sm:$0xff] }
 0x2cb   : > { %2920 = vmatprep.mubr.bf16.mxu0 %v13277_v12  ;;  %3146 = vmatprep.mubr.bf16.mxu1 %v13277_v12  ;;  %v11414_v8 = vld [vmem:[#allocation13 + $0x28] ss:$48 sps:$4 sm:$0xff]  }
 0x2cc   : > { %v11450_v63 = vld [vmem:[#allocation13 + $0x268] ss:$48 sps:$4 sm:$0xff]  }
 0x2cd   : > { %2970 = vmatpush1.bf16.msra.mxu0 %v11369_v9  ;;  %3196 = vmatpush1.bf16.msra.mxu1 %v11372_v11  ;;  %v11419_v9 = vld [vmem:[#allocation13 + $0x84] ss:$48 sps:$4 sm:$0xff]   ;;  %v11422_v11 = vld [vmem:[#allocation13 + $0x8c] ss:$48 sps:$4 sm:$0xff]  }
 0x2ce   : > { %2971 = vmatprep.subr.bf16.mxu0 %v11377_v15  ;;  %3197 = vmatprep.subr.bf16.mxu1 %v11380_v16  ;;  %v13325_v15 = vpack.c.bf16 %v1989_v7, %v1985_v6  ;;  %v1984_v16 = vld [vmem:[%s12814_s15 + $0x50] sm:$0xff]  ;;  %v11458_v6 = vld [vmem:[#allocation13 + $0x2cc] ss:$48 sps:$4 sm:$0xff]  }
 0x2cf   : > { %v11453_v7 = vld [vmem:[#allocation13 + $0x2c0] ss:$48 sps:$4 sm:$0xff]  }
 0x2d0   : > { %2921 = vmatmul.mubr.bf16.gmra.mrb[20].mxu0 %v13285_v19  ;;  %3147 = vmatmul.mubr.bf16.gmra.mrb[20].mxu1 %v13285_v19 }
 0x2d1   : > { %2972 = vmatpush1.bf16.msra.mxu0 %v11375_v18  ;;  %3198 = vmatpush1.bf16.msra.mxu1 %v11378_v20  ;;  %v1988_v18 = vld [vmem:[%s12814_s15 + $0x70] sm:$0xff] }
 0x2d2   : > { %2973 = vmatprep.subr.bf16.mxu0 %v11383_v23  ;;  %3199 = vmatprep.subr.bf16.mxu1 %v11386_v24  ;;  %v11425_v20 = vld [vmem:[#allocation13 + $0xe4] ss:$48 sps:$4 sm:$0xff]   ;;  %v13333_v22 = vpack.c.bf16 %v1988_v18, %v1984_v16  ;;  %v1993_v23 = vld [vmem:[%s12814_s15 + $0x98] sm:$0xff]  ;;  %v11459_v18 = vld [vmem:[#allocation13 + $0x320] ss:$48 sps:$4 sm:$0xff]  }
 0x2d3   : > { %2930 = vmatprep.mubr.bf16.mxu0 %v13289_v27  ;;  %3156 = vmatprep.mubr.bf16.mxu1 %v13289_v27  ;;  %v1997_v24 = vld [vmem:[%s12814_s15 + $0xb8] sm:$0xff] }
 0x2d4   : > { %v11464_v16 = vld [vmem:[#allocation13 + $0x32c] ss:$48 sps:$4 sm:$0xff]  }
 0x2d5   : > { %2974 = vmatpush1.bf16.msra.mxu0 %v11381_v26  ;;  %3200 = vmatpush1.bf16.msra.mxu1 %v11384_v28  ;;  %v11423_v26 = vld [vmem:[#allocation13 + $0xe0] ss:$48 sps:$4 sm:$0xff]   ;;  %v11426_v28 = vld [vmem:[#allocation13 + $0xe8] ss:$48 sps:$4 sm:$0xff]  }
 0x2d6   : > { %2975 = vmatprep.subr.bf16.mxu0 %v11389_v32  ;;  %3201 = vmatprep.subr.bf16.mxu1 %v11392_v33  ;;  %v11429_v32 = vld [vmem:[#allocation13 + $0x140] ss:$48 sps:$4 sm:$0xff]   ;;  %v11432_v33 = vld [vmem:[#allocation13 + $0x148] ss:$48 sps:$4 sm:$0xff]  }
 0x2d8   : > { %2931 = vmatmul.mubr.bf16.gmra.mrb[24].mxu0 %v13297_v36  ;;  %3157 = vmatmul.mubr.bf16.gmra.mrb[24].mxu1 %v13297_v36 }
 0x2d9   : > { %2976 = vmatpush1.bf16.msra.mxu0 %v11387_v34  ;;  %3202 = vmatpush1.bf16.msra.mxu1 %v11390_v35  ;;  %v13337_v34 = vpack.c.bf16 %v1997_v24, %v1993_v23  ;;  %v1992_v35 = vld [vmem:[%s12814_s15 + $0x90] sm:$0xff]  ;;  %v2017_v23 = vld [vmem:[%s12814_s15 + $0x158] sm:$0xff] }
 0x2da   : > { %2977 = vmatprep.subr.bf16.mxu0 %v11395_v40  ;;  %3203 = vmatprep.subr.bf16.mxu1 %v11398_v41  ;;  %v11440_v40 = vld [vmem:[#allocation13 + $0x1ac] ss:$48 sps:$4 sm:$0xff]   ;;  %v11435_v41 = vld [vmem:[#allocation13 + $0x1a0] ss:$48 sps:$4 sm:$0xff]  }
 0x2db   : > { %2940 = vmatprep.mubr.bf16.mxu0 %v13301_v42  ;;  %3166 = vmatprep.mubr.bf16.mxu1 %v13301_v42  ;;  %v2021_v24 = vld [vmem:[%s12814_s15 + $0x178] sm:$0xff] }
 0x2dd   : > { %2978 = vmatpush1.bf16.msra.mxu0 %v11393_v43  ;;  %3204 = vmatpush1.bf16.msra.mxu1 %v11396_v44  ;;  %v13345_v43 = vpack.c.bf16 %v1996_v37, %v1992_v35  ;;  %v11438_v44 = vld [vmem:[#allocation13 + $0x1a8] ss:$48 sps:$4 sm:$0xff]   ;;  %v2020_v35 = vld [vmem:[%s12814_s15 + $0x170] sm:$0xff] }
 0x2de   : > { %2979 = vmatprep.subr.bf16.mxu0 %v11401_v48  ;;  %3205 = vmatprep.subr.bf16.mxu1 %v11404_v49  ;;  %v11443_v48 = vld [vmem:[#allocation13 + $0x204] ss:$48 sps:$4 sm:$0xff]   ;;  %v11446_v49 = vld [vmem:[#allocation13 + $0x20c] ss:$48 sps:$4 sm:$0xff]  }
 0x2df   : > { %v11473_v37 = vld [vmem:[#allocation13 + $0x3e4] ss:$48 sps:$4 sm:$0xff]  }
 0x2e0   : > { %2941 = vmatmul.mubr.bf16.gmra.mrb[28].mxu0 %v13309_v54  ;;  %3167 = vmatmul.mubr.bf16.gmra.mrb[28].mxu1 %v13309_v54 }
 0x2e1   : > { %2980 = vmatpush1.bf16.msra.mxu0 %v11399_v50  ;;  %3206 = vmatpush1.bf16.msra.mxu1 %v11402_v51  ;;  %v11441_v50 = vld [vmem:[#allocation13 + $0x200] ss:$48 sps:$4 sm:$0xff]   ;;  %v11444_v51 = vld [vmem:[#allocation13 + $0x208] ss:$48 sps:$4 sm:$0xff]  }
 0x2e2   : > { %2981 = vmatprep.subr.bf16.mxu0 %v11407_v57  ;;  %3207 = vmatprep.subr.bf16.mxu1 %v11410_v58  ;;  %v2004_v57 = vld [vmem:[%s12814_s15 + $0xf0] sm:$0xff] }
 0x2e3   : > { %2983 = vmatprep.mubr.bf16.mxu0 %v13313_v60  ;;  %3209 = vmatprep.mubr.bf16.mxu1 %v13313_v60  ;;  %v11449_v58 = vld [vmem:[#allocation13 + $0x264] ss:$48 sps:$4 sm:$0xff]   ;;  %v13357_v0 = vpack.c.bf16 %v2004_v57, %v2000_v56  ;;  %v13385_v56 = vpack.c.bf16 %v2029_v47, %v2025_v46  ;;  %v11518_v47 = vld [vmem:[#allocation13 + $0x68c] ss:$48 sps:$4 sm:$0xff]  }
 0x2e4   : > { %v2024_v57 = vld [vmem:[%s12814_s15 + $0x190] sm:$0xff] }
 0x2e5   : > { %2982 = vmatpush1.bf16.msra.mxu0 %v11405_v59  ;;  %3208 = vmatpush1.bf16.msra.mxu1 %v11408_v62  ;;  %v11452_v59 = vld [vmem:[#allocation13 + $0x26c] ss:$48 sps:$4 sm:$0xff]   ;;  %v11447_v62 = vld [vmem:[#allocation13 + $0x260] ss:$48 sps:$4 sm:$0xff]   ;;  %v11515_v46 = vld [vmem:[#allocation13 + $0x684] ss:$48 sps:$4 sm:$0xff]  }
 0x2e6   : > { %4090 = vmatprep.subr.bf16.mxu0 %v11413_v1  ;;  %4316 = vmatprep.subr.bf16.mxu1 %v11416_v3  ;;  %v2009_v1 = vld [vmem:[%s12814_s15 + $0x118] sm:$0xff] }
 0x2e7   : > { %v2013_v3 = vld [vmem:[%s12814_s15 + $0x138] sm:$0xff] }
 0x2e8   : > { %2984 = vmatmul.mubr.bf16.vlgmr.msra.gmra.mrb[0].mxu0 %v13321_v5  ;;  %3210 = vmatmul.mubr.bf16.vlgmr.msra.gmra.mrb[0].mxu1 %v13321_v5 }
 0x2e9   : > { %4091 = vmatpush1.bf16.msra.mxu0 %v11411_v4  ;;  %4317 = vmatpush1.bf16.msra.mxu1 %v11414_v8  ;;  %v11455_v4 = vld [vmem:[#allocation13 + $0x2c4] ss:$48 sps:$4 sm:$0xff]   ;;  %v11456_v8 = vld [vmem:[#allocation13 + $0x2c8] ss:$48 sps:$4 sm:$0xff]  }
 0x2ea   : > { %4092 = vmatprep.subr.bf16.mxu0 %v11419_v9  ;;  %4318 = vmatprep.subr.bf16.mxu1 %v11422_v11  ;;  %v13361_v9 = vpack.c.bf16 %v2013_v3, %v2009_v1  ;;  %v2008_v11 = vld [vmem:[%s12814_s15 + $0x110] sm:$0xff]  ;;  %v11486_v1 = vld [vmem:[#allocation13 + $0x4a8] ss:$48 sps:$4 sm:$0xff]  }
 0x2eb   : > { %2993 = vmatprep.mubr.bf16.mxu0 %v13325_v15  ;;  %3219 = vmatprep.mubr.bf16.mxu1 %v13325_v15 }
 0x2ed   : > { %4093 = vmatpush1.bf16.msra.mxu0 %v11417_v13  ;;  %4319 = vmatpush1.bf16.msra.mxu1 %v11420_v14  ;;  %v2012_v13 = vld [vmem:[%s12814_s15 + $0x130] sm:$0xff] }
 0x2ee   : > { %4094 = vmatprep.subr.bf16.mxu0 %v11425_v20  ;;  %4320 = vmatprep.subr.bf16.mxu1 %v11428_v21  ;;  %v11461_v14 = vld [vmem:[#allocation13 + $0x324] ss:$48 sps:$4 sm:$0xff]   ;;  %v11462_v20 = vld [vmem:[#allocation13 + $0x328] ss:$48 sps:$4 sm:$0xff]   ;;  %v13369_v21 = vpack.c.bf16 %v2012_v13, %v2008_v11  ;;  %v11489_v11 = vld [vmem:[#allocation13 + $0x500] ss:$48 sps:$4 sm:$0xff]  }
 0x2ef   : > { %v11492_v13 = vld [vmem:[#allocation13 + $0x508] ss:$48 sps:$4 sm:$0xff]  }
 0x2f0   : > { %2994 = vmatmul.mubr.bf16.gmra.mrb[4].mxu0 %v13333_v22  ;;  %3220 = vmatmul.mubr.bf16.gmra.mrb[4].mxu1 %v13333_v22 }
 0x2f1   : > { %4095 = vmatpush1.bf16.msra.mxu0 %v11423_v26  ;;  %4321 = vmatpush1.bf16.msra.mxu1 %v11426_v28  ;;  %v11467_v26 = vld [vmem:[#allocation13 + $0x384] ss:$48 sps:$4 sm:$0xff]   ;;  %v11470_v28 = vld [vmem:[#allocation13 + $0x38c] ss:$48 sps:$4 sm:$0xff]  }
 0x2f2   : > { %4096 = vmatprep.subr.bf16.mxu0 %v11431_v29  ;;  %4322 = vmatprep.subr.bf16.mxu1 %v11434_v31  ;;  %v11465_v29 = vld [vmem:[#allocation13 + $0x380] ss:$48 sps:$4 sm:$0xff]   ;;  %v11468_v31 = vld [vmem:[#allocation13 + $0x388] ss:$48 sps:$4 sm:$0xff]  }
 0x2f3   : > { %3003 = vmatprep.mubr.bf16.mxu0 %v13337_v34  ;;  %3229 = vmatprep.mubr.bf16.mxu1 %v13337_v34 }
 0x2f5   : > { %4097 = vmatpush1.bf16.msra.mxu0 %v11429_v32  ;;  %4323 = vmatpush1.bf16.msra.mxu1 %v11432_v33  ;;  %v13373_v32 = vpack.c.bf16 %v2021_v24, %v2017_v23  ;;  %v2016_v33 = vld [vmem:[%s12814_s15 + $0x150] sm:$0xff]  ;;  %v11500_v23 = vld [vmem:[#allocation13 + $0x56c] ss:$48 sps:$4 sm:$0xff]  }
 0x2f6   : > { %4098 = vmatprep.subr.bf16.mxu0 %v11437_v38  ;;  %4324 = vmatprep.subr.bf16.mxu1 %v11440_v40  ;;  %v11476_v38 = vld [vmem:[#allocation13 + $0x3ec] ss:$48 sps:$4 sm:$0xff]   ;;  %v11471_v40 = vld [vmem:[#allocation13 + $0x3e0] ss:$48 sps:$4 sm:$0xff]  }
 0x2f8   : > { %3004 = vmatmul.mubr.bf16.gmra.mrb[8].mxu0 %v13345_v43  ;;  %3230 = vmatmul.mubr.bf16.gmra.mrb[8].mxu1 %v13345_v43 }
 0x2f9   : > { %4099 = vmatpush1.bf16.msra.mxu0 %v11435_v41  ;;  %4325 = vmatpush1.bf16.msra.mxu1 %v11438_v44  ;;  %v11474_v41 = vld [vmem:[#allocation13 + $0x3e8] ss:$48 sps:$4 sm:$0xff]   ;;  %v13381_v44 = vpack.c.bf16 %v2020_v35, %v2016_v33  ;;  %v11501_v33 = vld [vmem:[#allocation13 + $0x5c0] ss:$48 sps:$4 sm:$0xff]  }
 0x2fa   : > { %4100 = vmatprep.subr.bf16.mxu0 %v11443_v48  ;;  %4326 = vmatprep.subr.bf16.mxu1 %v11446_v49  ;;  %v11479_v48 = vld [vmem:[#allocation13 + $0x444] ss:$48 sps:$4 sm:$0xff]   ;;  %v11482_v49 = vld [vmem:[#allocation13 + $0x44c] ss:$48 sps:$4 sm:$0xff]   ;;  %v11504_v35 = vld [vmem:[#allocation13 + $0x5c8] ss:$48 sps:$4 sm:$0xff]  }
 0x2fb   : > { %3013 = vmatprep.mubr.bf16.mxu0 %v13349_v55  ;;  %3239 = vmatprep.mubr.bf16.mxu1 %v13349_v55 }
 0x2fd   : > { %4101 = vmatpush1.bf16.msra.mxu0 %v11441_v50  ;;  %4327 = vmatpush1.bf16.msra.mxu1 %v11444_v51  ;;  %v11477_v50 = vld [vmem:[#allocation13 + $0x440] ss:$48 sps:$4 sm:$0xff]   ;;  %v11480_v51 = vld [vmem:[#allocation13 + $0x448] ss:$48 sps:$4 sm:$0xff]  }
 0x2fe   : > { %4102 = vmatprep.subr.bf16.mxu0 %v11449_v58  ;;  %4328 = vmatprep.subr.bf16.mxu1 %v11452_v59  ;;  %v2028_v58 = vld [vmem:[%s12814_s15 + $0x1b0] sm:$0xff] }
 0x2ff   : > { %v11485_v59 = vld [vmem:[#allocation13 + $0x4a4] ss:$48 sps:$4 sm:$0xff]   ;;  %v13393_v3 = vpack.c.bf16 %v2028_v58, %v2024_v57  ;;  %v11522_v57 = vld [vmem:[#allocation13 + $0x6e8] ss:$48 sps:$4 sm:$0xff]  }
 0x300   : > { %3014 = vmatmul.mubr.bf16.gmra.mrb[12].mxu0 %v13357_v0  ;;  %3240 = vmatmul.mubr.bf16.gmra.mrb[12].mxu1 %v13357_v0  ;;  %v11527_v58 = vld [vmem:[#allocation13 + $0x744] ss:$48 sps:$4 sm:$0xff]  }
 0x301   : > { %4103 = vmatpush1.bf16.msra.mxu0 %v11447_v62  ;;  %4329 = vmatpush1.bf16.msra.mxu1 %v11450_v63  ;;  %v11488_v62 = vld [vmem:[#allocation13 + $0x4ac] ss:$48 sps:$4 sm:$0xff]   ;;  %v11483_v63 = vld [vmem:[#allocation13 + $0x4a0] ss:$48 sps:$4 sm:$0xff]  }
 0x302   : > { %4104 = vmatprep.subr.bf16.mxu0 %v11455_v4  ;;  %4330 = vmatprep.subr.bf16.mxu1 %v11458_v6  ;;  %v2033_v4 = vld [vmem:[%s12814_s15 + $0x1d8] sm:$0xff] }
 0x303   : > { %3023 = vmatprep.mubr.bf16.mxu0 %v13361_v9  ;;  %3249 = vmatprep.mubr.bf16.mxu1 %v13361_v9  ;;  %v2037_v6 = vld [vmem:[%s12814_s15 + $0x1f8] sm:$0xff] }
 0x305   : > { %4105 = vmatpush1.bf16.msra.mxu0 %v11453_v7  ;;  %4331 = vmatpush1.bf16.msra.mxu1 %v11456_v8  ;;  %v11491_v7 = vld [vmem:[#allocation13 + $0x504] ss:$48 sps:$4 sm:$0xff]   ;;  %v11494_v8 = vld [vmem:[#allocation13 + $0x50c] ss:$48 sps:$4 sm:$0xff]  }
 0x306   : > { %4106 = vmatprep.subr.bf16.mxu0 %v11461_v14  ;;  %4332 = vmatprep.subr.bf16.mxu1 %v11464_v16  ;;  %v13397_v14 = vpack.c.bf16 %v2037_v6, %v2033_v4  ;;  %v2032_v16 = vld [vmem:[%s12814_s15 + $0x1d0] sm:$0xff]  ;;  %v11534_v4 = vld [vmem:[#allocation13 + $0x7a8] ss:$48 sps:$4 sm:$0xff]  }
 0x307   : > { %v11539_v6 = vld [vmem:[#allocation13 + $0x804] ss:$48 sps:$4 sm:$0xff]  }
 0x308   : > { %3024 = vmatmul.mubr.bf16.gmra.mrb[16].mxu0 %v13369_v21  ;;  %3250 = vmatmul.mubr.bf16.gmra.mrb[16].mxu1 %v13369_v21 }
 0x309   : > { %4107 = vmatpush1.bf16.msra.mxu0 %v11459_v18  ;;  %4333 = vmatpush1.bf16.msra.mxu1 %v11462_v20  ;;  %v2036_v18 = vld [vmem:[%s12814_s15 + $0x1f0] sm:$0xff] }
 0x30a   : > { %4108 = vmatprep.subr.bf16.mxu0 %v11467_v26  ;;  %4334 = vmatprep.subr.bf16.mxu1 %v11470_v28  ;;  %v11497_v20 = vld [vmem:[#allocation13 + $0x564] ss:$48 sps:$4 sm:$0xff]   ;;  %v13405_v24 = vpack.c.bf16 %v2036_v18, %v2032_v16  ;;  %v11495_v26 = vld [vmem:[#allocation13 + $0x560] ss:$48 sps:$4 sm:$0xff]   ;;  %v11498_v28 = vld [vmem:[#allocation13 + $0x568] ss:$48 sps:$4 sm:$0xff]  }
 0x30b   : > { %3033 = vmatprep.mubr.bf16.mxu0 %v13373_v32  ;;  %3259 = vmatprep.mubr.bf16.mxu1 %v13373_v32  ;;  %v11546_v16 = vld [vmem:[#allocation13 + $0x868] ss:$48 sps:$4 sm:$0xff]   ;;  %v11551_v18 = vld [vmem:[#allocation13 + $0x8c4] ss:$48 sps:$4 sm:$0xff]  }
 0x30d   : > { %4109 = vmatpush1.bf16.msra.mxu0 %v11465_v29  ;;  %4335 = vmatpush1.bf16.msra.mxu1 %v11468_v31  ;;  %v11503_v29 = vld [vmem:[#allocation13 + $0x5c4] ss:$48 sps:$4 sm:$0xff]   ;;  %v11506_v31 = vld [vmem:[#allocation13 + $0x5cc] ss:$48 sps:$4 sm:$0xff]  }
 0x30e   : > { %4110 = vmatprep.subr.bf16.mxu0 %v11473_v37  ;;  %4336 = vmatprep.subr.bf16.mxu1 %v11476_v38  ;;  %v11509_v37 = vld [vmem:[#allocation13 + $0x624] ss:$48 sps:$4 sm:$0xff]   ;;  %v11512_v38 = vld [vmem:[#allocation13 + $0x62c] ss:$48 sps:$4 sm:$0xff]  }
 0x310   : > { %3034 = vmatmul.mubr.bf16.gmra.mrb[20].mxu0 %v13381_v44  ;;  %3260 = vmatmul.mubr.bf16.gmra.mrb[20].mxu1 %v13381_v44 }
 0x311   : > { %4111 = vmatpush1.bf16.msra.mxu0 %v11471_v40  ;;  %4337 = vmatpush1.bf16.msra.mxu1 %v11474_v41  ;;  %v11507_v40 = vld [vmem:[#allocation13 + $0x620] ss:$48 sps:$4 sm:$0xff]   ;;  %v11510_v41 = vld [vmem:[#allocation13 + $0x628] ss:$48 sps:$4 sm:$0xff]  }
 0x312   : > { %4112 = vmatprep.subr.bf16.mxu0 %v11479_v48  ;;  %4338 = vmatprep.subr.bf16.mxu1 %v11482_v49  ;;  %v11513_v48 = vld [vmem:[#allocation13 + $0x680] ss:$48 sps:$4 sm:$0xff]   ;;  %v11516_v49 = vld [vmem:[#allocation13 + $0x688] ss:$48 sps:$4 sm:$0xff]  }
 0x313   : > { %3043 = vmatprep.mubr.bf16.mxu0 %v13385_v56  ;;  %3269 = vmatprep.mubr.bf16.mxu1 %v13385_v56 }
 0x315   : > { %4113 = vmatpush1.bf16.msra.mxu0 %v11477_v50  ;;  %4339 = vmatpush1.bf16.msra.mxu1 %v11480_v51  ;;  %v11521_v50 = vld [vmem:[#allocation13 + $0x6e4] ss:$48 sps:$4 sm:$0xff]   ;;  %v11519_v51 = vld [vmem:[#allocation13 + $0x6e0] ss:$48 sps:$4 sm:$0xff]  }
 0x316   : > { %4114 = vmatprep.subr.bf16.mxu0 %v11485_v59  ;;  %4340 = vmatprep.subr.bf16.mxu1 %v11488_v62  ;;  %v11525_v59 = vld [vmem:[#allocation13 + $0x740] ss:$48 sps:$4 sm:$0xff]   ;;  %v11528_v62 = vld [vmem:[#allocation13 + $0x748] ss:$48 sps:$4 sm:$0xff]  }
 0x318   : > { %3044 = vmatmul.mubr.bf16.gmra.mrb[24].mxu0 %v13393_v3  ;;  %3270 = vmatmul.mubr.bf16.gmra.mrb[24].mxu1 %v13393_v3 }
 0x319   : > { %4115 = vmatpush1.bf16.msra.mxu0 %v11483_v63  ;;  %4341 = vmatpush1.bf16.msra.mxu1 %v11486_v1  ;;  %v11533_v63 = vld [vmem:[#allocation13 + $0x7a4] ss:$48 sps:$4 sm:$0xff]   ;;  %v11531_v1 = vld [vmem:[#allocation13 + $0x7a0] ss:$48 sps:$4 sm:$0xff]  }
 0x31a   : > { %4116 = vmatprep.subr.bf16.mxu0 %v11491_v7  ;;  %4342 = vmatprep.subr.bf16.mxu1 %v11494_v8  ;;  %v11537_v7 = vld [vmem:[#allocation13 + $0x800] ss:$48 sps:$4 sm:$0xff]   ;;  %v11540_v8 = vld [vmem:[#allocation13 + $0x808] ss:$48 sps:$4 sm:$0xff]  }
 0x31b   : > { %3053 = vmatprep.mubr.bf16.mxu0 %v13397_v14  ;;  %3279 = vmatprep.mubr.bf16.mxu1 %v13397_v14 }
 0x31d   : > { %4117 = vmatpush1.bf16.msra.mxu0 %v11489_v11  ;;  %4343 = vmatpush1.bf16.msra.mxu1 %v11492_v13  ;;  %v11545_v11 = vld [vmem:[#allocation13 + $0x864] ss:$48 sps:$4 sm:$0xff]   ;;  %v11543_v13 = vld [vmem:[#allocation13 + $0x860] ss:$48 sps:$4 sm:$0xff]  }
 0x31e   : > { %4118 = vmatprep.subr.bf16.mxu0 %v11497_v20  ;;  %4344 = vmatprep.subr.bf16.mxu1 %v11500_v23  ;;  %v11549_v20 = vld [vmem:[#allocation13 + $0x8c0] ss:$48 sps:$4 sm:$0xff]   ;;  %v11552_v23 = vld [vmem:[#allocation13 + $0x8c8] ss:$48 sps:$4 sm:$0xff]  }
 0x320   : > { %3054 = vmatmul.mubr.bf16.gmra.mrb[28].mxu0 %v13405_v24  ;;  %3280 = vmatmul.mubr.bf16.gmra.mrb[28].mxu1 %v13405_v24 }
 0x321   : > { %4119 = vmatpush1.bf16.msra.mxu0 %v11495_v26  ;;  %4345 = vmatpush1.bf16.msra.mxu1 %v11498_v28  ;;  %v11557_v26 = vld [vmem:[#allocation13 + $0x924] ss:$48 sps:$4 sm:$0xff]   ;;  %v11555_v28 = vld [vmem:[#allocation13 + $0x920] ss:$48 sps:$4 sm:$0xff]  }
 0x322   : > { %4120 = vmatprep.subr.bf16.mxu0 %v11503_v29  ;;  %4346 = vmatprep.subr.bf16.mxu1 %v11506_v31  ;;  %v11558_v29 = vld [vmem:[#allocation13 + $0x928] ss:$48 sps:$4 sm:$0xff]   ;;  %v11563_v31 = vld [vmem:[#allocation13 + $0x984] ss:$48 sps:$4 sm:$0xff]  }
 0x323   : > { %4122 = vmatprep.mubr.bf16.mxu0 %v13219_v53  ;;  %4348 = vmatprep.mubr.bf16.mxu1 %v13219_v53  ;;  %v11524_v53 = vld [vmem:[#allocation13 + $0x6ec] ss:$48 sps:$4 sm:$0xff]  }
 0x325   : > { %4121 = vmatpush1.bf16.msra.mxu0 %v11501_v33  ;;  %4347 = vmatpush1.bf16.msra.mxu1 %v11504_v35  ;;  %v11561_v33 = vld [vmem:[#allocation13 + $0x980] ss:$48 sps:$4 sm:$0xff]   ;;  %v11564_v35 = vld [vmem:[#allocation13 + $0x988] ss:$48 sps:$4 sm:$0xff]  }
 0x326   : > { %4203 = vmatprep.subr.bf16.mxu0 %v11509_v37  ;;  %4429 = vmatprep.subr.bf16.mxu1 %v11512_v38  ;;  %v11569_v37 = vld [vmem:[#allocation13 + $0x9e4] ss:$48 sps:$4 sm:$0xff]   ;;  %v11567_v38 = vld [vmem:[#allocation13 + $0x9e0] ss:$48 sps:$4 sm:$0xff]  }
 0x328   : > { %4123 = vmatmul.mubr.bf16.vlgmr.msra.gmra.mrb[32].mxu0 %v13225_v10  ;;  %4349 = vmatmul.mubr.bf16.vlgmr.msra.gmra.mrb[32].mxu1 %v13225_v10  ;;  %v11530_v10 = vld [vmem:[#allocation13 + $0x74c] ss:$48 sps:$4 sm:$0xff]  }
 0x329   : > { %4204 = vmatpush1.bf16.msra.mxu0 %v11507_v40  ;;  %4430 = vmatpush1.bf16.msra.mxu1 %v11510_v41  ;;  %v11570_v40 = vld [vmem:[#allocation13 + $0x9e8] ss:$48 sps:$4 sm:$0xff]   ;;  %v11575_v41 = vld [vmem:[#allocation13 + $0xa44] ss:$48 sps:$4 sm:$0xff]  }
 0x32a   : > { %4205 = vmatprep.subr.bf16.mxu0 %v11515_v46  ;;  %4431 = vmatprep.subr.bf16.mxu1 %v11518_v47  ;;  %v11573_v46 = vld [vmem:[#allocation13 + $0xa40] ss:$48 sps:$4 sm:$0xff]   ;;  %v11576_v47 = vld [vmem:[#allocation13 + $0xa48] ss:$48 sps:$4 sm:$0xff]  }
 0x32b   : > { %4132 = vmatprep.mubr.bf16.mxu0 %v13229_v17  ;;  %4358 = vmatprep.mubr.bf16.mxu1 %v13229_v17  ;;  %v11536_v17 = vld [vmem:[#allocation13 + $0x7ac] ss:$48 sps:$4 sm:$0xff]  }
 0x32d   : > { %4206 = vmatpush1.bf16.msra.mxu0 %v11513_v48  ;;  %4432 = vmatpush1.bf16.msra.mxu1 %v11516_v49  ;;  %v11581_v48 = vld [vmem:[#allocation13 + $0xaa4] ss:$48 sps:$4 sm:$0xff]   ;;  %v11579_v49 = vld [vmem:[#allocation13 + $0xaa0] ss:$48 sps:$4 sm:$0xff]  }
 0x32e   : > { %4207 = vmatprep.subr.bf16.mxu0 %v11521_v50  ;;  %4433 = vmatprep.subr.bf16.mxu1 %v11524_v53  ;;  %v11582_v50 = vld [vmem:[#allocation13 + $0xaa8] ss:$48 sps:$4 sm:$0xff]   ;;  %v11587_v53 = vld [vmem:[#allocation13 + $0xb04] ss:$48 sps:$4 sm:$0xff]  }
 0x330   : > { %4133 = vmatmul.mubr.bf16.gmra.mrb[36].mxu0 %v13237_v25  ;;  %4359 = vmatmul.mubr.bf16.gmra.mrb[36].mxu1 %v13237_v25  ;;  %v11542_v25 = vld [vmem:[#allocation13 + $0x80c] ss:$48 sps:$4 sm:$0xff]  }
 0x331   : > { %4208 = vmatpush1.bf16.msra.mxu0 %v11519_v51  ;;  %4434 = vmatpush1.bf16.msra.mxu1 %v11522_v57  ;;  %v11585_v51 = vld [vmem:[#allocation13 + $0xb00] ss:$48 sps:$4 sm:$0xff]   ;;  %v11588_v57 = vld [vmem:[#allocation13 + $0xb08] ss:$48 sps:$4 sm:$0xff]  }
 0x332   : > { %4209 = vmatprep.subr.bf16.mxu0 %v11527_v58  ;;  %4435 = vmatprep.subr.bf16.mxu1 %v11530_v10  ;;  %v11593_v58 = vld [vmem:[#allocation13 + $0xb64] ss:$48 sps:$4 sm:$0xff]   ;;  %v11591_v10 = vld [vmem:[#allocation13 + $0xb60] ss:$48 sps:$4 sm:$0xff]  }
 0x333   : > { %4142 = vmatprep.mubr.bf16.mxu0 %v13241_v30  ;;  %4368 = vmatprep.mubr.bf16.mxu1 %v13241_v30  ;;  %v11548_v30 = vld [vmem:[#allocation13 + $0x86c] ss:$48 sps:$4 sm:$0xff]  }
 0x335   : > { %4210 = vmatpush1.bf16.msra.mxu0 %v11525_v59  ;;  %4436 = vmatpush1.bf16.msra.mxu1 %v11528_v62  ;;  %v11594_v59 = vld [vmem:[#allocation13 + $0xb68] ss:$48 sps:$4 sm:$0xff]   ;;  %v11599_v62 = vld [vmem:[#allocation13 + $0xbc4] ss:$48 sps:$4 sm:$0xff]  }
 0x336   : > { %4211 = vmatprep.subr.bf16.mxu0 %v11533_v63  ;;  %4437 = vmatprep.subr.bf16.mxu1 %v11536_v17  ;;  %v11597_v63 = vld [vmem:[#allocation13 + $0xbc0] ss:$48 sps:$4 sm:$0xff]   ;;  %v11600_v17 = vld [vmem:[#allocation13 + $0xbc8] ss:$48 sps:$4 sm:$0xff]  }
 0x338   : > { %4143 = vmatmul.mubr.bf16.gmra.mrb[40].mxu0 %v13249_v39  ;;  %4369 = vmatmul.mubr.bf16.gmra.mrb[40].mxu1 %v13249_v39  ;;  %v11554_v39 = vld [vmem:[#allocation13 + $0x8cc] ss:$48 sps:$4 sm:$0xff]  }
 0x339   : > { %4212 = vmatpush1.bf16.msra.mxu0 %v11531_v1  ;;  %4438 = vmatpush1.bf16.msra.mxu1 %v11534_v4 }
 0x33a   : > { %4213 = vmatprep.subr.bf16.mxu0 %v11539_v6  ;;  %4439 = vmatprep.subr.bf16.mxu1 %v11542_v25 }
 0x33b   : > { %4152 = vmatprep.mubr.bf16.mxu0 %v13253_v45  ;;  %4378 = vmatprep.mubr.bf16.mxu1 %v13253_v45  ;;  %v11560_v45 = vld [vmem:[#allocation13 + $0x92c] ss:$48 sps:$4 sm:$0xff]  }
 0x33d   : > { %4214 = vmatpush1.bf16.msra.mxu0 %v11537_v7  ;;  %4440 = vmatpush1.bf16.msra.mxu1 %v11540_v8 }
 0x33e   : > { %4215 = vmatprep.subr.bf16.mxu0 %v11545_v11  ;;  %4441 = vmatprep.subr.bf16.mxu1 %v11548_v30 }
 0x340   : > { %4153 = vmatmul.mubr.bf16.gmra.mrb[44].mxu0 %v13261_v52  ;;  %4379 = vmatmul.mubr.bf16.gmra.mrb[44].mxu1 %v13261_v52  ;;  %v11566_v52 = vld [vmem:[#allocation13 + $0x98c] ss:$48 sps:$4 sm:$0xff]  }
 0x341   : > { %4216 = vmatpush1.bf16.msra.mxu0 %v11543_v13  ;;  %4442 = vmatpush1.bf16.msra.mxu1 %v11546_v16 }
 0x342   : > { %4217 = vmatprep.subr.bf16.mxu0 %v11551_v18  ;;  %4443 = vmatprep.subr.bf16.mxu1 %v11554_v39 }
 0x343   : > { %4162 = vmatprep.mubr.bf16.mxu0 %v13265_v61  ;;  %4388 = vmatprep.mubr.bf16.mxu1 %v13265_v61  ;;  %v11572_v61 = vld [vmem:[#allocation13 + $0x9ec] ss:$48 sps:$4 sm:$0xff]  }
 0x345   : > { %4218 = vmatpush1.bf16.msra.mxu0 %v11549_v20  ;;  %4444 = vmatpush1.bf16.msra.mxu1 %v11552_v23 }
 0x346   : > { %4219 = vmatprep.subr.bf16.mxu0 %v11557_v26  ;;  %4445 = vmatprep.subr.bf16.mxu1 %v11560_v45 }
 0x348   : > { %4163 = vmatmul.mubr.bf16.gmra.mrb[48].mxu0 %v13273_v2  ;;  %4389 = vmatmul.mubr.bf16.gmra.mrb[48].mxu1 %v13273_v2  ;;  %v11578_v2 = vld [vmem:[#allocation13 + $0xa4c] ss:$48 sps:$4 sm:$0xff]  }
 0x349   : > { %4220 = vmatpush1.bf16.msra.mxu0 %v11555_v28  ;;  %4446 = vmatpush1.bf16.msra.mxu1 %v11558_v29 }
 0x34a   : > { %4221 = vmatprep.subr.bf16.mxu0 %v11563_v31  ;;  %4447 = vmatprep.subr.bf16.mxu1 %v11566_v52 }
 0x34b   : > { %4172 = vmatprep.mubr.bf16.mxu0 %v13277_v12  ;;  %4398 = vmatprep.mubr.bf16.mxu1 %v13277_v12  ;;  %v11584_v12 = vld [vmem:[#allocation13 + $0xaac] ss:$48 sps:$4 sm:$0xff]  }
 0x34d   : > { %4222 = vmatpush1.bf16.msra.mxu0 %v11561_v33  ;;  %4448 = vmatpush1.bf16.msra.mxu1 %v11564_v35 }
 0x34e   : > { %4223 = vmatprep.subr.bf16.mxu0 %v11569_v37  ;;  %4449 = vmatprep.subr.bf16.mxu1 %v11572_v61 }
 0x350   : > { %4173 = vmatmul.mubr.bf16.gmra.mrb[52].mxu0 %v13285_v19  ;;  %4399 = vmatmul.mubr.bf16.gmra.mrb[52].mxu1 %v13285_v19  ;;  %v11590_v19 = vld [vmem:[#allocation13 + $0xb0c] ss:$48 sps:$4 sm:$0xff]  }
 0x351   : > { %4224 = vmatpush1.bf16.msra.mxu0 %v11567_v38  ;;  %4450 = vmatpush1.bf16.msra.mxu1 %v11570_v40 }
 0x352   : > { %4225 = vmatprep.subr.bf16.mxu0 %v11575_v41  ;;  %4451 = vmatprep.subr.bf16.mxu1 %v11578_v2 }
 0x353   : > { %4182 = vmatprep.mubr.bf16.mxu0 %v13289_v27  ;;  %4408 = vmatprep.mubr.bf16.mxu1 %v13289_v27  ;;  %v11596_v27 = vld [vmem:[#allocation13 + $0xb6c] ss:$48 sps:$4 sm:$0xff]  }
 0x355   : > { %4226 = vmatpush1.bf16.msra.mxu0 %v11573_v46  ;;  %4452 = vmatpush1.bf16.msra.mxu1 %v11576_v47 }
 0x356   : > { %4227 = vmatprep.subr.bf16.mxu0 %v11581_v48  ;;  %4453 = vmatprep.subr.bf16.mxu1 %v11584_v12 }
 0x358   : > { %4183 = vmatmul.mubr.bf16.gmra.mrb[56].mxu0 %v13297_v36  ;;  %4409 = vmatmul.mubr.bf16.gmra.mrb[56].mxu1 %v13297_v36  ;;  %v11602_v36 = vld [vmem:[#allocation13 + $0xbcc] ss:$48 sps:$4 sm:$0xff]  }
 0x359   : > { %4228 = vmatpush1.bf16.msra.mxu0 %v11579_v49  ;;  %4454 = vmatpush1.bf16.msra.mxu1 %v11582_v50 }
 0x35a   : > { %4229 = vmatprep.subr.bf16.mxu0 %v11587_v53  ;;  %4455 = vmatprep.subr.bf16.mxu1 %v11590_v19 }
 0x35b   : > { %4192 = vmatprep.mubr.bf16.mxu0 %v13301_v42  ;;  %4418 = vmatprep.mubr.bf16.mxu1 %v13301_v42 }
 0x35d   : > { %4230 = vmatpush1.bf16.msra.mxu0 %v11585_v51  ;;  %4456 = vmatpush1.bf16.msra.mxu1 %v11588_v57 }
 0x35e   : > { %4231 = vmatprep.subr.bf16.mxu0 %v11593_v58  ;;  %4457 = vmatprep.subr.bf16.mxu1 %v11596_v27 }
 0x360   : > { %4193 = vmatmul.mubr.bf16.gmra.mrb[60].mxu0 %v13309_v54  ;;  %4419 = vmatmul.mubr.bf16.gmra.mrb[60].mxu1 %v13309_v54 }
 0x361   : > { %4232 = vmatpush1.bf16.msra.mxu0 %v11591_v10  ;;  %4458 = vmatpush1.bf16.msra.mxu1 %v11594_v59 }
 0x362   : > { %4233 = vmatprep.subr.bf16.mxu0 %v11599_v62  ;;  %4459 = vmatprep.subr.bf16.mxu1 %v11602_v36 }
 0x363   : > { %4235 = vmatprep.mubr.bf16.mxu0 %v13313_v60  ;;  %4461 = vmatprep.mubr.bf16.mxu1 %v13313_v60 }
 0x365   : > { %4234 = vmatpush1.bf16.msra.mxu0 %v11597_v63  ;;  %4460 = vmatpush1.bf16.msra.mxu1 %v11600_v17 }
 0x368   : > { %4236 = vmatmul.mubr.bf16.vlgmr.msra.gmra.mrb[32].mxu0 %v13321_v5  ;;  %4462 = vmatmul.mubr.bf16.vlgmr.msra.gmra.mrb[32].mxu1 %v13321_v5 }
 0x369   : > { %4245 = vmatprep.mubr.bf16.mxu0 %v13325_v15  ;;  %4471 = vmatprep.mubr.bf16.mxu1 %v13325_v15 }
 0x370   : > { %4246 = vmatmul.mubr.bf16.gmra.mrb[36].mxu0 %v13333_v22  ;;  %4472 = vmatmul.mubr.bf16.gmra.mrb[36].mxu1 %v13333_v22 }
 0x371   : > { %4255 = vmatprep.mubr.bf16.mxu0 %v13337_v34  ;;  %4481 = vmatprep.mubr.bf16.mxu1 %v13337_v34 }
 0x378   : > { %4256 = vmatmul.mubr.bf16.gmra.mrb[40].mxu0 %v13345_v43  ;;  %4482 = vmatmul.mubr.bf16.gmra.mrb[40].mxu1 %v13345_v43 }
 0x379   : > { %4265 = vmatprep.mubr.bf16.mxu0 %v13349_v55  ;;  %4491 = vmatprep.mubr.bf16.mxu1 %v13349_v55 }
 0x380   : > { %4266 = vmatmul.mubr.bf16.gmra.mrb[44].mxu0 %v13357_v0  ;;  %4492 = vmatmul.mubr.bf16.gmra.mrb[44].mxu1 %v13357_v0 }
 0x381   : > { %4275 = vmatprep.mubr.bf16.mxu0 %v13361_v9  ;;  %4501 = vmatprep.mubr.bf16.mxu1 %v13361_v9 }
 0x388   : > { %4276 = vmatmul.mubr.bf16.gmra.mrb[48].mxu0 %v13369_v21  ;;  %4502 = vmatmul.mubr.bf16.gmra.mrb[48].mxu1 %v13369_v21 }
 0x389   : > { %4285 = vmatprep.mubr.bf16.mxu0 %v13373_v32  ;;  %4511 = vmatprep.mubr.bf16.mxu1 %v13373_v32 }
 0x390   : > { %4286 = vmatmul.mubr.bf16.gmra.mrb[52].mxu0 %v13381_v44  ;;  %4512 = vmatmul.mubr.bf16.gmra.mrb[52].mxu1 %v13381_v44 }
 0x391   : > { %4295 = vmatprep.mubr.bf16.mxu0 %v13385_v56  ;;  %4521 = vmatprep.mubr.bf16.mxu1 %v13385_v56 }
 0x398   : > { %4296 = vmatmul.mubr.bf16.gmra.mrb[56].mxu0 %v13393_v3  ;;  %4522 = vmatmul.mubr.bf16.gmra.mrb[56].mxu1 %v13393_v3 }
 0x399   : > { %4305 = vmatprep.mubr.bf16.mxu0 %v13397_v14  ;;  %4531 = vmatprep.mubr.bf16.mxu1 %v13397_v14 }
 0x3a0   : > { %4306 = vmatmul.mubr.bf16.gmra.mrb[60].mxu0 %v13405_v24  ;;  %4532 = vmatmul.mubr.bf16.gmra.mrb[60].mxu1 %v13405_v24 }
 0x3bb   : > { %v2985_v42 = vpop.f32.mrb[0].mxu0  ;;  %v3211_v54 = vpop.f32.mrb[0].mxu1 }
 0x3bc   : > { %v2987_v60 = vpop.f32.mrb[1].mxu0  ;;  %v3213_v5 = vpop.f32.mrb[1].mxu1 }
 0x3bd   : > { %v2989_v15 = vpop.f32.mrb[2].mxu0  ;;  %v3215_v22 = vpop.f32.mrb[2].mxu1 }
 0x3be   : > { %v3290_v34 = vpack.c.bf16 %v2989_v15, %v2985_v42  ;;  %v3292_v43 = vpack.c.bf16 %v3215_v22, %v3211_v54  ;;  %v2991_v55 = vpop.f32.mrb[3].mxu0  ;;  %v3217_v0 = vpop.f32.mrb[3].mxu1 }
 0x3bf   : > { %v3291_v9 = vpack.c.bf16 %v2991_v55, %v2987_v60  ;;  %v3293_v21 = vpack.c.bf16 %v3217_v0, %v3213_v5 }
 0x3c0   : > { %4579 = vst [vmem:[%s13480_s13] sm:$0xff] %v3290_v34  ;;  %4581 = vst [vmem:[%s13480_s13 + $0x10] sm:$0xff] %v3292_v43 }
 0x3c1   : > { %4580 = vst [vmem:[%s13480_s13 + $0x8] sm:$0xff] %v3291_v9  ;;  %4582 = vst [vmem:[%s13480_s13 + $0x18] sm:$0xff] %v3293_v21 }
 0x3c3   : > { %v2995_v32 = vpop.f32.mrb[4].mxu0  ;;  %v3221_v44 = vpop.f32.mrb[4].mxu1 }
 0x3c4   : > { %v2997_v56 = vpop.f32.mrb[5].mxu0  ;;  %v3223_v3 = vpop.f32.mrb[5].mxu1 }
 0x3c5   : > { %v2999_v14 = vpop.f32.mrb[6].mxu0  ;;  %v3225_v24 = vpop.f32.mrb[6].mxu1 }
 0x3c6   : > { %v3294_v1 = vpack.c.bf16 %v2999_v14, %v2995_v32  ;;  %v3296_v4 = vpack.c.bf16 %v3225_v24, %v3221_v44  ;;  %v3001_v6 = vpop.f32.mrb[7].mxu0  ;;  %v3227_v25 = vpop.f32.mrb[7].mxu1 }
 0x3c7   : > { %v3295_v7 = vpack.c.bf16 %v3001_v6, %v2997_v56  ;;  %v3297_v8 = vpack.c.bf16 %v3227_v25, %v3223_v3 }
 0x3c8   : > { %4583 = vst [vmem:[%s13480_s13 + $0x20] sm:$0xff] %v3294_v1  ;;  %4585 = vst [vmem:[%s13480_s13 + $0x30] sm:$0xff] %v3296_v4 }
 0x3c9   : > { %4584 = vst [vmem:[%s13480_s13 + $0x28] sm:$0xff] %v3295_v7  ;;  %4586 = vst [vmem:[%s13480_s13 + $0x38] sm:$0xff] %v3297_v8 }
 0x3cb   : > { %v3005_v11 = vpop.f32.mrb[8].mxu0  ;;  %v3231_v30 = vpop.f32.mrb[8].mxu1 }
 0x3cc   : > { %v3007_v13 = vpop.f32.mrb[9].mxu0  ;;  %v3233_v16 = vpop.f32.mrb[9].mxu1 }
 0x3cd   : > { %v3009_v18 = vpop.f32.mrb[10].mxu0  ;;  %v3235_v39 = vpop.f32.mrb[10].mxu1 }
 0x3ce   : > { %v3298_v20 = vpack.c.bf16 %v3009_v18, %v3005_v11  ;;  %v3300_v23 = vpack.c.bf16 %v3235_v39, %v3231_v30  ;;  %v3011_v26 = vpop.f32.mrb[11].mxu0  ;;  %v3237_v45 = vpop.f32.mrb[11].mxu1 }
 0x3cf   : > { %v3299_v28 = vpack.c.bf16 %v3011_v26, %v3007_v13  ;;  %v3301_v29 = vpack.c.bf16 %v3237_v45, %v3233_v16 }
 0x3d0   : > { %4587 = vst [vmem:[%s13480_s13 + $0x40] sm:$0xff] %v3298_v20  ;;  %4589 = vst [vmem:[%s13480_s13 + $0x50] sm:$0xff] %v3300_v23 }
 0x3d1   : > { %4588 = vst [vmem:[%s13480_s13 + $0x48] sm:$0xff] %v3299_v28  ;;  %4590 = vst [vmem:[%s13480_s13 + $0x58] sm:$0xff] %v3301_v29 }
 0x3d3   : > { %v3015_v31 = vpop.f32.mrb[12].mxu0  ;;  %v3241_v52 = vpop.f32.mrb[12].mxu1 }
 0x3d4   : > { %v3017_v33 = vpop.f32.mrb[13].mxu0  ;;  %v3243_v35 = vpop.f32.mrb[13].mxu1 }
 0x3d5   : > { %v3019_v37 = vpop.f32.mrb[14].mxu0  ;;  %v3245_v61 = vpop.f32.mrb[14].mxu1 }
 0x3d6   : > { %v3302_v38 = vpack.c.bf16 %v3019_v37, %v3015_v31  ;;  %v3304_v40 = vpack.c.bf16 %v3245_v61, %v3241_v52  ;;  %v3021_v41 = vpop.f32.mrb[15].mxu0  ;;  %v3247_v2 = vpop.f32.mrb[15].mxu1 }
 0x3d7   : > { %v3303_v46 = vpack.c.bf16 %v3021_v41, %v3017_v33  ;;  %v3305_v47 = vpack.c.bf16 %v3247_v2, %v3243_v35 }
 0x3d8   : > { %4591 = vst [vmem:[%s13480_s13 + $0x60] sm:$0xff] %v3302_v38  ;;  %4593 = vst [vmem:[%s13480_s13 + $0x70] sm:$0xff] %v3304_v40 }
 0x3d9   : > { %4592 = vst [vmem:[%s13480_s13 + $0x68] sm:$0xff] %v3303_v46  ;;  %4594 = vst [vmem:[%s13480_s13 + $0x78] sm:$0xff] %v3305_v47 }
 0x3db   : > { %v3025_v48 = vpop.f32.mrb[16].mxu0  ;;  %v3251_v12 = vpop.f32.mrb[16].mxu1 }
 0x3dc   : > { %v3027_v49 = vpop.f32.mrb[17].mxu0  ;;  %v3253_v50 = vpop.f32.mrb[17].mxu1 }
 0x3dd   : > { %v3029_v53 = vpop.f32.mrb[18].mxu0  ;;  %v3255_v19 = vpop.f32.mrb[18].mxu1 }
 0x3de   : > { %v3306_v51 = vpack.c.bf16 %v3029_v53, %v3025_v48  ;;  %v3308_v57 = vpack.c.bf16 %v3255_v19, %v3251_v12  ;;  %v3031_v58 = vpop.f32.mrb[19].mxu0  ;;  %v3257_v27 = vpop.f32.mrb[19].mxu1 }
 0x3df   : > { %v3307_v10 = vpack.c.bf16 %v3031_v58, %v3027_v49  ;;  %v3309_v59 = vpack.c.bf16 %v3257_v27, %v3253_v50 }
 0x3e0   : > { %4595 = vst [vmem:[%s13480_s13 + $0x80] sm:$0xff] %v3306_v51  ;;  %4597 = vst [vmem:[%s13480_s13 + $0x90] sm:$0xff] %v3308_v57 }
 0x3e1   : > { %4596 = vst [vmem:[%s13480_s13 + $0x88] sm:$0xff] %v3307_v10  ;;  %4598 = vst [vmem:[%s13480_s13 + $0x98] sm:$0xff] %v3309_v59 }
 0x3e3   : > { %v3035_v62 = vpop.f32.mrb[20].mxu0  ;;  %v3261_v36 = vpop.f32.mrb[20].mxu1 }
 0x3e4   : > { %v3037_v63 = vpop.f32.mrb[21].mxu0  ;;  %v3263_v17 = vpop.f32.mrb[21].mxu1 }
 0x3e5   : > { %v3039_v42 = vpop.f32.mrb[22].mxu0  ;;  %v3265_v54 = vpop.f32.mrb[22].mxu1 }
 0x3e6   : > { %v3310_v60 = vpack.c.bf16 %v3039_v42, %v3035_v62  ;;  %v3312_v5 = vpack.c.bf16 %v3265_v54, %v3261_v36  ;;  %v3041_v15 = vpop.f32.mrb[23].mxu0  ;;  %v3267_v22 = vpop.f32.mrb[23].mxu1 }
 0x3e7   : > { %v3311_v34 = vpack.c.bf16 %v3041_v15, %v3037_v63  ;;  %v3313_v43 = vpack.c.bf16 %v3267_v22, %v3263_v17 }
 0x3e8   : > { %4599 = vst [vmem:[%s13480_s13 + $0xa0] sm:$0xff] %v3310_v60  ;;  %4601 = vst [vmem:[%s13480_s13 + $0xb0] sm:$0xff] %v3312_v5 }
 0x3e9   : > { %4600 = vst [vmem:[%s13480_s13 + $0xa8] sm:$0xff] %v3311_v34  ;;  %4602 = vst [vmem:[%s13480_s13 + $0xb8] sm:$0xff] %v3313_v43 }
 0x3eb   : > { %v3045_v55 = vpop.f32.mrb[24].mxu0  ;;  %v3271_v0 = vpop.f32.mrb[24].mxu1 }
 0x3ec   : > { %v3047_v9 = vpop.f32.mrb[25].mxu0  ;;  %v3273_v21 = vpop.f32.mrb[25].mxu1 }
 0x3ed   : > { %v3049_v32 = vpop.f32.mrb[26].mxu0  ;;  %v3275_v44 = vpop.f32.mrb[26].mxu1 }
 0x3ee   : > { %v3314_v56 = vpack.c.bf16 %v3049_v32, %v3045_v55  ;;  %v3316_v3 = vpack.c.bf16 %v3275_v44, %v3271_v0  ;;  %v3051_v14 = vpop.f32.mrb[27].mxu0  ;;  %v3277_v24 = vpop.f32.mrb[27].mxu1 }
 0x3ef   : > { %v3315_v1 = vpack.c.bf16 %v3051_v14, %v3047_v9  ;;  %v3317_v4 = vpack.c.bf16 %v3277_v24, %v3273_v21 }
 0x3f0   : > { %4603 = vst [vmem:[%s13480_s13 + $0xc0] sm:$0xff] %v3314_v56  ;;  %4605 = vst [vmem:[%s13480_s13 + $0xd0] sm:$0xff] %v3316_v3 }
 0x3f1   : > { %4604 = vst [vmem:[%s13480_s13 + $0xc8] sm:$0xff] %v3315_v1  ;;  %4606 = vst [vmem:[%s13480_s13 + $0xd8] sm:$0xff] %v3317_v4 }
 0x3f3   : > { %v3055_v6 = vpop.f32.mrb[28].mxu0  ;;  %v3281_v25 = vpop.f32.mrb[28].mxu1 }
 0x3f4   : > { %v3057_v7 = vpop.f32.mrb[29].mxu0  ;;  %v3283_v8 = vpop.f32.mrb[29].mxu1 }
 0x3f5   : > { %v3059_v11 = vpop.f32.mrb[30].mxu0  ;;  %v3285_v30 = vpop.f32.mrb[30].mxu1 }
 0x3f6   : > { %v3318_v13 = vpack.c.bf16 %v3059_v11, %v3055_v6  ;;  %v3320_v16 = vpack.c.bf16 %v3285_v30, %v3281_v25  ;;  %v3061_v18 = vpop.f32.mrb[31].mxu0  ;;  %v3287_v39 = vpop.f32.mrb[31].mxu1 }
 0x3f7   : > { %v3319_v20 = vpack.c.bf16 %v3061_v18, %v3057_v7  ;;  %v3321_v23 = vpack.c.bf16 %v3287_v39, %v3283_v8 }
 0x3f8   : > { %4607 = vst [vmem:[%s13480_s13 + $0xe0] sm:$0xff] %v3318_v13  ;;  %4609 = vst [vmem:[%s13480_s13 + $0xf0] sm:$0xff] %v3320_v16 }
 0x3f9   : > { %4608 = vst [vmem:[%s13480_s13 + $0xe8] sm:$0xff] %v3319_v20  ;;  %4610 = vst [vmem:[%s13480_s13 + $0xf8] sm:$0xff] %v3321_v23 }
 0x43b   : > { %v4237_v26 = vpop.f32.mrb[32].mxu0  ;;  %v4463_v45 = vpop.f32.mrb[32].mxu1 }
 0x43c   : > { %v4239_v28 = vpop.f32.mrb[33].mxu0  ;;  %v4465_v29 = vpop.f32.mrb[33].mxu1 }
 0x43d   : > { %v4241_v31 = vpop.f32.mrb[34].mxu0  ;;  %v4467_v52 = vpop.f32.mrb[34].mxu1 }
 0x43e   : > { %v4542_v33 = vpack.c.bf16 %v4241_v31, %v4237_v26  ;;  %v4544_v35 = vpack.c.bf16 %v4467_v52, %v4463_v45  ;;  %v4243_v37 = vpop.f32.mrb[35].mxu0  ;;  %v4469_v61 = vpop.f32.mrb[35].mxu1 }
 0x43f   : > { %v4543_v38 = vpack.c.bf16 %v4243_v37, %v4239_v28  ;;  %v4545_v40 = vpack.c.bf16 %v4469_v61, %v4465_v29 }
 0x440   : > { %4613 = vst [vmem:[%s13516_s12] sm:$0xff] %v4542_v33  ;;  %4615 = vst [vmem:[%s13516_s12 + $0x10] sm:$0xff] %v4544_v35 }
 0x441   : > { %4614 = vst [vmem:[%s13516_s12 + $0x8] sm:$0xff] %v4543_v38  ;;  %4616 = vst [vmem:[%s13516_s12 + $0x18] sm:$0xff] %v4545_v40 }
 0x443   : > { %v4247_v41 = vpop.f32.mrb[36].mxu0  ;;  %v4473_v2 = vpop.f32.mrb[36].mxu1 }
 0x444   : > { %v4249_v46 = vpop.f32.mrb[37].mxu0  ;;  %v4475_v47 = vpop.f32.mrb[37].mxu1 }
 0x445   : > { %v4251_v48 = vpop.f32.mrb[38].mxu0  ;;  %v4477_v12 = vpop.f32.mrb[38].mxu1 }
 0x446   : > { %v4546_v49 = vpack.c.bf16 %v4251_v48, %v4247_v41  ;;  %v4548_v50 = vpack.c.bf16 %v4477_v12, %v4473_v2  ;;  %v4253_v53 = vpop.f32.mrb[39].mxu0  ;;  %v4479_v19 = vpop.f32.mrb[39].mxu1 }
 0x447   : > { %v4547_v51 = vpack.c.bf16 %v4253_v53, %v4249_v46  ;;  %v4549_v57 = vpack.c.bf16 %v4479_v19, %v4475_v47 }
 0x448   : > { %4617 = vst [vmem:[%s13516_s12 + $0x20] sm:$0xff] %v4546_v49  ;;  %4619 = vst [vmem:[%s13516_s12 + $0x30] sm:$0xff] %v4548_v50 }
 0x449   : > { %4618 = vst [vmem:[%s13516_s12 + $0x28] sm:$0xff] %v4547_v51  ;;  %4620 = vst [vmem:[%s13516_s12 + $0x38] sm:$0xff] %v4549_v57 }
 0x44b   : > { %v4257_v58 = vpop.f32.mrb[40].mxu0  ;;  %v4483_v27 = vpop.f32.mrb[40].mxu1 }
 0x44c   : > { %v4259_v10 = vpop.f32.mrb[41].mxu0  ;;  %v4485_v59 = vpop.f32.mrb[41].mxu1 }
 0x44d   : > { %v4261_v62 = vpop.f32.mrb[42].mxu0  ;;  %v4487_v36 = vpop.f32.mrb[42].mxu1 }
 0x44e   : > { %v4550_v63 = vpack.c.bf16 %v4261_v62, %v4257_v58  ;;  %v4552_v17 = vpack.c.bf16 %v4487_v36, %v4483_v27  ;;  %v4263_v42 = vpop.f32.mrb[43].mxu0  ;;  %v4489_v54 = vpop.f32.mrb[43].mxu1 }
 0x44f   : > { %v4551_v60 = vpack.c.bf16 %v4263_v42, %v4259_v10  ;;  %v4553_v5 = vpack.c.bf16 %v4489_v54, %v4485_v59 }
 0x450   : > { %4621 = vst [vmem:[%s13516_s12 + $0x40] sm:$0xff] %v4550_v63  ;;  %4623 = vst [vmem:[%s13516_s12 + $0x50] sm:$0xff] %v4552_v17 }
 0x451   : > { %4622 = vst [vmem:[%s13516_s12 + $0x48] sm:$0xff] %v4551_v60  ;;  %4624 = vst [vmem:[%s13516_s12 + $0x58] sm:$0xff] %v4553_v5 }
 0x453   : > { %v4267_v15 = vpop.f32.mrb[44].mxu0  ;;  %v4493_v22 = vpop.f32.mrb[44].mxu1 }
 0x454   : > { %v4269_v34 = vpop.f32.mrb[45].mxu0  ;;  %v4495_v43 = vpop.f32.mrb[45].mxu1 }
 0x455   : > { %v4271_v55 = vpop.f32.mrb[46].mxu0  ;;  %v4497_v0 = vpop.f32.mrb[46].mxu1 }
 0x456   : > { %v4554_v9 = vpack.c.bf16 %v4271_v55, %v4267_v15  ;;  %v4556_v21 = vpack.c.bf16 %v4497_v0, %v4493_v22  ;;  %v4273_v32 = vpop.f32.mrb[47].mxu0  ;;  %v4499_v44 = vpop.f32.mrb[47].mxu1 }
 0x457   : > { %v4555_v56 = vpack.c.bf16 %v4273_v32, %v4269_v34  ;;  %v4557_v3 = vpack.c.bf16 %v4499_v44, %v4495_v43 }
 0x458   : > { %4625 = vst [vmem:[%s13516_s12 + $0x60] sm:$0xff] %v4554_v9  ;;  %4627 = vst [vmem:[%s13516_s12 + $0x70] sm:$0xff] %v4556_v21 }
 0x459   : > { %4626 = vst [vmem:[%s13516_s12 + $0x68] sm:$0xff] %v4555_v56  ;;  %4628 = vst [vmem:[%s13516_s12 + $0x78] sm:$0xff] %v4557_v3 }
 0x45b   : > { %v4277_v14 = vpop.f32.mrb[48].mxu0  ;;  %v4503_v24 = vpop.f32.mrb[48].mxu1 }
 0x45c   : > { %v4279_v1 = vpop.f32.mrb[49].mxu0  ;;  %v4505_v4 = vpop.f32.mrb[49].mxu1 }
 0x45d   : > { %v4281_v6 = vpop.f32.mrb[50].mxu0  ;;  %v4507_v25 = vpop.f32.mrb[50].mxu1 }
 0x45e   : > { %v4558_v7 = vpack.c.bf16 %v4281_v6, %v4277_v14  ;;  %v4560_v8 = vpack.c.bf16 %v4507_v25, %v4503_v24  ;;  %v4283_v11 = vpop.f32.mrb[51].mxu0  ;;  %v4509_v30 = vpop.f32.mrb[51].mxu1 }
 0x45f   : > { %v4559_v13 = vpack.c.bf16 %v4283_v11, %v4279_v1  ;;  %v4561_v16 = vpack.c.bf16 %v4509_v30, %v4505_v4 }
 0x460   : > { %4629 = vst [vmem:[%s13516_s12 + $0x80] sm:$0xff] %v4558_v7  ;;  %4631 = vst [vmem:[%s13516_s12 + $0x90] sm:$0xff] %v4560_v8 }
 0x461   : > { %4630 = vst [vmem:[%s13516_s12 + $0x88] sm:$0xff] %v4559_v13  ;;  %4632 = vst [vmem:[%s13516_s12 + $0x98] sm:$0xff] %v4561_v16 }
 0x463   : > { %v4287_v18 = vpop.f32.mrb[52].mxu0  ;;  %v4513_v39 = vpop.f32.mrb[52].mxu1 }
 0x464   : > { %v4289_v20 = vpop.f32.mrb[53].mxu0  ;;  %v4515_v23 = vpop.f32.mrb[53].mxu1 }
 0x465   : > { %v4291_v26 = vpop.f32.mrb[54].mxu0  ;;  %v4517_v45 = vpop.f32.mrb[54].mxu1 }
 0x466   : > { %v4562_v28 = vpack.c.bf16 %v4291_v26, %v4287_v18  ;;  %v4564_v29 = vpack.c.bf16 %v4517_v45, %v4513_v39  ;;  %v4293_v31 = vpop.f32.mrb[55].mxu0  ;;  %v4519_v52 = vpop.f32.mrb[55].mxu1 }
 0x467   : > { %v4563_v33 = vpack.c.bf16 %v4293_v31, %v4289_v20  ;;  %v4565_v35 = vpack.c.bf16 %v4519_v52, %v4515_v23 }
 0x468   : > { %4633 = vst [vmem:[%s13516_s12 + $0xa0] sm:$0xff] %v4562_v28  ;;  %4635 = vst [vmem:[%s13516_s12 + $0xb0] sm:$0xff] %v4564_v29 }
 0x469   : > { %4634 = vst [vmem:[%s13516_s12 + $0xa8] sm:$0xff] %v4563_v33  ;;  %4636 = vst [vmem:[%s13516_s12 + $0xb8] sm:$0xff] %v4565_v35 }
 0x46b   : > { %v4297_v37 = vpop.f32.mrb[56].mxu0  ;;  %v4523_v61 = vpop.f32.mrb[56].mxu1 }
 0x46c   : > { %v4299_v38 = vpop.f32.mrb[57].mxu0  ;;  %v4525_v40 = vpop.f32.mrb[57].mxu1 }
 0x46d   : > { %v4301_v41 = vpop.f32.mrb[58].mxu0  ;;  %v4527_v2 = vpop.f32.mrb[58].mxu1 }
 0x46e   : > { %v4566_v46 = vpack.c.bf16 %v4301_v41, %v4297_v37  ;;  %v4568_v47 = vpack.c.bf16 %v4527_v2, %v4523_v61  ;;  %v4303_v48 = vpop.f32.mrb[59].mxu0  ;;  %v4529_v12 = vpop.f32.mrb[59].mxu1 }
 0x46f   : > { %v4567_v49 = vpack.c.bf16 %v4303_v48, %v4299_v38  ;;  %v4569_v50 = vpack.c.bf16 %v4529_v12, %v4525_v40 }
 0x470   : > { %4637 = vst [vmem:[%s13516_s12 + $0xc0] sm:$0xff] %v4566_v46  ;;  %4639 = vst [vmem:[%s13516_s12 + $0xd0] sm:$0xff] %v4568_v47 }
 0x471   : > { %4638 = vst [vmem:[%s13516_s12 + $0xc8] sm:$0xff] %v4567_v49  ;;  %4640 = vst [vmem:[%s13516_s12 + $0xd8] sm:$0xff] %v4569_v50 }
 0x473   : > { %v4307_v53 = vpop.f32.mrb[60].mxu0  ;;  %v4533_v19 = vpop.f32.mrb[60].mxu1 }
 0x474   : > { %v4309_v51 = vpop.f32.mrb[61].mxu0  ;;  %v4535_v57 = vpop.f32.mrb[61].mxu1 }
 0x475   : > { %v4311_v58 = vpop.f32.mrb[62].mxu0  ;;  %v4537_v27 = vpop.f32.mrb[62].mxu1 }
 0x476   : > { %v4570_v10 = vpack.c.bf16 %v4311_v58, %v4307_v53  ;;  %v4572_v59 = vpack.c.bf16 %v4537_v27, %v4533_v19  ;;  %v4313_v62 = vpop.f32.mrb[63].mxu0  ;;  %v4539_v36 = vpop.f32.mrb[63].mxu1 }
 0x477   : > { %v4571_v63 = vpack.c.bf16 %v4313_v62, %v4309_v51  ;;  %v4573_v17 = vpack.c.bf16 %v4539_v36, %v4535_v57 }
 0x478   : > { %4641 = vst [vmem:[%s13516_s12 + $0xe0] sm:$0xff] %v4570_v10  ;;  %4643 = vst [vmem:[%s13516_s12 + $0xf0] sm:$0xff] %v4572_v59 }
 0x479   : > { %4642 = vst [vmem:[%s13516_s12 + $0xe8] sm:$0xff] %v4571_v63  ;;  %4644 = vst [vmem:[%s13516_s12 + $0xf8] sm:$0xff] %v4573_v17 }
 0x47a PF: > { %s15806_s14 = sld [smem:[#allocation23_spill]]  ;;  %s13552_s22 = sshra.s32 %s9824_s9, 4  ;;  %v4716_v42 = vld [vmem:[#allocation2] sm:$0xff]  ;;  %v12463_v30 = vmov 0   ;;  %v13622_v31 = vld [vmem:[#allocation3 + $0x10] sm:$0xff]  ;;  %vm5141_vm1 = vcmask 7168  }
 0x47b   : > { %s10228_s5 = sshll.u32 %s13552_s22, 5  ;;  %10375 = vmatprep.mubr.bf16.mxu0 %v4716_v42  ;;  %v4717_v0 = vld [vmem:[#allocation2 + $0x20] sm:$0xff]  ;;  %11604 = vset.pattern.permute.xlu1 %v12463_v30  ;;  %v13632_v38 = vld [vmem:[#allocation3 + $0x18] sm:$0xff]  ;;  %v13640_v2 = vld [vmem:[#allocation3 + $0x8] sm:$0xff] }
 0x47c   : > { %s13557_s7 = scalar_lea.vmem [#allocation6], %s10228_s5  ;;  %v4718_v9 = vld [vmem:[#allocation2 + $0x40] sm:$0xff]  ;;  %11603 = vset.pattern.permute.xlu0 %v12463_v30  ;;  %s13617_s18 = scalar_lea.vmem [#allocation7], %s10228_s5  ;;  %v13658_v19 = vld [vmem:[#allocation3 + $0x30] sm:$0xff]  ;;  %v13665_v57 = vld [vmem:[#allocation3 + $0x38] sm:$0xff] }
 0x47d   : > { %v4650_v54 = vld [vmem:[%s13557_s7] sm:$0xff]  ;;  %15807 = vst [vmem:[#allocation32_spill] sm:$0xff] %v13658_v19  ;;  %15808 = vst [vmem:[#allocation33_spill] sm:$0xff] %v13665_v57  ;;  %v13681_v17 = vld [vmem:[#allocation3 + $0x28] sm:$0xff] }
 0x47e   : > { %v4654_v60 = vld [vmem:[%s13557_s7 + $0x20] sm:$0xff]  ;;  %10359 = vmatprep.subr.bf16.mxu0 %v4650_v54  ;;  %v13717_v30 = vld [vmem:[#allocation3 + $0x48] sm:$0xff] }
 0x47f   : > { %10360 = vmatpush3.bf16.xpose.msra.mxu0 %v4650_v54  ;;  %v4658_v5 = vld [vmem:[%s13557_s7 + $0x40] sm:$0xff]  ;;  %15816 = vst [vmem:[#allocation41_spill] sm:$0xff] %v13717_v30 }
 0x480   : > { %10361 = vmatprep.subr.bf16.mxu0 %v4654_v60  ;;  %v4662_v15 = vld [vmem:[%s13557_s7 + $0x60] sm:$0xff]  ;;  %p10088_p0 = scmp.ne.s32.totalorder %s15806_s14, 1 }
 0x481   : > { %v4666_v22 = vld [vmem:[%s13557_s7 + $0x80] sm:$0xff] }
 0x482   : > { %v4670_v34 = vld [vmem:[%s13557_s7 + $0xa0] sm:$0xff] }
 0x483   : > { %v4674_v43 = vld [vmem:[%s13557_s7 + $0xc0] sm:$0xff] }
 0x484   : > { %v4678_v55 = vld [vmem:[%s13557_s7 + $0xe0] sm:$0xff] }
 0x485   : > { %v4719_v21 = vld [vmem:[#allocation2 + $0x60] sm:$0xff] }
 0x486   : > { %v4720_v32 = vld [vmem:[#allocation2 + $0x80] sm:$0xff] }
 0x487   : > { %10362 = vmatpush3.bf16.xpose.msra.mxu0 %v4654_v60  ;;  %v4721_v44 = vld [vmem:[#allocation2 + $0xa0] sm:$0xff] }
 0x488   : > { %10363 = vmatprep.subr.bf16.mxu0 %v4658_v5  ;;  %v4722_v56 = vld [vmem:[#allocation2 + $0xc0] sm:$0xff] }
 0x489   : > { %v4723_v3 = vld [vmem:[#allocation2 + $0xe0] sm:$0xff] }
 0x48a   : > { %v4684_v45 = vld [vmem:[%s13617_s18] sm:$0xff] }
 0x48b   : > { %v4688_v28 = vld [vmem:[%s13617_s18 + $0x20] sm:$0xff]  ;;  %10391 = vmatprep.subr.bf16.mxu1 %v4684_v45 }
 0x48c   : > { %10392 = vmatpush3.bf16.msra.mxu1 %v4684_v45  ;;  %v4692_v29 = vld [vmem:[%s13617_s18 + $0x40] sm:$0xff] }
 0x48d   : > { %10393 = vmatprep.subr.bf16.mxu1 %v4688_v28  ;;  %v13624_v52 = vld [vmem:[#allocation3] sm:$0xff] }
 0x48e   : > { %v4696_v40 = vld [vmem:[%s13617_s18 + $0x60] sm:$0xff] }
 0x48f   : > { %10364 = vmatpush3.bf16.xpose.msra.mxu0 %v4658_v5  ;;  %v4700_v50 = vld [vmem:[%s13617_s18 + $0x80] sm:$0xff] }
 0x490   : > { %10365 = vmatprep.subr.bf16.mxu0 %v4662_v15  ;;  %10394 = vmatpush3.bf16.msra.mxu1 %v4688_v28  ;;  %v4704_v59 = vld [vmem:[%s13617_s18 + $0xa0] sm:$0xff] }
 0x491   : > { %10395 = vmatprep.subr.bf16.mxu1 %v4692_v29  ;;  %v13674_v36 = vld [vmem:[#allocation3 + $0x20] sm:$0xff] }
 0x494   : > { %10396 = vmatpush3.bf16.msra.mxu1 %v4692_v29 }
 0x495   : > { %10397 = vmatprep.subr.bf16.mxu1 %v4696_v40 }
 0x497   : > { %10366 = vmatpush3.bf16.xpose.msra.mxu0 %v4662_v15  ;;  %v4708_v15 = vld [vmem:[%s13617_s18 + $0xc0] sm:$0xff] }
 0x498   : > { %10367 = vmatprep.subr.bf16.mxu0 %v4666_v22  ;;  %10398 = vmatpush3.bf16.msra.mxu1 %v4696_v40 }
 0x499   : > { %10399 = vmatprep.subr.bf16.mxu1 %v4700_v50 }
 0x49c   : > { %10400 = vmatpush3.bf16.msra.mxu1 %v4700_v50 }
 0x49d   : > { %10401 = vmatprep.subr.bf16.mxu1 %v4704_v59 }
 0x49f   : > { %10368 = vmatpush3.bf16.xpose.msra.mxu0 %v4666_v22 }
 0x4a0   : > { %10369 = vmatprep.subr.bf16.mxu0 %v4670_v34  ;;  %10402 = vmatpush3.bf16.msra.mxu1 %v4704_v59 }
 0x4a1   : > { %10403 = vmatprep.subr.bf16.mxu1 %v4708_v15 }
 0x4a4   : > { %10404 = vmatpush3.bf16.msra.mxu1 %v4708_v15  ;;  %v13753_v15 = vld [vmem:[#allocation3 + $0x60] sm:$0xff] }
 0x4a5   : > { %15823 = vst [vmem:[#allocation48_spill] sm:$0xff] %v13753_v15 }
 0x4a7   : > { %10370 = vmatpush3.bf16.xpose.msra.mxu0 %v4670_v34  ;;  %v13694_v34 = vld [vmem:[#allocation3 + $0x50] sm:$0xff] }
 0x4a8   : > { %10371 = vmatprep.subr.bf16.mxu0 %v4674_v43  ;;  %15811 = vst [vmem:[#allocation36_spill] sm:$0xff] %v13694_v34 }
 0x4af   : > { %10372 = vmatpush3.bf16.xpose.msra.mxu0 %v4674_v43 }
 0x4b0   : > { %10373 = vmatprep.subr.bf16.mxu0 %v4678_v55 }
 0x4b7   : > { %10374 = vmatpush3.bf16.xpose.msra.mxu0 %v4678_v55  ;;  %v13701_v55 = vld [vmem:[#allocation3 + $0x58] sm:$0xff] }
 0x4b8   : > { %15812 = vst [vmem:[#allocation37_spill] sm:$0xff] %v13701_v55 }
 0x4be   : > { %10376 = vmatmul.mubr.bf16.vlgmr.msra.gmra.mrb[0].mxu0 %v4717_v0 }
 0x4bf   : > { %10379 = vmatprep.mubr.bf16.mxu0 %v4718_v9 }
 0x4c6   : > { %10380 = vmatmul.mubr.bf16.gmra.mrb[4].mxu0 %v4719_v21 }
 0x4c7   : > { %10383 = vmatprep.mubr.bf16.mxu0 %v4720_v32 }
 0x4ce   : > { %10384 = vmatmul.mubr.bf16.gmra.mrb[8].mxu0 %v4721_v44  ;;  %v4712_v44 = vld [vmem:[%s13617_s18 + $0xe0] sm:$0xff] }
 0x4cf   : > { %10387 = vmatprep.mubr.bf16.mxu0 %v4722_v56  ;;  %10405 = vmatprep.subr.bf16.mxu1 %v4712_v44 }
 0x4d0   : > { %10406 = vmatpush3.bf16.msra.mxu1 %v4712_v44 }
 0x4d6   : > { %10388 = vmatmul.mubr.bf16.gmra.mrb[12].mxu0 %v4723_v3  ;;  %v13714_v3 = vld [vmem:[#allocation3 + $0x40] sm:$0xff] }
 0x4d7   : > { %15815 = vst [vmem:[#allocation40_spill] sm:$0xff] %v13714_v3 }
 0x591   : > { %v13567_v14 = vpop.f32.mrb[0].mxu0 }
 0x592   : > { %4841 = vmax.xlane.f32.xlu1 %v13567_v14  ;;  %v13570_v24 = vpop.f32.mrb[1].mxu0 }
 0x593   : > { %4837 = vmax.xlane.f32.xlu0 %v13570_v24  ;;  %v13573_v1 = vpop.f32.mrb[2].mxu0 }
 0x594   : > { %v13575_v4 = vpop.f32.mrb[3].mxu0 }
 0x596   : > { %4843 = vmax.xlane.f32.xlu1 %v13573_v1 }
 0x597   : > { %4839 = vmax.xlane.f32.xlu0 %v13575_v4 }
 0x599   : > { %v13579_v6 = vpop.f32.mrb[4].mxu0 }
 0x59a   : > { %v13581_v25 = vpop.f32.mrb[5].mxu0 }
 0x59b   : > { %v13583_v7 = vpop.f32.mrb[6].mxu0  ;;  %4849 = vmax.xlane.f32.xlu0 %v13579_v6 }
 0x59c   : > { %4851 = vmax.xlane.f32.xlu1 %v13583_v7  ;;  %v13587_v8 = vpop.f32.mrb[7].mxu0 }
 0x59f   : > { %4845 = vmax.xlane.f32.xlu0 %v13581_v25 }
 0x5a0   : > { %4847 = vmax.xlane.f32.xlu1 %v13587_v8 }
 0x5a1   : > { %v13591_v11 = vpop.f32.mrb[8].mxu0 }
 0x5a2   : > { %v13593_v13 = vpop.f32.mrb[9].mxu0 }
 0x5a3   : > { %v13595_v16 = vpop.f32.mrb[10].mxu0  ;;  %4857 = vmax.xlane.f32.xlu0 %v13591_v11 }
 0x5a4   : > { %4859 = vmax.xlane.f32.xlu1 %v13595_v16  ;;  %v13599_v18 = vpop.f32.mrb[11].mxu0 }
 0x5a7   : > { %4853 = vmax.xlane.f32.xlu0 %v13593_v13 }
 0x5a8   : > { %4855 = vmax.xlane.f32.xlu1 %v13599_v18 }
 0x5a9   : > { %v13603_v39 = vpop.f32.mrb[12].mxu0 }
 0x5aa   : > { %v13605_v20 = vpop.f32.mrb[13].mxu0 }
 0x5ab   : > { %v13607_v23 = vpop.f32.mrb[14].mxu0  ;;  %4865 = vmax.xlane.f32.xlu0 %v13603_v39 }
 0x5ac   : > { %4867 = vmax.xlane.f32.xlu1 %v13607_v23  ;;  %v13611_v26 = vpop.f32.mrb[15].mxu0 }
 0x5af   : > { %4861 = vmax.xlane.f32.xlu0 %v13605_v20 }
 0x5b0   : > { %4863 = vmax.xlane.f32.xlu1 %v13611_v26 }
 0x61f   : > { %v4842_v33 = vpop.xlane.xlu1 %4841 }
 0x620   : > { %v13627_v35 = vmax.f32 %v13622_v31, %v4842_v33  ;;  %v4838_v37 = vpop.xlane.xlu0 %4837 }
 0x621   : > { %v13630_v61 = vmax.f32 %v13624_v52, %v4838_v37 }
 0x622   : > { %5409 = vst.msk [vmem:[#allocation3 + $0x10] sm:$0xff] %vm5141_vm1, %v13627_v35  ;;  %4945 = vperm.xlu1 %11604, %v13627_v35  }
 0x623   : > { %5407 = vst.msk [vmem:[#allocation3] sm:$0xff] %vm5141_vm1, %v13630_v61  ;;  %v4844_v47 = vpop.xlane.xlu1 %4843  ;;  %4935 = vperm.xlu0 %11603, %v13630_v61  }
 0x624   : > { %v13648_v48 = vmax.f32 %v13632_v38, %v4844_v47  ;;  %v4840_v12 = vpop.xlane.xlu0 %4839  ;;  %v13733_v47 = vld [vmem:[#allocation3 + $0x70] sm:$0xff] }
 0x625   : > { %v13651_v49 = vmax.f32 %v13640_v2, %v4840_v12  ;;  %15819 = vst [vmem:[#allocation44_spill] sm:$0xff] %v13733_v47  ;;  %v13736_v12 = vld [vmem:[#allocation3 + $0x78] sm:$0xff] }
 0x626   : > { %5410 = vst.msk [vmem:[#allocation3 + $0x18] sm:$0xff] %vm5141_vm1, %v13648_v48  ;;  %15820 = vst [vmem:[#allocation45_spill] sm:$0xff] %v13736_v12 }
 0x627   : > { %5408 = vst.msk [vmem:[#allocation3 + $0x8] sm:$0xff] %vm5141_vm1, %v13651_v49  ;;  %4940 = vperm.xlu1 %11604, %v13651_v49  }
 0x628   : > { %v4850_v58 = vpop.xlane.xlu0 %4849 }
 0x629   : > { %v4852_v27 = vpop.xlane.xlu1 %4851  ;;  %v13668_v10 = vmax.f32 %v13658_v19, %v4850_v58  ;;  %v4710_v19 = vld [vmem:[%s13617_s18 + $0xd0] sm:$0xff] }
 0x62a   : > { %v13672_v62 = vmax.f32 %v13665_v57, %v4852_v27 }
 0x62b   : > { %15809 = vst [vmem:[#allocation34_spill] sm:$0xff] %v13668_v10  ;;  %4950 = vperm.xlu1 %11604, %v13648_v48   ;;  %5413 = vst.msk [vmem:[#allocation3 + $0x30] sm:$0xff] %vm5141_vm1, %v13668_v10 }
 0x62c   : > { %15810 = vst [vmem:[#allocation35_spill] sm:$0xff] %v13672_v62  ;;  %5414 = vst.msk [vmem:[#allocation3 + $0x38] sm:$0xff] %vm5141_vm1, %v13672_v62  ;;  %v4846_v54 = vpop.xlane.xlu0 %4845 }
 0x62d   : > { %v4848_v60 = vpop.xlane.xlu1 %4847  ;;  %v13688_v5 = vmax.f32 %v13674_v36, %v4846_v54 }
 0x62e   : > { %v13692_v22 = vmax.f32 %v13681_v17, %v4848_v60 }
 0x62f   : > { %4965 = vperm.xlu1 %11604, %v13668_v10   ;;  %5411 = vst.msk [vmem:[#allocation3 + $0x20] sm:$0xff] %vm5141_vm1, %v13688_v5 }
 0x630   : > { %5412 = vst.msk [vmem:[#allocation3 + $0x28] sm:$0xff] %vm5141_vm1, %v13692_v22  ;;  %v4858_v9 = vpop.xlane.xlu0 %4857 }
 0x631   : > { %v4860_v21 = vpop.xlane.xlu1 %4859  ;;  %v13708_v32 = vmax.f32 %v13694_v34, %v4858_v9  ;;  %v13756_v9 = vld [vmem:[%s13557_s7 + $0x8] sm:$0xff]  ;;  %v13954_v34 = vld [vmem:[#allocation3 + $0x98] sm:$0xff] }
 0x632   : > { %v13712_v56 = vmax.f32 %v13701_v55, %v4860_v21  ;;  %v13759_v21 = vld [vmem:[#allocation3 + $0x68] sm:$0xff]  ;;  %10423 = vmatprep.subr.bf16.mxu1 %v13756_v9  ;;  %15846 = vst [vmem:[#allocation71_spill] sm:$0xff] %v13954_v34 }
 0x633   : > { %15813 = vst [vmem:[#allocation38_spill] sm:$0xff] %v13708_v32  ;;  %4955 = vperm.xlu1 %11604, %v13688_v5   ;;  %5417 = vst.msk [vmem:[#allocation3 + $0x50] sm:$0xff] %vm5141_vm1, %v13708_v32  ;;  %v4709_v55 = vld [vmem:[%s13617_s18 + $0xc8] sm:$0xff] }
 0x634   : > { %15814 = vst [vmem:[#allocation39_spill] sm:$0xff] %v13712_v56  ;;  %5418 = vst.msk [vmem:[#allocation3 + $0x58] sm:$0xff] %vm5141_vm1, %v13712_v56  ;;  %v4854_v29 = vpop.xlane.xlu0 %4853 }
 0x635   : > { %v4856_v33 = vpop.xlane.xlu1 %4855  ;;  %v13728_v37 = vmax.f32 %v13714_v3, %v4854_v29  ;;  %15824 = vst [vmem:[#allocation49_spill] sm:$0xff] %v13759_v21 }
 0x636   : > { %v13731_v40 = vmax.f32 %v13717_v30, %v4856_v33  ;;  %v14270_v30 = vld [vmem:[#allocation3 + $0x100] sm:$0xff] }
 0x637   : > { %15817 = vst [vmem:[#allocation42_spill] sm:$0xff] %v13728_v37  ;;  %4960 = vperm.xlu1 %11604, %v13692_v22   ;;  %5415 = vst.msk [vmem:[#allocation3 + $0x40] sm:$0xff] %vm5141_vm1, %v13728_v37 }
 0x638   : > { %15818 = vst [vmem:[#allocation43_spill] sm:$0xff] %v13731_v40  ;;  %5416 = vst.msk [vmem:[#allocation3 + $0x48] sm:$0xff] %vm5141_vm1, %v13731_v40  ;;  %4980 = vperm.xlu0 %11603, %v13731_v40   ;;  %v4866_v27 = vpop.xlane.xlu0 %4865 }
 0x639   : > { %v4868_v59 = vpop.xlane.xlu1 %4867  ;;  %v13748_v54 = vmax.f32 %v13733_v47, %v4866_v27  ;;  %v4689_v47 = vld [vmem:[%s13617_s18 + $0x28] sm:$0xff]  ;;  %15901 = vst [vmem:[#allocation126_spill] sm:$0xff] %v14270_v30 }
 0x63a   : > { %v13751_v60 = vmax.f32 %v13736_v12, %v4868_v59  ;;  %v4697_v12 = vld [vmem:[%s13617_s18 + $0x68] sm:$0xff] }
 0x63b   : > { %15821 = vst [vmem:[#allocation46_spill] sm:$0xff] %v13748_v54  ;;  %4970 = vperm.xlu1 %11604, %v13672_v62   ;;  %5421 = vst.msk [vmem:[#allocation3 + $0x70] sm:$0xff] %vm5141_vm1, %v13748_v54  ;;  %v4714_v62 = vld [vmem:[%s13617_s18 + $0xf0] sm:$0xff] }
 0x63c   : > { %15822 = vst [vmem:[#allocation47_spill] sm:$0xff] %v13751_v60  ;;  %5422 = vst.msk [vmem:[#allocation3 + $0x78] sm:$0xff] %vm5141_vm1, %v13751_v60  ;;  %4990 = vperm.xlu0 %11603, %v13712_v56   ;;  %v4862_v33 = vpop.xlane.xlu0 %4861  ;;  %v13965_v56 = vld [vmem:[#allocation3 + $0x90] sm:$0xff] }
 0x63d   : > { %v4864_v27 = vpop.xlane.xlu1 %4863  ;;  %v13772_v59 = vmax.f32 %v13753_v15, %v4862_v33  ;;  %15848 = vst [vmem:[#allocation73_spill] sm:$0xff] %v13965_v56 }
 0x63e   : > { %v13775_v44 = vmax.f32 %v13759_v21, %v4864_v27 }
 0x63f   : > { %15825 = vst [vmem:[#allocation50_spill] sm:$0xff] %v13772_v59  ;;  %4975 = vperm.xlu1 %11604, %v13728_v37   ;;  %5419 = vst.msk [vmem:[#allocation3 + $0x60] sm:$0xff] %vm5141_vm1, %v13772_v59  ;;  %v4713_v37 = vld [vmem:[%s13617_s18 + $0xe8] sm:$0xff] }
 0x640   : > { %15826 = vst [vmem:[#allocation51_spill] sm:$0xff] %v13775_v44  ;;  %5420 = vst.msk [vmem:[#allocation3 + $0x68] sm:$0xff] %vm5141_vm1, %v13775_v44  ;;  %5000 = vperm.xlu0 %11603, %v13775_v44   ;;  %v13949_v44 = vld [vmem:[#allocation3 + $0x88] sm:$0xff] }
 0x641   : > { %15844 = vst [vmem:[#allocation69_spill] sm:$0xff] %v13949_v44 }
 0x643   : > { %4985 = vperm.xlu1 %11604, %v13708_v32  }
 0x644   : > { %5010 = vperm.xlu0 %11603, %v13751_v60   ;;  %v4693_v60 = vld [vmem:[%s13617_s18 + $0x48] sm:$0xff] }
 0x647   : > { %4995 = vperm.xlu1 %11604, %v13772_v59   ;;  %v13947_v59 = vld [vmem:[#allocation3 + $0x80] sm:$0xff] }
 0x648   : > { %15843 = vst [vmem:[#allocation68_spill] sm:$0xff] %v13947_v59 }
 0x64b   : > { %5005 = vperm.xlu1 %11604, %v13748_v54   ;;  %v4685_v54 = vld [vmem:[%s13617_s18 + $0x8] sm:$0xff] }
 0x64c   : > { %10455 = vmatprep.subr.bf16.mxu0 %v4685_v54 }
 0x64d   : > { %10456 = vmatpush3.bf16.msra.mxu0 %v4685_v54 }
 0x64e   : > { %10457 = vmatprep.subr.bf16.mxu0 %v4689_v47 }
 0x651   : > { %10458 = vmatpush3.bf16.msra.mxu0 %v4689_v47 }
 0x652   : > { %10459 = vmatprep.subr.bf16.mxu0 %v4693_v60 }
 0x655   : > { %10460 = vmatpush3.bf16.msra.mxu0 %v4693_v60 }
 0x656   : > { %10461 = vmatprep.subr.bf16.mxu0 %v4697_v12 }
 0x659   : > { %10462 = vmatpush3.bf16.msra.mxu0 %v4697_v12  ;;  %v4701_v12 = vld [vmem:[%s13617_s18 + $0x88] sm:$0xff] }
 0x65a   : > { %10463 = vmatprep.subr.bf16.mxu0 %v4701_v12 }
 0x65d   : > { %10464 = vmatpush3.bf16.msra.mxu0 %v4701_v12 }
 0x6a1   : > { %v4946_v33 = vpop.permute.xlu1 %4945 }
 0x6a2   : > { %v4936_v27 = vpop.permute.xlu0 %4935  ;;  %v5015_v28 = vsub.f32 %v13567_v14, %v4946_v33 }
 0x6a3   : > { %v5013_v45 = vsub.f32 %v13570_v24, %v4936_v27 }
 0x6a4   : > { %v5033_v42 = vmul.f32 1.442695, %v5015_v28 }
 0x6a5   : > { %v5029_v29 = vmul.f32 1.442695, %v5013_v45 }
 0x6a6   : > { %v4941_v50 = vpop.permute.xlu1 %4940 }
 0x6a7   : > { %v5014_v58 = vsub.f32 %v13575_v4, %v4941_v50  ;;  %11605 = vpow2.f32 %v5029_v29 }
 0x6a9   : > { %v5031_v63 = vmul.f32 1.442695, %v5014_v58 }
 0x6aa   : > { %v4951_v43 = vpop.permute.xlu1 %4950 }
 0x6ab   : > { %11607 = vpow2.f32 %v5031_v63  ;;  %v5016_v0 = vsub.f32 %v13573_v1, %v4951_v43 }
 0x6ac   : > { %11609 = vpow2.f32 %v5033_v42 }
 0x6ad   : > { %v5035_v41 = vmul.f32 1.442695, %v5016_v0 }
 0x6ae   : > { %v4966_v53 = vpop.permute.xlu1 %4965 }
 0x6af   : > { %11611 = vpow2.f32 %v5035_v41  ;;  %v5019_v4 = vsub.f32 %v13579_v6, %v4966_v53 }
 0x6b1   : > { %v13796_v27 = vpop.eup %11605 }
 0x6b2   : > { %v4956_v51 = vpop.permute.xlu1 %4955 }
 0x6b3   : > { %v5017_v24 = vsub.f32 %v13581_v25, %v4956_v51  ;;  %v5041_v51 = vmul.f32 1.442695, %v5019_v4 }
 0x6b5   : > { %v13798_v14 = vpop.eup %11607  ;;  %v5037_v45 = vmul.f32 1.442695, %v5017_v24 }
 0x6b6   : > { %v4961_v28 = vpop.permute.xlu1 %4960  ;;  %v5270_v63 = vpack.c.bf16 %v13798_v14, %v13796_v27  ;;  %v13804_v43 = vpop.eup %11609 }
 0x6b7   : > { %v5018_v1 = vsub.f32 %v13587_v8, %v4961_v28  ;;  %v4981_v42 = vpop.permute.xlu0 %4980  ;;  %11613 = vpow2.f32 %v5037_v45  ;;  %v4655_v8 = vld [vmem:[%s13557_s7 + $0x28] sm:$0xff] }
 0x6b8   : > { %10407 = vmatprep.mubr.bf16.mxu1 %v5270_v63  ;;  %v5022_v0 = vsub.f32 %v13599_v18, %v4981_v42 }
 0x6b9   : > { %v13806_v41 = vpop.eup %11611  ;;  %v5039_v25 = vmul.f32 1.442695, %v5018_v1 }
 0x6ba   : > { %v4971_v6 = vpop.permute.xlu1 %4970  ;;  %v5271_v53 = vpack.c.bf16 %v13806_v41, %v13804_v43  ;;  %v5047_v33 = vmul.f32 1.442695, %v5022_v0 }
 0x6bb   : > { %11615 = vpow2.f32 %v5039_v25  ;;  %v5020_v50 = vsub.f32 %v13583_v7, %v4971_v6  ;;  %v4991_v58 = vpop.permute.xlu0 %4990  ;;  %v4659_v25 = vld [vmem:[%s13557_s7 + $0x48] sm:$0xff] }
 0x6bc   : > { %10408 = vmatmul.mubr.bf16.vlgmr.msra.gmra.mrb[0].mxu1 %v5271_v53  ;;  %11617 = vpow2.f32 %v5041_v51  ;;  %v5024_v24 = vsub.f32 %v13595_v16, %v4991_v58 }
 0x6bd   : > { %v5043_v29 = vmul.f32 1.442695, %v5020_v50  ;;  %10424 = vmatpush3.bf16.xpose.msra.mxu1 %v13756_v9 }
 0x6be   : > { %v4976_v4 = vpop.permute.xlu1 %4975  ;;  %10425 = vmatprep.subr.bf16.mxu1 %v4655_v8  ;;  %v5051_v7 = vmul.f32 1.442695, %v5024_v24 }
 0x6bf   : > { %11619 = vpow2.f32 %v5043_v29  ;;  %v5021_v18 = vsub.f32 %v13593_v13, %v4976_v4  ;;  %v5001_v45 = vpop.permute.xlu0 %5000  ;;  %v4663_v4 = vld [vmem:[%s13557_s7 + $0x68] sm:$0xff] }
 0x6c0   : > { %11621 = vpow2.f32 %v5047_v33  ;;  %v5026_v63 = vsub.f32 %v13611_v26, %v5001_v45 }
 0x6c1   : > { %v5045_v28 = vmul.f32 1.442695, %v5021_v18  ;;  %v13819_v51 = vpop.eup %11613 }
 0x6c2   : > { %v4986_v1 = vpop.permute.xlu1 %4985  ;;  %v5055_v13 = vmul.f32 1.442695, %v5026_v63 }
 0x6c3   : > { %11623 = vpow2.f32 %v5045_v28  ;;  %v5023_v9 = vsub.f32 %v13591_v11, %v4986_v1  ;;  %v5011_v42 = vpop.permute.xlu0 %5010  ;;  %v4667_v1 = vld [vmem:[%s13557_s7 + $0x88] sm:$0xff] }
 0x6c4   : > { %11625 = vpow2.f32 %v5051_v7  ;;  %v5028_v6 = vsub.f32 %v13607_v23, %v5011_v42 }
 0x6c5   : > { %v13821_v16 = vpop.eup %11615  ;;  %v5049_v0 = vmul.f32 1.442695, %v5023_v9  ;;  %10426 = vmatpush3.bf16.xpose.msra.mxu1 %v4655_v8 }
 0x6c6   : > { %v4996_v53 = vpop.permute.xlu1 %4995  ;;  %v5272_v26 = vpack.c.bf16 %v13821_v16, %v13819_v51  ;;  %10427 = vmatprep.subr.bf16.mxu1 %v4659_v25  ;;  %v13827_v50 = vpop.eup %11617  ;;  %v5059_v8 = vmul.f32 1.442695, %v5028_v6 }
 0x6c7   : > { %11627 = vpow2.f32 %v5049_v0  ;;  %v5025_v11 = vsub.f32 %v13605_v20, %v4996_v53  ;;  %v5423_v53 = vld [vmem:[#allocation2 + $0x8] sm:$0xff] }
 0x6c8   : > { %10411 = vmatprep.mubr.bf16.mxu1 %v5272_v26  ;;  %11629 = vpow2.f32 %v5055_v13  ;;  %v4671_v26 = vld [vmem:[%s13557_s7 + $0xa8] sm:$0xff] }
 0x6c9   : > { %v13829_v58 = vpop.eup %11619  ;;  %v5053_v29 = vmul.f32 1.442695, %v5025_v11  ;;  %v4675_v11 = vld [vmem:[%s13557_s7 + $0xc8] sm:$0xff] }
 0x6ca   : > { %v5006_v33 = vpop.permute.xlu1 %5005  ;;  %v5273_v23 = vpack.c.bf16 %v13829_v58, %v13827_v50  ;;  %v13835_v18 = vpop.eup %11621 }
 0x6cb   : > { %11631 = vpow2.f32 %v5053_v29  ;;  %v5027_v24 = vsub.f32 %v13603_v39, %v5006_v33  ;;  %v4679_v29 = vld [vmem:[%s13557_s7 + $0xe8] sm:$0xff] }
 0x6cc   : > { %10412 = vmatmul.mubr.bf16.gmra.mrb[4].mxu1 %v5273_v23  ;;  %11633 = vpow2.f32 %v5059_v8  ;;  %v5424_v8 = vld [vmem:[#allocation2 + $0x28] sm:$0xff] }
 0x6cd   : > { %v13837_v20 = vpop.eup %11623  ;;  %v5057_v45 = vmul.f32 1.442695, %v5027_v24  ;;  %10428 = vmatpush3.bf16.xpose.msra.mxu1 %v4659_v25  ;;  %v5425_v33 = vld [vmem:[#allocation2 + $0x48] sm:$0xff] }
 0x6ce   : > { %v5274_v28 = vpack.c.bf16 %v13835_v18, %v13837_v20  ;;  %10429 = vmatprep.subr.bf16.mxu1 %v4663_v4  ;;  %v13841_v7 = vpop.eup %11625  ;;  %v5426_v23 = vld [vmem:[#allocation2 + $0x68] sm:$0xff] }
 0x6cf   : > { %11635 = vpow2.f32 %v5057_v45  ;;  %v5427_v24 = vld [vmem:[#allocation2 + $0x88] sm:$0xff] }
 0x6d0   : > { %10415 = vmatprep.mubr.bf16.mxu1 %v5274_v28  ;;  %v5429_v45 = vld [vmem:[#allocation2 + $0xc8] sm:$0xff] }
 0x6d1   : > { %v13843_v63 = vpop.eup %11627  ;;  %v5430_v28 = vld [vmem:[#allocation2 + $0xe8] sm:$0xff] }
 0x6d2   : > { %v5275_v39 = vpack.c.bf16 %v13841_v7, %v13843_v63  ;;  %v13848_v9 = vpop.eup %11629 }
 0x6d4   : > { %10416 = vmatmul.mubr.bf16.gmra.mrb[8].mxu1 %v5275_v39 }
 0x6d5   : > { %v13850_v42 = vpop.eup %11631  ;;  %10430 = vmatpush3.bf16.xpose.msra.mxu1 %v4663_v4  ;;  %v5428_v4 = vld [vmem:[#allocation2 + $0xa8] sm:$0xff] }
 0x6d6   : > { %v5276_v25 = vpack.c.bf16 %v13848_v9, %v13850_v42  ;;  %10431 = vmatprep.subr.bf16.mxu1 %v4667_v1  ;;  %v13854_v0 = vpop.eup %11633 }
 0x6d8   : > { %10419 = vmatprep.mubr.bf16.mxu1 %v5276_v25 }
 0x6d9   : > { %v13856_v13 = vpop.eup %11635 }
 0x6da   : > { %v5277_v6 = vpack.c.bf16 %v13854_v0, %v13856_v13 }
 0x6dc   : > { %10420 = vmatmul.mubr.bf16.gmra.mrb[12].mxu1 %v5277_v6 }
 0x6dd   : > { %10432 = vmatpush3.bf16.xpose.msra.mxu1 %v4667_v1  ;;  %10439 = vmatprep.mubr.bf16.mxu1 %v5423_v53 }
 0x6de   : > { %10433 = vmatprep.subr.bf16.mxu1 %v4671_v26 }
 0x6e5   : > { %10434 = vmatpush3.bf16.xpose.msra.mxu1 %v4671_v26 }
 0x6e6   : > { %10435 = vmatprep.subr.bf16.mxu1 %v4675_v11 }
 0x6ed   : > { %10436 = vmatpush3.bf16.xpose.msra.mxu1 %v4675_v11 }
 0x6ee   : > { %10437 = vmatprep.subr.bf16.mxu1 %v4679_v29 }
 0x6f5   : > { %10438 = vmatpush3.bf16.xpose.msra.mxu1 %v4679_v29 }
 0x6fc   : > { %10440 = vmatmul.mubr.bf16.vlgmr.msra.gmra.mrb[16].mxu1 %v5424_v8 }
 0x6fd   : > { %10443 = vmatprep.mubr.bf16.mxu1 %v5425_v33 }
 0x704   : > { %10444 = vmatmul.mubr.bf16.gmra.mrb[20].mxu1 %v5426_v23 }
 0x705   : > { %10447 = vmatprep.mubr.bf16.mxu1 %v5427_v24 }
 0x70c   : > { %10448 = vmatmul.mubr.bf16.gmra.mrb[24].mxu1 %v5428_v4 }
 0x70d   : > { %10451 = vmatprep.mubr.bf16.mxu1 %v5429_v45 }
 0x714   : > { %10452 = vmatmul.mubr.bf16.gmra.mrb[28].mxu1 %v5430_v28 }
 0x78f   : > { %v13863_v39 = vpop.f32.mrb[0].mxu1 }
 0x790   : > { %15827 = vst [vmem:[#allocation52_spill] sm:$0xff] %v13863_v39  ;;  %v13865_v1 = vpop.f32.mrb[1].mxu1 }
 0x791   : > { %15828 = vst [vmem:[#allocation53_spill] sm:$0xff] %v13865_v1  ;;  %v13867_v25 = vpop.f32.mrb[2].mxu1 }
 0x792   : > { %15829 = vst [vmem:[#allocation54_spill] sm:$0xff] %v13867_v25  ;;  %v13869_v6 = vpop.f32.mrb[3].mxu1 }
 0x793   : > { %15830 = vst [vmem:[#allocation55_spill] sm:$0xff] %v13869_v6 }
 0x79f   : > { %v13871_v53 = vpop.f32.mrb[4].mxu1 }
 0x7a0   : > { %15831 = vst [vmem:[#allocation56_spill] sm:$0xff] %v13871_v53  ;;  %v13873_v26 = vpop.f32.mrb[5].mxu1 }
 0x7a1   : > { %15832 = vst [vmem:[#allocation57_spill] sm:$0xff] %v13873_v26  ;;  %v13875_v11 = vpop.f32.mrb[6].mxu1 }
 0x7a2   : > { %15833 = vst [vmem:[#allocation58_spill] sm:$0xff] %v13875_v11  ;;  %v13877_v29 = vpop.f32.mrb[7].mxu1 }
 0x7a3   : > { %15834 = vst [vmem:[#allocation59_spill] sm:$0xff] %v13877_v29 }
 0x7a7   : > { %v13879_v8 = vpop.f32.mrb[8].mxu1 }
 0x7a8   : > { %15835 = vst [vmem:[#allocation60_spill] sm:$0xff] %v13879_v8  ;;  %v13881_v33 = vpop.f32.mrb[9].mxu1 }
 0x7a9   : > { %15836 = vst [vmem:[#allocation61_spill] sm:$0xff] %v13881_v33  ;;  %v13883_v23 = vpop.f32.mrb[10].mxu1 }
 0x7aa   : > { %15837 = vst [vmem:[#allocation62_spill] sm:$0xff] %v13883_v23  ;;  %v13885_v24 = vpop.f32.mrb[11].mxu1 }
 0x7ab   : > { %15838 = vst [vmem:[#allocation63_spill] sm:$0xff] %v13885_v24 }
 0x7af   : > { %v13887_v4 = vpop.f32.mrb[12].mxu1 }
 0x7b0   : > { %15839 = vst [vmem:[#allocation64_spill] sm:$0xff] %v13887_v4  ;;  %v13889_v45 = vpop.f32.mrb[13].mxu1 }
 0x7b1   : > { %15840 = vst [vmem:[#allocation65_spill] sm:$0xff] %v13889_v45  ;;  %v13891_v28 = vpop.f32.mrb[14].mxu1 }
 0x7b2   : > { %15841 = vst [vmem:[#allocation66_spill] sm:$0xff] %v13891_v28  ;;  %v13893_v46 = vpop.f32.mrb[15].mxu1 }
 0x7b3   : > { %15842 = vst [vmem:[#allocation67_spill] sm:$0xff] %v13893_v46 }
 0x7cf   : > { %v13895_v53 = vpop.f32.mrb[16].mxu1 }
 0x7d0   : > { %v13897_v11 = vpop.f32.mrb[17].mxu1 }
 0x7d1   : > { %5545 = vmax.xlane.f32.xlu1 %v13897_v11  ;;  %v13900_v8 = vpop.f32.mrb[18].mxu1 }
 0x7d2   : > { %v13902_v33 = vpop.f32.mrb[19].mxu1 }
 0x7d3   : > { %5547 = vmax.xlane.f32.xlu0 %v13902_v33 }
 0x7d5   : > { %5551 = vmax.xlane.f32.xlu1 %v13900_v8 }
 0x7d7   : > { %5549 = vmax.xlane.f32.xlu0 %v13895_v53  ;;  %v13907_v4 = vpop.f32.mrb[20].mxu1 }
 0x7d8   : > { %v13909_v28 = vpop.f32.mrb[21].mxu1 }
 0x7d9   : > { %v13911_v45 = vpop.f32.mrb[22].mxu1 }
 0x7da   : > { %5559 = vmax.xlane.f32.xlu1 %v13911_v45  ;;  %v13914_v46 = vpop.f32.mrb[23].mxu1 }
 0x7db   : > { %5557 = vmax.xlane.f32.xlu0 %v13907_v4 }
 0x7de   : > { %5555 = vmax.xlane.f32.xlu1 %v13914_v46 }
 0x7df   : > { %5553 = vmax.xlane.f32.xlu0 %v13909_v28  ;;  %v13919_v23 = vpop.f32.mrb[24].mxu1 }
 0x7e0   : > { %v13921_v24 = vpop.f32.mrb[25].mxu1 }
 0x7e1   : > { %v13923_v26 = vpop.f32.mrb[26].mxu1 }
 0x7e2   : > { %5567 = vmax.xlane.f32.xlu1 %v13923_v26  ;;  %v13926_v29 = vpop.f32.mrb[27].mxu1 }
 0x7e3   : > { %5565 = vmax.xlane.f32.xlu0 %v13919_v23 }
 0x7e6   : > { %5563 = vmax.xlane.f32.xlu1 %v13926_v29 }
 0x7e7   : > { %5561 = vmax.xlane.f32.xlu0 %v13921_v24  ;;  %v13931_v39 = vpop.f32.mrb[28].mxu1 }
 0x7e8   : > { %v13933_v25 = vpop.f32.mrb[29].mxu1 }
 0x7e9   : > { %v13935_v6 = vpop.f32.mrb[30].mxu1 }
 0x7ea   : > { %5575 = vmax.xlane.f32.xlu1 %v13935_v6  ;;  %v13938_v1 = vpop.f32.mrb[31].mxu1 }
 0x7eb   : > { %5573 = vmax.xlane.f32.xlu0 %v13931_v39 }
 0x7ee   : > { %5571 = vmax.xlane.f32.xlu1 %v13938_v1 }
 0x7ef   : > { %5569 = vmax.xlane.f32.xlu0 %v13933_v25 }
 0x85e   : > { %v5546_v15 = vpop.xlane.xlu1 %5545 }
 0x85f   : > { %v13952_v21 = vmax.f32 %v13947_v59, %v5546_v15  ;;  %v13983_v15 = vld [vmem:[#allocation3 + $0xb8] sm:$0xff] }
 0x860   : > { %v5548_v32 = vpop.xlane.xlu0 %5547  ;;  %15851 = vst [vmem:[#allocation76_spill] sm:$0xff] %v13983_v15 }
 0x861   : > { %15845 = vst [vmem:[#allocation70_spill] sm:$0xff] %v13952_v21  ;;  %6115 = vst.msk [vmem:[#allocation3 + $0x80] sm:$0xff] %vm5141_vm1, %v13952_v21  ;;  %v13961_v54 = vmax.f32 %v13949_v44, %v5548_v32  ;;  %5643 = vperm.xlu0 %11603, %v13952_v21   ;;  %v13986_v44 = vld [vmem:[#allocation3 + $0xb0] sm:$0xff] }
 0x862   : > { %v5552_v60 = vpop.xlane.xlu1 %5551  ;;  %15852 = vst [vmem:[#allocation77_spill] sm:$0xff] %v13986_v44 }
 0x863   : > { %15847 = vst [vmem:[#allocation72_spill] sm:$0xff] %v13961_v54  ;;  %6116 = vst.msk [vmem:[#allocation3 + $0x88] sm:$0xff] %vm5141_vm1, %v13961_v54  ;;  %v13972_v47 = vmax.f32 %v13954_v34, %v5552_v60  ;;  %5648 = vperm.xlu1 %11604, %v13961_v54   ;;  %v4705_v60 = vld [vmem:[%s13617_s18 + $0xa8] sm:$0xff] }
 0x864   : > { %v5550_v32 = vpop.xlane.xlu0 %5549  ;;  %10465 = vmatprep.subr.bf16.mxu0 %v4705_v60  ;;  %v13999_v54 = vld [vmem:[#allocation3 + $0xa8] sm:$0xff] }
 0x865   : > { %15849 = vst [vmem:[#allocation74_spill] sm:$0xff] %v13972_v47  ;;  %6118 = vst.msk [vmem:[#allocation3 + $0x98] sm:$0xff] %vm5141_vm1, %v13972_v47  ;;  %v13980_v59 = vmax.f32 %v13965_v56, %v5550_v32  ;;  %5658 = vperm.xlu0 %11603, %v13972_v47   ;;  %10466 = vmatpush3.bf16.msra.mxu0 %v4705_v60  ;;  %v14006_v56 = vld [vmem:[#allocation3 + $0xa0] sm:$0xff] }
 0x866   : > { %15855 = vst [vmem:[#allocation80_spill] sm:$0xff] %v13999_v54  ;;  %15856 = vst [vmem:[#allocation81_spill] sm:$0xff] %v14006_v56  ;;  %10467 = vmatprep.subr.bf16.mxu0 %v4709_v55 }
 0x867   : > { %15850 = vst [vmem:[#allocation75_spill] sm:$0xff] %v13980_v59  ;;  %6117 = vst.msk [vmem:[#allocation3 + $0x90] sm:$0xff] %vm5141_vm1, %v13980_v59  ;;  %v5560_v21 = vpop.xlane.xlu1 %5559  ;;  %5653 = vperm.xlu1 %11604, %v13980_v59  }
 0x868   : > { %v13994_v32 = vmax.f32 %v13983_v15, %v5560_v21  ;;  %v5558_v47 = vpop.xlane.xlu0 %5557  ;;  %v14018_v15 = vld [vmem:[#allocation3 + $0xd8] sm:$0xff]  ;;  %v14026_v21 = vld [vmem:[#allocation3 + $0xd0] sm:$0xff] }
 0x869   : > { %v13997_v34 = vmax.f32 %v13986_v44, %v5558_v47  ;;  %10468 = vmatpush3.bf16.msra.mxu0 %v4709_v55  ;;  %15859 = vst [vmem:[#allocation84_spill] sm:$0xff] %v14018_v15  ;;  %15860 = vst [vmem:[#allocation85_spill] sm:$0xff] %v14026_v21  ;;  %v14046_v55 = vld [vmem:[#allocation3 + $0xc0] sm:$0xff] }
 0x86a   : > { %15853 = vst [vmem:[#allocation78_spill] sm:$0xff] %v13994_v32  ;;  %6122 = vst.msk [vmem:[#allocation3 + $0xb8] sm:$0xff] %vm5141_vm1, %v13994_v32  ;;  %10469 = vmatprep.subr.bf16.mxu0 %v4713_v37 }
 0x86b   : > { %15854 = vst [vmem:[#allocation79_spill] sm:$0xff] %v13997_v34  ;;  %6121 = vst.msk [vmem:[#allocation3 + $0xb0] sm:$0xff] %vm5141_vm1, %v13997_v34  ;;  %v5556_v47 = vpop.xlane.xlu1 %5555 }
 0x86c   : > { %v14013_v60 = vmax.f32 %v13999_v54, %v5556_v47  ;;  %v5554_v59 = vpop.xlane.xlu0 %5553  ;;  %15864 = vst [vmem:[#allocation89_spill] sm:$0xff] %v14046_v55 }
 0x86d   : > { %v14016_v12 = vmax.f32 %v14006_v56, %v5554_v59  ;;  %10470 = vmatpush3.bf16.msra.mxu0 %v4713_v37  ;;  %v14066_v37 = vld [vmem:[#allocation3 + $0xf0] sm:$0xff] }
 0x86e   : > { %15857 = vst [vmem:[#allocation82_spill] sm:$0xff] %v14013_v60  ;;  %6120 = vst.msk [vmem:[#allocation3 + $0xa8] sm:$0xff] %vm5141_vm1, %v14013_v60  ;;  %5668 = vperm.xlu0 %11603, %v14013_v60   ;;  %v14039_v60 = vld [vmem:[#allocation3 + $0xc8] sm:$0xff] }
 0x86f   : > { %15858 = vst [vmem:[#allocation83_spill] sm:$0xff] %v14016_v12  ;;  %6119 = vst.msk [vmem:[#allocation3 + $0xa0] sm:$0xff] %vm5141_vm1, %v14016_v12  ;;  %v5568_v59 = vpop.xlane.xlu1 %5567  ;;  %5663 = vperm.xlu1 %11604, %v14016_v12   ;;  %v14059_v12 = vld [vmem:[#allocation3 + $0xf8] sm:$0xff] }
 0x870   : > { %v14034_v47 = vmax.f32 %v14018_v15, %v5568_v59  ;;  %v5566_v3 = vpop.xlane.xlu0 %5565  ;;  %15863 = vst [vmem:[#allocation88_spill] sm:$0xff] %v14039_v60  ;;  %15867 = vst [vmem:[#allocation92_spill] sm:$0xff] %v14059_v12 }
 0x871   : > { %v14037_v54 = vmax.f32 %v14026_v21, %v5566_v3  ;;  %15868 = vst [vmem:[#allocation93_spill] sm:$0xff] %v14066_v37  ;;  %v14069_v21 = vld [vmem:[%s13557_s7 + $0x10] sm:$0xff] }
 0x872   : > { %15861 = vst [vmem:[#allocation86_spill] sm:$0xff] %v14034_v47  ;;  %6126 = vst.msk [vmem:[#allocation3 + $0xd8] sm:$0xff] %vm5141_vm1, %v14034_v47  ;;  %5678 = vperm.xlu0 %11603, %v13994_v32   ;;  %10487 = vmatprep.subr.bf16.mxu0 %v14069_v21 }
 0x873   : > { %15862 = vst [vmem:[#allocation87_spill] sm:$0xff] %v14037_v54  ;;  %6125 = vst.msk [vmem:[#allocation3 + $0xd0] sm:$0xff] %vm5141_vm1, %v14037_v54  ;;  %v5564_v3 = vpop.xlane.xlu1 %5563  ;;  %5673 = vperm.xlu1 %11604, %v13997_v34   ;;  %v14083_v34 = vld [vmem:[#allocation3 + $0xe8] sm:$0xff] }
 0x874   : > { %v14054_v59 = vmax.f32 %v14039_v60, %v5564_v3  ;;  %v5562_v44 = vpop.xlane.xlu0 %5561  ;;  %15871 = vst [vmem:[#allocation96_spill] sm:$0xff] %v14083_v34 }
 0x875   : > { %v14057_v15 = vmax.f32 %v14046_v55, %v5562_v44 }
 0x876   : > { %15865 = vst [vmem:[#allocation90_spill] sm:$0xff] %v14054_v59  ;;  %6124 = vst.msk [vmem:[#allocation3 + $0xc8] sm:$0xff] %vm5141_vm1, %v14054_v59  ;;  %5688 = vperm.xlu0 %11603, %v14054_v59  }
 0x877   : > { %15866 = vst [vmem:[#allocation91_spill] sm:$0xff] %v14057_v15  ;;  %6123 = vst.msk [vmem:[#allocation3 + $0xc0] sm:$0xff] %vm5141_vm1, %v14057_v15  ;;  %v5576_v44 = vpop.xlane.xlu1 %5575  ;;  %5683 = vperm.xlu1 %11604, %v14057_v15   ;;  %v14090_v15 = vld [vmem:[#allocation3 + $0xe0] sm:$0xff] }
 0x878   : > { %v14078_v32 = vmax.f32 %v14059_v12, %v5576_v44  ;;  %v5574_v60 = vpop.xlane.xlu0 %5573  ;;  %15872 = vst [vmem:[#allocation97_spill] sm:$0xff] %v14090_v15 }
 0x879   : > { %v14081_v59 = vmax.f32 %v14066_v37, %v5574_v60 }
 0x87a   : > { %15869 = vst [vmem:[#allocation94_spill] sm:$0xff] %v14078_v32  ;;  %6130 = vst.msk [vmem:[#allocation3 + $0xf8] sm:$0xff] %vm5141_vm1, %v14078_v32  ;;  %5698 = vperm.xlu0 %11603, %v14034_v47  }
 0x87b   : > { %15870 = vst [vmem:[#allocation95_spill] sm:$0xff] %v14081_v59  ;;  %6129 = vst.msk [vmem:[#allocation3 + $0xf0] sm:$0xff] %vm5141_vm1, %v14081_v59  ;;  %5693 = vperm.xlu1 %11604, %v14037_v54   ;;  %v5572_v60 = vpop.xlane.xlu1 %5571 }
 0x87c   : > { %v14098_v55 = vmax.f32 %v14083_v34, %v5572_v60  ;;  %v5570_v3 = vpop.xlane.xlu0 %5569 }
 0x87d   : > { %v14101_v12 = vmax.f32 %v14090_v15, %v5570_v3 }
 0x87e   : > { %15873 = vst [vmem:[#allocation98_spill] sm:$0xff] %v14098_v55  ;;  %6128 = vst.msk [vmem:[#allocation3 + $0xe8] sm:$0xff] %vm5141_vm1, %v14098_v55  ;;  %5708 = vperm.xlu0 %11603, %v14098_v55  }
 0x87f   : > { %15874 = vst [vmem:[#allocation99_spill] sm:$0xff] %v14101_v12  ;;  %6127 = vst.msk [vmem:[#allocation3 + $0xe0] sm:$0xff] %vm5141_vm1, %v14101_v12  ;;  %5703 = vperm.xlu1 %11604, %v14101_v12  }
 0x882   : > { %5718 = vperm.xlu0 %11603, %v14078_v32  }
 0x883   : > { %5713 = vperm.xlu1 %11604, %v14081_v59  }
 0x8e0   : > { %v5644_v3 = vpop.permute.xlu0 %5643 }
 0x8e1   : > { %v5721_v60 = vsub.f32 %v13897_v11, %v5644_v3 }
 0x8e2   : > { %v5649_v47 = vpop.permute.xlu1 %5648 }
 0x8e3   : > { %v5737_v34 = vmul.f32 1.442695, %v5721_v60  ;;  %v5722_v37 = vsub.f32 %v13902_v33, %v5649_v47 }
 0x8e4   : > { %v5659_v55 = vpop.permute.xlu0 %5658 }
 0x8e5   : > { %v5739_v54 = vmul.f32 1.442695, %v5722_v37  ;;  %v5724_v44 = vsub.f32 %v13900_v8, %v5659_v55  ;;  %11637 = vpow2.f32 %v5737_v34 }
 0x8e6   : > { %v5654_v15 = vpop.permute.xlu1 %5653 }
 0x8e7   : > { %11639 = vpow2.f32 %v5739_v54  ;;  %v5743_v56 = vmul.f32 1.442695, %v5724_v44  ;;  %v5723_v12 = vsub.f32 %v13895_v53, %v5654_v15 }
 0x8e9   : > { %v5741_v32 = vmul.f32 1.442695, %v5723_v12  ;;  %11641 = vpow2.f32 %v5743_v56 }
 0x8eb   : > { %11643 = vpow2.f32 %v5741_v32 }
 0x8ed   : > { %v5669_v59 = vpop.permute.xlu0 %5668 }
 0x8ee   : > { %v5726_v11 = vsub.f32 %v13914_v46, %v5669_v59  ;;  %v5664_v3 = vpop.permute.xlu1 %5663 }
 0x8ef   : > { %v5725_v60 = vsub.f32 %v13909_v28, %v5664_v3  ;;  %v14121_v33 = vpop.eup %11637  ;;  %v4656_v3 = vld [vmem:[%s13557_s7 + $0x30] sm:$0xff] }
 0x8f0   : > { %v5747_v47 = vmul.f32 1.442695, %v5726_v11 }
 0x8f1   : > { %v14123_v37 = vpop.eup %11639  ;;  %v5745_v34 = vmul.f32 1.442695, %v5725_v60  ;;  %v5679_v8 = vpop.permute.xlu0 %5678 }
 0x8f2   : > { %11645 = vpow2.f32 %v5747_v47  ;;  %v5728_v54 = vsub.f32 %v13911_v45, %v5679_v8  ;;  %v5674_v53 = vpop.permute.xlu1 %5673  ;;  %v5978_v56 = vpack.c.bf16 %v14123_v37, %v14121_v33 }
 0x8f3   : > { %11647 = vpow2.f32 %v5745_v34  ;;  %v5727_v46 = vsub.f32 %v13907_v4, %v5674_v53  ;;  %v14129_v15 = vpop.eup %11641 }
 0x8f4   : > { %v5751_v28 = vmul.f32 1.442695, %v5728_v54  ;;  %10471 = vmatprep.mubr.bf16.mxu0 %v5978_v56 }
 0x8f5   : > { %v14131_v12 = vpop.eup %11643  ;;  %v5749_v32 = vmul.f32 1.442695, %v5727_v46  ;;  %v5689_v55 = vpop.permute.xlu0 %5688 }
 0x8f6   : > { %11649 = vpow2.f32 %v5751_v28  ;;  %v5730_v59 = vsub.f32 %v13926_v29, %v5689_v55  ;;  %v5684_v45 = vpop.permute.xlu1 %5683  ;;  %v5979_v44 = vpack.c.bf16 %v14129_v15, %v14131_v12  ;;  %v4660_v55 = vld [vmem:[%s13557_s7 + $0x50] sm:$0xff] }
 0x8f7   : > { %11651 = vpow2.f32 %v5749_v32  ;;  %v5729_v11 = vsub.f32 %v13921_v24, %v5684_v45 }
 0x8f8   : > { %v5755_v4 = vmul.f32 1.442695, %v5730_v59  ;;  %10472 = vmatmul.mubr.bf16.vlgmr.msra.gmra.mrb[16].mxu0 %v5979_v44 }
 0x8f9   : > { %v5753_v60 = vmul.f32 1.442695, %v5729_v11  ;;  %10488 = vmatpush3.bf16.xpose.msra.mxu0 %v14069_v21  ;;  %v5699_v47 = vpop.permute.xlu0 %5698 }
 0x8fa   : > { %11653 = vpow2.f32 %v5755_v4  ;;  %v5732_v34 = vsub.f32 %v13923_v26, %v5699_v47  ;;  %v5694_v8 = vpop.permute.xlu1 %5693  ;;  %10489 = vmatprep.subr.bf16.mxu0 %v4656_v3 }
 0x8fb   : > { %11655 = vpow2.f32 %v5753_v60  ;;  %v5731_v29 = vsub.f32 %v13919_v23, %v5694_v8 }
 0x8fc   : > { %v14141_v54 = vpop.eup %11645  ;;  %v5759_v53 = vmul.f32 1.442695, %v5732_v34 }
 0x8fd   : > { %v14143_v24 = vpop.eup %11647  ;;  %v5757_v56 = vmul.f32 1.442695, %v5731_v29  ;;  %v5709_v46 = vpop.permute.xlu0 %5708  ;;  %v4664_v29 = vld [vmem:[%s13557_s7 + $0x70] sm:$0xff] }
 0x8fe   : > { %11657 = vpow2.f32 %v5759_v53  ;;  %v5734_v21 = vsub.f32 %v13938_v1, %v5709_v46  ;;  %v5704_v28 = vpop.permute.xlu1 %5703  ;;  %v5980_v26 = vpack.c.bf16 %v14141_v54, %v14143_v24 }
 0x8ff   : > { %11659 = vpow2.f32 %v5757_v56  ;;  %v5733_v32 = vsub.f32 %v13933_v25, %v5704_v28 }
 0x900   : > { %v14150_v59 = vpop.eup %11649  ;;  %v5763_v23 = vmul.f32 1.442695, %v5734_v21  ;;  %10475 = vmatprep.mubr.bf16.mxu0 %v5980_v26  ;;  %v4668_v26 = vld [vmem:[%s13557_s7 + $0x90] sm:$0xff] }
 0x901   : > { %v14152_v45 = vpop.eup %11651  ;;  %v5761_v44 = vmul.f32 1.442695, %v5733_v32  ;;  %10490 = vmatpush3.bf16.xpose.msra.mxu0 %v4656_v3  ;;  %v5719_v11 = vpop.permute.xlu0 %5718 }
 0x902   : > { %11661 = vpow2.f32 %v5763_v23  ;;  %v5736_v1 = vsub.f32 %v13935_v6, %v5719_v11  ;;  %v5714_v4 = vpop.permute.xlu1 %5713  ;;  %v5981_v60 = vpack.c.bf16 %v14150_v59, %v14152_v45  ;;  %10491 = vmatprep.subr.bf16.mxu0 %v4660_v55  ;;  %v4672_v11 = vld [vmem:[%s13557_s7 + $0xb0] sm:$0xff] }
 0x903   : > { %11663 = vpow2.f32 %v5761_v44  ;;  %v5735_v25 = vsub.f32 %v13931_v39, %v5714_v4  ;;  %v6131_v44 = vld [vmem:[#allocation2 + $0x10] sm:$0xff] }
 0x904   : > { %v14158_v47 = vpop.eup %11653  ;;  %v5767_v34 = vmul.f32 1.442695, %v5736_v1  ;;  %10476 = vmatmul.mubr.bf16.gmra.mrb[20].mxu0 %v5981_v60  ;;  %v4676_v1 = vld [vmem:[%s13557_s7 + $0xd0] sm:$0xff] }
 0x905   : > { %v14160_v8 = vpop.eup %11655  ;;  %v5765_v3 = vmul.f32 1.442695, %v5735_v25  ;;  %v4680_v4 = vld [vmem:[%s13557_s7 + $0xf0] sm:$0xff] }
 0x906   : > { %11665 = vpow2.f32 %v5767_v34  ;;  %v5982_v6 = vpack.c.bf16 %v14158_v47, %v14160_v8  ;;  %v6132_v60 = vld [vmem:[#allocation2 + $0x30] sm:$0xff] }
 0x907   : > { %11667 = vpow2.f32 %v5765_v3  ;;  %v6133_v25 = vld [vmem:[#allocation2 + $0x50] sm:$0xff] }
 0x908   : > { %v14165_v53 = vpop.eup %11657  ;;  %10479 = vmatprep.mubr.bf16.mxu0 %v5982_v6  ;;  %v6134_v34 = vld [vmem:[#allocation2 + $0x70] sm:$0xff] }
 0x909   : > { %v14167_v56 = vpop.eup %11659  ;;  %10492 = vmatpush3.bf16.xpose.msra.mxu0 %v4660_v55  ;;  %v6135_v3 = vld [vmem:[#allocation2 + $0x90] sm:$0xff] }
 0x90a   : > { %v5983_v39 = vpack.c.bf16 %v14165_v53, %v14167_v56  ;;  %10493 = vmatprep.subr.bf16.mxu0 %v4664_v29  ;;  %v6136_v6 = vld [vmem:[#allocation2 + $0xb0] sm:$0xff] }
 0x90c   : > { %v14171_v46 = vpop.eup %11661  ;;  %10480 = vmatmul.mubr.bf16.gmra.mrb[24].mxu0 %v5983_v39  ;;  %v6138_v39 = vld [vmem:[#allocation2 + $0xf0] sm:$0xff] }
 0x90d   : > { %v14173_v21 = vpop.eup %11663 }
 0x90e   : > { %v5984_v28 = vpack.c.bf16 %v14171_v46, %v14173_v21 }
 0x910   : > { %v14178_v32 = vpop.eup %11665  ;;  %10483 = vmatprep.mubr.bf16.mxu0 %v5984_v28 }
 0x911   : > { %v14180_v55 = vpop.eup %11667  ;;  %10494 = vmatpush3.bf16.xpose.msra.mxu0 %v4664_v29  ;;  %v6137_v29 = vld [vmem:[#allocation2 + $0xd0] sm:$0xff] }
 0x912   : > { %v5985_v23 = vpack.c.bf16 %v14178_v32, %v14180_v55  ;;  %10495 = vmatprep.subr.bf16.mxu0 %v4668_v26 }
 0x914   : > { %10484 = vmatmul.mubr.bf16.gmra.mrb[28].mxu0 %v5985_v23 }
 0x915   : > { %10503 = vmatprep.mubr.bf16.mxu0 %v6131_v44 }
 0x919   : > { %10496 = vmatpush3.bf16.xpose.msra.mxu0 %v4668_v26 }
 0x91a   : > { %10497 = vmatprep.subr.bf16.mxu0 %v4672_v11 }
 0x921   : > { %10498 = vmatpush3.bf16.xpose.msra.mxu0 %v4672_v11 }
 0x922   : > { %10499 = vmatprep.subr.bf16.mxu0 %v4676_v1 }
 0x929   : > { %10500 = vmatpush3.bf16.xpose.msra.mxu0 %v4676_v1 }
 0x92a   : > { %10501 = vmatprep.subr.bf16.mxu0 %v4680_v4 }
 0x931   : > { %10502 = vmatpush3.bf16.xpose.msra.mxu0 %v4680_v4 }
 0x938   : > { %10504 = vmatmul.mubr.bf16.vlgmr.msra.gmra.mrb[32].mxu0 %v6132_v60 }
 0x939   : > { %10507 = vmatprep.mubr.bf16.mxu0 %v6133_v25 }
 0x940   : > { %10508 = vmatmul.mubr.bf16.gmra.mrb[36].mxu0 %v6134_v34 }
 0x941   : > { %10511 = vmatprep.mubr.bf16.mxu0 %v6135_v3 }
 0x948   : > { %10512 = vmatmul.mubr.bf16.gmra.mrb[40].mxu0 %v6136_v6 }
 0x949   : > { %10515 = vmatprep.mubr.bf16.mxu0 %v6137_v29 }
 0x950   : > { %10516 = vmatmul.mubr.bf16.gmra.mrb[44].mxu0 %v6138_v39 }
 0x9cb   : > { %v14187_v28 = vpop.f32.mrb[16].mxu0 }
 0x9cc   : > { %15875 = vst [vmem:[#allocation100_spill] sm:$0xff] %v14187_v28  ;;  %v14189_v26 = vpop.f32.mrb[17].mxu0 }
 0x9cd   : > { %15876 = vst [vmem:[#allocation101_spill] sm:$0xff] %v14189_v26  ;;  %v14191_v23 = vpop.f32.mrb[18].mxu0 }
 0x9ce   : > { %15877 = vst [vmem:[#allocation102_spill] sm:$0xff] %v14191_v23  ;;  %v14193_v44 = vpop.f32.mrb[19].mxu0 }
 0x9cf   : > { %15878 = vst [vmem:[#allocation103_spill] sm:$0xff] %v14193_v44 }
 0x9d7   : > { %v14195_v11 = vpop.f32.mrb[20].mxu0 }
 0x9d8   : > { %15879 = vst [vmem:[#allocation104_spill] sm:$0xff] %v14195_v11  ;;  %v14197_v1 = vpop.f32.mrb[21].mxu0 }
 0x9d9   : > { %15880 = vst [vmem:[#allocation105_spill] sm:$0xff] %v14197_v1  ;;  %v14199_v4 = vpop.f32.mrb[22].mxu0 }
 0x9da   : > { %15881 = vst [vmem:[#allocation106_spill] sm:$0xff] %v14199_v4  ;;  %v14201_v60 = vpop.f32.mrb[23].mxu0 }
 0x9db   : > { %15882 = vst [vmem:[#allocation107_spill] sm:$0xff] %v14201_v60 }
 0x9df   : > { %v14203_v25 = vpop.f32.mrb[24].mxu0 }
 0x9e0   : > { %15883 = vst [vmem:[#allocation108_spill] sm:$0xff] %v14203_v25  ;;  %v14205_v34 = vpop.f32.mrb[25].mxu0 }
 0x9e1   : > { %15884 = vst [vmem:[#allocation109_spill] sm:$0xff] %v14205_v34  ;;  %v14207_v3 = vpop.f32.mrb[26].mxu0 }
 0x9e2   : > { %15885 = vst [vmem:[#allocation110_spill] sm:$0xff] %v14207_v3  ;;  %v14209_v6 = vpop.f32.mrb[27].mxu0 }
 0x9e3   : > { %15886 = vst [vmem:[#allocation111_spill] sm:$0xff] %v14209_v6 }
 0x9e7   : > { %v14211_v29 = vpop.f32.mrb[28].mxu0 }
 0x9e8   : > { %15887 = vst [vmem:[#allocation112_spill] sm:$0xff] %v14211_v29  ;;  %v14213_v39 = vpop.f32.mrb[29].mxu0 }
 0x9e9   : > { %15888 = vst [vmem:[#allocation113_spill] sm:$0xff] %v14213_v39  ;;  %v14215_v28 = vpop.f32.mrb[30].mxu0 }
 0x9ea   : > { %15889 = vst [vmem:[#allocation114_spill] sm:$0xff] %v14215_v28  ;;  %v14217_v11 = vpop.f32.mrb[31].mxu0 }
 0x9eb   : > { %15890 = vst [vmem:[#allocation115_spill] sm:$0xff] %v14217_v11 }
 0xa0b   : > { %v14219_v1 = vpop.f32.mrb[32].mxu0 }
 0xa0c   : > { %v14221_v4 = vpop.f32.mrb[33].mxu0 }
 0xa0d   : > { %6253 = vmax.xlane.f32.xlu1 %v14221_v4  ;;  %v14224_v60 = vpop.f32.mrb[34].mxu0 }
 0xa0e   : > { %v14226_v25 = vpop.f32.mrb[35].mxu0 }
 0xa0f   : > { %6255 = vmax.xlane.f32.xlu0 %v14226_v25 }
 0xa11   : > { %6259 = vmax.xlane.f32.xlu1 %v14224_v60 }
 0xa13   : > { %6257 = vmax.xlane.f32.xlu0 %v14219_v1  ;;  %v14231_v29 = vpop.f32.mrb[36].mxu0 }
 0xa14   : > { %15891 = vst [vmem:[#allocation116_spill] sm:$0xff] %v14231_v29  ;;  %v14233_v28 = vpop.f32.mrb[37].mxu0 }
 0xa15   : > { %v14235_v3 = vpop.f32.mrb[38].mxu0 }
 0xa16   : > { %15892 = vst [vmem:[#allocation117_spill] sm:$0xff] %v14235_v3  ;;  %6267 = vmax.xlane.f32.xlu1 %v14235_v3  ;;  %v14238_v6 = vpop.f32.mrb[39].mxu0  ;;  %v14273_v3 = vld [vmem:[#allocation3 + $0x108] sm:$0xff] }
 0xa17   : > { %6265 = vmax.xlane.f32.xlu0 %v14231_v29  ;;  %15902 = vst [vmem:[#allocation127_spill] sm:$0xff] %v14273_v3 }
 0xa1a   : > { %6263 = vmax.xlane.f32.xlu1 %v14238_v6 }
 0xa1b   : > { %6261 = vmax.xlane.f32.xlu0 %v14233_v28  ;;  %v14243_v11 = vpop.f32.mrb[40].mxu0 }
 0xa1c   : > { %15893 = vst [vmem:[#allocation118_spill] sm:$0xff] %v14243_v11  ;;  %v14245_v39 = vpop.f32.mrb[41].mxu0 }
 0xa1d   : > { %15894 = vst [vmem:[#allocation119_spill] sm:$0xff] %v14245_v39  ;;  %v14247_v34 = vpop.f32.mrb[42].mxu0 }
 0xa1e   : > { %15895 = vst [vmem:[#allocation120_spill] sm:$0xff] %v14247_v34  ;;  %6275 = vmax.xlane.f32.xlu1 %v14247_v34  ;;  %v14250_v23 = vpop.f32.mrb[43].mxu0 }
 0xa1f   : > { %15896 = vst [vmem:[#allocation121_spill] sm:$0xff] %v14250_v23  ;;  %6273 = vmax.xlane.f32.xlu0 %v14243_v11  ;;  %v4686_v11 = vld [vmem:[%s13617_s18 + $0x10] sm:$0xff] }
 0xa20   : > { %10519 = vmatprep.subr.bf16.mxu1 %v4686_v11 }
 0xa21   : > { %10520 = vmatpush3.bf16.msra.mxu1 %v4686_v11  ;;  %v14278_v11 = vld [vmem:[#allocation3 + $0x118] sm:$0xff] }
 0xa22   : > { %6271 = vmax.xlane.f32.xlu1 %v14250_v23  ;;  %v4694_v23 = vld [vmem:[%s13617_s18 + $0x50] sm:$0xff]  ;;  %15904 = vst [vmem:[#allocation129_spill] sm:$0xff] %v14278_v11 }
 0xa23   : > { %6269 = vmax.xlane.f32.xlu0 %v14245_v39  ;;  %v14255_v44 = vpop.f32.mrb[44].mxu0  ;;  %v4690_v39 = vld [vmem:[%s13617_s18 + $0x30] sm:$0xff] }
 0xa24   : > { %15897 = vst [vmem:[#allocation122_spill] sm:$0xff] %v14255_v44  ;;  %v14257_v26 = vpop.f32.mrb[45].mxu0  ;;  %10521 = vmatprep.subr.bf16.mxu1 %v4690_v39 }
 0xa25   : > { %15898 = vst [vmem:[#allocation123_spill] sm:$0xff] %v14257_v26  ;;  %v14259_v40 = vpop.f32.mrb[46].mxu0  ;;  %10522 = vmatpush3.bf16.msra.mxu1 %v4690_v39 }
 0xa26   : > { %15899 = vst [vmem:[#allocation124_spill] sm:$0xff] %v14259_v40  ;;  %6283 = vmax.xlane.f32.xlu1 %v14259_v40  ;;  %v14262_v34 = vpop.f32.mrb[47].mxu0  ;;  %10523 = vmatprep.subr.bf16.mxu1 %v4694_v23  ;;  %v4698_v40 = vld [vmem:[%s13617_s18 + $0x70] sm:$0xff] }
 0xa27   : > { %15900 = vst [vmem:[#allocation125_spill] sm:$0xff] %v14262_v34  ;;  %6281 = vmax.xlane.f32.xlu0 %v14255_v44 }
 0xa29   : > { %10524 = vmatpush3.bf16.msra.mxu1 %v4694_v23 }
 0xa2a   : > { %6279 = vmax.xlane.f32.xlu1 %v14262_v34  ;;  %10525 = vmatprep.subr.bf16.mxu1 %v4698_v40  ;;  %v4702_v34 = vld [vmem:[%s13617_s18 + $0x90] sm:$0xff] }
 0xa2b   : > { %6277 = vmax.xlane.f32.xlu0 %v14257_v26 }
 0xa2d   : > { %10526 = vmatpush3.bf16.msra.mxu1 %v4698_v40  ;;  %v14307_v40 = vld [vmem:[#allocation3 + $0x138] sm:$0xff] }
 0xa2e   : > { %10527 = vmatprep.subr.bf16.mxu1 %v4702_v34  ;;  %15909 = vst [vmem:[#allocation134_spill] sm:$0xff] %v14307_v40 }
 0xa31   : > { %10528 = vmatpush3.bf16.msra.mxu1 %v4702_v34 }
 0xa9a   : > { %v6254_v29 = vpop.xlane.xlu1 %6253 }
 0xa9b   : > { %v14276_v44 = vmax.f32 %v14270_v30, %v6254_v29  ;;  %v14289_v29 = vld [vmem:[#allocation3 + $0x110] sm:$0xff] }
 0xa9c   : > { %v6256_v26 = vpop.xlane.xlu0 %6255  ;;  %15906 = vst [vmem:[#allocation131_spill] sm:$0xff] %v14289_v29 }
 0xa9d   : > { %15903 = vst [vmem:[#allocation128_spill] sm:$0xff] %v14276_v44  ;;  %6823 = vst.msk [vmem:[#allocation3 + $0x100] sm:$0xff] %vm5141_vm1, %v14276_v44  ;;  %v14285_v23 = vmax.f32 %v14273_v3, %v6256_v26  ;;  %6351 = vperm.xlu0 %11603, %v14276_v44   ;;  %v14310_v3 = vld [vmem:[#allocation3 + $0x130] sm:$0xff] }
 0xa9e   : > { %v6260_v10 = vpop.xlane.xlu1 %6259  ;;  %15910 = vst [vmem:[#allocation135_spill] sm:$0xff] %v14310_v3 }
 0xa9f   : > { %15905 = vst [vmem:[#allocation130_spill] sm:$0xff] %v14285_v23  ;;  %6824 = vst.msk [vmem:[#allocation3 + $0x108] sm:$0xff] %vm5141_vm1, %v14285_v23  ;;  %v14296_v39 = vmax.f32 %v14278_v11, %v6260_v10  ;;  %6356 = vperm.xlu1 %11604, %v14285_v23   ;;  %v4706_v10 = vld [vmem:[%s13617_s18 + $0xb0] sm:$0xff]  ;;  %v14323_v23 = vld [vmem:[#allocation3 + $0x128] sm:$0xff] }
 0xaa0   : > { %v6258_v26 = vpop.xlane.xlu0 %6257  ;;  %10529 = vmatprep.subr.bf16.mxu1 %v4706_v10  ;;  %15913 = vst [vmem:[#allocation138_spill] sm:$0xff] %v14323_v23 }
 0xaa1   : > { %15907 = vst [vmem:[#allocation132_spill] sm:$0xff] %v14296_v39  ;;  %6826 = vst.msk [vmem:[#allocation3 + $0x118] sm:$0xff] %vm5141_vm1, %v14296_v39  ;;  %v14304_v30 = vmax.f32 %v14289_v29, %v6258_v26  ;;  %6366 = vperm.xlu0 %11603, %v14296_v39   ;;  %10530 = vmatpush3.bf16.msra.mxu1 %v4706_v10  ;;  %v14330_v29 = vld [vmem:[#allocation3 + $0x120] sm:$0xff] }
 0xaa2   : > { %10531 = vmatprep.subr.bf16.mxu1 %v4710_v19 }
 0xaa3   : > { %15908 = vst [vmem:[#allocation133_spill] sm:$0xff] %v14304_v30  ;;  %6825 = vst.msk [vmem:[#allocation3 + $0x110] sm:$0xff] %vm5141_vm1, %v14304_v30  ;;  %v6268_v44 = vpop.xlane.xlu1 %6267  ;;  %6361 = vperm.xlu1 %11604, %v14304_v30  }
 0xaa4   : > { %v14318_v26 = vmax.f32 %v14307_v40, %v6268_v44  ;;  %v6266_v39 = vpop.xlane.xlu0 %6265  ;;  %v14342_v40 = vld [vmem:[#allocation3 + $0x158] sm:$0xff]  ;;  %v14350_v44 = vld [vmem:[#allocation3 + $0x150] sm:$0xff] }
 0xaa5   : > { %v14321_v11 = vmax.f32 %v14310_v3, %v6266_v39  ;;  %10532 = vmatpush3.bf16.msra.mxu1 %v4710_v19  ;;  %15916 = vst [vmem:[#allocation141_spill] sm:$0xff] %v14342_v40  ;;  %15917 = vst [vmem:[#allocation142_spill] sm:$0xff] %v14350_v44  ;;  %v14370_v19 = vld [vmem:[#allocation3 + $0x140] sm:$0xff] }
 0xaa6   : > { %15911 = vst [vmem:[#allocation136_spill] sm:$0xff] %v14318_v26  ;;  %6830 = vst.msk [vmem:[#allocation3 + $0x138] sm:$0xff] %vm5141_vm1, %v14318_v26  ;;  %10533 = vmatprep.subr.bf16.mxu1 %v4714_v62 }
 0xaa7   : > { %15912 = vst [vmem:[#allocation137_spill] sm:$0xff] %v14321_v11  ;;  %6829 = vst.msk [vmem:[#allocation3 + $0x130] sm:$0xff] %vm5141_vm1, %v14321_v11  ;;  %v6264_v39 = vpop.xlane.xlu1 %6263 }
 0xaa8   : > { %v14337_v10 = vmax.f32 %v14323_v23, %v6264_v39  ;;  %v6262_v30 = vpop.xlane.xlu0 %6261  ;;  %15920 = vst [vmem:[#allocation145_spill] sm:$0xff] %v14370_v19 }
 0xaa9   : > { %v14340_v34 = vmax.f32 %v14330_v29, %v6262_v30  ;;  %10534 = vmatpush3.bf16.msra.mxu1 %v4714_v62  ;;  %v14390_v62 = vld [vmem:[#allocation3 + $0x170] sm:$0xff] }
 0xaaa   : > { %15914 = vst [vmem:[#allocation139_spill] sm:$0xff] %v14337_v10  ;;  %6828 = vst.msk [vmem:[#allocation3 + $0x128] sm:$0xff] %vm5141_vm1, %v14337_v10  ;;  %6376 = vperm.xlu0 %11603, %v14337_v10   ;;  %v14363_v10 = vld [vmem:[#allocation3 + $0x148] sm:$0xff] }
 0xaab   : > { %15915 = vst [vmem:[#allocation140_spill] sm:$0xff] %v14340_v34  ;;  %6827 = vst.msk [vmem:[#allocation3 + $0x120] sm:$0xff] %vm5141_vm1, %v14340_v34  ;;  %v6276_v30 = vpop.xlane.xlu1 %6275  ;;  %6371 = vperm.xlu1 %11604, %v14340_v34   ;;  %v14383_v34 = vld [vmem:[#allocation3 + $0x178] sm:$0xff] }
 0xaac   : > { %v14358_v39 = vmax.f32 %v14342_v40, %v6276_v30  ;;  %v6274_v57 = vpop.xlane.xlu0 %6273  ;;  %15919 = vst [vmem:[#allocation144_spill] sm:$0xff] %v14363_v10  ;;  %15923 = vst [vmem:[#allocation148_spill] sm:$0xff] %v14383_v34 }
 0xaad   : > { %v14361_v3 = vmax.f32 %v14350_v44, %v6274_v57  ;;  %v14393_v44 = vld [vmem:[%s13557_s7 + $0x18] sm:$0xff] }
 0xaae   : > { %15918 = vst [vmem:[#allocation143_spill] sm:$0xff] %v14358_v39  ;;  %6834 = vst.msk [vmem:[#allocation3 + $0x158] sm:$0xff] %vm5141_vm1, %v14358_v39  ;;  %6386 = vperm.xlu0 %11603, %v14318_v26   ;;  %10551 = vmatprep.subr.bf16.mxu1 %v14393_v44 }
 0xaaf   : > { %6833 = vst.msk [vmem:[#allocation3 + $0x150] sm:$0xff] %vm5141_vm1, %v14361_v3  ;;  %v6272_v57 = vpop.xlane.xlu1 %6271  ;;  %6381 = vperm.xlu1 %11604, %v14321_v11   ;;  %v14407_v11 = vld [vmem:[#allocation3 + $0x168] sm:$0xff] }
 0xab0   : > { %v14378_v30 = vmax.f32 %v14363_v10, %v6272_v57  ;;  %v6270_v23 = vpop.xlane.xlu0 %6269 }
 0xab1   : > { %v14381_v40 = vmax.f32 %v14370_v19, %v6270_v23 }
 0xab2   : > { %15921 = vst [vmem:[#allocation146_spill] sm:$0xff] %v14378_v30  ;;  %6832 = vst.msk [vmem:[#allocation3 + $0x148] sm:$0xff] %vm5141_vm1, %v14378_v30  ;;  %6396 = vperm.xlu0 %11603, %v14378_v30  }
 0xab3   : > { %15922 = vst [vmem:[#allocation147_spill] sm:$0xff] %v14381_v40  ;;  %6831 = vst.msk [vmem:[#allocation3 + $0x140] sm:$0xff] %vm5141_vm1, %v14381_v40  ;;  %v6284_v23 = vpop.xlane.xlu1 %6283  ;;  %6391 = vperm.xlu1 %11604, %v14381_v40   ;;  %v14414_v40 = vld [vmem:[#allocation3 + $0x160] sm:$0xff] }
 0xab4   : > { %v14402_v26 = vmax.f32 %v14383_v34, %v6284_v23  ;;  %v6282_v10 = vpop.xlane.xlu0 %6281 }
 0xab5   : > { %v14405_v30 = vmax.f32 %v14390_v62, %v6282_v10 }
 0xab6   : > { %6838 = vst.msk [vmem:[#allocation3 + $0x178] sm:$0xff] %vm5141_vm1, %v14402_v26  ;;  %6406 = vperm.xlu0 %11603, %v14358_v39  }
 0xab7   : > { %15924 = vst [vmem:[#allocation149_spill] sm:$0xff] %v14405_v30  ;;  %6837 = vst.msk [vmem:[#allocation3 + $0x170] sm:$0xff] %vm5141_vm1, %v14405_v30  ;;  %6401 = vperm.xlu1 %11604, %v14361_v3   ;;  %v6280_v10 = vpop.xlane.xlu1 %6279 }
 0xab8   : > { %v14422_v19 = vmax.f32 %v14407_v11, %v6280_v10  ;;  %v6278_v57 = vpop.xlane.xlu0 %6277  ;;  %v15940_v10 = vld [vmem:[#allocation43_spill] sm:$0xff] }
 0xab9   : > { %v14425_v34 = vmax.f32 %v14414_v40, %v6278_v57  ;;  %v15939_v57 = vld [vmem:[#allocation41_spill] sm:$0xff] }
 0xaba   : > { %6836 = vst.msk [vmem:[#allocation3 + $0x168] sm:$0xff] %vm5141_vm1, %v14422_v19  ;;  %6416 = vperm.xlu0 %11603, %v14422_v19  }
 0xabb   : > { %6835 = vst.msk [vmem:[#allocation3 + $0x160] sm:$0xff] %vm5141_vm1, %v14425_v34  ;;  %6411 = vperm.xlu1 %11604, %v14425_v34  }
 0xabe   : > { %6426 = vperm.xlu0 %11603, %v14402_v26  }
 0xabf   : > { %6421 = vperm.xlu1 %11604, %v14405_v30   ;;  %v6841_v30 = vld [vmem:[#allocation2 + $0x58] sm:$0xff] }
 0xadd   : > { %5095 = vadd.xlane.f32.xlu0 %v13798_v14 }
 0xae1   : > { %5097 = vadd.xlane.f32.xlu0 %v13804_v43 }
 0xae3   : > { %5093 = vadd.xlane.f32.xlu1 %v13796_v27 }
 0xae5   : > { %5101 = vadd.xlane.f32.xlu0 %v13819_v51 }
 0xae7   : > { %5099 = vadd.xlane.f32.xlu1 %v13806_v41 }
 0xae9   : > { %5105 = vadd.xlane.f32.xlu0 %v13827_v50 }
 0xaeb   : > { %5103 = vadd.xlane.f32.xlu1 %v13821_v16  ;;  %v15925_v16 = vsub.f32 %v13624_v52, %v13630_v61  ;;  %v15928_v61 = vsub.f32 %v13622_v31, %v13627_v35 }
 0xaed   : > { %5109 = vadd.xlane.f32.xlu0 %v13837_v20  ;;  %v4901_v50 = vmul.f32 1.442695, %v15925_v16  ;;  %v15943_v16 = vld [vmem:[#allocation42_spill] sm:$0xff] }
 0xaef   : > { %5107 = vadd.xlane.f32.xlu1 %v13829_v58 }
 0xaf1   : > { %5113 = vadd.xlane.f32.xlu0 %v13843_v63 }
 0xaf3   : > { %5111 = vadd.xlane.f32.xlu1 %v13835_v18  ;;  %v15926_v18 = vsub.f32 %v13640_v2, %v13651_v49  ;;  %v15929_v49 = vsub.f32 %v13681_v17, %v13692_v22 }
 0xaf5   : > { %5117 = vadd.xlane.f32.xlu0 %v13850_v42  ;;  %v4903_v20 = vmul.f32 1.442695, %v15926_v18 }
 0xaf7   : > { %5115 = vadd.xlane.f32.xlu1 %v13841_v7 }
 0xaf9   : > { %5121 = vadd.xlane.f32.xlu0 %v13856_v13  ;;  %v15927_v13 = vsub.f32 %v13632_v38, %v13648_v48 }
 0xafb   : > { %5119 = vadd.xlane.f32.xlu1 %v13848_v9  ;;  %v4907_v52 = vmul.f32 1.442695, %v15927_v13 }
 0xafd   : > { %5804 = vadd.xlane.f32.xlu0 %v14123_v37  ;;  %v4911_v37 = vmul.f32 1.442695, %v15929_v49  ;;  %v15948_v49 = vld [vmem:[#allocation39_spill] sm:$0xff] }
 0xaff   : > { %5123 = vadd.xlane.f32.xlu1 %v13854_v0 }
 0xb01   : > { %5806 = vadd.xlane.f32.xlu0 %v14131_v12 }
 0xb03   : > { %5802 = vadd.xlane.f32.xlu1 %v14121_v33  ;;  %v4905_v33 = vmul.f32 1.442695, %v15928_v61 }
 0xb05   : > { %5810 = vadd.xlane.f32.xlu0 %v14143_v24  ;;  %v15931_v24 = vld [vmem:[#allocation33_spill] sm:$0xff] }
 0xb07   : > { %5808 = vadd.xlane.f32.xlu1 %v14129_v15  ;;  %v15930_v15 = vsub.f32 %v13674_v36, %v13688_v5 }
 0xb09   : > { %5814 = vadd.xlane.f32.xlu0 %v14152_v45  ;;  %v4909_v12 = vmul.f32 1.442695, %v15930_v15 }
 0xb0b   : > { %5812 = vadd.xlane.f32.xlu1 %v14141_v54 }
 0xb0d   : > { %5818 = vadd.xlane.f32.xlu0 %v14160_v8  ;;  %v15934_v8 = vld [vmem:[#allocation32_spill] sm:$0xff] }
 0xb0f   : > { %5816 = vadd.xlane.f32.xlu1 %v14150_v59  ;;  %v15932_v59 = vld [vmem:[#allocation35_spill] sm:$0xff] }
 0xb10   : > { %v15933_v45 = vsub.f32 %v15931_v24, %v15932_v59 }
 0xb11   : > { %5822 = vadd.xlane.f32.xlu0 %v14167_v56 }
 0xb13   : > { %5820 = vadd.xlane.f32.xlu1 %v14158_v47  ;;  %v4915_v47 = vmul.f32 1.442695, %v15933_v45 }
 0xb15   : > { %5826 = vadd.xlane.f32.xlu0 %v14173_v21 }
 0xb17   : > { %5824 = vadd.xlane.f32.xlu1 %v14165_v53  ;;  %v15935_v53 = vld [vmem:[#allocation34_spill] sm:$0xff] }
 0xb18   : > { %v15936_v36 = vsub.f32 %v15934_v8, %v15935_v53 }
 0xb19   : > { %5830 = vadd.xlane.f32.xlu0 %v14180_v55 }
 0xb1a   : > { %v4913_v5 = vmul.f32 1.442695, %v15936_v36  ;;  %v15954_v36 = vld [vmem:[#allocation118_spill] sm:$0xff] }
 0xb1b   : > { %5828 = vadd.xlane.f32.xlu1 %v14171_v46 }
 0xb1c   : > { %v6352_v27 = vpop.permute.xlu0 %6351 }
 0xb1d   : > { %v6429_v14 = vsub.f32 %v14221_v4, %v6352_v27  ;;  %v15941_v27 = vsub.f32 %v15939_v57, %v15940_v10 }
 0xb1e   : > { %v6357_v43 = vpop.permute.xlu1 %6356 }
 0xb1f   : > { %v6445_v41 = vmul.f32 1.442695, %v6429_v14  ;;  %v6430_v51 = vsub.f32 %v14226_v25, %v6357_v43  ;;  %5832 = vadd.xlane.f32.xlu1 %v14178_v32  ;;  %v15937_v32 = vld [vmem:[#allocation117_spill] sm:$0xff]  ;;  %v4919_v14 = vmul.f32 1.442695, %v15941_v27 }
 0xb20   : > { %v6367_v58 = vpop.permute.xlu0 %6366 }
 0xb21   : > { %v6447_v7 = vmul.f32 1.442695, %v6430_v51  ;;  %v6432_v63 = vsub.f32 %v14224_v60, %v6367_v58  ;;  %11669 = vpow2.f32 %v6445_v41  ;;  %v15938_v60 = vld [vmem:[#allocation116_spill] sm:$0xff] }
 0xb22   : > { %v6362_v9 = vpop.permute.xlu1 %6361  ;;  %v15942_v51 = vld [vmem:[#allocation40_spill] sm:$0xff] }
 0xb23   : > { %11671 = vpow2.f32 %v6447_v7  ;;  %v6451_v42 = vmul.f32 1.442695, %v6432_v63  ;;  %v6431_v0 = vsub.f32 %v14219_v1, %v6362_v9  ;;  %v15945_v63 = vld [vmem:[#allocation121_spill] sm:$0xff] }
 0xb24   : > { %11673 = vpow2.f32 %v4901_v50  ;;  %v15944_v50 = vsub.f32 %v15942_v51, %v15943_v16  ;;  %v15961_v51 = vld [vmem:[#allocation125_spill] sm:$0xff] }
 0xb25   : > { %11675 = vpow2.f32 %v4903_v20  ;;  %v6449_v2 = vmul.f32 1.442695, %v6431_v0 }
 0xb26   : > { %11677 = vpow2.f32 %v6451_v42  ;;  %v4917_v58 = vmul.f32 1.442695, %v15944_v50 }
 0xb27   : > { %11679 = vpow2.f32 %v6449_v2  ;;  %v15947_v2 = vld [vmem:[#allocation37_spill] sm:$0xff] }
 0xb28   : > { %11681 = vpow2.f32 %v4907_v52  ;;  %v15946_v52 = vld [vmem:[#allocation119_spill] sm:$0xff] }
 0xb29   : > { %11683 = vpow2.f32 %v4905_v33  ;;  %v6377_v38 = vpop.permute.xlu0 %6376  ;;  %v4657_v33 = vld [vmem:[%s13557_s7 + $0x38] sm:$0xff] }
 0xb2a   : > { %v6434_v48 = vsub.f32 %v14238_v6, %v6377_v38  ;;  %v6372_v54 = vpop.permute.xlu1 %6371  ;;  %11685 = vpow2.f32 %v4911_v37  ;;  %v15949_v37 = vsub.f32 %v15947_v2, %v15948_v49  ;;  %v15950_v38 = vld [vmem:[#allocation36_spill] sm:$0xff] }
 0xb2b   : > { %v6433_v31 = vsub.f32 %v14233_v28, %v6372_v54  ;;  %v14495_v35 = vpop.eup %11669  ;;  %11687 = vpow2.f32 %v4909_v12 }
 0xb2c   : > { %v6455_v17 = vmul.f32 1.442695, %v6434_v48  ;;  %v4923_v15 = vmul.f32 1.442695, %v15949_v37  ;;  %v15951_v48 = vld [vmem:[#allocation38_spill] sm:$0xff] }
 0xb2d   : > { %v14500_v22 = vpop.eup %11671  ;;  %v6453_v56 = vmul.f32 1.442695, %v6433_v31  ;;  %v6387_v46 = vpop.permute.xlu0 %6386  ;;  %v15952_v54 = vsub.f32 %v15950_v38, %v15951_v48 }
 0xb2e   : > { %v14505_v21 = vpop.eup %11673  ;;  %11689 = vpow2.f32 %v6455_v17  ;;  %v6436_v55 = vsub.f32 %v15937_v32, %v6387_v46  ;;  %v6382_v28 = vpop.permute.xlu1 %6381  ;;  %v6686_v1 = vpack.c.bf16 %v14500_v22, %v14495_v35  ;;  %v15955_v46 = vld [vmem:[#allocation49_spill] sm:$0xff] }
 0xb2f   : > { %v14510_v4 = vpop.eup %11675  ;;  %11691 = vpow2.f32 %v6453_v56  ;;  %v6435_v25 = vsub.f32 %v15938_v60, %v6382_v28  ;;  %5176 = vperm.xlu0 %11603, %v14505_v21   ;;  %v4921_v31 = vmul.f32 1.442695, %v15952_v54  ;;  %v15958_v60 = vld [vmem:[#allocation48_spill] sm:$0xff] }
 0xb30   : > { %v14514_v6 = vpop.eup %11677  ;;  %11693 = vpow2.f32 %v4915_v47  ;;  %v6459_v43 = vmul.f32 1.442695, %v6436_v55  ;;  %5181 = vperm.xlu1 %11604, %v14510_v4   ;;  %10535 = vmatprep.mubr.bf16.mxu1 %v6686_v1  ;;  %v15953_v47 = vld [vmem:[#allocation120_spill] sm:$0xff] }
 0xb31   : > { %v14520_v41 = vpop.eup %11679  ;;  %11695 = vpow2.f32 %v4913_v5  ;;  %v6457_v18 = vmul.f32 1.442695, %v6435_v25  ;;  %v6397_v20 = vpop.permute.xlu0 %6396  ;;  %v15959_v25 = vld [vmem:[#allocation50_spill] sm:$0xff] }
 0xb32   : > { %v14525_v7 = vpop.eup %11681  ;;  %11697 = vpow2.f32 %v6459_v43  ;;  %v6438_v9 = vsub.f32 %v15945_v63, %v6397_v20  ;;  %v6392_v42 = vpop.permute.xlu1 %6391  ;;  %v6687_v0 = vpack.c.bf16 %v14514_v6, %v14520_v41  ;;  %v15960_v57 = vsub.f32 %v15958_v60, %v15959_v25  ;;  %v15962_v20 = vld [vmem:[#allocation123_spill] sm:$0xff] }
 0xb33   : > { %v14530_v13 = vpop.eup %11683  ;;  %11699 = vpow2.f32 %v6457_v18  ;;  %v6437_v61 = vsub.f32 %v15946_v52, %v6392_v42  ;;  %5191 = vperm.xlu0 %11603, %v14525_v7   ;;  %v15964_v52 = vld [vmem:[#allocation47_spill] sm:$0xff] }
 0xb34   : > { %11701 = vpow2.f32 %v4919_v14  ;;  %v6463_v12 = vmul.f32 1.442695, %v6438_v9  ;;  %5186 = vperm.xlu1 %11604, %v14530_v13   ;;  %10536 = vmatmul.mubr.bf16.vlgmr.msra.gmra.mrb[32].mxu1 %v6687_v0  ;;  %v14543_v45 = vpop.eup %11685  ;;  %v4925_v10 = vmul.f32 1.442695, %v15960_v57  ;;  %v4661_v9 = vld [vmem:[%s13557_s7 + $0x58] sm:$0xff]  ;;  %v15963_v0 = vld [vmem:[#allocation45_spill] sm:$0xff] }
 0xb35   : > { %11703 = vpow2.f32 %v4917_v58  ;;  %v6461_v24 = vmul.f32 1.442695, %v6437_v61  ;;  %10552 = vmatpush3.bf16.xpose.msra.mxu1 %v14393_v44  ;;  %v6407_v59 = vpop.permute.xlu0 %6406  ;;  %v14546_v53 = vpop.eup %11687  ;;  %v15956_v44 = vld [vmem:[#allocation51_spill] sm:$0xff]  ;;  %v15965_v61 = vsub.f32 %v15963_v0, %v15964_v52  ;;  %v15974_v57 = vld [vmem:[#allocation69_spill] sm:$0xff]  ;;  %v15978_v52 = vld [vmem:[#allocation74_spill] sm:$0xff] }
 0xb36   : > { %11705 = vpow2.f32 %v6463_v12  ;;  %v6440_v17 = vsub.f32 %v15953_v47, %v6407_v59  ;;  %v6402_v8 = vpop.permute.xlu1 %6401  ;;  %10553 = vmatprep.subr.bf16.mxu1 %v4657_v33  ;;  %v15957_v32 = vsub.f32 %v15955_v46, %v15956_v44  ;;  %v15967_v12 = vld [vmem:[#allocation46_spill] sm:$0xff]  ;;  %v15969_v59 = vld [vmem:[#allocation124_spill] sm:$0xff]  ;;  %v15977_v0 = vld [vmem:[#allocation71_spill] sm:$0xff] }
 0xb37   : > { %11707 = vpow2.f32 %v6461_v24  ;;  %v6439_v5 = vsub.f32 %v15954_v36, %v6402_v8  ;;  %5201 = vperm.xlu0 %11603, %v14543_v45   ;;  %v4931_v2 = vmul.f32 1.442695, %v15965_v61  ;;  %v15979_v61 = vsub.f32 %v15977_v0, %v15978_v52  ;;  %v6839_v52 = vld [vmem:[#allocation2 + $0x18] sm:$0xff] }
 0xb38   : > { %v14550_v56 = vpop.eup %11689  ;;  %11709 = vpow2.f32 %v4923_v15  ;;  %v4927_v55 = vmul.f32 1.442695, %v15957_v32  ;;  %v6467_v28 = vmul.f32 1.442695, %v6440_v17  ;;  %5196 = vperm.xlu1 %11604, %v14546_v53   ;;  %v15966_v15 = vld [vmem:[#allocation44_spill] sm:$0xff]  ;;  %v15972_v32 = vld [vmem:[#allocation70_spill] sm:$0xff] }
 0xb39   : > { %v14556_v1 = vpop.eup %11691  ;;  %11711 = vpow2.f32 %v4921_v31  ;;  %v6465_v27 = vmul.f32 1.442695, %v6439_v5  ;;  %v6417_v14 = vpop.permute.xlu0 %6416  ;;  %v15968_v38 = vsub.f32 %v15966_v15, %v15967_v12  ;;  %v15970_v5 = vld [vmem:[#allocation122_spill] sm:$0xff]  ;;  %v15980_v15 = vld [vmem:[#allocation73_spill] sm:$0xff]  ;;  %v15981_v12 = vld [vmem:[#allocation75_spill] sm:$0xff] }
 0xb3a   : > { %v14561_v43 = vpop.eup %11693  ;;  %11713 = vpow2.f32 %v6467_v28  ;;  %v6442_v16 = vsub.f32 %v15961_v51, %v6417_v14  ;;  %v6412_v50 = vpop.permute.xlu1 %6411  ;;  %v6688_v58 = vpack.c.bf16 %v14550_v56, %v14556_v1 }
 0xb3b   : > { %v14566_v18 = vpop.eup %11695  ;;  %11715 = vpow2.f32 %v6465_v27  ;;  %v6441_v63 = vsub.f32 %v15962_v20, %v6412_v50  ;;  %5211 = vperm.xlu0 %11603, %v14561_v43   ;;  %v4929_v48 = vmul.f32 1.442695, %v15968_v38  ;;  %v4665_v20 = vld [vmem:[%s13557_s7 + $0x78] sm:$0xff]  ;;  %v15982_v38 = vsub.f32 %v15980_v15, %v15981_v12 }
 0xb3c   : > { %v14571_v42 = vpop.eup %11697  ;;  %11717 = vpow2.f32 %v4927_v55  ;;  %v6471_v49 = vmul.f32 1.442695, %v6442_v16  ;;  %5206 = vperm.xlu1 %11604, %v14566_v18   ;;  %10539 = vmatprep.mubr.bf16.mxu1 %v6688_v58  ;;  %v15990_v15 = vld [vmem:[#allocation91_spill] sm:$0xff] }
 0xb3d   : > { %v14577_v37 = vpop.eup %11699  ;;  %11719 = vpow2.f32 %v4925_v10  ;;  %v6469_v54 = vmul.f32 1.442695, %v6441_v63  ;;  %10554 = vmatpush3.bf16.xpose.msra.mxu1 %v4657_v33  ;;  %v6427_v31 = vpop.permute.xlu0 %6426  ;;  %v15971_v33 = vld [vmem:[#allocation68_spill] sm:$0xff] }
 0xb3e   : > { %v14582_v24 = vpop.eup %11701  ;;  %11721 = vpow2.f32 %v6471_v49  ;;  %v6444_v47 = vsub.f32 %v15969_v59, %v6427_v31  ;;  %v6422_v17 = vpop.permute.xlu1 %6421  ;;  %v6689_v8 = vpack.c.bf16 %v14571_v42, %v14577_v37  ;;  %10555 = vmatprep.subr.bf16.mxu1 %v4661_v9  ;;  %v15973_v55 = vsub.f32 %v15971_v33, %v15972_v32  ;;  %v15975_v10 = vld [vmem:[#allocation72_spill] sm:$0xff] }
 0xb3f   : > { %v14587_v36 = vpop.eup %11703  ;;  %11723 = vpow2.f32 %v6469_v54  ;;  %v6443_v46 = vsub.f32 %v15970_v5, %v6422_v17  ;;  %5221 = vperm.xlu0 %11603, %v14582_v24   ;;  %v15976_v27 = vsub.f32 %v15974_v57, %v15975_v10  ;;  %v15986_v10 = vld [vmem:[#allocation77_spill] sm:$0xff] }
 0xb40   : > { %v14591_v44 = vpop.eup %11705  ;;  %11725 = vpow2.f32 %v4931_v2  ;;  %v5609_v28 = vmul.f32 1.442695, %v15973_v55  ;;  %v6475_v60 = vmul.f32 1.442695, %v6444_v47  ;;  %5216 = vperm.xlu1 %11604, %v14587_v36   ;;  %10540 = vmatmul.mubr.bf16.gmra.mrb[36].mxu1 %v6689_v8  ;;  %v5615_v2 = vmul.f32 1.442695, %v15979_v61 }
 0xb41   : > { %v14597_v25 = vpop.eup %11707  ;;  %11727 = vpow2.f32 %v4929_v48  ;;  %v5611_v14 = vmul.f32 1.442695, %v15976_v27  ;;  %v6473_v51 = vmul.f32 1.442695, %v6443_v46  ;;  %v5613_v48 = vmul.f32 1.442695, %v15982_v38 }
 0xb42   : > { %v14602_v16 = vpop.eup %11709  ;;  %11729 = vpow2.f32 %v6475_v60  ;;  %v6690_v50 = vpack.c.bf16 %v14591_v44, %v14597_v25  ;;  %v15984_v8 = vld [vmem:[#allocation83_spill] sm:$0xff] }
 0xb43   : > { %v14606_v58 = vpop.eup %11711  ;;  %11731 = vpow2.f32 %v6473_v51  ;;  %5231 = vperm.xlu0 %11603, %v14602_v16   ;;  %v15987_v27 = vld [vmem:[#allocation79_spill] sm:$0xff] }
 0xb44   : > { %v14610_v63 = vpop.eup %11713  ;;  %11733 = vpow2.f32 %v5609_v28  ;;  %5226 = vperm.xlu1 %11604, %v14606_v58   ;;  %10543 = vmatprep.mubr.bf16.mxu1 %v6690_v50  ;;  %v4669_v28 = vld [vmem:[%s13557_s7 + $0x98] sm:$0xff] }
 0xb45   : > { %v14616_v49 = vpop.eup %11715  ;;  %11735 = vpow2.f32 %v5611_v14  ;;  %10556 = vmatpush3.bf16.xpose.msra.mxu1 %v4661_v9  ;;  %v15983_v9 = vld [vmem:[#allocation81_spill] sm:$0xff]  ;;  %v15988_v14 = vsub.f32 %v15986_v10, %v15987_v27  ;;  %v4677_v27 = vld [vmem:[%s13557_s7 + $0xd8] sm:$0xff] }
 0xb46   : > { %v14621_v54 = vpop.eup %11717  ;;  %v6691_v31 = vpack.c.bf16 %v14610_v63, %v14616_v49  ;;  %10557 = vmatprep.subr.bf16.mxu1 %v4665_v20  ;;  %11737 = vpow2.f32 %v5615_v2  ;;  %v15985_v5 = vsub.f32 %v15983_v9, %v15984_v8  ;;  %v15989_v2 = vld [vmem:[#allocation89_spill] sm:$0xff]  ;;  %v15993_v8 = vld [vmem:[#allocation87_spill] sm:$0xff] }
 0xb47   : > { %v14625_v59 = vpop.eup %11719  ;;  %5241 = vperm.xlu0 %11603, %v14621_v54   ;;  %11739 = vpow2.f32 %v5613_v48  ;;  %v5621_v51 = vmul.f32 1.442695, %v15988_v14  ;;  %v15991_v12 = vsub.f32 %v15989_v2, %v15990_v15  ;;  %v15992_v9 = vld [vmem:[#allocation85_spill] sm:$0xff]  ;;  %v5063_v15 = vld [vmem:[#allocation4 + $0x10] sm:$0xff] }
 0xb48   : > { %v14628_v47 = vpop.eup %11721  ;;  %5236 = vperm.xlu1 %11604, %v14625_v59   ;;  %10544 = vmatmul.mubr.bf16.gmra.mrb[40].mxu1 %v6691_v31  ;;  %v5617_v46 = vmul.f32 1.442695, %v15985_v5  ;;  %v4673_v31 = vld [vmem:[%s13557_s7 + $0xb8] sm:$0xff]  ;;  %v15994_v5 = vsub.f32 %v15992_v9, %v15993_v8  ;;  %v5065_v8 = vld [vmem:[#allocation4 + $0x20] sm:$0xff] }
 0xb49   : > { %v14631_v17 = vpop.eup %11723 }
 0xb4a   : > { %v14636_v33 = vpop.eup %11725  ;;  %v6692_v32 = vpack.c.bf16 %v14628_v47, %v14631_v17  ;;  %11741 = vpow2.f32 %v5617_v46  ;;  %v5629_v46 = vmul.f32 1.442695, %v15994_v5 }
 0xb4b   : > { %v14640_v55 = vpop.eup %11727  ;;  %5251 = vperm.xlu0 %11603, %v14636_v33   ;;  %11743 = vpow2.f32 %v5621_v51 }
 0xb4c   : > { %v14644_v60 = vpop.eup %11729  ;;  %5246 = vperm.xlu1 %11604, %v14640_v55   ;;  %10547 = vmatprep.mubr.bf16.mxu1 %v6692_v32 }
 0xb4d   : > { %v14647_v57 = vpop.eup %11731  ;;  %10558 = vmatpush3.bf16.xpose.msra.mxu1 %v4665_v20  ;;  %v5625_v20 = vmul.f32 1.442695, %v15991_v12 }
 0xb4e   : > { %v14652_v50 = vpop.eup %11733  ;;  %v6693_v0 = vpack.c.bf16 %v14644_v60, %v14647_v57  ;;  %10559 = vmatprep.subr.bf16.mxu1 %v4669_v28 }
 0xb4f   : > { %v14656_v61 = vpop.eup %11735  ;;  %5884 = vperm.xlu0 %11603, %v14652_v50   ;;  %11745 = vpow2.f32 %v5625_v20  ;;  %v5061_v20 = vld [vmem:[#allocation4] sm:$0xff] }
 0xb50   : > { %5889 = vperm.xlu1 %11604, %v14656_v61   ;;  %10548 = vmatmul.mubr.bf16.gmra.mrb[44].mxu1 %v6693_v0  ;;  %v14663_v38 = vpop.eup %11737  ;;  %11747 = vpow2.f32 %v5629_v46  ;;  %v5062_v0 = vld [vmem:[#allocation4 + $0x8] sm:$0xff]  ;;  %v5077_v46 = vmul.f32 %v14505_v21, %v5061_v20 }
 0xb51   : > { %10567 = vmatprep.mubr.bf16.mxu1 %v6839_v52  ;;  %v14665_v48 = vpop.eup %11739  ;;  %v5078_v52 = vmul.f32 %v14510_v4, %v5062_v0  ;;  %v5081_v4 = vmul.f32 %v14546_v53, %v5065_v8  ;;  %v6840_v0 = vld [vmem:[#allocation2 + $0x38] sm:$0xff]  ;;  %v5069_v53 = vld [vmem:[#allocation4 + $0x40] sm:$0xff] }
 0xb52   : > { %v5068_v8 = vld [vmem:[#allocation4 + $0x38] sm:$0xff] }
 0xb53   : > { %5899 = vperm.xlu0 %11603, %v14663_v38  }
 0xb54   : > { %5894 = vperm.xlu1 %11604, %v14665_v48   ;;  %v14673_v32 = vpop.eup %11741 }
 0xb55   : > { %10560 = vmatpush3.bf16.xpose.msra.mxu1 %v4669_v28  ;;  %v14676_v10 = vpop.eup %11743  ;;  %v4681_v28 = vld [vmem:[%s13557_s7 + $0xf8] sm:$0xff] }
 0xb56   : > { %10561 = vmatprep.subr.bf16.mxu1 %v4673_v31 }
 0xb58   : > { %5904 = vperm.xlu1 %11604, %v14673_v32  }
 0xb59   : > { %v14680_v14 = vpop.eup %11745 }
 0xb5a   : > { %v14683_v51 = vpop.eup %11747 }
 0xb5c   : > { %5914 = vperm.xlu1 %11604, %v14676_v10  }
 0xb5d   : > { %10562 = vmatpush3.bf16.xpose.msra.mxu1 %v4673_v31  ;;  %v5079_v31 = vmul.f32 %v14530_v13, %v5063_v15 }
 0xb5e   : > { %10563 = vmatprep.subr.bf16.mxu1 %v4677_v27 }
 0xb60   : > { %5924 = vperm.xlu1 %11604, %v14680_v14  }
 0xb64   : > { %5934 = vperm.xlu1 %11604, %v14683_v51  }
 0xb65   : > { %10564 = vmatpush3.bf16.xpose.msra.mxu1 %v4677_v27  ;;  %v5064_v27 = vld [vmem:[#allocation4 + $0x18] sm:$0xff] }
 0xb66   : > { %10565 = vmatprep.subr.bf16.mxu1 %v4681_v28  ;;  %v5080_v13 = vmul.f32 %v14525_v7, %v5064_v27 }
 0xb6a   : > { %v5096_v2 = vpop.xlane.xlu0 %5095 }
 0xb6b   : > { %v5126_v12 = vadd.f32 %v5096_v2, %v5078_v52  ;;  %v5067_v2 = vld [vmem:[#allocation4 + $0x30] sm:$0xff] }
 0xb6c   : > { %v5083_v20 = vmul.f32 %v14566_v18, %v5067_v2  ;;  %v5084_v18 = vmul.f32 %v14561_v43, %v5068_v8  ;;  %v5070_v2 = vld [vmem:[#allocation4 + $0x48] sm:$0xff] }
 0xb6d   : > { %5143 = vst.msk [vmem:[#allocation4 + $0x8] sm:$0xff] %vm5141_vm1, %v5126_v12  ;;  %10566 = vmatpush3.bf16.xpose.msra.mxu1 %v4681_v28  ;;  %v5066_v12 = vld [vmem:[#allocation4 + $0x28] sm:$0xff] }
 0xb6e   : > { %v5098_v9 = vpop.xlane.xlu0 %5097 }
 0xb6f   : > { %v5127_v5 = vadd.f32 %v5098_v9, %v5079_v31  ;;  %v5082_v9 = vmul.f32 %v14543_v45, %v5066_v12  ;;  %v5086_v12 = vmul.f32 %v14582_v24, %v5070_v2 }
 0xb70   : > { %v5094_v23 = vpop.xlane.xlu1 %5093 }
 0xb71   : > { %5144 = vst.msk [vmem:[#allocation4 + $0x10] sm:$0xff] %vm5141_vm1, %v5127_v5  ;;  %v5125_v39 = vadd.f32 %v5094_v23, %v5077_v46  ;;  %v5085_v5 = vmul.f32 %v14587_v36, %v5069_v53  ;;  %v6842_v46 = vld [vmem:[#allocation2 + $0x78] sm:$0xff]  ;;  %v5073_v36 = vld [vmem:[#allocation4 + $0x60] sm:$0xff] }
 0xb72   : > { %v5102_v52 = vpop.xlane.xlu0 %5101  ;;  %v6844_v53 = vld [vmem:[#allocation2 + $0xb8] sm:$0xff] }
 0xb73   : > { %5142 = vst.msk [vmem:[#allocation4] sm:$0xff] %vm5141_vm1, %v5125_v39  ;;  %v5129_v28 = vadd.f32 %v5102_v52, %v5081_v4  ;;  %v5071_v4 = vld [vmem:[#allocation4 + $0x50] sm:$0xff] }
 0xb74   : > { %10568 = vmatmul.mubr.bf16.vlgmr.msra.gmra.mrb[48].mxu1 %v6840_v0  ;;  %v5100_v15 = vpop.xlane.xlu1 %5099  ;;  %v6843_v0 = vld [vmem:[#allocation2 + $0x98] sm:$0xff] }
 0xb75   : > { %5146 = vst.msk [vmem:[#allocation4 + $0x20] sm:$0xff] %vm5141_vm1, %v5129_v28  ;;  %v5128_v21 = vadd.f32 %v5100_v15, %v5080_v13  ;;  %10571 = vmatprep.mubr.bf16.mxu1 %v6841_v30  ;;  %v5087_v28 = vmul.f32 %v14606_v58, %v5071_v4 }
 0xb76   : > { %v5106_v23 = vpop.xlane.xlu0 %5105 }
 0xb77   : > { %5145 = vst.msk [vmem:[#allocation4 + $0x18] sm:$0xff] %vm5141_vm1, %v5128_v21  ;;  %v5131_v31 = vadd.f32 %v5106_v23, %v5083_v20  ;;  %v5072_v20 = vld [vmem:[#allocation4 + $0x58] sm:$0xff]  ;;  %v5089_v23 = vmul.f32 %v14625_v59, %v5073_v36  ;;  %v15996_v59 = vld [vmem:[#allocation82_spill] sm:$0xff]  ;;  %v15998_v36 = vld [vmem:[#allocation76_spill] sm:$0xff] }
 0xb78   : > { %v5104_v39 = vpop.xlane.xlu1 %5103  ;;  %v5088_v8 = vmul.f32 %v14602_v16, %v5072_v20 }
 0xb79   : > { %5148 = vst.msk [vmem:[#allocation4 + $0x30] sm:$0xff] %vm5141_vm1, %v5131_v31  ;;  %v5130_v7 = vadd.f32 %v5104_v39, %v5082_v9  ;;  %v5075_v9 = vld [vmem:[#allocation4 + $0x70] sm:$0xff]  ;;  %v6845_v39 = vld [vmem:[#allocation2 + $0xd8] sm:$0xff] }
 0xb7a   : > { %v5110_v27 = vpop.xlane.xlu0 %5109 }
 0xb7b   : > { %5147 = vst.msk [vmem:[#allocation4 + $0x28] sm:$0xff] %vm5141_vm1, %v5130_v7  ;;  %v5133_v30 = vadd.f32 %v5110_v27, %v5085_v5  ;;  %v5074_v5 = vld [vmem:[#allocation4 + $0x68] sm:$0xff]  ;;  %v15995_v27 = vld [vmem:[#allocation80_spill] sm:$0xff] }
 0xb7c   : > { %10572 = vmatmul.mubr.bf16.gmra.mrb[52].mxu1 %v6842_v46  ;;  %v5108_v52 = vpop.xlane.xlu1 %5107  ;;  %v5091_v46 = vmul.f32 %v14640_v55, %v5075_v9  ;;  %v15997_v4 = vsub.f32 %v15995_v27, %v15996_v59  ;;  %v5090_v16 = vmul.f32 %v14621_v54, %v5074_v5  ;;  %v6846_v55 = vld [vmem:[#allocation2 + $0xf8] sm:$0xff]  ;;  %v16004_v27 = vld [vmem:[#allocation97_spill] sm:$0xff] }
 0xb7d   : > { %5150 = vst.msk [vmem:[#allocation4 + $0x40] sm:$0xff] %vm5141_vm1, %v5133_v30  ;;  %v5132_v45 = vadd.f32 %v5108_v52, %v5084_v18  ;;  %10575 = vmatprep.mubr.bf16.mxu1 %v6843_v0  ;;  %v5771_v18 = vld [vmem:[#allocation4 + $0x88] sm:$0xff]  ;;  %v16005_v59 = vld [vmem:[#allocation99_spill] sm:$0xff] }
 0xb7e   : > { %v5114_v13 = vpop.xlane.xlu0 %5113  ;;  %v5619_v0 = vmul.f32 1.442695, %v15997_v4  ;;  %v16006_v4 = vsub.f32 %v16004_v27, %v16005_v59  ;;  %v16016_v27 = vld [vmem:[#allocation92_spill] sm:$0xff]  ;;  %v16017_v59 = vld [vmem:[#allocation94_spill] sm:$0xff] }
 0xb7f   : > { %5149 = vst.msk [vmem:[#allocation4 + $0x38] sm:$0xff] %vm5141_vm1, %v5132_v45  ;;  %v5135_v15 = vadd.f32 %v5114_v13, %v5087_v28  ;;  %v5076_v45 = vld [vmem:[#allocation4 + $0x78] sm:$0xff]  ;;  %v5787_v13 = vmul.f32 %v14656_v61, %v5771_v18 }
 0xb80   : > { %v5112_v21 = vpop.xlane.xlu1 %5111  ;;  %11749 = vpow2.f32 %v5619_v0  ;;  %v5092_v54 = vmul.f32 %v14636_v33, %v5076_v45  ;;  %v5633_v0 = vmul.f32 1.442695, %v16006_v4  ;;  %v5773_v18 = vld [vmem:[#allocation4 + $0x98] sm:$0xff]  ;;  %v16018_v4 = vsub.f32 %v16016_v27, %v16017_v59 }
 0xb81   : > { %5152 = vst.msk [vmem:[#allocation4 + $0x50] sm:$0xff] %vm5141_vm1, %v5135_v15  ;;  %v5134_v43 = vadd.f32 %v5112_v21, %v5086_v12  ;;  %v15999_v15 = vld [vmem:[#allocation78_spill] sm:$0xff]  ;;  %v5785_v27 = vld [vmem:[#allocation4 + $0xf8] sm:$0xff] }
 0xb82   : > { %v5118_v31 = vpop.xlane.xlu0 %5117  ;;  %v16000_v12 = vsub.f32 %v15998_v36, %v15999_v15  ;;  %v5789_v36 = vmul.f32 %v14663_v38, %v5773_v18  ;;  %v5780_v18 = vld [vmem:[#allocation4 + $0xd0] sm:$0xff] }
 0xb83   : > { %5151 = vst.msk [vmem:[#allocation4 + $0x48] sm:$0xff] %vm5141_vm1, %v5134_v43  ;;  %v5137_v58 = vadd.f32 %v5118_v31, %v5089_v23  ;;  %v5772_v43 = vld [vmem:[#allocation4 + $0x90] sm:$0xff]  ;;  %v5770_v31 = vld [vmem:[#allocation4 + $0x80] sm:$0xff] }
 0xb84   : > { %10576 = vmatmul.mubr.bf16.gmra.mrb[56].mxu1 %v6844_v53  ;;  %v5116_v7 = vpop.xlane.xlu1 %5115  ;;  %v5623_v21 = vmul.f32 1.442695, %v16000_v12  ;;  %v5788_v61 = vmul.f32 %v14665_v48, %v5772_v43  ;;  %v5786_v33 = vmul.f32 %v14652_v50, %v5770_v31  ;;  %v16010_v12 = vld [vmem:[#allocation93_spill] sm:$0xff]  ;;  %v16013_v31 = vld [vmem:[#allocation96_spill] sm:$0xff] }
 0xb85   : > { %5154 = vst.msk [vmem:[#allocation4 + $0x60] sm:$0xff] %vm5141_vm1, %v5137_v58  ;;  %v5136_v24 = vadd.f32 %v5116_v7, %v5088_v8  ;;  %10579 = vmatprep.mubr.bf16.mxu1 %v6845_v39  ;;  %v16001_v39 = vld [vmem:[#allocation88_spill] sm:$0xff]  ;;  %v16002_v58 = vld [vmem:[#allocation90_spill] sm:$0xff] }
 0xb86   : > { %v5122_v30 = vpop.xlane.xlu0 %5121  ;;  %11751 = vpow2.f32 %v5623_v21  ;;  %v16003_v8 = vsub.f32 %v16001_v39, %v16002_v58  ;;  %v16011_v21 = vld [vmem:[#allocation95_spill] sm:$0xff]  ;;  %v5778_v58 = vld [vmem:[#allocation4 + $0xc0] sm:$0xff] }
 0xb87   : > { %5153 = vst.msk [vmem:[#allocation4 + $0x58] sm:$0xff] %vm5141_vm1, %v5136_v24  ;;  %v5139_v52 = vadd.f32 %v5122_v30, %v5091_v46  ;;  %v5774_v24 = vld [vmem:[#allocation4 + $0xa0] sm:$0xff] }
 0xb88   : > { %v5120_v2 = vpop.xlane.xlu1 %5119  ;;  %v5627_v7 = vmul.f32 1.442695, %v16003_v8 }
 0xb89   : > { %5156 = vst.msk [vmem:[#allocation4 + $0x70] sm:$0xff] %vm5141_vm1, %v5139_v52  ;;  %v5138_v28 = vadd.f32 %v5120_v2, %v5090_v16  ;;  %v5790_v52 = vmul.f32 %v14673_v32, %v5774_v24  ;;  %v16007_v16 = vld [vmem:[#allocation84_spill] sm:$0xff]  ;;  %v16008_v2 = vld [vmem:[#allocation86_spill] sm:$0xff] }
 0xb8a   : > { %v5805_v20 = vpop.xlane.xlu0 %5804  ;;  %v16009_v45 = vsub.f32 %v16007_v16, %v16008_v2  ;;  %11753 = vpow2.f32 %v5627_v7  ;;  %v14742_v15 = vpop.eup %11749 }
 0xb8b   : > { %5155 = vst.msk [vmem:[#allocation4 + $0x68] sm:$0xff] %vm5141_vm1, %v5138_v28  ;;  %v5835_v23 = vadd.f32 %v5805_v20, %v5787_v13  ;;  %v16012_v20 = vsub.f32 %v16010_v12, %v16011_v21  ;;  %11755 = vpow2.f32 %v5633_v0  ;;  %v5639_v0 = vmul.f32 1.442695, %v16018_v4 }
 0xb8c   : > { %10580 = vmatmul.mubr.bf16.gmra.mrb[60].mxu1 %v6846_v55  ;;  %v5124_v53 = vpop.xlane.xlu1 %5123  ;;  %v5631_v28 = vmul.f32 1.442695, %v16009_v45  ;;  %v5776_v55 = vld [vmem:[#allocation4 + $0xb0] sm:$0xff]  ;;  %v5779_v45 = vld [vmem:[#allocation4 + $0xc8] sm:$0xff] }
 0xb8d   : > { %5851 = vst.msk [vmem:[#allocation4 + $0x88] sm:$0xff] %vm5141_vm1, %v5835_v23  ;;  %v5140_v9 = vadd.f32 %v5124_v53, %v5092_v54  ;;  %v5637_v43 = vmul.f32 1.442695, %v16012_v20  ;;  %v5775_v23 = vld [vmem:[#allocation4 + $0xa8] sm:$0xff]  ;;  %v5792_v53 = vmul.f32 %v14676_v10, %v5776_v55 }
 0xb8e   : > { %v5807_v5 = vpop.xlane.xlu0 %5806  ;;  %11757 = vpow2.f32 %v5631_v28  ;;  %v5791_v7 = vmul.f32 %v14742_v15, %v5775_v23 }
 0xb8f   : > { %5157 = vst.msk [vmem:[#allocation4 + $0x78] sm:$0xff] %vm5141_vm1, %v5140_v9  ;;  %v5836_v46 = vadd.f32 %v5807_v5, %v5788_v61  ;;  %v16014_v9 = vld [vmem:[#allocation98_spill] sm:$0xff]  ;;  %11759 = vpow2.f32 %v5637_v43  ;;  %v5781_v43 = vld [vmem:[#allocation4 + $0xd8] sm:$0xff] }
 0xb90   : > { %v5803_v30 = vpop.xlane.xlu1 %5802  ;;  %v16015_v61 = vsub.f32 %v16013_v31, %v16014_v9  ;;  %v14754_v5 = vpop.eup %11751 }
 0xb91   : > { %5852 = vst.msk [vmem:[#allocation4 + $0x90] sm:$0xff] %vm5141_vm1, %v5836_v46  ;;  %v5834_v48 = vadd.f32 %v5803_v30, %v5786_v33  ;;  %v5777_v46 = vld [vmem:[#allocation4 + $0xb8] sm:$0xff]  ;;  %v5794_v33 = vmul.f32 %v14680_v14, %v5778_v58  ;;  %v5796_v14 = vmul.f32 %v14683_v51, %v5780_v18 }
 0xb92   : > { %v5811_v13 = vpop.xlane.xlu0 %5810  ;;  %v5635_v39 = vmul.f32 1.442695, %v16015_v61 }
 0xb93   : > { %5850 = vst.msk [vmem:[#allocation4 + $0x80] sm:$0xff] %vm5141_vm1, %v5834_v48  ;;  %v5838_v50 = vadd.f32 %v5811_v13, %v5790_v52  ;;  %v5793_v52 = vmul.f32 %v14754_v5, %v5777_v46 }
 0xb94   : > { %v5809_v32 = vpop.xlane.xlu1 %5808  ;;  %11761 = vpow2.f32 %v5635_v39  ;;  %v14763_v16 = vpop.eup %11753 }
 0xb95   : > { %5854 = vst.msk [vmem:[#allocation4 + $0xa0] sm:$0xff] %vm5141_vm1, %v5838_v50  ;;  %v5837_v54 = vadd.f32 %v5809_v32, %v5789_v36  ;;  %v14767_v13 = vpop.eup %11755  ;;  %11763 = vpow2.f32 %v5639_v0  ;;  %v5782_v50 = vld [vmem:[#allocation4 + $0xe0] sm:$0xff]  ;;  %v5795_v12 = vmul.f32 %v14763_v16, %v5779_v45 }
 0xb96   : > { %v5815_v38 = vpop.xlane.xlu0 %5814  ;;  %v5798_v23 = vmul.f32 %v14767_v13, %v5782_v50 }
 0xb97   : > { %5853 = vst.msk [vmem:[#allocation4 + $0x98] sm:$0xff] %vm5141_vm1, %v5837_v54  ;;  %v5840_v8 = vadd.f32 %v5815_v38, %v5792_v53  ;;  %v5784_v53 = vld [vmem:[#allocation4 + $0xf0] sm:$0xff]  ;;  %v5783_v38 = vld [vmem:[#allocation4 + $0xe8] sm:$0xff] }
 0xb98   : > { %v5813_v24 = vpop.xlane.xlu1 %5812  ;;  %v14771_v21 = vpop.eup %11757 }
 0xb99   : > { %5856 = vst.msk [vmem:[#allocation4 + $0xb0] sm:$0xff] %vm5141_vm1, %v5840_v8  ;;  %v5839_v10 = vadd.f32 %v5813_v24, %v5791_v7  ;;  %v14775_v51 = vpop.eup %11759  ;;  %v5797_v9 = vmul.f32 %v14771_v21, %v5781_v43 }
 0xb9a   : > { %v5819_v30 = vpop.xlane.xlu0 %5818  ;;  %v5800_v8 = vmul.f32 %v14775_v51, %v5784_v53  ;;  %v16021_v53 = vld [vmem:[#allocation54_spill] sm:$0xff] }
 0xb9b   : > { %5855 = vst.msk [vmem:[#allocation4 + $0xa8] sm:$0xff] %vm5141_vm1, %v5839_v10  ;;  %v5842_v48 = vadd.f32 %v5819_v30, %v5794_v33  ;;  %v5158_v30 = vld [vmem:[#allocation5] sm:$0xff] }
 0xb9c   : > { %v5817_v2 = vpop.xlane.xlu1 %5816 }
 0xb9d   : > { %5858 = vst.msk [vmem:[#allocation4 + $0xc0] sm:$0xff] %vm5141_vm1, %v5842_v48  ;;  %v5841_v28 = vadd.f32 %v5817_v2, %v5793_v52  ;;  %v5159_v52 = vld [vmem:[#allocation5 + $0x20] sm:$0xff] }
 0xb9e   : > { %v5823_v55 = vpop.xlane.xlu0 %5822  ;;  %v14779_v61 = vpop.eup %11761 }
 0xb9f   : > { %5857 = vst.msk [vmem:[#allocation4 + $0xb8] sm:$0xff] %vm5141_vm1, %v5841_v28  ;;  %v5844_v36 = vadd.f32 %v5823_v55, %v5796_v14  ;;  %v5799_v46 = vmul.f32 %v14779_v61, %v5783_v38  ;;  %v14785_v10 = vpop.eup %11763  ;;  %v5161_v28 = vld [vmem:[#allocation5 + $0x60] sm:$0xff]  ;;  %v16019_v14 = vld [vmem:[#allocation53_spill] sm:$0xff] }
 0xba0   : > { %v5821_v20 = vpop.xlane.xlu1 %5820  ;;  %v5801_v4 = vmul.f32 %v14785_v10, %v5785_v27  ;;  %v5162_v38 = vld [vmem:[#allocation5 + $0x80] sm:$0xff] }
 0xba1   : > { %5860 = vst.msk [vmem:[#allocation4 + $0xd0] sm:$0xff] %vm5141_vm1, %v5844_v36  ;;  %v5843_v32 = vadd.f32 %v5821_v20, %v5795_v12  ;;  %v5160_v12 = vld [vmem:[#allocation5 + $0x40] sm:$0xff]  ;;  %v16020_v20 = vld [vmem:[#allocation55_spill] sm:$0xff] }
 0xba2   : > { %v5827_v54 = vpop.xlane.xlu0 %5826 }
 0xba3   : > { %5859 = vst.msk [vmem:[#allocation4 + $0xc8] sm:$0xff] %vm5141_vm1, %v5843_v32  ;;  %v5846_v31 = vadd.f32 %v5827_v54, %v5798_v23  ;;  %v5163_v54 = vld [vmem:[#allocation5 + $0xa0] sm:$0xff] }
 0xba4   : > { %v5825_v39 = vpop.xlane.xlu1 %5824 }
 0xba5   : > { %5862 = vst.msk [vmem:[#allocation4 + $0xe0] sm:$0xff] %vm5141_vm1, %v5846_v31  ;;  %v5845_v58 = vadd.f32 %v5825_v39, %v5797_v9 }
 0xba6   : > { %v5831_v7 = vpop.xlane.xlu0 %5830 }
 0xba7   : > { %5861 = vst.msk [vmem:[#allocation4 + $0xd8] sm:$0xff] %vm5141_vm1, %v5845_v58  ;;  %v5848_v24 = vadd.f32 %v5831_v7, %v5800_v8  ;;  %v16022_v58 = vld [vmem:[#allocation52_spill] sm:$0xff] }
 0xba8   : > { %v5829_v33 = vpop.xlane.xlu1 %5828 }
 0xba9   : > { %5864 = vst.msk [vmem:[#allocation4 + $0xf0] sm:$0xff] %vm5141_vm1, %v5848_v24  ;;  %v5847_v59 = vadd.f32 %v5829_v33, %v5799_v46  ;;  %v5165_v46 = vld [vmem:[#allocation5 + $0xe0] sm:$0xff]  ;;  %v16023_v33 = vld [vmem:[#allocation59_spill] sm:$0xff] }
 0xbab   : > { %5863 = vst.msk [vmem:[#allocation4 + $0xe8] sm:$0xff] %vm5141_vm1, %v5847_v59 }
 0xbac   : > { %v5833_v0 = vpop.xlane.xlu1 %5832 }
 0xbad   : > { %v5849_v18 = vadd.f32 %v5833_v0, %v5801_v4  ;;  %v5164_v0 = vld [vmem:[#allocation5 + $0xc0] sm:$0xff] }
 0xbae   : > { %v5177_v48 = vpop.permute.xlu0 %5176 }
 0xbaf   : > { %5865 = vst.msk [vmem:[#allocation4 + $0xf8] sm:$0xff] %vm5141_vm1, %v5849_v18  ;;  %v5254_v2 = vmul.f32 %v5177_v48, %v5158_v30  ;;  %v16024_v30 = vld [vmem:[#allocation57_spill] sm:$0xff] }
 0xbb0   : > { %v5182_v45 = vpop.permute.xlu1 %5181 }
 0xbb1   : > { %v5375_v55 = vadd.f32 %v16019_v14, %v5254_v2  ;;  %v5255_v50 = vmul.f32 %v5182_v45, %v5159_v52  ;;  %v5167_v2 = vld [vmem:[#allocation5 + $0x120] sm:$0xff]  ;;  %v16025_v45 = vld [vmem:[#allocation58_spill] sm:$0xff] }
 0xbb2   : > { %v5192_v36 = vpop.permute.xlu0 %5191 }
 0xbb3   : > { %5391 = vst [vmem:[#allocation5] sm:$0xff] %v5375_v55  ;;  %v5376_v43 = vadd.f32 %v16020_v20, %v5255_v50  ;;  %v5257_v32 = vmul.f32 %v5192_v36, %v5161_v28  ;;  %v5166_v50 = vld [vmem:[#allocation5 + $0x100] sm:$0xff] }
 0xbb4   : > { %v5187_v23 = vpop.permute.xlu1 %5186  ;;  %v16026_v36 = vld [vmem:[#allocation56_spill] sm:$0xff] }
 0xbb5   : > { %5392 = vst [vmem:[#allocation5 + $0x20] sm:$0xff] %v5376_v43  ;;  %v5378_v31 = vadd.f32 %v16021_v53, %v5257_v32  ;;  %v5256_v9 = vmul.f32 %v5187_v23, %v5160_v12  ;;  %v5169_v32 = vld [vmem:[#allocation5 + $0x160] sm:$0xff]  ;;  %v16027_v23 = vld [vmem:[#allocation63_spill] sm:$0xff] }
 0xbb6   : > { %v5202_v39 = vpop.permute.xlu0 %5201 }
 0xbb7   : > { %5394 = vst [vmem:[#allocation5 + $0x60] sm:$0xff] %v5378_v31  ;;  %v5377_v8 = vadd.f32 %v16022_v58, %v5256_v9  ;;  %v5259_v7 = vmul.f32 %v5202_v39, %v5163_v54  ;;  %v5168_v9 = vld [vmem:[#allocation5 + $0x140] sm:$0xff]  ;;  %v16028_v39 = vld [vmem:[#allocation61_spill] sm:$0xff] }
 0xbb8   : > { %v5197_v24 = vpop.permute.xlu1 %5196 }
 0xbb9   : > { %5393 = vst [vmem:[#allocation5 + $0x40] sm:$0xff] %v5377_v8  ;;  %v5380_v27 = vadd.f32 %v16023_v33, %v5259_v7  ;;  %v5258_v59 = vmul.f32 %v5197_v24, %v5162_v38  ;;  %v5171_v7 = vld [vmem:[#allocation5 + $0x1a0] sm:$0xff]  ;;  %v16029_v24 = vld [vmem:[#allocation62_spill] sm:$0xff] }
 0xbba   : > { %v5212_v4 = vpop.permute.xlu0 %5211 }
 0xbbb   : > { %5396 = vst [vmem:[#allocation5 + $0xa0] sm:$0xff] %v5380_v27  ;;  %v5379_v18 = vadd.f32 %v16024_v30, %v5258_v59  ;;  %v5261_v48 = vmul.f32 %v5212_v4, %v5165_v46  ;;  %v5170_v59 = vld [vmem:[#allocation5 + $0x180] sm:$0xff] }
 0xbbc   : > { %v5207_v52 = vpop.permute.xlu1 %5206  ;;  %v16030_v4 = vld [vmem:[#allocation60_spill] sm:$0xff] }
 0xbbd   : > { %5395 = vst [vmem:[#allocation5 + $0x80] sm:$0xff] %v5379_v18  ;;  %v5382_v28 = vadd.f32 %v16025_v45, %v5261_v48  ;;  %v5260_v14 = vmul.f32 %v5207_v52, %v5164_v0  ;;  %v5173_v48 = vld [vmem:[#allocation5 + $0x1e0] sm:$0xff]  ;;  %v16031_v52 = vld [vmem:[#allocation67_spill] sm:$0xff] }
 0xbbe   : > { %v5222_v55 = vpop.permute.xlu0 %5221 }
 0xbbf   : > { %5398 = vst [vmem:[#allocation5 + $0xe0] sm:$0xff] %v5382_v28  ;;  %v5381_v12 = vadd.f32 %v16026_v36, %v5260_v14  ;;  %v5263_v20 = vmul.f32 %v5222_v55, %v5167_v2  ;;  %v5172_v14 = vld [vmem:[#allocation5 + $0x1c0] sm:$0xff]  ;;  %v16032_v55 = vld [vmem:[#allocation65_spill] sm:$0xff] }
 0xbc0   : > { %v5217_v43 = vpop.permute.xlu1 %5216 }
 0xbc1   : > { %5397 = vst [vmem:[#allocation5 + $0xc0] sm:$0xff] %v5381_v12  ;;  %v5384_v54 = vadd.f32 %v16027_v23, %v5263_v20  ;;  %v5262_v53 = vmul.f32 %v5217_v43, %v5166_v50  ;;  %v5866_v20 = vld [vmem:[#allocation5 + $0x8] sm:$0xff]  ;;  %v16033_v43 = vld [vmem:[#allocation66_spill] sm:$0xff] }
 0xbc2   : > { %v5232_v31 = vpop.permute.xlu0 %5231 }
 0xbc3   : > { %5400 = vst [vmem:[#allocation5 + $0x120] sm:$0xff] %v5384_v54  ;;  %v5383_v38 = vadd.f32 %v16028_v39, %v5262_v53  ;;  %v5265_v58 = vmul.f32 %v5232_v31, %v5169_v32  ;;  %v5867_v53 = vld [vmem:[#allocation5 + $0x28] sm:$0xff]  ;;  %v16034_v31 = vld [vmem:[#allocation64_spill] sm:$0xff] }
 0xbc4   : > { %v5227_v8 = vpop.permute.xlu1 %5226 }
 0xbc5   : > { %5399 = vst [vmem:[#allocation5 + $0x100] sm:$0xff] %v5383_v38  ;;  %v5386_v46 = vadd.f32 %v16029_v24, %v5265_v58  ;;  %v5264_v33 = vmul.f32 %v5227_v8, %v5168_v9  ;;  %v5869_v58 = vld [vmem:[#allocation5 + $0x68] sm:$0xff] }
 0xbc6   : > { %v5242_v27 = vpop.permute.xlu0 %5241  ;;  %v16035_v8 = vld [vmem:[#allocation101_spill] sm:$0xff] }
 0xbc7   : > { %5402 = vst [vmem:[#allocation5 + $0x160] sm:$0xff] %v5386_v46  ;;  %v5385_v0 = vadd.f32 %v16030_v4, %v5264_v33  ;;  %v5267_v30 = vmul.f32 %v5242_v27, %v5171_v7  ;;  %v5868_v33 = vld [vmem:[#allocation5 + $0x48] sm:$0xff]  ;;  %v16036_v27 = vld [vmem:[#allocation103_spill] sm:$0xff] }
 0xbc8   : > { %v5237_v18 = vpop.permute.xlu1 %5236 }
 0xbc9   : > { %5401 = vst [vmem:[#allocation5 + $0x140] sm:$0xff] %v5385_v0  ;;  %v5388_v2 = vadd.f32 %v16031_v52, %v5267_v30  ;;  %v5266_v45 = vmul.f32 %v5237_v18, %v5170_v59  ;;  %v16037_v30 = vld [vmem:[#allocation102_spill] sm:$0xff]  ;;  %v5870_v52 = vld [vmem:[#allocation5 + $0x88] sm:$0xff] }
 0xbca   : > { %v5252_v28 = vpop.permute.xlu0 %5251 }
 0xbcb   : > { %5404 = vst [vmem:[#allocation5 + $0x1a0] sm:$0xff] %v5388_v2  ;;  %v5387_v50 = vadd.f32 %v16032_v55, %v5266_v45  ;;  %v5269_v36 = vmul.f32 %v5252_v28, %v5173_v48  ;;  %v16038_v2 = vld [vmem:[#allocation100_spill] sm:$0xff]  ;;  %v5872_v55 = vld [vmem:[#allocation5 + $0xc8] sm:$0xff] }
 0xbcc   : > { %v5247_v12 = vpop.permute.xlu1 %5246 }
 0xbcd   : > { %5403 = vst [vmem:[#allocation5 + $0x180] sm:$0xff] %v5387_v50  ;;  %v5390_v32 = vadd.f32 %v16033_v43, %v5269_v36  ;;  %v5268_v23 = vmul.f32 %v5247_v12, %v5172_v14  ;;  %v16039_v50 = vld [vmem:[#allocation105_spill] sm:$0xff] }
 0xbce   : > { %v5885_v54 = vpop.permute.xlu0 %5884  ;;  %v5874_v43 = vld [vmem:[#allocation5 + $0x108] sm:$0xff] }
 0xbcf   : > { %5406 = vst [vmem:[#allocation5 + $0x1e0] sm:$0xff] %v5390_v32  ;;  %v5389_v9 = vadd.f32 %v16034_v31, %v5268_v23  ;;  %v5962_v39 = vmul.f32 %v5885_v54, %v5866_v20  ;;  %v16040_v32 = vld [vmem:[#allocation104_spill] sm:$0xff]  ;;  %v5876_v31 = vld [vmem:[#allocation5 + $0x148] sm:$0xff] }
 0xbd0   : > { %v5890_v38 = vpop.permute.xlu1 %5889 }
 0xbd1   : > { %5405 = vst [vmem:[#allocation5 + $0x1c0] sm:$0xff] %v5389_v9  ;;  %v6083_v7 = vadd.f32 %v16035_v8, %v5962_v39  ;;  %v5963_v24 = vmul.f32 %v5890_v38, %v5867_v53  ;;  %v16041_v9 = vld [vmem:[#allocation109_spill] sm:$0xff]  ;;  %v16042_v8 = vld [vmem:[#allocation108_spill] sm:$0xff] }
 0xbd2   : > { %v5900_v46 = vpop.permute.xlu0 %5899 }
 0xbd3   : > { %6099 = vst [vmem:[#allocation5 + $0x8] sm:$0xff] %v6083_v7  ;;  %v6084_v59 = vadd.f32 %v16036_v27, %v5963_v24  ;;  %v5965_v4 = vmul.f32 %v5900_v46, %v5869_v58 }
 0xbd4   : > { %v5895_v0 = vpop.permute.xlu1 %5894 }
 0xbd5   : > { %6100 = vst [vmem:[#allocation5 + $0x28] sm:$0xff] %v6084_v59  ;;  %v6086_v18 = vadd.f32 %v16037_v30, %v5965_v4  ;;  %v5964_v48 = vmul.f32 %v5895_v0, %v5868_v33 }
 0xbd7   : > { %6102 = vst [vmem:[#allocation5 + $0x68] sm:$0xff] %v6086_v18  ;;  %v6085_v45 = vadd.f32 %v16038_v2, %v5964_v48 }
 0xbd8   : > { %v5905_v28 = vpop.permute.xlu1 %5904 }
 0xbd9   : > { %6101 = vst [vmem:[#allocation5 + $0x48] sm:$0xff] %v6085_v45  ;;  %v5966_v14 = vmul.f32 %v5905_v28, %v5870_v52 }
 0xbdb   : > { %v6087_v36 = vadd.f32 %v16039_v50, %v5966_v14 }
 0xbdc   : > { %v5915_v12 = vpop.permute.xlu1 %5914 }
 0xbdd   : > { %6103 = vst [vmem:[#allocation5 + $0x88] sm:$0xff] %v6087_v36  ;;  %v5968_v20 = vmul.f32 %v5915_v12, %v5872_v55 }
 0xbdf   : > { %v6089_v23 = vadd.f32 %v16040_v32, %v5968_v20 }
 0xbe0   : > { %v5925_v54 = vpop.permute.xlu1 %5924 }
 0xbe1   : > { %6105 = vst [vmem:[#allocation5 + $0xc8] sm:$0xff] %v6089_v23  ;;  %v5970_v53 = vmul.f32 %v5925_v54, %v5874_v43 }
 0xbe3   : > { %v6091_v39 = vadd.f32 %v16041_v9, %v5970_v53 }
 0xbe4   : > { %v5935_v38 = vpop.permute.xlu1 %5934 }
 0xbe5   : > { %6107 = vst [vmem:[#allocation5 + $0x108] sm:$0xff] %v6091_v39  ;;  %v5972_v58 = vmul.f32 %v5935_v38, %v5876_v31 }
 0xbe7   : > { %v6093_v7 = vadd.f32 %v16042_v8, %v5972_v58 }
 0xbe9   : > { %6109 = vst [vmem:[#allocation5 + $0x148] sm:$0xff] %v6093_v7 }
 0xc07   : > { %v14815_v24 = vpop.f32.mrb[32].mxu1 }
 0xc08   : > { %16043 = vst [vmem:[#allocation33_spill] sm:$0xff] %v14815_v24  ;;  %v14817_v46 = vpop.f32.mrb[33].mxu1  ;;  %v14966_v24 = vld [vmem:[#allocation3 + $0x1d0] sm:$0xff] }
 0xc09   : > { %16044 = vst [vmem:[#allocation35_spill] sm:$0xff] %v14817_v46  ;;  %v14819_v33 = vpop.f32.mrb[34].mxu1  ;;  %16072 = vst [vmem:[#allocation122_spill] sm:$0xff] %v14966_v24  ;;  %v14985_v46 = vld [vmem:[#allocation3 + $0x1d8] sm:$0xff] }
 0xc0a   : > { %16045 = vst [vmem:[#allocation32_spill] sm:$0xff] %v14819_v33  ;;  %v14821_v27 = vpop.f32.mrb[35].mxu1  ;;  %16074 = vst [vmem:[#allocation70_spill] sm:$0xff] %v14985_v46  ;;  %v14987_v33 = vld [vmem:[#allocation3 + $0x1c0] sm:$0xff] }
 0xc0b   : > { %16046 = vst [vmem:[#allocation34_spill] sm:$0xff] %v14821_v27  ;;  %16075 = vst [vmem:[#allocation69_spill] sm:$0xff] %v14987_v33 }
 0xc13   : > { %v14823_v59 = vpop.f32.mrb[36].mxu1 }
 0xc14   : > { %16047 = vst [vmem:[#allocation117_spill] sm:$0xff] %v14823_v59  ;;  %v14825_v4 = vpop.f32.mrb[37].mxu1  ;;  %v14946_v59 = vld [vmem:[#allocation3 + $0x1a0] sm:$0xff] }
 0xc15   : > { %16048 = vst [vmem:[#allocation116_spill] sm:$0xff] %v14825_v4  ;;  %v14827_v0 = vpop.f32.mrb[38].mxu1  ;;  %v4699_v4 = vld [vmem:[%s13617_s18 + $0x78] sm:$0xff] }
 0xc16   : > { %16049 = vst [vmem:[#allocation41_spill] sm:$0xff] %v14827_v0  ;;  %v14829_v30 = vpop.f32.mrb[39].mxu1 }
 0xc17   : > { %16050 = vst [vmem:[#allocation43_spill] sm:$0xff] %v14829_v30  ;;  %v14964_v30 = vld [vmem:[#allocation3 + $0x1a8] sm:$0xff] }
 0xc1b   : > { %v14831_v18 = vpop.f32.mrb[40].mxu1 }
 0xc1c   : > { %16051 = vst [vmem:[#allocation40_spill] sm:$0xff] %v14831_v18  ;;  %v14833_v48 = vpop.f32.mrb[41].mxu1  ;;  %v14930_v18 = vld [vmem:[#allocation3 + $0x1b0] sm:$0xff] }
 0xc1d   : > { %16052 = vst [vmem:[#allocation42_spill] sm:$0xff] %v14833_v48  ;;  %v14835_v52 = vpop.f32.mrb[42].mxu1 }
 0xc1e   : > { %16053 = vst [vmem:[#allocation121_spill] sm:$0xff] %v14835_v52  ;;  %v14837_v2 = vpop.f32.mrb[43].mxu1 }
 0xc1f   : > { %16054 = vst [vmem:[#allocation119_spill] sm:$0xff] %v14837_v2 }
 0xc23   : > { %v14839_v45 = vpop.f32.mrb[44].mxu1 }
 0xc24   : > { %16055 = vst [vmem:[#allocation37_spill] sm:$0xff] %v14839_v45  ;;  %v14841_v28 = vpop.f32.mrb[45].mxu1  ;;  %v4687_v45 = vld [vmem:[%s13617_s18 + $0x18] sm:$0xff] }
 0xc25   : > { %16056 = vst [vmem:[#allocation39_spill] sm:$0xff] %v14841_v28  ;;  %v14843_v14 = vpop.f32.mrb[46].mxu1  ;;  %10583 = vmatprep.subr.bf16.mxu0 %v4687_v45 }
 0xc26   : > { %16057 = vst [vmem:[#allocation36_spill] sm:$0xff] %v14843_v14  ;;  %v14845_v55 = vpop.f32.mrb[47].mxu1  ;;  %v14903_v14 = vld [vmem:[#allocation3 + $0x190] sm:$0xff]  ;;  %10584 = vmatpush3.bf16.msra.mxu0 %v4687_v45  ;;  %v4691_v45 = vld [vmem:[%s13617_s18 + $0x38] sm:$0xff] }
 0xc27   : > { %16058 = vst [vmem:[#allocation38_spill] sm:$0xff] %v14845_v55  ;;  %10585 = vmatprep.subr.bf16.mxu0 %v4691_v45  ;;  %v4695_v55 = vld [vmem:[%s13617_s18 + $0x58] sm:$0xff] }
 0xc2a   : > { %10586 = vmatpush3.bf16.msra.mxu0 %v4691_v45  ;;  %v14944_v45 = vld [vmem:[#allocation3 + $0x1b8] sm:$0xff] }
 0xc2b   : > { %10587 = vmatprep.subr.bf16.mxu0 %v4695_v55  ;;  %16070 = vst [vmem:[#allocation46_spill] sm:$0xff] %v14944_v45 }
 0xc2e   : > { %10588 = vmatpush3.bf16.msra.mxu0 %v4695_v55 }
 0xc2f   : > { %10589 = vmatprep.subr.bf16.mxu0 %v4699_v4 }
 0xc32   : > { %10590 = vmatpush3.bf16.msra.mxu0 %v4699_v4  ;;  %v4703_v4 = vld [vmem:[%s13617_s18 + $0x98] sm:$0xff] }
 0xc33   : > { %10591 = vmatprep.subr.bf16.mxu0 %v4703_v4 }
 0xc36   : > { %10592 = vmatpush3.bf16.msra.mxu0 %v4703_v4  ;;  %v4707_v4 = vld [vmem:[%s13617_s18 + $0xb8] sm:$0xff] }
 0xc37   : > { %10593 = vmatprep.subr.bf16.mxu0 %v4707_v4 }
 0xc3a   : > { %10594 = vmatpush3.bf16.msra.mxu0 %v4707_v4  ;;  %v4711_v4 = vld [vmem:[%s13617_s18 + $0xd8] sm:$0xff] }
 0xc3b   : > { %10595 = vmatprep.subr.bf16.mxu0 %v4711_v4 }
 0xc3e   : > { %10596 = vmatpush3.bf16.msra.mxu0 %v4711_v4 }
 0xc47   : > { %v14847_v50 = vpop.f32.mrb[48].mxu1 }
 0xc48   : > { %6965 = vmax.xlane.f32.xlu0 %v14847_v50  ;;  %v14850_v36 = vpop.f32.mrb[49].mxu1 }
 0xc49   : > { %v14852_v12 = vpop.f32.mrb[50].mxu1 }
 0xc4a   : > { %v14854_v20 = vpop.f32.mrb[51].mxu1 }
 0xc4b   : > { %6963 = vmax.xlane.f32.xlu1 %v14854_v20 }
 0xc4c   : > { %6961 = vmax.xlane.f32.xlu0 %v14850_v36 }
 0xc4f   : > { %v14858_v43 = vpop.f32.mrb[52].mxu1 }
 0xc50   : > { %16059 = vst [vmem:[#allocation120_spill] sm:$0xff] %v14858_v43  ;;  %6967 = vmax.xlane.f32.xlu0 %v14852_v12  ;;  %6973 = vmax.xlane.f32.xlu1 %v14858_v43  ;;  %v14862_v32 = vpop.f32.mrb[53].mxu1 }
 0xc51   : > { %v14864_v23 = vpop.f32.mrb[54].mxu1 }
 0xc52   : > { %16060 = vst [vmem:[#allocation118_spill] sm:$0xff] %v14864_v23  ;;  %v14866_v54 = vpop.f32.mrb[55].mxu1 }
 0xc53   : > { %16061 = vst [vmem:[#allocation49_spill] sm:$0xff] %v14866_v54 }
 0xc54   : > { %6969 = vmax.xlane.f32.xlu1 %v14862_v32  ;;  %6975 = vmax.xlane.f32.xlu0 %v14864_v23  ;;  %v15027_v23 = vld [vmem:[#allocation3 + $0x1f8] sm:$0xff] }
 0xc55   : > { %16082 = vst [vmem:[#allocation83_spill] sm:$0xff] %v15027_v23 }
 0xc57   : > { %v14870_v53 = vpop.f32.mrb[56].mxu1 }
 0xc58   : > { %16062 = vst [vmem:[#allocation51_spill] sm:$0xff] %v14870_v53  ;;  %6971 = vmax.xlane.f32.xlu0 %v14866_v54  ;;  %6981 = vmax.xlane.f32.xlu1 %v14870_v53  ;;  %v14874_v31 = vpop.f32.mrb[57].mxu1 }
 0xc59   : > { %16063 = vst [vmem:[#allocation48_spill] sm:$0xff] %v14874_v31  ;;  %v14876_v9 = vpop.f32.mrb[58].mxu1 }
 0xc5a   : > { %16064 = vst [vmem:[#allocation50_spill] sm:$0xff] %v14876_v9  ;;  %v14878_v39 = vpop.f32.mrb[59].mxu1 }
 0xc5b   : > { %16065 = vst [vmem:[#allocation125_spill] sm:$0xff] %v14878_v39 }
 0xc5c   : > { %6977 = vmax.xlane.f32.xlu1 %v14874_v31  ;;  %6983 = vmax.xlane.f32.xlu0 %v14876_v9  ;;  %v15006_v9 = vld [vmem:[#allocation3 + $0x1c8] sm:$0xff]  ;;  %v4715_v31 = vld [vmem:[%s13617_s18 + $0xf8] sm:$0xff] }
 0xc5d   : > { %16078 = vst [vmem:[#allocation74_spill] sm:$0xff] %v15006_v9  ;;  %10597 = vmatprep.subr.bf16.mxu0 %v4715_v31 }
 0xc5e   : > { %10598 = vmatpush3.bf16.msra.mxu0 %v4715_v31 }
 0xc5f   : > { %v14882_v38 = vpop.f32.mrb[60].mxu1 }
 0xc60   : > { %16066 = vst [vmem:[#allocation123_spill] sm:$0xff] %v14882_v38  ;;  %6979 = vmax.xlane.f32.xlu0 %v14878_v39  ;;  %6989 = vmax.xlane.f32.xlu1 %v14882_v38  ;;  %v14886_v58 = vpop.f32.mrb[61].mxu1  ;;  %v15029_v39 = vld [vmem:[#allocation3 + $0x1e0] sm:$0xff] }
 0xc61   : > { %16067 = vst [vmem:[#allocation45_spill] sm:$0xff] %v14886_v58  ;;  %v14888_v8 = vpop.f32.mrb[62].mxu1  ;;  %16083 = vst [vmem:[#allocation77_spill] sm:$0xff] %v15029_v39 }
 0xc62   : > { %16068 = vst [vmem:[#allocation47_spill] sm:$0xff] %v14888_v8  ;;  %v14890_v7 = vpop.f32.mrb[63].mxu1 }
 0xc63   : > { %16069 = vst [vmem:[#allocation44_spill] sm:$0xff] %v14890_v7 }
 0xc64   : > { %6985 = vmax.xlane.f32.xlu1 %v14886_v58  ;;  %6991 = vmax.xlane.f32.xlu0 %v14888_v8 }
 0xc68   : > { %6987 = vmax.xlane.f32.xlu0 %v14890_v7  ;;  %v15008_v7 = vld [vmem:[#allocation3 + $0x1f0] sm:$0xff] }
 0xc69   : > { %16079 = vst [vmem:[#allocation73_spill] sm:$0xff] %v15008_v7 }
 0xc75   : > { %5944 = vperm.xlu1 %11604, %v14767_v13  }
 0xc79   : > { %5949 = vperm.xlu1 %11604, %v14779_v61   ;;  %v14908_v61 = vld [vmem:[#allocation3 + $0x188] sm:$0xff] }
 0xc7e   : > { %5909 = vperm.xlu0 %11603, %v14742_v15   ;;  %v14910_v15 = vld [vmem:[#allocation3 + $0x180] sm:$0xff] }
 0xc82   : > { %5919 = vperm.xlu0 %11603, %v14754_v5   ;;  %v14928_v5 = vld [vmem:[#allocation3 + $0x198] sm:$0xff] }
 0xc86   : > { %5929 = vperm.xlu0 %11603, %v14763_v16  }
 0xc8a   : > { %5939 = vperm.xlu0 %11603, %v14771_v21  }
 0xc8e   : > { %5954 = vperm.xlu0 %11603, %v14775_v51  }
 0xcd5   : > { %v6966_v28 = vpop.xlane.xlu0 %6965 }
 0xcd6   : > { %v14906_v13 = vmax.f32 %v14903_v14, %v6966_v28 }
 0xcd8   : > { %7533 = vst.msk [vmem:[#allocation3 + $0x190] sm:$0xff] %vm5141_vm1, %v14906_v13  ;;  %7069 = vperm.xlu0 %11603, %v14906_v13   ;;  %v6964_v16 = vpop.xlane.xlu1 %6963 }
 0xcd9   : > { %v14918_v21 = vmax.f32 %v14908_v61, %v6964_v16  ;;  %v6962_v51 = vpop.xlane.xlu0 %6961 }
 0xcda   : > { %v14922_v28 = vmax.f32 %v14910_v15, %v6962_v51 }
 0xcdb   : > { %7532 = vst.msk [vmem:[#allocation3 + $0x188] sm:$0xff] %vm5141_vm1, %v14918_v21 }
 0xcdc   : > { %7531 = vst.msk [vmem:[#allocation3 + $0x180] sm:$0xff] %vm5141_vm1, %v14922_v28  ;;  %7059 = vperm.xlu1 %11604, %v14922_v28  }
 0xcdd   : > { %v6968_v51 = vpop.xlane.xlu0 %6967  ;;  %v6974_v52 = vpop.xlane.xlu1 %6973 }
 0xcde   : > { %v14939_v48 = vmax.f32 %v14928_v5, %v6968_v51  ;;  %v14942_v2 = vmax.f32 %v14930_v18, %v6974_v52 }
 0xce0   : > { %7534 = vst.msk [vmem:[#allocation3 + $0x198] sm:$0xff] %vm5141_vm1, %v14939_v48  ;;  %7537 = vst.msk [vmem:[#allocation3 + $0x1b0] sm:$0xff] %vm5141_vm1, %v14942_v2  ;;  %7064 = vperm.xlu1 %11604, %v14918_v21  }
 0xce1   : > { %v6976_v52 = vpop.xlane.xlu0 %6975  ;;  %v6970_v51 = vpop.xlane.xlu1 %6969 }
 0xce2   : > { %v14959_v55 = vmax.f32 %v14944_v45, %v6976_v52  ;;  %v14962_v16 = vmax.f32 %v14946_v59, %v6970_v51 }
 0xce4   : > { %16071 = vst [vmem:[#allocation124_spill] sm:$0xff] %v14959_v55  ;;  %7538 = vst.msk [vmem:[#allocation3 + $0x1b8] sm:$0xff] %vm5141_vm1, %v14959_v55  ;;  %7074 = vperm.xlu1 %11604, %v14939_v48   ;;  %7079 = vperm.xlu0 %11603, %v14962_v16  }
 0xce5   : > { %7535 = vst.msk [vmem:[#allocation3 + $0x1a0] sm:$0xff] %vm5141_vm1, %v14962_v16  ;;  %v6972_v52 = vpop.xlane.xlu0 %6971  ;;  %v6982_v51 = vpop.xlane.xlu1 %6981 }
 0xce6   : > { %v14980_v27 = vmax.f32 %v14964_v30, %v6972_v52  ;;  %v14983_v0 = vmax.f32 %v14966_v24, %v6982_v51 }
 0xce8   : > { %16073 = vst [vmem:[#allocation68_spill] sm:$0xff] %v14983_v0  ;;  %7536 = vst.msk [vmem:[#allocation3 + $0x1a8] sm:$0xff] %vm5141_vm1, %v14980_v27  ;;  %7084 = vperm.xlu1 %11604, %v14980_v27   ;;  %7089 = vperm.xlu0 %11603, %v14942_v2  }
 0xce9   : > { %7541 = vst.msk [vmem:[#allocation3 + $0x1d0] sm:$0xff] %vm5141_vm1, %v14983_v0  ;;  %v6984_v52 = vpop.xlane.xlu0 %6983  ;;  %v6978_v51 = vpop.xlane.xlu1 %6977 }
 0xcea   : > { %v15001_v38 = vmax.f32 %v14985_v46, %v6984_v52  ;;  %v15004_v8 = vmax.f32 %v14987_v33, %v6978_v51 }
 0xcec   : > { %16076 = vst [vmem:[#allocation72_spill] sm:$0xff] %v15001_v38  ;;  %16077 = vst [vmem:[#allocation71_spill] sm:$0xff] %v15004_v8  ;;  %7094 = vperm.xlu1 %11604, %v14959_v55   ;;  %7099 = vperm.xlu0 %11603, %v15004_v8  }
 0xced   : > { %7542 = vst.msk [vmem:[#allocation3 + $0x1d8] sm:$0xff] %vm5141_vm1, %v15001_v38  ;;  %7539 = vst.msk [vmem:[#allocation3 + $0x1c0] sm:$0xff] %vm5141_vm1, %v15004_v8  ;;  %v6980_v52 = vpop.xlane.xlu0 %6979  ;;  %v6990_v51 = vpop.xlane.xlu1 %6989  ;;  %v5878_v8 = vld [vmem:[#allocation5 + $0x188] sm:$0xff] }
 0xcee   : > { %v15022_v53 = vmax.f32 %v15006_v9, %v6980_v52  ;;  %v15025_v58 = vmax.f32 %v15008_v7, %v6990_v51  ;;  %v15048_v9 = vld [vmem:[#allocation3 + $0x1e8] sm:$0xff] }
 0xcef   : > { %16086 = vst [vmem:[#allocation91_spill] sm:$0xff] %v15048_v9  ;;  %v5879_v7 = vld [vmem:[#allocation5 + $0x1a8] sm:$0xff] }
 0xcf0   : > { %16080 = vst [vmem:[#allocation75_spill] sm:$0xff] %v15022_v53  ;;  %16081 = vst [vmem:[#allocation81_spill] sm:$0xff] %v15025_v58  ;;  %7104 = vperm.xlu1 %11604, %v15022_v53   ;;  %7109 = vperm.xlu0 %11603, %v14983_v0   ;;  %v5871_v0 = vld [vmem:[#allocation5 + $0xa8] sm:$0xff] }
 0xcf1   : > { %7540 = vst.msk [vmem:[#allocation3 + $0x1c8] sm:$0xff] %vm5141_vm1, %v15022_v53  ;;  %7545 = vst.msk [vmem:[#allocation3 + $0x1f0] sm:$0xff] %vm5141_vm1, %v15025_v58  ;;  %v6992_v52 = vpop.xlane.xlu0 %6991  ;;  %v6986_v51 = vpop.xlane.xlu1 %6985  ;;  %v16088_v53 = vld [vmem:[#allocation113_spill] sm:$0xff] }
 0xcf2   : > { %v15043_v4 = vmax.f32 %v15027_v23, %v6992_v52  ;;  %v15046_v33 = vmax.f32 %v15029_v39, %v6986_v51  ;;  %v5873_v23 = vld [vmem:[#allocation5 + $0xe8] sm:$0xff] }
 0xcf4   : > { %16084 = vst [vmem:[#allocation79_spill] sm:$0xff] %v15043_v4  ;;  %16085 = vst [vmem:[#allocation89_spill] sm:$0xff] %v15046_v33  ;;  %7114 = vperm.xlu1 %11604, %v15001_v38   ;;  %7119 = vperm.xlu0 %11603, %v15046_v33  }
 0xcf5   : > { %7546 = vst.msk [vmem:[#allocation3 + $0x1f8] sm:$0xff] %vm5141_vm1, %v15043_v4  ;;  %7543 = vst.msk [vmem:[#allocation3 + $0x1e0] sm:$0xff] %vm5141_vm1, %v15046_v33  ;;  %v6988_v52 = vpop.xlane.xlu0 %6987  ;;  %v5945_v51 = vpop.permute.xlu1 %5944 }
 0xcf6   : > { %v15061_v31 = vmax.f32 %v15048_v9, %v6988_v52  ;;  %v5974_v46 = vmul.f32 %v5945_v51, %v5878_v8  ;;  %v16089_v52 = vld [vmem:[#allocation115_spill] sm:$0xff] }
 0xcf7   : > { %v16090_v9 = vld [vmem:[#allocation107_spill] sm:$0xff] }
 0xcf8   : > { %16087 = vst [vmem:[#allocation85_spill] sm:$0xff] %v15061_v31  ;;  %7544 = vst.msk [vmem:[#allocation3 + $0x1e8] sm:$0xff] %vm5141_vm1, %v15061_v31  ;;  %v6095_v39 = vadd.f32 %v16088_v53, %v5974_v46  ;;  %7124 = vperm.xlu1 %11604, %v15061_v31   ;;  %7129 = vperm.xlu0 %11603, %v15025_v58   ;;  %v5875_v53 = vld [vmem:[#allocation5 + $0x128] sm:$0xff]  ;;  %v16091_v31 = vld [vmem:[#allocation106_spill] sm:$0xff] }
 0xcf9   : > { %v5950_v33 = vpop.permute.xlu1 %5949 }
 0xcfa   : > { %6111 = vst [vmem:[#allocation5 + $0x188] sm:$0xff] %v6095_v39  ;;  %v5975_v38 = vmul.f32 %v5950_v33, %v5879_v7  ;;  %v5877_v39 = vld [vmem:[#allocation5 + $0x168] sm:$0xff]  ;;  %v16092_v7 = vld [vmem:[#allocation111_spill] sm:$0xff] }
 0xcfc   : > { %v6096_v24 = vadd.f32 %v16089_v52, %v5975_v38  ;;  %7134 = vperm.xlu1 %11604, %v15043_v4  }
 0xcfd   : > { %v5910_v8 = vpop.permute.xlu0 %5909 }
 0xcfe   : > { %6112 = vst [vmem:[#allocation5 + $0x1a8] sm:$0xff] %v6096_v24  ;;  %v5967_v51 = vmul.f32 %v5910_v8, %v5871_v0  ;;  %v5880_v24 = vld [vmem:[#allocation5 + $0x1c8] sm:$0xff]  ;;  %v16093_v0 = vld [vmem:[#allocation110_spill] sm:$0xff] }
 0xd00   : > { %v6088_v54 = vadd.f32 %v16090_v9, %v5967_v51 }
 0xd01   : > { %v5920_v43 = vpop.permute.xlu0 %5919 }
 0xd02   : > { %6104 = vst [vmem:[#allocation5 + $0xa8] sm:$0xff] %v6088_v54  ;;  %v5969_v46 = vmul.f32 %v5920_v43, %v5873_v23  ;;  %v16094_v54 = vld [vmem:[#allocation112_spill] sm:$0xff] }
 0xd04   : > { %v6090_v58 = vadd.f32 %v16091_v31, %v5969_v46  ;;  %v16112_v46 = vld [vmem:[#allocation134_spill] sm:$0xff] }
 0xd05   : > { %v5930_v55 = vpop.permute.xlu0 %5929 }
 0xd06   : > { %6106 = vst [vmem:[#allocation5 + $0xe8] sm:$0xff] %v6090_v58  ;;  %v5971_v33 = vmul.f32 %v5930_v55, %v5875_v53  ;;  %v16108_v58 = vld [vmem:[#allocation139_spill] sm:$0xff]  ;;  %v16113_v53 = vld [vmem:[#allocation136_spill] sm:$0xff] }
 0xd08   : > { %v6092_v38 = vadd.f32 %v16092_v7, %v5971_v33  ;;  %v16114_v33 = vsub.f32 %v16112_v46, %v16113_v53  ;;  %v16115_v7 = vld [vmem:[#allocation135_spill] sm:$0xff]  ;;  %v16135_v53 = vsub.f32 %v14903_v14, %v14906_v13 }
 0xd09   : > { %v5940_v52 = vpop.permute.xlu0 %5939 }
 0xd0a   : > { %6108 = vst [vmem:[#allocation5 + $0x128] sm:$0xff] %v6092_v38  ;;  %v5973_v4 = vmul.f32 %v5940_v52, %v5877_v39  ;;  %v6331_v39 = vmul.f32 1.442695, %v16114_v33  ;;  %v16116_v38 = vld [vmem:[#allocation137_spill] sm:$0xff] }
 0xd0b   : > { %v16117_v52 = vsub.f32 %v16115_v7, %v16116_v38 }
 0xd0c   : > { %v6094_v8 = vadd.f32 %v16093_v0, %v5973_v4  ;;  %v16110_v4 = vld [vmem:[#allocation140_spill] sm:$0xff] }
 0xd0d   : > { %v5955_v45 = vpop.permute.xlu0 %5954  ;;  %v16111_v31 = vsub.f32 %v14330_v29, %v16110_v4  ;;  %v16119_v29 = vld [vmem:[#allocation146_spill] sm:$0xff] }
 0xd0e   : > { %6110 = vst [vmem:[#allocation5 + $0x168] sm:$0xff] %v6094_v8  ;;  %v5976_v9 = vmul.f32 %v5955_v45, %v5880_v24  ;;  %v6329_v24 = vmul.f32 1.442695, %v16117_v52 }
 0xd0f   : > { %v6325_v51 = vmul.f32 1.442695, %v16111_v31 }
 0xd10   : > { %v6097_v43 = vadd.f32 %v16094_v54, %v5976_v9  ;;  %v16118_v9 = vld [vmem:[#allocation144_spill] sm:$0xff] }
 0xd11   : > { %v16120_v54 = vsub.f32 %v16118_v9, %v16119_v29  ;;  %v16138_v9 = vsub.f32 %v14928_v5, %v14939_v48 }
 0xd12   : > { %6113 = vst [vmem:[#allocation5 + $0x1c8] sm:$0xff] %v6097_v43 }
 0xd13   : > { %v6335_v43 = vmul.f32 1.442695, %v16120_v54  ;;  %v7031_v29 = vmul.f32 1.442695, %v16138_v9  ;;  %v16156_v9 = vld [vmem:[#allocation71_spill] sm:$0xff] }
 0xd17   : > { %6512 = vadd.xlane.f32.xlu0 %v14500_v22  ;;  %v16096_v22 = vld [vmem:[#allocation128_spill] sm:$0xff] }
 0xd1b   : > { %6514 = vadd.xlane.f32.xlu0 %v14520_v41 }
 0xd1f   : > { %6518 = vadd.xlane.f32.xlu0 %v14556_v1  ;;  %v16099_v1 = vld [vmem:[#allocation130_spill] sm:$0xff] }
 0xd20   : > { %6510 = vadd.xlane.f32.xlu1 %v14495_v35  ;;  %v16095_v35 = vld [vmem:[#allocation126_spill] sm:$0xff] }
 0xd23   : > { %6522 = vadd.xlane.f32.xlu0 %v14577_v37 }
 0xd24   : > { %6516 = vadd.xlane.f32.xlu1 %v14514_v6  ;;  %v16097_v6 = vsub.f32 %v16095_v35, %v16096_v22  ;;  %v16122_v35 = vld [vmem:[#allocation147_spill] sm:$0xff] }
 0xd26   : > { %v6317_v41 = vmul.f32 1.442695, %v16097_v6 }
 0xd27   : > { %6526 = vadd.xlane.f32.xlu0 %v14597_v25  ;;  %v16101_v25 = vld [vmem:[#allocation129_spill] sm:$0xff] }
 0xd28   : > { %6520 = vadd.xlane.f32.xlu1 %v14550_v56  ;;  %v16098_v56 = vld [vmem:[#allocation127_spill] sm:$0xff]  ;;  %11765 = vpow2.f32 %v6317_v41 }
 0xd29   : > { %v16100_v37 = vsub.f32 %v16098_v56, %v16099_v1  ;;  %v16124_v1 = vld [vmem:[#allocation141_spill] sm:$0xff] }
 0xd2b   : > { %6530 = vadd.xlane.f32.xlu0 %v14616_v49  ;;  %v16102_v49 = vld [vmem:[#allocation132_spill] sm:$0xff] }
 0xd2c   : > { %6524 = vadd.xlane.f32.xlu1 %v14571_v42  ;;  %v6319_v42 = vmul.f32 1.442695, %v16100_v37  ;;  %v16125_v37 = vld [vmem:[#allocation143_spill] sm:$0xff] }
 0xd2e   : > { %11767 = vpow2.f32 %v6319_v42  ;;  %v16126_v42 = vsub.f32 %v16124_v1, %v16125_v37  ;;  %v16142_v1 = vld [vmem:[#allocation46_spill] sm:$0xff]  ;;  %v16143_v37 = vld [vmem:[#allocation124_spill] sm:$0xff] }
 0xd2f   : > { %6534 = vadd.xlane.f32.xlu0 %v14631_v17 }
 0xd30   : > { %6528 = vadd.xlane.f32.xlu1 %v14591_v44  ;;  %v16103_v44 = vsub.f32 %v16101_v25, %v16102_v49  ;;  %v6339_v25 = vmul.f32 1.442695, %v16126_v42  ;;  %v16127_v49 = vld [vmem:[#allocation142_spill] sm:$0xff]  ;;  %v16144_v42 = vsub.f32 %v16142_v1, %v16143_v37  ;;  %v16162_v37 = vld [vmem:[#allocation125_spill] sm:$0xff] }
 0xd32   : > { %v6323_v17 = vmul.f32 1.442695, %v16103_v44  ;;  %v15118_v0 = vpop.eup %11765  ;;  %v16128_v44 = vsub.f32 %v16127_v49, %v14361_v3 }
 0xd33   : > { %6538 = vadd.xlane.f32.xlu0 %v14647_v57  ;;  %v16104_v57 = vld [vmem:[#allocation131_spill] sm:$0xff] }
 0xd34   : > { %6532 = vadd.xlane.f32.xlu1 %v14610_v63  ;;  %v16105_v63 = vld [vmem:[#allocation133_spill] sm:$0xff]  ;;  %11769 = vpow2.f32 %v6323_v17  ;;  %v6337_v17 = vmul.f32 1.442695, %v16128_v44 }
 0xd35   : > { %v16106_v23 = vsub.f32 %v16104_v57, %v16105_v63 }
 0xd38   : > { %6536 = vadd.xlane.f32.xlu1 %v14628_v47  ;;  %v6321_v47 = vmul.f32 1.442695, %v16106_v23  ;;  %v15120_v8 = vpop.eup %11767  ;;  %v16129_v23 = vsub.f32 %v14407_v11, %v14422_v19  ;;  %v16133_v11 = vld [vmem:[#allocation149_spill] sm:$0xff] }
 0xd39   : > { %v16134_v19 = vsub.f32 %v14390_v62, %v16133_v11  ;;  %v16137_v62 = vsub.f32 %v14910_v15, %v14922_v28  ;;  %v16139_v15 = vsub.f32 %v14930_v18, %v14942_v2 }
 0xd3a   : > { %11771 = vpow2.f32 %v6321_v47  ;;  %v6343_v47 = vmul.f32 1.442695, %v16129_v23 }
 0xd3b   : > { %v7025_v52 = vmul.f32 1.442695, %v16137_v62  ;;  %v7037_v28 = vmul.f32 1.442695, %v16139_v15 }
 0xd3c   : > { %6540 = vadd.xlane.f32.xlu1 %v14644_v60  ;;  %v16107_v60 = vld [vmem:[#allocation138_spill] sm:$0xff] }
 0xd3d   : > { %v16109_v45 = vsub.f32 %v16107_v60, %v16108_v58  ;;  %v16130_v60 = vsub.f32 %v14414_v40, %v14425_v34 }
 0xd3e   : > { %v15130_v41 = vpop.eup %11769 }
 0xd3f   : > { %v6327_v55 = vmul.f32 1.442695, %v16109_v45  ;;  %v6341_v3 = vmul.f32 1.442695, %v16130_v60 }
 0xd41   : > { %11773 = vpow2.f32 %v6327_v55  ;;  %v16131_v55 = vld [vmem:[#allocation148_spill] sm:$0xff] }
 0xd42   : > { %11775 = vpow2.f32 %v6325_v51  ;;  %v16132_v4 = vsub.f32 %v16131_v55, %v14402_v26  ;;  %v6345_v51 = vmul.f32 1.442695, %v16134_v19  ;;  %v7029_v26 = vmul.f32 1.442695, %v16135_v53  ;;  %v16150_v19 = vld [vmem:[#allocation70_spill] sm:$0xff] }
 0xd43   : > { %11777 = vpow2.f32 %v6331_v39  ;;  %v16136_v39 = vsub.f32 %v14908_v61, %v14918_v21 }
 0xd44   : > { %11779 = vpow2.f32 %v6329_v24  ;;  %v15132_v56 = vpop.eup %11771  ;;  %v6347_v31 = vmul.f32 1.442695, %v16132_v4 }
 0xd45   : > { %11781 = vpow2.f32 %v6335_v43  ;;  %v7027_v7 = vmul.f32 1.442695, %v16136_v39 }
 0xd49   : > { %5959 = vperm.xlu0 %11603, %v14785_v10   ;;  %v16121_v10 = vld [vmem:[#allocation145_spill] sm:$0xff] }
 0xd4a   : > { %v16123_v22 = vsub.f32 %v16121_v10, %v16122_v35 }
 0xd4b   : > { %v15142_v57 = vpop.eup %11773 }
 0xd4c   : > { %v6333_v6 = vmul.f32 1.442695, %v16123_v22  ;;  %v15144_v63 = vpop.eup %11775 }
 0xd4d   : > { %6597 = vperm.xlu1 %11604, %v15120_v8   ;;  %6592 = vperm.xlu0 %11603, %v15118_v0   ;;  %v15154_v58 = vpop.eup %11777 }
 0xd4e   : > { %11783 = vpow2.f32 %v6333_v6  ;;  %v15156_v45 = vpop.eup %11779 }
 0xd4f   : > { %11785 = vpow2.f32 %v6339_v25  ;;  %v15166_v40 = vpop.eup %11781  ;;  %v7039_v25 = vmul.f32 1.442695, %v16144_v42 }
 0xd50   : > { %11787 = vpow2.f32 %v6337_v17  ;;  %v16145_v17 = vld [vmem:[#allocation120_spill] sm:$0xff] }
 0xd51   : > { %6602 = vperm.xlu1 %11604, %v15132_v56   ;;  %6607 = vperm.xlu0 %11603, %v15130_v41   ;;  %11789 = vpow2.f32 %v6343_v47  ;;  %v16146_v47 = vld [vmem:[#allocation49_spill] sm:$0xff] }
 0xd52   : > { %11791 = vpow2.f32 %v6341_v3  ;;  %v16148_v3 = vld [vmem:[#allocation68_spill] sm:$0xff] }
 0xd53   : > { %11793 = vpow2.f32 %v6347_v31 }
 0xd54   : > { %11795 = vpow2.f32 %v6345_v51  ;;  %v16151_v51 = vld [vmem:[#allocation72_spill] sm:$0xff] }
 0xd55   : > { %6612 = vperm.xlu1 %11604, %v15144_v63   ;;  %6617 = vperm.xlu0 %11603, %v15142_v57   ;;  %11797 = vpow2.f32 %v7029_v26 }
 0xd56   : > { %11799 = vpow2.f32 %v7027_v7 }
 0xd57   : > { %v7070_v38 = vpop.permute.xlu0 %7069  ;;  %11801 = vpow2.f32 %v7025_v52  ;;  %v16154_v52 = vld [vmem:[#allocation118_spill] sm:$0xff] }
 0xd58   : > { %v15168_v46 = vpop.eup %11783  ;;  %v7139_v61 = vsub.f32 %v14847_v50, %v7070_v38  ;;  %v16140_v50 = vsub.f32 %v14946_v59, %v14962_v16  ;;  %v16141_v59 = vsub.f32 %v14964_v30, %v14980_v27  ;;  %v16147_v30 = vld [vmem:[#allocation122_spill] sm:$0xff]  ;;  %v16153_v38 = vld [vmem:[#allocation48_spill] sm:$0xff] }
 0xd59   : > { %6622 = vperm.xlu1 %11604, %v15156_v45   ;;  %6627 = vperm.xlu0 %11603, %v15154_v58   ;;  %v15182_v24 = vpop.eup %11785  ;;  %v16149_v55 = vsub.f32 %v16147_v30, %v16148_v3 }
 0xd5a   : > { %v7157_v35 = vmul.f32 1.442695, %v7139_v61  ;;  %v7035_v18 = vmul.f32 1.442695, %v16141_v59 }
 0xd5b   : > { %v7060_v34 = vpop.permute.xlu1 %7059  ;;  %v7045_v4 = vmul.f32 1.442695, %v16149_v55 }
 0xd5c   : > { %v7137_v33 = vsub.f32 %v14850_v36, %v7060_v34  ;;  %v15184_v36 = vpop.eup %11787  ;;  %v16152_v34 = vsub.f32 %v16150_v19, %v16151_v51  ;;  %v16167_v51 = vld [vmem:[#allocation50_spill] sm:$0xff] }
 0xd5d   : > { %6632 = vperm.xlu1 %11604, %v15168_v46   ;;  %6637 = vperm.xlu0 %11603, %v15166_v40   ;;  %v15196_v43 = vpop.eup %11789 }
 0xd5e   : > { %v7153_v14 = vmul.f32 1.442695, %v7137_v33  ;;  %v15201_v5 = vpop.eup %11791  ;;  %v7047_v53 = vmul.f32 1.442695, %v16152_v34 }
 0xd5f   : > { %v7065_v13 = vpop.permute.xlu1 %7064  ;;  %v15210_v16 = vpop.eup %11793 }
 0xd60   : > { %v7138_v21 = vsub.f32 %v14854_v20, %v7065_v13  ;;  %v7033_v20 = vmul.f32 1.442695, %v16140_v50  ;;  %11803 = vpow2.f32 %v7153_v14  ;;  %v15215_v49 = vpop.eup %11795  ;;  %v16158_v50 = vld [vmem:[#allocation74_spill] sm:$0xff] }
 0xd61   : > { %6642 = vperm.xlu1 %11604, %v15184_v36   ;;  %6647 = vperm.xlu0 %11603, %v15182_v24   ;;  %v15221_v27 = vpop.eup %11797 }
 0xd62   : > { %v7155_v54 = vmul.f32 1.442695, %v7138_v21  ;;  %v15226_v11 = vpop.eup %11799  ;;  %v16155_v21 = vld [vmem:[#allocation69_spill] sm:$0xff] }
 0xd63   : > { %v7080_v10 = vpop.permute.xlu0 %7079  ;;  %v7075_v48 = vpop.permute.xlu1 %7074 }
 0xd64   : > { %11805 = vpow2.f32 %v7155_v54  ;;  %v7141_v22 = vsub.f32 %v14862_v32, %v7080_v10  ;;  %v7140_v6 = vsub.f32 %v14852_v12, %v7075_v48  ;;  %v15231_v39 = vpop.eup %11801 }
 0xd65   : > { %11807 = vpow2.f32 %v7031_v29  ;;  %6652 = vperm.xlu1 %11604, %v15201_v5   ;;  %6657 = vperm.xlu0 %11603, %v15196_v43   ;;  %v16157_v29 = vsub.f32 %v16155_v21, %v16156_v9 }
 0xd66   : > { %11809 = vpow2.f32 %v7037_v28  ;;  %v7159_v2 = vmul.f32 1.442695, %v7140_v6  ;;  %v7161_v44 = vmul.f32 1.442695, %v7141_v22 }
 0xd67   : > { %11811 = vpow2.f32 %v7033_v20  ;;  %v7090_v32 = vpop.permute.xlu0 %7089  ;;  %v7085_v12 = vpop.permute.xlu1 %7084  ;;  %v7041_v15 = vmul.f32 1.442695, %v16157_v29  ;;  %v16159_v20 = vld [vmem:[#allocation75_spill] sm:$0xff] }
 0xd68   : > { %11813 = vpow2.f32 %v7157_v35  ;;  %v7143_v23 = vsub.f32 %v16145_v17, %v7090_v32  ;;  %v7142_v60 = vsub.f32 %v16146_v47, %v7085_v12  ;;  %v16160_v10 = vsub.f32 %v16158_v50, %v16159_v20  ;;  %v16163_v12 = vld [vmem:[#allocation77_spill] sm:$0xff]  ;;  %v16171_v50 = vld [vmem:[#allocation123_spill] sm:$0xff] }
 0xd69   : > { %11815 = vpow2.f32 %v7159_v2  ;;  %6662 = vperm.xlu1 %11604, %v15215_v49   ;;  %6667 = vperm.xlu0 %11603, %v15210_v16   ;;  %v16161_v2 = vld [vmem:[#allocation51_spill] sm:$0xff] }
 0xd6a   : > { %11817 = vpow2.f32 %v7035_v18  ;;  %v7163_v31 = vmul.f32 1.442695, %v7142_v60  ;;  %v7165_v7 = vmul.f32 1.442695, %v7143_v23  ;;  %v15235_v13 = vpop.eup %11803  ;;  %v7043_v48 = vmul.f32 1.442695, %v16160_v10 }
 0xd6b   : > { %11819 = vpow2.f32 %v7039_v25  ;;  %v7100_v26 = vpop.permute.xlu0 %7099  ;;  %v7095_v33 = vpop.permute.xlu1 %7094  ;;  %v16172_v10 = vld [vmem:[#allocation44_spill] sm:$0xff] }
 0xd6c   : > { %11821 = vpow2.f32 %v7161_v44  ;;  %v7145_v62 = vsub.f32 %v16153_v38, %v7100_v26  ;;  %v7144_v14 = vsub.f32 %v16154_v52, %v7095_v33  ;;  %v16164_v44 = vld [vmem:[#allocation89_spill] sm:$0xff] }
 0xd6d   : > { %11823 = vpow2.f32 %v7163_v31  ;;  %7305 = vperm.xlu1 %11604, %v15226_v11   ;;  %7300 = vperm.xlu0 %11603, %v15231_v39   ;;  %v16165_v17 = vsub.f32 %v16163_v12, %v16164_v44  ;;  %v16166_v31 = vld [vmem:[#allocation45_spill] sm:$0xff]  ;;  %v16173_v12 = vld [vmem:[#allocation47_spill] sm:$0xff] }
 0xd6e   : > { %v15239_v61 = vpop.eup %11805  ;;  %11825 = vpow2.f32 %v7045_v4  ;;  %v7167_v28 = vmul.f32 1.442695, %v7144_v14  ;;  %v7169_v18 = vmul.f32 1.442695, %v7145_v62  ;;  %v16169_v38 = vld [vmem:[#allocation85_spill] sm:$0xff] }
 0xd6f   : > { %v15244_v54 = vpop.eup %11807  ;;  %11827 = vpow2.f32 %v7047_v53  ;;  %v7110_v35 = vpop.permute.xlu0 %7109  ;;  %v7394_v6 = vpack.c.bf16 %v15239_v61, %v15235_v13  ;;  %v7049_v23 = vmul.f32 1.442695, %v16165_v17 }
 0xd70   : > { %v7105_v22 = vpop.permute.xlu1 %7104  ;;  %v15251_v59 = vpop.eup %11809  ;;  %11829 = vpow2.f32 %v7165_v7  ;;  %v7147_v1 = vsub.f32 %v16161_v2, %v7110_v35  ;;  %v16168_v7 = vld [vmem:[#allocation91_spill] sm:$0xff] }
 0xd71   : > { %v7146_v42 = vsub.f32 %v16162_v37, %v7105_v22  ;;  %v15255_v25 = vpop.eup %11811  ;;  %11831 = vpow2.f32 %v7167_v28  ;;  %7310 = vperm.xlu1 %11604, %v15221_v27   ;;  %7315 = vperm.xlu0 %11603, %v15244_v54   ;;  %v16170_v62 = vsub.f32 %v16168_v7, %v16169_v38 }
 0xd72   : > { %v15259_v32 = vpop.eup %11813  ;;  %11833 = vpow2.f32 %v7041_v15  ;;  %10599 = vmatprep.mubr.bf16.mxu0 %v7394_v6  ;;  %v7173_v30 = vmul.f32 1.442695, %v7147_v1 }
 0xd73   : > { %v7171_v47 = vmul.f32 1.442695, %v7146_v42  ;;  %v15264_v60 = vpop.eup %11815  ;;  %11835 = vpow2.f32 %v7043_v48  ;;  %v7120_v3 = vpop.permute.xlu0 %7119  ;;  %v7051_v52 = vmul.f32 1.442695, %v16170_v62 }
 0xd74   : > { %v7115_v55 = vpop.permute.xlu1 %7114  ;;  %v15266_v4 = vpop.eup %11817  ;;  %11837 = vpow2.f32 %v7169_v18  ;;  %v7149_v19 = vsub.f32 %v16166_v31, %v7120_v3  ;;  %v7395_v53 = vpack.c.bf16 %v15264_v60, %v15259_v32 }
 0xd75   : > { %v7148_v34 = vsub.f32 %v16167_v51, %v7115_v55  ;;  %v15272_v26 = vpop.eup %11819  ;;  %11839 = vpow2.f32 %v7171_v47  ;;  %7320 = vperm.xlu1 %11604, %v15255_v25   ;;  %7325 = vperm.xlu0 %11603, %v15266_v4  }
 0xd76   : > { %v15276_v33 = vpop.eup %11821  ;;  %11841 = vpow2.f32 %v7049_v23  ;;  %10600 = vmatmul.mubr.bf16.vlgmr.msra.gmra.mrb[48].mxu0 %v7395_v53  ;;  %v7177_v28 = vmul.f32 1.442695, %v7149_v19 }
 0xd77   : > { %v7175_v14 = vmul.f32 1.442695, %v7148_v34  ;;  %v15281_v21 = vpop.eup %11823  ;;  %11843 = vpow2.f32 %v7173_v30  ;;  %v7130_v9 = vpop.permute.xlu0 %7129 }
 0xd78   : > { %v7125_v29 = vpop.permute.xlu1 %7124  ;;  %v15283_v15 = vpop.eup %11825  ;;  %v7151_v20 = vsub.f32 %v16171_v50, %v7130_v9  ;;  %v7396_v35 = vpack.c.bf16 %v15281_v21, %v15276_v33 }
 0xd79   : > { %v7150_v48 = vsub.f32 %v16172_v10, %v7125_v29  ;;  %v15289_v22 = vpop.eup %11827  ;;  %11845 = vpow2.f32 %v7175_v14  ;;  %7330 = vperm.xlu1 %11604, %v15251_v59   ;;  %7335 = vperm.xlu0 %11603, %v15272_v26   ;;  %v6479_v29 = vld [vmem:[#allocation4 + $0x108] sm:$0xff] }
 0xd7a   : > { %v11830_v6 = vpop.eup %11829  ;;  %11847 = vpow2.f32 %v7051_v52  ;;  %10603 = vmatprep.mubr.bf16.mxu0 %v7396_v35  ;;  %v7181_v1 = vmul.f32 1.442695, %v7151_v20  ;;  %v6480_v20 = vld [vmem:[#allocation4 + $0x110] sm:$0xff] }
 0xd7b   : > { %v7179_v18 = vmul.f32 1.442695, %v7150_v48  ;;  %v15293_v2 = vpop.eup %11831  ;;  %11849 = vpow2.f32 %v7177_v28  ;;  %v6495_v28 = vmul.f32 %v15120_v8, %v6479_v29  ;;  %v6496_v48 = vmul.f32 %v15132_v56, %v6480_v20 }
 0xd7c   : > { %v7135_v37 = vpop.permute.xlu1 %7134  ;;  %v15295_v42 = vpop.eup %11833  ;;  %v7397_v17 = vpack.c.bf16 %v15293_v2, %v11830_v6 }
 0xd7d   : > { %v7152_v44 = vsub.f32 %v16173_v12, %v7135_v37  ;;  %v15299_v23 = vpop.eup %11835  ;;  %11851 = vpow2.f32 %v7179_v18  ;;  %7350 = vperm.xlu1 %11604, %v15283_v15   ;;  %7355 = vperm.xlu0 %11603, %v15289_v22   ;;  %v6482_v18 = vld [vmem:[#allocation4 + $0x120] sm:$0xff] }
 0xd7e   : > { %v15303_v47 = vpop.eup %11837  ;;  %10604 = vmatmul.mubr.bf16.gmra.mrb[52].mxu0 %v7397_v17  ;;  %11853 = vpow2.f32 %v7181_v1  ;;  %v6478_v37 = vld [vmem:[#allocation4 + $0x100] sm:$0xff]  ;;  %v6498_v8 = vmul.f32 %v15144_v63, %v6482_v18 }
 0xd7f   : > { %v7183_v30 = vmul.f32 1.442695, %v7152_v44  ;;  %v15305_v3 = vpop.eup %11839  ;;  %v6494_v12 = vmul.f32 %v15118_v0, %v6478_v37  ;;  %v6484_v44 = vld [vmem:[#allocation4 + $0x130] sm:$0xff] }
 0xd80   : > { %v15307_v55 = vpop.eup %11841  ;;  %v7398_v31 = vpack.c.bf16 %v15305_v3, %v15303_v47 }
 0xd81   : > { %11855 = vpow2.f32 %v7183_v30  ;;  %v11844_v19 = vpop.eup %11843  ;;  %7340 = vperm.xlu1 %11604, %v15295_v42   ;;  %7345 = vperm.xlu0 %11603, %v15299_v23   ;;  %v6481_v30 = vld [vmem:[#allocation4 + $0x118] sm:$0xff] }
 0xd82   : > { %10607 = vmatprep.mubr.bf16.mxu0 %v7398_v31  ;;  %v6497_v63 = vmul.f32 %v15130_v41, %v6481_v30  ;;  %v16174_v30 = vld [vmem:[#allocation73_spill] sm:$0xff] }
 0xd83   : > { %v15313_v51 = vpop.eup %11845 }
 0xd84   : > { %v15315_v34 = vpop.eup %11847  ;;  %v7399_v53 = vpack.c.bf16 %v15313_v51, %v11844_v19 }
 0xd85   : > { %7365 = vperm.xlu0 %11603, %v15315_v34   ;;  %7360 = vperm.xlu1 %11604, %v15307_v55   ;;  %v15320_v7 = vpop.eup %11849 }
 0xd86   : > { %10608 = vmatmul.mubr.bf16.gmra.mrb[56].mxu0 %v7399_v53 }
 0xd87   : > { %v15322_v38 = vpop.eup %11851 }
 0xd88   : > { %v7400_v62 = vpack.c.bf16 %v15322_v38, %v15320_v7  ;;  %v15326_v52 = vpop.eup %11853 }
 0xd8a   : > { %10611 = vmatprep.mubr.bf16.mxu0 %v7400_v62 }
 0xd8b   : > { %v15328_v14 = vpop.eup %11855 }
 0xd8c   : > { %v7401_v9 = vpack.c.bf16 %v15328_v14, %v15326_v52 }
 0xd8e   : > { %10612 = vmatmul.mubr.bf16.gmra.mrb[60].mxu0 %v7401_v9 }
 0xda4   : > { %7222 = vadd.xlane.f32.xlu0 %v15259_v32  ;;  %v6513_v50 = vpop.xlane.xlu0 %6512 }
 0xda5   : > { %v6543_v10 = vadd.f32 %v6513_v50, %v6495_v28  ;;  %v6485_v50 = vld [vmem:[#allocation4 + $0x138] sm:$0xff] }
 0xda7   : > { %6559 = vst.msk [vmem:[#allocation4 + $0x108] sm:$0xff] %vm5141_vm1, %v6543_v10  ;;  %v6490_v10 = vld [vmem:[#allocation4 + $0x160] sm:$0xff] }
 0xda8   : > { %v6515_v35 = vpop.xlane.xlu0 %6514  ;;  %7220 = vadd.xlane.f32.xlu0 %v15239_v61  ;;  %v6506_v18 = vmul.f32 %v15201_v5, %v6490_v10  ;;  %v16182_v10 = vld [vmem:[#allocation34_spill] sm:$0xff] }
 0xda9   : > { %v6544_v1 = vadd.f32 %v6515_v35, %v6496_v48  ;;  %7218 = vadd.xlane.f32.xlu1 %v15235_v13  ;;  %v6500_v13 = vmul.f32 %v15156_v45, %v6484_v44  ;;  %v6491_v44 = vld [vmem:[#allocation4 + $0x168] sm:$0xff] }
 0xdab   : > { %6560 = vst.msk [vmem:[#allocation4 + $0x110] sm:$0xff] %vm5141_vm1, %v6544_v1  ;;  %v6492_v1 = vld [vmem:[#allocation4 + $0x170] sm:$0xff] }
 0xdac   : > { %v6519_v32 = vpop.xlane.xlu0 %6518  ;;  %7230 = vadd.xlane.f32.xlu0 %v11830_v6  ;;  %v6486_v6 = vld [vmem:[#allocation4 + $0x140] sm:$0xff] }
 0xdad   : > { %v6546_v17 = vadd.f32 %v6519_v32, %v6498_v8  ;;  %7224 = vadd.xlane.f32.xlu1 %v15264_v60  ;;  %v6511_v56 = vpop.xlane.xlu1 %6510  ;;  %v6483_v60 = vld [vmem:[#allocation4 + $0x128] sm:$0xff]  ;;  %v6502_v9 = vmul.f32 %v15168_v46, %v6486_v6  ;;  %v6508_v32 = vmul.f32 %v15215_v49, %v6492_v1 }
 0xdae   : > { %v6542_v61 = vadd.f32 %v6511_v56, %v6494_v12  ;;  %v6499_v29 = vmul.f32 %v15142_v57, %v6483_v60  ;;  %v6493_v56 = vld [vmem:[#allocation4 + $0x178] sm:$0xff] }
 0xdaf   : > { %6562 = vst.msk [vmem:[#allocation4 + $0x120] sm:$0xff] %vm5141_vm1, %v6546_v17  ;;  %v6507_v17 = vmul.f32 %v15196_v43, %v6491_v44  ;;  %v6509_v60 = vmul.f32 %v15210_v16, %v6493_v56  ;;  %v6576_v16 = vld [vmem:[#allocation5 + $0x50] sm:$0xff]  ;;  %v16186_v56 = vld [vmem:[#allocation116_spill] sm:$0xff] }
 0xdb0   : > { %6558 = vst.msk [vmem:[#allocation4 + $0x100] sm:$0xff] %vm5141_vm1, %v6542_v61  ;;  %v6523_v31 = vpop.xlane.xlu0 %6522  ;;  %7226 = vadd.xlane.f32.xlu0 %v15276_v33  ;;  %v6488_v33 = vld [vmem:[#allocation4 + $0x150] sm:$0xff] }
 0xdb1   : > { %v6548_v0 = vadd.f32 %v6523_v31, %v6500_v13  ;;  %7232 = vadd.xlane.f32.xlu1 %v15293_v2  ;;  %v6517_v53 = vpop.xlane.xlu1 %6516  ;;  %v6504_v20 = vmul.f32 %v15184_v36, %v6488_v33  ;;  %v5881_v31 = vld [vmem:[#allocation5 + $0x1e8] sm:$0xff]  ;;  %v6575_v33 = vld [vmem:[#allocation5 + $0x30] sm:$0xff] }
 0xdb2   : > { %v6545_v62 = vadd.f32 %v6517_v53, %v6497_v63  ;;  %v16178_v63 = vld [vmem:[#allocation79_spill] sm:$0xff]  ;;  %v6581_v44 = vld [vmem:[#allocation5 + $0xf0] sm:$0xff] }
 0xdb3   : > { %6564 = vst.msk [vmem:[#allocation4 + $0x130] sm:$0xff] %vm5141_vm1, %v6548_v0 }
 0xdb4   : > { %6561 = vst.msk [vmem:[#allocation4 + $0x118] sm:$0xff] %vm5141_vm1, %v6545_v62  ;;  %v6527_v45 = vpop.xlane.xlu0 %6526  ;;  %7238 = vadd.xlane.f32.xlu0 %v11844_v19  ;;  %v6501_v19 = vmul.f32 %v15154_v58, %v6485_v50 }
 0xdb5   : > { %v6550_v28 = vadd.f32 %v6527_v45, %v6502_v9  ;;  %7228 = vadd.xlane.f32.xlu1 %v15281_v21  ;;  %v6521_v41 = vpop.xlane.xlu1 %6520  ;;  %v6487_v21 = vld [vmem:[#allocation4 + $0x148] sm:$0xff]  ;;  %v6574_v9 = vld [vmem:[#allocation5 + $0x10] sm:$0xff] }
 0xdb6   : > { %v6547_v2 = vadd.f32 %v6521_v41, %v6499_v29  ;;  %v16180_v45 = vld [vmem:[#allocation114_spill] sm:$0xff] }
 0xdb7   : > { %6566 = vst.msk [vmem:[#allocation4 + $0x140] sm:$0xff] %vm5141_vm1, %v6550_v28 }
 0xdb8   : > { %6563 = vst.msk [vmem:[#allocation4 + $0x128] sm:$0xff] %vm5141_vm1, %v6547_v2  ;;  %v6531_v46 = vpop.xlane.xlu0 %6530  ;;  %7234 = vadd.xlane.f32.xlu0 %v15303_v47  ;;  %v6503_v47 = vmul.f32 %v15166_v40, %v6487_v21 }
 0xdb9   : > { %v6552_v57 = vadd.f32 %v6531_v46, %v6504_v20  ;;  %7240 = vadd.xlane.f32.xlu1 %v15313_v51  ;;  %v6525_v48 = vpop.xlane.xlu1 %6524  ;;  %v6489_v51 = vld [vmem:[#allocation4 + $0x158] sm:$0xff]  ;;  %v6577_v20 = vld [vmem:[#allocation5 + $0x70] sm:$0xff] }
 0xdba   : > { %v6549_v35 = vadd.f32 %v6525_v48, %v6501_v19  ;;  %v16181_v46 = vld [vmem:[#allocation35_spill] sm:$0xff] }
 0xdbb   : > { %6568 = vst.msk [vmem:[#allocation4 + $0x150] sm:$0xff] %vm5141_vm1, %v6552_v57 }
 0xdbc   : > { %6565 = vst.msk [vmem:[#allocation4 + $0x138] sm:$0xff] %vm5141_vm1, %v6549_v35  ;;  %v6535_v36 = vpop.xlane.xlu0 %6534  ;;  %7246 = vadd.xlane.f32.xlu0 %v15326_v52  ;;  %v6505_v52 = vmul.f32 %v15182_v24, %v6489_v51  ;;  %v16184_v51 = vld [vmem:[#allocation33_spill] sm:$0xff] }
 0xdbd   : > { %v6554_v58 = vadd.f32 %v6535_v36, %v6506_v18  ;;  %7236 = vadd.xlane.f32.xlu1 %v15305_v3  ;;  %v6529_v37 = vpop.xlane.xlu1 %6528  ;;  %v6579_v36 = vld [vmem:[#allocation5 + $0xb0] sm:$0xff] }
 0xdbe   : > { %v6551_v8 = vadd.f32 %v6529_v37, %v6503_v47  ;;  %v16183_v47 = vld [vmem:[#allocation32_spill] sm:$0xff] }
 0xdbf   : > { %6570 = vst.msk [vmem:[#allocation4 + $0x160] sm:$0xff] %vm5141_vm1, %v6554_v58  ;;  %v6578_v58 = vld [vmem:[#allocation5 + $0x90] sm:$0xff] }
 0xdc0   : > { %6567 = vst.msk [vmem:[#allocation4 + $0x148] sm:$0xff] %vm5141_vm1, %v6551_v8  ;;  %v6539_v5 = vpop.xlane.xlu0 %6538  ;;  %7242 = vadd.xlane.f32.xlu0 %v15320_v7  ;;  %v16175_v7 = vld [vmem:[#allocation81_spill] sm:$0xff] }
 0xdc1   : > { %v6556_v12 = vadd.f32 %v6539_v5, %v6508_v32  ;;  %7248 = vadd.xlane.f32.xlu1 %v15328_v14  ;;  %v6533_v40 = vpop.xlane.xlu1 %6532  ;;  %v16176_v61 = vsub.f32 %v16174_v30, %v16175_v7  ;;  %v16177_v14 = vld [vmem:[#allocation83_spill] sm:$0xff] }
 0xdc2   : > { %v6553_v3 = vadd.f32 %v6533_v40, %v6505_v52  ;;  %v16179_v6 = vsub.f32 %v16177_v14, %v16178_v63  ;;  %v16187_v14 = vld [vmem:[#allocation41_spill] sm:$0xff] }
 0xdc3   : > { %6572 = vst.msk [vmem:[#allocation4 + $0x170] sm:$0xff] %vm5141_vm1, %v6556_v12  ;;  %v7053_v24 = vmul.f32 1.442695, %v16176_v61 }
 0xdc4   : > { %6569 = vst.msk [vmem:[#allocation4 + $0x158] sm:$0xff] %vm5141_vm1, %v6553_v3  ;;  %v7055_v0 = vmul.f32 1.442695, %v16179_v6  ;;  %v16185_v3 = vld [vmem:[#allocation43_spill] sm:$0xff]  ;;  %v6582_v6 = vld [vmem:[#allocation5 + $0x110] sm:$0xff] }
 0xdc5   : > { %7244 = vadd.xlane.f32.xlu1 %v15322_v38  ;;  %v6537_v49 = vpop.xlane.xlu1 %6536  ;;  %11857 = vpow2.f32 %v7053_v24 }
 0xdc6   : > { %v6555_v13 = vadd.f32 %v6537_v49, %v6507_v17  ;;  %11859 = vpow2.f32 %v7055_v0  ;;  %v6580_v49 = vld [vmem:[#allocation5 + $0xd0] sm:$0xff]  ;;  %v16188_v0 = vld [vmem:[#allocation117_spill] sm:$0xff] }
 0xdc8   : > { %6571 = vst.msk [vmem:[#allocation4 + $0x168] sm:$0xff] %vm5141_vm1, %v6555_v13  ;;  %v5960_v53 = vpop.permute.xlu0 %5959 }
 0xdc9   : > { %v5977_v43 = vmul.f32 %v5960_v53, %v5881_v31  ;;  %v6541_v62 = vpop.xlane.xlu1 %6540  ;;  %v6583_v31 = vld [vmem:[#allocation5 + $0x130] sm:$0xff] }
 0xdca   : > { %v6557_v38 = vadd.f32 %v6541_v62, %v6509_v60 }
 0xdcb   : > { %v6098_v29 = vadd.f32 %v16180_v45, %v5977_v43  ;;  %v16189_v45 = vld [vmem:[#allocation119_spill] sm:$0xff] }
 0xdcc   : > { %6573 = vst.msk [vmem:[#allocation4 + $0x178] sm:$0xff] %vm5141_vm1, %v6557_v38  ;;  %v6593_v28 = vpop.permute.xlu0 %6592 }
 0xdcd   : > { %6114 = vst [vmem:[#allocation5 + $0x1e8] sm:$0xff] %v6098_v29  ;;  %v6670_v41 = vmul.f32 %v6593_v28, %v6574_v9  ;;  %v6598_v50 = vpop.permute.xlu1 %6597  ;;  %v6585_v9 = vld [vmem:[#allocation5 + $0x170] sm:$0xff] }
 0xdce   : > { %v6671_v2 = vmul.f32 %v6598_v50, %v6575_v33  ;;  %v6584_v33 = vld [vmem:[#allocation5 + $0x150] sm:$0xff] }
 0xdcf   : > { %v6791_v19 = vadd.f32 %v16181_v46, %v6670_v41  ;;  %v15388_v37 = vpop.eup %11857  ;;  %v16190_v28 = vld [vmem:[#allocation42_spill] sm:$0xff] }
 0xdd0   : > { %v6792_v57 = vadd.f32 %v16182_v10, %v6671_v2  ;;  %v6608_v48 = vpop.permute.xlu0 %6607  ;;  %v15391_v5 = vpop.eup %11859 }
 0xdd1   : > { %6807 = vst [vmem:[#allocation5 + $0x10] sm:$0xff] %v6791_v19  ;;  %v6673_v21 = vmul.f32 %v6608_v48, %v6577_v20  ;;  %v6603_v35 = vpop.permute.xlu1 %6602  ;;  %v6587_v19 = vld [vmem:[#allocation5 + $0x1b0] sm:$0xff]  ;;  %v16192_v48 = vld [vmem:[#allocation40_spill] sm:$0xff] }
 0xdd2   : > { %6808 = vst [vmem:[#allocation5 + $0x30] sm:$0xff] %v6792_v57  ;;  %v6672_v18 = vmul.f32 %v6603_v35, %v6576_v16  ;;  %v16191_v16 = vld [vmem:[#allocation121_spill] sm:$0xff]  ;;  %v6586_v57 = vld [vmem:[#allocation5 + $0x190] sm:$0xff] }
 0xdd3   : > { %v6794_v1 = vadd.f32 %v16183_v47, %v6673_v21 }
 0xdd4   : > { %v6793_v8 = vadd.f32 %v16184_v51, %v6672_v18  ;;  %v6618_v32 = vpop.permute.xlu0 %6617 }
 0xdd5   : > { %6810 = vst [vmem:[#allocation5 + $0x70] sm:$0xff] %v6794_v1  ;;  %v6675_v52 = vmul.f32 %v6618_v32, %v6579_v36  ;;  %v6613_v12 = vpop.permute.xlu1 %6612  ;;  %v6589_v1 = vld [vmem:[#allocation5 + $0x1f0] sm:$0xff]  ;;  %v16194_v32 = vld [vmem:[#allocation39_spill] sm:$0xff] }
 0xdd6   : > { %6809 = vst [vmem:[#allocation5 + $0x50] sm:$0xff] %v6793_v8  ;;  %v6674_v40 = vmul.f32 %v6613_v12, %v6578_v58  ;;  %7375 = vperm.xlu0 %11603, %v15391_v5   ;;  %7370 = vperm.xlu1 %11604, %v15388_v37   ;;  %v16193_v58 = vld [vmem:[#allocation38_spill] sm:$0xff] }
 0xdd7   : > { %v6796_v17 = vadd.f32 %v16185_v3, %v6675_v52  ;;  %v6588_v8 = vld [vmem:[#allocation5 + $0x1d0] sm:$0xff] }
 0xdd8   : > { %v6795_v30 = vadd.f32 %v16186_v56, %v6674_v40  ;;  %v6628_v7 = vpop.permute.xlu0 %6627  ;;  %v16196_v56 = vld [vmem:[#allocation37_spill] sm:$0xff] }
 0xdd9   : > { %6812 = vst [vmem:[#allocation5 + $0xb0] sm:$0xff] %v6796_v17  ;;  %v6677_v61 = vmul.f32 %v6628_v7, %v6581_v44  ;;  %v6623_v24 = vpop.permute.xlu1 %6622  ;;  %v16195_v17 = vld [vmem:[#allocation36_spill] sm:$0xff] }
 0xdda   : > { %6811 = vst [vmem:[#allocation5 + $0x90] sm:$0xff] %v6795_v30  ;;  %v6676_v13 = vmul.f32 %v6623_v24, %v6580_v49 }
 0xddb   : > { %v6798_v63 = vadd.f32 %v16187_v14, %v6677_v61 }
 0xddc   : > { %v6797_v53 = vadd.f32 %v16188_v0, %v6676_v13  ;;  %v6638_v60 = vpop.permute.xlu0 %6637 }
 0xddd   : > { %6814 = vst [vmem:[#allocation5 + $0xf0] sm:$0xff] %v6798_v63  ;;  %v6679_v43 = vmul.f32 %v6638_v60, %v6583_v31  ;;  %v6633_v62 = vpop.permute.xlu1 %6632 }
 0xdde   : > { %6813 = vst [vmem:[#allocation5 + $0xd0] sm:$0xff] %v6797_v53  ;;  %v6678_v38 = vmul.f32 %v6633_v62, %v6582_v6 }
 0xddf   : > { %v6800_v29 = vadd.f32 %v16189_v45, %v6679_v43 }
 0xde0   : > { %v6799_v41 = vadd.f32 %v16190_v28, %v6678_v38  ;;  %v6648_v50 = vpop.permute.xlu0 %6647  ;;  %v7188_v38 = vld [vmem:[#allocation4 + $0x190] sm:$0xff] }
 0xde1   : > { %6816 = vst [vmem:[#allocation5 + $0x130] sm:$0xff] %v6800_v29  ;;  %v6681_v2 = vmul.f32 %v6648_v50, %v6585_v9  ;;  %v6643_v20 = vpop.permute.xlu1 %6642  ;;  %v7204_v9 = vmul.f32 %v15221_v27, %v7188_v38  ;;  %v7187_v29 = vld [vmem:[#allocation4 + $0x188] sm:$0xff]  ;;  %v7200_v38 = vld [vmem:[#allocation4 + $0x1f0] sm:$0xff] }
 0xde2   : > { %6815 = vst [vmem:[#allocation5 + $0x110] sm:$0xff] %v6799_v41  ;;  %v6680_v46 = vmul.f32 %v6643_v20, %v6584_v33  ;;  %v7186_v41 = vld [vmem:[#allocation4 + $0x180] sm:$0xff]  ;;  %v7203_v50 = vmul.f32 %v15226_v11, %v7187_v29 }
 0xde3   : > { %v6802_v10 = vadd.f32 %v16191_v16, %v6681_v2  ;;  %v7202_v20 = vmul.f32 %v15231_v39, %v7186_v41 }
 0xde4   : > { %v6801_v21 = vadd.f32 %v16192_v48, %v6680_v46  ;;  %v6658_v35 = vpop.permute.xlu0 %6657  ;;  %v7192_v46 = vld [vmem:[#allocation4 + $0x1b0] sm:$0xff] }
 0xde5   : > { %6818 = vst [vmem:[#allocation5 + $0x170] sm:$0xff] %v6802_v10  ;;  %v6683_v18 = vmul.f32 %v6658_v35, %v6587_v19  ;;  %v6653_v36 = vpop.permute.xlu1 %6652  ;;  %v7189_v10 = vld [vmem:[#allocation4 + $0x198] sm:$0xff]  ;;  %v7208_v27 = vmul.f32 %v15251_v59, %v7192_v46  ;;  %v7190_v35 = vld [vmem:[#allocation4 + $0x1a0] sm:$0xff]  ;;  %v7196_v59 = vld [vmem:[#allocation4 + $0x1d0] sm:$0xff] }
 0xde6   : > { %6817 = vst [vmem:[#allocation5 + $0x150] sm:$0xff] %v6801_v21  ;;  %v6682_v47 = vmul.f32 %v6653_v36, %v6586_v57  ;;  %v7205_v21 = vmul.f32 %v15244_v54, %v7189_v10  ;;  %v7193_v36 = vld [vmem:[#allocation4 + $0x1b8] sm:$0xff]  ;;  %v7206_v39 = vmul.f32 %v15255_v25, %v7190_v35  ;;  %v7212_v54 = vmul.f32 %v15283_v15, %v7196_v59  ;;  %v7194_v25 = vld [vmem:[#allocation4 + $0x1c0] sm:$0xff] }
 0xde7   : > { %v6804_v51 = vadd.f32 %v16193_v58, %v6683_v18  ;;  %v7209_v58 = vmul.f32 %v15272_v26, %v7193_v36  ;;  %v7210_v26 = vmul.f32 %v15295_v42, %v7194_v25  ;;  %v7216_v42 = vmul.f32 %v15388_v37, %v7200_v38  ;;  %v7290_v38 = vld [vmem:[#allocation5 + $0x118] sm:$0xff] }
 0xde8   : > { %v6803_v52 = vadd.f32 %v16194_v32, %v6682_v47  ;;  %v6668_v12 = vpop.permute.xlu0 %6667  ;;  %v7191_v32 = vld [vmem:[#allocation4 + $0x1a8] sm:$0xff] }
 0xde9   : > { %6820 = vst [vmem:[#allocation5 + $0x1b0] sm:$0xff] %v6804_v51  ;;  %v6685_v40 = vmul.f32 %v6668_v12, %v6589_v1  ;;  %v6663_v44 = vpop.permute.xlu1 %6662 }
 0xdea   : > { %6819 = vst [vmem:[#allocation5 + $0x190] sm:$0xff] %v6803_v52  ;;  %v6684_v3 = vmul.f32 %v6663_v44, %v6588_v8 }
 0xdeb   : > { %v6806_v49 = vadd.f32 %v16195_v17, %v6685_v40  ;;  %v7207_v40 = vmul.f32 %v15266_v4, %v7191_v32  ;;  %v7197_v17 = vld [vmem:[#allocation4 + $0x1d8] sm:$0xff]  ;;  %v7195_v4 = vld [vmem:[#allocation4 + $0x1c8] sm:$0xff] }
 0xdec   : > { %v6805_v30 = vadd.f32 %v16196_v56, %v6684_v3  ;;  %v15407_v7 = vpop.permute.xlu0 %7300  ;;  %v7284_v56 = vld [vmem:[#allocation5 + $0x58] sm:$0xff]  ;;  %v7213_v15 = vmul.f32 %v15289_v22, %v7197_v17 }
 0xded   : > { %6822 = vst [vmem:[#allocation5 + $0x1f0] sm:$0xff] %v6806_v49  ;;  %v15409_v61 = vpop.permute.xlu1 %7305 }
 0xdee   : > { %6821 = vst [vmem:[#allocation5 + $0x1d0] sm:$0xff] %v6805_v30 }
 0xdf0   : > { %v15411_v24 = vpop.permute.xlu0 %7315 }
 0xdf1   : > { %v15413_v13 = vpop.permute.xlu1 %7310 }
 0xdf4   : > { %v15415_v31 = vpop.permute.xlu0 %7325 }
 0xdf5   : > { %v15417_v14 = vpop.permute.xlu1 %7320 }
 0xdf8   : > { %v15419_v63 = vpop.permute.xlu0 %7335 }
 0xdf9   : > { %v15421_v6 = vpop.permute.xlu1 %7330 }
 0xdfc   : > { %v15423_v0 = vpop.permute.xlu0 %7355 }
 0xdfd   : > { %v15425_v53 = vpop.permute.xlu1 %7350 }
 0xe00   : > { %v15427_v60 = vpop.permute.xlu0 %7345 }
 0xe01   : > { %v15429_v43 = vpop.permute.xlu1 %7340 }
 0xe04   : > { %v15431_v62 = vpop.permute.xlu0 %7365 }
 0xe05   : > { %v15434_v33 = vpop.permute.xlu1 %7360 }
 0xe31   : > { %v7223_v45 = vpop.xlane.xlu0 %7222 }
 0xe32   : > { %v7252_v28 = vadd.f32 %v7223_v45, %v7204_v9  ;;  %v7282_v9 = vld [vmem:[#allocation5 + $0x18] sm:$0xff] }
 0xe34   : > { %7268 = vst.msk [vmem:[#allocation4 + $0x190] sm:$0xff] %vm5141_vm1, %v7252_v28  ;;  %v7285_v28 = vld [vmem:[#allocation5 + $0x78] sm:$0xff] }
 0xe35   : > { %v7221_v2 = vpop.xlane.xlu0 %7220  ;;  %v7381_v10 = vmul.f32 %v15411_v24, %v7285_v28 }
 0xe36   : > { %v7251_v19 = vadd.f32 %v7221_v2, %v7203_v50  ;;  %v7219_v16 = vpop.xlane.xlu1 %7218  ;;  %v7283_v50 = vld [vmem:[#allocation5 + $0x38] sm:$0xff]  ;;  %v7380_v2 = vmul.f32 %v15413_v13, %v7284_v56 }
 0xe37   : > { %v7250_v57 = vadd.f32 %v7219_v16, %v7202_v20  ;;  %v7378_v20 = vmul.f32 %v15407_v7, %v7282_v9  ;;  %v7198_v16 = vld [vmem:[#allocation4 + $0x1e0] sm:$0xff]  ;;  %v7201_v13 = vld [vmem:[#allocation4 + $0x1f8] sm:$0xff]  ;;  %v7379_v35 = vmul.f32 %v15409_v61, %v7283_v50 }
 0xe38   : > { %7267 = vst.msk [vmem:[#allocation4 + $0x188] sm:$0xff] %vm5141_vm1, %v7251_v19  ;;  %v7211_v19 = vmul.f32 %v15299_v23, %v7195_v4  ;;  %v7214_v23 = vmul.f32 %v15307_v55, %v7198_v16  ;;  %v7291_v9 = vld [vmem:[#allocation5 + $0x138] sm:$0xff] }
 0xe39   : > { %7266 = vst.msk [vmem:[#allocation4 + $0x180] sm:$0xff] %vm5141_vm1, %v7250_v57  ;;  %v7231_v48 = vpop.xlane.xlu0 %7230  ;;  %v7297_v16 = vld [vmem:[#allocation5 + $0x1f8] sm:$0xff] }
 0xe3a   : > { %v7256_v18 = vadd.f32 %v7231_v48, %v7208_v27  ;;  %v7225_v11 = vpop.xlane.xlu1 %7224 }
 0xe3b   : > { %v7253_v47 = vadd.f32 %v7225_v11, %v7205_v21 }
 0xe3c   : > { %7272 = vst.msk [vmem:[#allocation4 + $0x1b0] sm:$0xff] %vm5141_vm1, %v7256_v18 }
 0xe3d   : > { %7269 = vst.msk [vmem:[#allocation4 + $0x198] sm:$0xff] %vm5141_vm1, %v7253_v47  ;;  %v7227_v1 = vpop.xlane.xlu0 %7226  ;;  %v7288_v47 = vld [vmem:[#allocation5 + $0xd8] sm:$0xff] }
 0xe3e   : > { %v7254_v51 = vadd.f32 %v7227_v1, %v7206_v39  ;;  %v7233_v8 = vpop.xlane.xlu1 %7232  ;;  %v7217_v1 = vmul.f32 %v15391_v5, %v7201_v13 }
 0xe3f   : > { %v7257_v52 = vadd.f32 %v7233_v8, %v7209_v58  ;;  %v7286_v58 = vld [vmem:[#allocation5 + $0x98] sm:$0xff] }
 0xe40   : > { %7270 = vst.msk [vmem:[#allocation4 + $0x1a0] sm:$0xff] %vm5141_vm1, %v7254_v51  ;;  %v7199_v51 = vld [vmem:[#allocation4 + $0x1e8] sm:$0xff]  ;;  %v7289_v8 = vld [vmem:[#allocation5 + $0xf8] sm:$0xff]  ;;  %v7382_v55 = vmul.f32 %v15417_v14, %v7286_v58 }
 0xe41   : > { %7273 = vst.msk [vmem:[#allocation4 + $0x1b8] sm:$0xff] %vm5141_vm1, %v7257_v52  ;;  %v7239_v12 = vpop.xlane.xlu0 %7238  ;;  %v7287_v52 = vld [vmem:[#allocation5 + $0xb8] sm:$0xff]  ;;  %v7215_v5 = vmul.f32 %v15315_v34, %v7199_v51  ;;  %v7715_v51 = vld [vmem:[#allocation4 + $0xa0] sm:$0xff] (!%p10088_p0) }
 0xe42   : > { %v7260_v44 = vadd.f32 %v7239_v12, %v7212_v54  ;;  %v7229_v3 = vpop.xlane.xlu1 %7228  ;;  %v7384_v54 = vmul.f32 %v15421_v6, %v7288_v47  ;;  %v7383_v17 = vmul.f32 %v15415_v31, %v7287_v52  ;;  %v7293_v34 = vld [vmem:[#allocation5 + $0x178] sm:$0xff]  ;;  %v7386_v31 = vmul.f32 %v15429_v43, %v7290_v38 }
 0xe43   : > { %v7255_v49 = vadd.f32 %v7229_v3, %v7207_v40  ;;  %v7385_v40 = vmul.f32 %v15419_v63, %v7289_v8  ;;  %v12464_v47 = vmov (!%p10088_p0), 0   ;;  %v7554_v58 = vld [vmem:[#allocation4 + $0x18] sm:$0xff] (!%p10088_p0) }
 0xe44   : > { %7276 = vst.msk [vmem:[#allocation4 + $0x1d0] sm:$0xff] %vm5141_vm1, %v7260_v44  ;;  %11862 = vset.pattern.permute.xlu1 (!%p10088_p0), %v12464_v47  ;;  %11861 = vset.pattern.permute.xlu0 (!%p10088_p0), %v12464_v47  ;;  %v11877_v38 = vld [vmem:[#allocation14 + $0x4c] ss:$16 sps:$4 sm:$0xff] (!%p10088_p0)   ;;  %v11905_v47 = vld [vmem:[#allocation14 + $0xe4] ss:$16 sps:$4 sm:$0xff] (!%p10088_p0)  }
 0xe45   : > { %7271 = vst.msk [vmem:[#allocation4 + $0x1a8] sm:$0xff] %vm5141_vm1, %v7255_v49  ;;  %v7235_v30 = vpop.xlane.xlu0 %7234 }
 0xe46   : > { %v7258_v45 = vadd.f32 %v7235_v30, %v7210_v26  ;;  %v7241_v29 = vpop.xlane.xlu1 %7240 }
 0xe47   : > { %v7261_v41 = vadd.f32 %v7241_v29, %v7213_v15  ;;  %v7292_v15 = vld [vmem:[#allocation5 + $0x158] sm:$0xff]  ;;  %v7389_v29 = vmul.f32 %v15423_v0, %v7293_v34 }
 0xe48   : > { %7274 = vst.msk [vmem:[#allocation4 + $0x1c0] sm:$0xff] %vm5141_vm1, %v7258_v45  ;;  %v7388_v63 = vmul.f32 %v15425_v53, %v7292_v15  ;;  %v7294_v53 = vld [vmem:[#allocation5 + $0x198] sm:$0xff]  ;;  %v11875_v15 = vld [vmem:[#allocation14 + $0x44] ss:$16 sps:$4 sm:$0xff] (!%p10088_p0)  }
 0xe49   : > { %7277 = vst.msk [vmem:[#allocation4 + $0x1d8] sm:$0xff] %vm5141_vm1, %v7261_v41  ;;  %v10601_v46 = vpop.f32.mrb[48].mxu0  ;;  %v7247_v22 = vpop.xlane.xlu0 %7246  ;;  %v7387_v41 = vmul.f32 %v15427_v60, %v7291_v9  ;;  %v11879_v9 = vld [vmem:[#allocation14 + $0x40] ss:$16 sps:$4 sm:$0xff] (!%p10088_p0)  }
 0xe4a   : > { %v7501_v57 = vadd.f32 %v10601_v46, %v7380_v2  ;;  %v7264_v27 = vadd.f32 %v7247_v22, %v7216_v42  ;;  %v7436_v48 = vpop.f32.mrb[49].mxu0  ;;  %v7237_v21 = vpop.xlane.xlu1 %7236  ;;  %v7296_v46 = vld [vmem:[#allocation5 + $0x1d8] sm:$0xff] }
 0xe4b   : > { %v7499_v18 = vadd.f32 %v7436_v48, %v7378_v20  ;;  %v10602_v37 = vpop.f32.mrb[50].mxu0  ;;  %v7259_v11 = vadd.f32 %v7237_v21, %v7211_v19 }
 0xe4c   : > { %7517 = vst [vmem:[#allocation5 + $0x58] sm:$0xff] %v7501_v57  ;;  %7280 = vst.msk [vmem:[#allocation4 + $0x1f0] sm:$0xff] %vm5141_vm1, %v7264_v27  ;;  %v7502_v7 = vadd.f32 %v10602_v37, %v7381_v10  ;;  %v7439_v36 = vpop.f32.mrb[51].mxu0  ;;  %v7295_v10 = vld [vmem:[#allocation5 + $0x1b8] sm:$0xff]  ;;  %v7390_v57 = vmul.f32 %v15434_v33, %v7294_v53  ;;  %v7551_v33 = vld [vmem:[#allocation4] sm:$0xff] (!%p10088_p0) }
 0xe4d   : > { %7515 = vst [vmem:[#allocation5 + $0x18] sm:$0xff] %v7499_v18  ;;  %7275 = vst.msk [vmem:[#allocation4 + $0x1c8] sm:$0xff] %vm5141_vm1, %v7259_v11  ;;  %v7500_v24 = vadd.f32 %v7439_v36, %v7379_v35  ;;  %v7243_v39 = vpop.xlane.xlu0 %7242  ;;  %v7391_v13 = vmul.f32 %v15431_v62, %v7295_v10  ;;  %v7711_v36 = vld [vmem:[#allocation4 + $0x80] sm:$0xff] (!%p10088_p0)  ;;  %v7552_v62 = vld [vmem:[#allocation4 + $0x8] sm:$0xff] (!%p10088_p0) }
 0xe4e   : > { %7518 = vst [vmem:[#allocation5 + $0x78] sm:$0xff] %v7502_v7  ;;  %v7262_v61 = vadd.f32 %v7243_v39, %v7214_v23  ;;  %v7249_v59 = vpop.xlane.xlu1 %7248  ;;  %v7712_v23 = vld [vmem:[#allocation4 + $0x88] sm:$0xff] (!%p10088_p0)  ;;  %12055 = vrcp.f32 (!%p10088_p0), %v7711_v36  ;;  %v7714_v39 = vld [vmem:[#allocation4 + $0x98] sm:$0xff] (!%p10088_p0)  ;;  %v11891_v53 = vld [vmem:[#allocation14 + $0x80] ss:$16 sps:$4 sm:$0xff] (!%p10088_p0)  }
 0xe4f   : > { %7516 = vst [vmem:[#allocation5 + $0x38] sm:$0xff] %v7500_v24  ;;  %v7265_v32 = vadd.f32 %v7249_v59, %v7217_v1  ;;  %12057 = vrcp.f32 (!%p10088_p0), %v7551_v33  ;;  %v7713_v24 = vld [vmem:[#allocation4 + $0x90] sm:$0xff] (!%p10088_p0) }
 0xe50   : > { %7278 = vst.msk [vmem:[#allocation4 + $0x1e0] sm:$0xff] %vm5141_vm1, %v7262_v61  ;;  %12059 = vrcp.f32 (!%p10088_p0), %v7712_v23  ;;  %v7553_v1 = vld [vmem:[#allocation4 + $0x10] sm:$0xff] (!%p10088_p0)  ;;  %v11904_v23 = vld [vmem:[#allocation14 + $0xc8] ss:$16 sps:$4 sm:$0xff] (!%p10088_p0)  }
 0xe51   : > { %7281 = vst.msk [vmem:[#allocation4 + $0x1f8] sm:$0xff] %vm5141_vm1, %v7265_v32  ;;  %v10605_v12 = vpop.f32.mrb[52].mxu0  ;;  %12061 = vrcp.f32 (!%p10088_p0), %v7552_v62  ;;  %v7716_v32 = vld [vmem:[#allocation4 + $0xa8] sm:$0xff] (!%p10088_p0)  ;;  %v11893_v10 = vld [vmem:[#allocation14 + $0xa4] ss:$16 sps:$4 sm:$0xff] (!%p10088_p0)  }
 0xe52   : > { %v7505_v25 = vadd.f32 %v10605_v12, %v7384_v54  ;;  %v7452_v44 = vpop.f32.mrb[53].mxu0  ;;  %v7245_v3 = vpop.xlane.xlu1 %7244  ;;  %12063 = vrcp.f32 (!%p10088_p0), %v7713_v24  ;;  %v11863_v54 = vld [vmem:[#allocation14 + $0x4] ss:$16 sps:$4 sm:$0xff] (!%p10088_p0)   ;;  %v7556_v12 = vld [vmem:[#allocation4 + $0x28] sm:$0xff] (!%p10088_p0)  ;;  %v11903_v33 = vld [vmem:[#allocation14 + $0xc0] ss:$16 sps:$4 sm:$0xff] (!%p10088_p0)  }
 0xe53   : > { %v7503_v49 = vadd.f32 %v7452_v44, %v7382_v55  ;;  %v10606_v26 = vpop.f32.mrb[54].mxu0  ;;  %v7263_v56 = vadd.f32 %v7245_v3, %v7215_v5  ;;  %12065 = vrcp.f32 (!%p10088_p0), %v7714_v39  ;;  %v7555_v55 = vld [vmem:[#allocation4 + $0x20] sm:$0xff] (!%p10088_p0)  ;;  %v11865_v5 = vld [vmem:[#allocation14 + $0xc] ss:$16 sps:$4 sm:$0xff] (!%p10088_p0)   ;;  %8991 = vmatprep.subr.bf16.mxu0 (!%p10088_p0), %v11863_v54  ;;  %v7561_v24 = vld [vmem:[#allocation4 + $0x50] sm:$0xff] (!%p10088_p0) }
 0xe54   : > { %7521 = vst [vmem:[#allocation5 + $0xd8] sm:$0xff] %v7505_v25  ;;  %v7506_v6 = vadd.f32 %v10606_v26, %v7385_v40  ;;  %v7455_v30 = vpop.f32.mrb[55].mxu0  ;;  %12067 = vrcp.f32 (!%p10088_p0), %v7553_v1  ;;  %v11867_v40 = vld [vmem:[#allocation14] ss:$16 sps:$4 sm:$0xff] (!%p10088_p0)   ;;  %v11868_v25 = vld [vmem:[#allocation14 + $0x8] ss:$16 sps:$4 sm:$0xff] (!%p10088_p0)   ;;  %9217 = vmatprep.subr.bf16.mxu1 (!%p10088_p0), %v11865_v5 }
 0xe55   : > { %7519 = vst [vmem:[#allocation5 + $0x98] sm:$0xff] %v7503_v49  ;;  %7279 = vst.msk [vmem:[#allocation4 + $0x1e8] sm:$0xff] %vm5141_vm1, %v7263_v56  ;;  %v7504_v14 = vadd.f32 %v7455_v30, %v7383_v17  ;;  %v7376_v43 = vpop.permute.xlu0 %7375  ;;  %12069 = vrcp.f32 (!%p10088_p0), %v7554_v58  ;;  %v11869_v3 = vld [vmem:[#allocation14 + $0x24] ss:$16 sps:$4 sm:$0xff] (!%p10088_p0)   ;;  %8992 = vmatpush1.bf16.msra.mxu0 (!%p10088_p0), %v11867_v40  ;;  %9218 = vmatpush1.bf16.msra.mxu1 (!%p10088_p0), %v11868_v25  ;;  %v11871_v26 = vld [vmem:[#allocation14 + $0x2c] ss:$16 sps:$4 sm:$0xff] (!%p10088_p0)  }
 0xe56   : > { %7522 = vst [vmem:[#allocation5 + $0xf8] sm:$0xff] %v7506_v6  ;;  %v7371_v22 = vpop.permute.xlu1 %7370  ;;  %v7393_v60 = vmul.f32 %v7376_v43, %v7297_v16  ;;  %12071 = vrcp.f32 (!%p10088_p0), %v7715_v51  ;;  %v7717_v49 = vld [vmem:[#allocation4 + $0xb0] sm:$0xff] (!%p10088_p0)  ;;  %v7718_v56 = vld [vmem:[#allocation4 + $0xb8] sm:$0xff] (!%p10088_p0)  ;;  %8993 = vmatprep.subr.bf16.mxu0 (!%p10088_p0), %v11869_v3  ;;  %9219 = vmatprep.subr.bf16.mxu1 (!%p10088_p0), %v11871_v26  ;;  %v7724_v54 = vld [vmem:[#allocation4 + $0xe8] sm:$0xff] (!%p10088_p0) }
 0xe57   : > { %7520 = vst [vmem:[#allocation5 + $0xb8] sm:$0xff] %v7504_v14  ;;  %v7392_v0 = vmul.f32 %v7371_v22, %v7296_v46  ;;  %12073 = vrcp.f32 (!%p10088_p0), %v7716_v32  ;;  %v11873_v6 = vld [vmem:[#allocation14 + $0x20] ss:$16 sps:$4 sm:$0xff] (!%p10088_p0)   ;;  %v11874_v30 = vld [vmem:[#allocation14 + $0x28] ss:$16 sps:$4 sm:$0xff] (!%p10088_p0)  }
 0xe58   : > { %v12056_v61 = vpop.eup (!%p10088_p0), %12055  ;;  %12075 = vrcp.f32 (!%p10088_p0), %v7555_v55  ;;  %v11889_v46 = vld [vmem:[#allocation14 + $0x8c] ss:$16 sps:$4 sm:$0xff] (!%p10088_p0)   ;;  %v11892_v16 = vld [vmem:[#allocation14 + $0x88] ss:$16 sps:$4 sm:$0xff] (!%p10088_p0)   ;;  %v11911_v51 = vld [vmem:[#allocation14 + $0x104] ss:$16 sps:$4 sm:$0xff] (!%p10088_p0)  }
 0xe59   : > { %v10609_v45 = vpop.f32.mrb[56].mxu0  ;;  %v12058_v59 = vpop.eup (!%p10088_p0), %12057  ;;  %7761 = vperm.xlu0 (!%p10088_p0), %11861, %v12056_v61   ;;  %12077 = vrcp.f32 (!%p10088_p0), %v7556_v12  ;;  %8994 = vmatpush1.bf16.msra.mxu0 (!%p10088_p0), %v11873_v6  ;;  %v11907_v62 = vld [vmem:[#allocation14 + $0xec] ss:$16 sps:$4 sm:$0xff] (!%p10088_p0)   ;;  %v11909_v61 = vld [vmem:[#allocation14 + $0xe0] ss:$16 sps:$4 sm:$0xff] (!%p10088_p0)  }
 0xe5a   : > { %v7509_v4 = vadd.f32 %v10609_v45, %v7388_v63  ;;  %v7468_v28 = vpop.f32.mrb[57].mxu0  ;;  %v12060_v8 = vpop.eup (!%p10088_p0), %12059  ;;  %7601 = vperm.xlu1 (!%p10088_p0), %11862, %v12058_v59   ;;  %v7557_v63 = vld [vmem:[#allocation4 + $0x30] sm:$0xff] (!%p10088_p0)  ;;  %9220 = vmatpush1.bf16.msra.mxu1 (!%p10088_p0), %v11874_v30  ;;  %12079 = vrcp.f32 (!%p10088_p0), %v7717_v49  ;;  %v7562_v1 = vld [vmem:[#allocation4 + $0x58] sm:$0xff] (!%p10088_p0)  ;;  %v7723_v32 = vld [vmem:[#allocation4 + $0xe0] sm:$0xff] (!%p10088_p0) }
 0xe5b   : > { %v7507_v50 = vadd.f32 %v7468_v28, %v7386_v31  ;;  %v10610_v2 = vpop.f32.mrb[58].mxu0  ;;  %v12062_v52 = vpop.eup (!%p10088_p0), %12061  ;;  %8995 = vmatprep.subr.bf16.mxu0 (!%p10088_p0), %v11875_v15  ;;  %9221 = vmatprep.subr.bf16.mxu1 (!%p10088_p0), %v11877_v38  ;;  %v11880_v31 = vld [vmem:[#allocation14 + $0x48] ss:$16 sps:$4 sm:$0xff] (!%p10088_p0)   ;;  %12081 = vrcp.f32 (!%p10088_p0), %v7718_v56  ;;  %v11881_v45 = vld [vmem:[#allocation14 + $0x64] ss:$16 sps:$4 sm:$0xff] (!%p10088_p0)  }
 0xe5c   : > { %7525 = vst [vmem:[#allocation5 + $0x158] sm:$0xff] %v7509_v4  ;;  %v7510_v42 = vadd.f32 %v10610_v2, %v7389_v29  ;;  %v7471_v20 = vpop.f32.mrb[59].mxu0  ;;  %v12064_v44 = vpop.eup (!%p10088_p0), %12063  ;;  %v7558_v4 = vld [vmem:[#allocation4 + $0x38] sm:$0xff] (!%p10088_p0)  ;;  %12083 = vrcp.f32 (!%p10088_p0), %v7557_v63  ;;  %v11915_v55 = vld [vmem:[#allocation14 + $0x100] ss:$16 sps:$4 sm:$0xff] (!%p10088_p0)  }
 0xe5d   : > { %7523 = vst [vmem:[#allocation5 + $0x118] sm:$0xff] %v7507_v50  ;;  %v7508_v19 = vadd.f32 %v7471_v20, %v7387_v41  ;;  %7766 = vperm.xlu0 (!%p10088_p0), %11861, %v12060_v8   ;;  %v12066_v17 = vpop.eup (!%p10088_p0), %12065  ;;  %v11883_v28 = vld [vmem:[#allocation14 + $0x6c] ss:$16 sps:$4 sm:$0xff] (!%p10088_p0)   ;;  %8996 = vmatpush1.bf16.msra.mxu0 (!%p10088_p0), %v11879_v9  ;;  %v11885_v50 = vld [vmem:[#allocation14 + $0x60] ss:$16 sps:$4 sm:$0xff] (!%p10088_p0)   ;;  %12085 = vrcp.f32 (!%p10088_p0), %v7558_v4 }
 0xe5e   : > { %7526 = vst [vmem:[#allocation5 + $0x178] sm:$0xff] %v7510_v42  ;;  %7606 = vperm.xlu1 (!%p10088_p0), %11862, %v12062_v52   ;;  %v12068_v14 = vpop.eup (!%p10088_p0), %12067  ;;  %9222 = vmatpush1.bf16.msra.mxu1 (!%p10088_p0), %v11880_v31  ;;  %v11886_v2 = vld [vmem:[#allocation14 + $0x68] ss:$16 sps:$4 sm:$0xff] (!%p10088_p0)   ;;  %v11887_v42 = vld [vmem:[#allocation14 + $0x84] ss:$16 sps:$4 sm:$0xff] (!%p10088_p0)  }
 0xe5f   : > { %7524 = vst [vmem:[#allocation5 + $0x138] sm:$0xff] %v7508_v19  ;;  %v12070_v34 = vpop.eup (!%p10088_p0), %12069  ;;  %8997 = vmatprep.subr.bf16.mxu0 (!%p10088_p0), %v11881_v45  ;;  %9223 = vmatprep.subr.bf16.mxu1 (!%p10088_p0), %v11883_v28  ;;  %v7719_v20 = vld [vmem:[#allocation4 + $0xc0] sm:$0xff] (!%p10088_p0)  ;;  %v7720_v19 = vld [vmem:[#allocation4 + $0xc8] sm:$0xff] (!%p10088_p0)  ;;  %v7725_v15 = vld [vmem:[#allocation4 + $0xf0] sm:$0xff] (!%p10088_p0) }
 0xe60   : > { %v12072_v29 = vpop.eup (!%p10088_p0), %12071  ;;  %12087 = vrcp.f32 (!%p10088_p0), %v7719_v20  ;;  %v11910_v59 = vld [vmem:[#allocation14 + $0xe8] ss:$16 sps:$4 sm:$0xff] (!%p10088_p0)   ;;  %v11913_v8 = vld [vmem:[#allocation14 + $0x10c] ss:$16 sps:$4 sm:$0xff] (!%p10088_p0)   ;;  %v11917_v40 = vld [vmem:[#allocation14 + $0x124] ss:$16 sps:$4 sm:$0xff] (!%p10088_p0)  }
 0xe61   : > { %v10613_v27 = vpop.f32.mrb[60].mxu0  ;;  %7550 = sbr.rel (%p10088_p0) target bundleno = 4146 (0x1032), region = 64  ;;  %7771 = vperm.xlu0 (!%p10088_p0), %11861, %v12064_v44   ;;  %v12074_v41 = vpop.eup (!%p10088_p0), %12073  ;;  %8998 = vmatpush1.bf16.msra.mxu0 (!%p10088_p0), %v11885_v50  ;;  %12089 = vrcp.f32 (!%p10088_p0), %v7720_v19  ;;  %v11916_v5 = vld [vmem:[#allocation14 + $0x108] ss:$16 sps:$4 sm:$0xff] (!%p10088_p0)   ;;  %v11919_v25 = vld [vmem:[#allocation14 + $0x12c] ss:$16 sps:$4 sm:$0xff] (!%p10088_p0)  }
 0xe62   : > { %v7513_v48 = vadd.f32 %v10613_v27, %v7392_v0  ;;  %v7484_v21 = vpop.f32.mrb[61].mxu0  ;;  %7776 = vperm.xlu1 (!%p10088_p0), %11862, %v12066_v17   ;;  %v12076_v22 = vpop.eup (!%p10088_p0), %12075  ;;  %9224 = vmatpush1.bf16.msra.mxu1 (!%p10088_p0), %v11886_v2  ;;  %v11895_v0 = vld [vmem:[#allocation14 + $0xac] ss:$16 sps:$4 sm:$0xff] (!%p10088_p0)   ;;  %v7563_v44 = vld [vmem:[#allocation4 + $0x60] sm:$0xff] (!%p10088_p0)  ;;  %v11922_v26 = vld [vmem:[#allocation14 + $0x128] ss:$16 sps:$4 sm:$0xff] (!%p10088_p0)  }
 0xe63   : > { %v7511_v35 = vadd.f32 %v7484_v21, %v7390_v57  ;;  %v10614_v18 = vpop.f32.mrb[62].mxu0  ;;  %v12078_v43 = vpop.eup (!%p10088_p0), %12077  ;;  %8999 = vmatprep.subr.bf16.mxu0 (!%p10088_p0), %v11887_v42  ;;  %9225 = vmatprep.subr.bf16.mxu1 (!%p10088_p0), %v11889_v46  ;;  %v7559_v57 = vld [vmem:[#allocation4 + $0x40] sm:$0xff] (!%p10088_p0)  ;;  %v7560_v27 = vld [vmem:[#allocation4 + $0x48] sm:$0xff] (!%p10088_p0)  ;;  %v7726_v38 = vld [vmem:[#allocation4 + $0xf8] sm:$0xff] (!%p10088_p0) }
 0xe64   : > { %7529 = vst [vmem:[#allocation5 + $0x1d8] sm:$0xff] %v7513_v48  ;;  %v7514_v37 = vadd.f32 %v10614_v18, %v7393_v60  ;;  %v7487_v11 = vpop.f32.mrb[63].mxu0  ;;  %v12080_v60 = vpop.eup (!%p10088_p0), %12079  ;;  %v11897_v48 = vld [vmem:[#allocation14 + $0xa0] ss:$16 sps:$4 sm:$0xff] (!%p10088_p0)   ;;  %12091 = vrcp.f32 (!%p10088_p0), %v7559_v57  ;;  %v11901_v18 = vld [vmem:[#allocation14 + $0xcc] ss:$16 sps:$4 sm:$0xff] (!%p10088_p0)  }
 0xe65   : > { %7527 = vst [vmem:[#allocation5 + $0x198] sm:$0xff] %v7511_v35  ;;  %v7512_v7 = vadd.f32 %v7487_v11, %v7391_v13  ;;  %7611 = vperm.xlu0 (!%p10088_p0), %11861, %v12068_v14   ;;  %v12082_v21 = vpop.eup (!%p10088_p0), %12081  ;;  %9000 = vmatpush1.bf16.msra.mxu0 (!%p10088_p0), %v11891_v53  ;;  %v11898_v13 = vld [vmem:[#allocation14 + $0xa8] ss:$16 sps:$4 sm:$0xff] (!%p10088_p0)   ;;  %v11899_v35 = vld [vmem:[#allocation14 + $0xc4] ss:$16 sps:$4 sm:$0xff] (!%p10088_p0)   ;;  %12093 = vrcp.f32 (!%p10088_p0), %v7560_v27 }
 0xe66   : > { %7530 = vst [vmem:[#allocation5 + $0x1f8] sm:$0xff] %v7514_v37  ;;  %7616 = vperm.xlu1 (!%p10088_p0), %11862, %v12070_v34   ;;  %9226 = vmatpush1.bf16.msra.mxu1 (!%p10088_p0), %v11892_v16  ;;  %v7721_v37 = vld [vmem:[#allocation4 + $0xd0] sm:$0xff] (!%p10088_p0)  ;;  %v12084_v11 = vpop.eup (!%p10088_p0), %12083  ;;  %v7564_v17 = vld [vmem:[#allocation4 + $0x68] sm:$0xff] (!%p10088_p0)  ;;  %v7566_v4 = vld [vmem:[#allocation4 + $0x78] sm:$0xff] (!%p10088_p0) }
 0xe67   : > { %7528 = vst [vmem:[#allocation5 + $0x1b8] sm:$0xff] %v7512_v7  ;;  %9001 = vmatprep.subr.bf16.mxu0 (!%p10088_p0), %v11893_v10  ;;  %9227 = vmatprep.subr.bf16.mxu1 (!%p10088_p0), %v11895_v0  ;;  %v7722_v7 = vld [vmem:[#allocation4 + $0xd8] sm:$0xff] (!%p10088_p0)  ;;  %v12086_v36 = vpop.eup (!%p10088_p0), %12085  ;;  %12095 = vrcp.f32 (!%p10088_p0), %v7721_v37  ;;  %v11921_v49 = vld [vmem:[#allocation14 + $0x120] ss:$16 sps:$4 sm:$0xff] (!%p10088_p0)   ;;  %v11923_v6 = vld [vmem:[#allocation14 + $0x144] ss:$16 sps:$4 sm:$0xff] (!%p10088_p0)  }
 0xe68   : > { %12097 = vrcp.f32 %v7722_v7  ;;  %v11925_v30 = vld [vmem:[#allocation14 + $0x14c] ss:$16 sps:$4 sm:$0xff]   ;;  %v11927_v34 = vld [vmem:[#allocation14 + $0x140] ss:$16 sps:$4 sm:$0xff]   ;;  %v11928_v63 = vld [vmem:[#allocation14 + $0x148] ss:$16 sps:$4 sm:$0xff]  }
 0xe69   : > { %7781 = vperm.xlu0 %11861, %v12072_v29   ;;  %9002 = vmatpush1.bf16.msra.mxu0 %v11897_v48  ;;  %12099 = vrcp.f32 %v7561_v24  ;;  %v11929_v31 = vld [vmem:[#allocation14 + $0x164] ss:$16 sps:$4 sm:$0xff]   ;;  %v11931_v45 = vld [vmem:[#allocation14 + $0x16c] ss:$16 sps:$4 sm:$0xff]   ;;  %v11934_v2 = vld [vmem:[#allocation14 + $0x168] ss:$16 sps:$4 sm:$0xff]  }
 0xe6a   : > { %7786 = vperm.xlu1 %11862, %v12074_v41   ;;  %9228 = vmatpush1.bf16.msra.mxu1 %v11898_v13  ;;  %v12088_v39 = vpop.eup %12087  ;;  %12101 = vrcp.f32 %v7562_v1  ;;  %v7565_v29 = vld [vmem:[#allocation4 + $0x70] sm:$0xff]  ;;  %v11937_v20 = vld [vmem:[#allocation14 + $0x18c] ss:$16 sps:$4 sm:$0xff]   ;;  %v8031_v46 = vld [vmem:[#allocation4 + $0x180] sm:$0xff] }
 0xe6b   : > { %9003 = vmatprep.subr.bf16.mxu0 %v11899_v35  ;;  %9229 = vmatprep.subr.bf16.mxu1 %v11901_v18  ;;  %v12090_v58 = vpop.eup %12089  ;;  %12103 = vrcp.f32 %v7723_v32  ;;  %v11933_v41 = vld [vmem:[#allocation14 + $0x160] ss:$16 sps:$4 sm:$0xff]   ;;  %v11935_v42 = vld [vmem:[#allocation14 + $0x184] ss:$16 sps:$4 sm:$0xff]   ;;  %v8032_v19 = vld [vmem:[#allocation4 + $0x188] sm:$0xff] }
 0xe6c   : > { %12105 = vrcp.f32 %v7724_v54  ;;  %v11939_v16 = vld [vmem:[#allocation14 + $0x180] ss:$16 sps:$4 sm:$0xff]   ;;  %v11941_v10 = vld [vmem:[#allocation14 + $0x1a4] ss:$16 sps:$4 sm:$0xff]   ;;  %v11943_v0 = vld [vmem:[#allocation14 + $0x1ac] ss:$16 sps:$4 sm:$0xff]  }
 0xe6d   : > { %7621 = vperm.xlu0 %11861, %v12076_v22   ;;  %9004 = vmatpush1.bf16.msra.mxu0 %v11903_v33  ;;  %12107 = vrcp.f32 %v7563_v44  ;;  %v7871_v57 = vld [vmem:[#allocation4 + $0x100] sm:$0xff]  ;;  %v11946_v13 = vld [vmem:[#allocation14 + $0x1a8] ss:$16 sps:$4 sm:$0xff]   ;;  %v11949_v18 = vld [vmem:[#allocation14 + $0x1cc] ss:$16 sps:$4 sm:$0xff]  }
 0xe6e   : > { %7626 = vperm.xlu1 %11862, %v12078_v43   ;;  %9230 = vmatpush1.bf16.msra.mxu1 %v11904_v23  ;;  %v12092_v52 = vpop.eup %12091  ;;  %12109 = vrcp.f32 %v7564_v17  ;;  %v11940_v43 = vld [vmem:[#allocation14 + $0x188] ss:$16 sps:$4 sm:$0xff]   ;;  %v11947_v35 = vld [vmem:[#allocation14 + $0x1c4] ss:$16 sps:$4 sm:$0xff]   ;;  %v11951_v33 = vld [vmem:[#allocation14 + $0x1c0] ss:$16 sps:$4 sm:$0xff]  }
 0xe6f   : > { %9005 = vmatprep.subr.bf16.mxu0 %v11905_v47  ;;  %9231 = vmatprep.subr.bf16.mxu1 %v11907_v62  ;;  %v12094_v12 = vpop.eup %12093  ;;  %12111 = vrcp.f32 %v7725_v15  ;;  %v8033_v37 = vld [vmem:[#allocation4 + $0x190] sm:$0xff]  ;;  %v8034_v7 = vld [vmem:[#allocation4 + $0x198] sm:$0xff]  ;;  %v8035_v32 = vld [vmem:[#allocation4 + $0x1a0] sm:$0xff] }
 0xe70   : > { %12113 = vrcp.f32 %v7726_v38  ;;  %v11952_v23 = vld [vmem:[#allocation14 + $0x1c8] ss:$16 sps:$4 sm:$0xff]   ;;  %v11953_v47 = vld [vmem:[#allocation14 + $0x1e4] ss:$16 sps:$4 sm:$0xff]   ;;  %v11955_v62 = vld [vmem:[#allocation14 + $0x1ec] ss:$16 sps:$4 sm:$0xff]  }
 0xe71   : > { %7791 = vperm.xlu0 %11861, %v12080_v60   ;;  %9006 = vmatpush1.bf16.msra.mxu0 %v11909_v61  ;;  %v12096_v3 = vpop.eup %12095  ;;  %12115 = vrcp.f32 %v7565_v29  ;;  %v7872_v60 = vld [vmem:[#allocation4 + $0x108] sm:$0xff]  ;;  %v7873_v24 = vld [vmem:[#allocation4 + $0x110] sm:$0xff]  ;;  %v7874_v1 = vld [vmem:[#allocation4 + $0x118] sm:$0xff] }
 0xe72   : > { %7796 = vperm.xlu1 %11862, %v12082_v21   ;;  %9232 = vmatpush1.bf16.msra.mxu1 %v11910_v59  ;;  %v12098_v56 = vpop.eup %12097  ;;  %12117 = vrcp.f32 %v7566_v4  ;;  %v11945_v21 = vld [vmem:[#allocation14 + $0x1a0] ss:$16 sps:$4 sm:$0xff]   ;;  %v11958_v61 = vld [vmem:[#allocation14 + $0x1e8] ss:$16 sps:$4 sm:$0xff]  }
 0xe73   : > { %9007 = vmatprep.subr.bf16.mxu0 %v11911_v51  ;;  %9233 = vmatprep.subr.bf16.mxu1 %v11913_v8  ;;  %v12100_v14 = vpop.eup %12099  ;;  %12119 = vrcp.f32 %v8031_v46  ;;  %v11961_v51 = vld [vmem:[#allocation14 + $0x204] ss:$16 sps:$4 sm:$0xff]   ;;  %v11964_v8 = vld [vmem:[#allocation14 + $0x20c] ss:$16 sps:$4 sm:$0xff]  }
 0xe74   : > { %v12102_v9 = vpop.eup %12101  ;;  %12121 = vrcp.f32 %v8032_v19  ;;  %v8036_v54 = vld [vmem:[#allocation4 + $0x1a8] sm:$0xff]  ;;  %v8037_v44 = vld [vmem:[#allocation4 + $0x1b0] sm:$0xff]  ;;  %v8038_v17 = vld [vmem:[#allocation4 + $0x1b8] sm:$0xff] }
 0xe75   : > { %7631 = vperm.xlu0 %11861, %v12084_v11   ;;  %9008 = vmatpush1.bf16.msra.mxu0 %v11915_v55  ;;  %v12104_v28 = vpop.eup %12103  ;;  %12123 = vrcp.f32 %v7871_v57  ;;  %v8039_v15 = vld [vmem:[#allocation4 + $0x1c0] sm:$0xff]  ;;  %v8040_v38 = vld [vmem:[#allocation4 + $0x1c8] sm:$0xff]  ;;  %v8041_v29 = vld [vmem:[#allocation4 + $0x1d0] sm:$0xff] }
 0xe76   : > { %7636 = vperm.xlu1 %11862, %v12086_v36   ;;  %9234 = vmatpush1.bf16.msra.mxu1 %v11916_v5  ;;  %v12106_v50 = vpop.eup %12105  ;;  %12125 = vrcp.f32 %v7872_v60  ;;  %v8043_v46 = vld [vmem:[#allocation4 + $0x1e0] sm:$0xff]  ;;  %v8044_v19 = vld [vmem:[#allocation4 + $0x1e8] sm:$0xff]  ;;  %v8045_v57 = vld [vmem:[#allocation4 + $0x1f0] sm:$0xff] }
 0xe77   : > { %9009 = vmatprep.subr.bf16.mxu0 %v11917_v40  ;;  %9235 = vmatprep.subr.bf16.mxu1 %v11919_v25  ;;  %v12108_v22 = vpop.eup %12107  ;;  %12127 = vrcp.f32 %v8033_v37  ;;  %v7876_v40 = vld [vmem:[#allocation4 + $0x128] sm:$0xff]  ;;  %v8046_v60 = vld [vmem:[#allocation4 + $0x1f8] sm:$0xff] }
 0xe78   : > { %v12110_v53 = vpop.eup %12109  ;;  %12129 = vrcp.f32 %v8034_v7 }
 0xe79   : > { %7801 = vperm.xlu0 %11861, %v12088_v39   ;;  %9010 = vmatpush1.bf16.msra.mxu0 %v11921_v49  ;;  %v12112_v27 = vpop.eup %12111  ;;  %12131 = vrcp.f32 %v7873_v24  ;;  %v7743_v24 = vld [vmem:[#allocation5 + $0x8] sm:$0xff] }
 0xe7a   : > { %7806 = vperm.xlu1 %11862, %v12090_v58   ;;  %9236 = vmatpush1.bf16.msra.mxu1 %v11922_v26  ;;  %v12114_v48 = vpop.eup %12113  ;;  %v11957_v58 = vld [vmem:[#allocation14 + $0x1e0] ss:$16 sps:$4 sm:$0xff]   ;;  %12133 = vrcp.f32 %v7874_v1 }
 0xe7b   : > { %9011 = vmatprep.subr.bf16.mxu0 %v11923_v6  ;;  %9237 = vmatprep.subr.bf16.mxu1 %v11925_v30  ;;  %v12116_v11 = vpop.eup %12115  ;;  %12135 = vrcp.f32 %v8035_v32  ;;  %v7877_v26 = vld [vmem:[#allocation4 + $0x130] sm:$0xff]  ;;  %v7878_v6 = vld [vmem:[#allocation4 + $0x138] sm:$0xff]  ;;  %v7583_v1 = vld [vmem:[#allocation5] sm:$0xff] }
 0xe7c   : > { %v12118_v36 = vpop.eup %12117  ;;  %12137 = vrcp.f32 %v8036_v54  ;;  %v7745_v54 = vld [vmem:[#allocation5 + $0x48] sm:$0xff] }
 0xe7d   : > { %7641 = vperm.xlu0 %11861, %v12092_v52   ;;  %9012 = vmatpush1.bf16.msra.mxu0 %v11927_v34  ;;  %v12120_v39 = vpop.eup %12119 }
 0xe7e   : > { %7646 = vperm.xlu1 %11862, %v12094_v12   ;;  %9238 = vmatpush1.bf16.msra.mxu1 %v11928_v63  ;;  %v12122_v59 = vpop.eup %12121  ;;  %v7875_v12 = vld [vmem:[#allocation4 + $0x120] sm:$0xff] }
 0xe7f   : > { %9013 = vmatprep.subr.bf16.mxu0 %v11929_v31  ;;  %9239 = vmatprep.subr.bf16.mxu1 %v11931_v45  ;;  %v12124_v52 = vpop.eup %12123  ;;  %12139 = vrcp.f32 %v7875_v12  ;;  %v7879_v63 = vld [vmem:[#allocation4 + $0x140] sm:$0xff]  ;;  %v7880_v31 = vld [vmem:[#allocation4 + $0x148] sm:$0xff] }
 0xe80   : > { %v12126_v55 = vpop.eup %12125  ;;  %12141 = vrcp.f32 %v7876_v40  ;;  %v7746_v12 = vld [vmem:[#allocation5 + $0x68] sm:$0xff] }
 0xe81   : > { %7811 = vperm.xlu0 %11861, %v12096_v3   ;;  %9014 = vmatpush1.bf16.msra.mxu0 %v11933_v41  ;;  %v12128_v5 = vpop.eup %12127  ;;  %12143 = vrcp.f32 %v8037_v44  ;;  %v11962_v40 = vld [vmem:[#allocation14 + $0x208] ss:$16 sps:$4 sm:$0xff]  }
 0xe82   : > { %7816 = vperm.xlu1 %11862, %v12098_v56   ;;  %9240 = vmatpush1.bf16.msra.mxu1 %v11934_v2  ;;  %v12130_v25 = vpop.eup %12129  ;;  %12145 = vrcp.f32 %v8038_v17  ;;  %v11970_v17 = vld [vmem:[#allocation14 + $0x22c] ss:$16 sps:$4 sm:$0xff]  }
 0xe83   : > { %9015 = vmatprep.subr.bf16.mxu0 %v11935_v42  ;;  %9241 = vmatprep.subr.bf16.mxu1 %v11937_v20  ;;  %v12132_v3 = vpop.eup %12131  ;;  %12147 = vrcp.f32 %v7877_v26  ;;  %v7882_v42 = vld [vmem:[#allocation4 + $0x158] sm:$0xff] }
 0xe84   : > { %v12134_v49 = vpop.eup %12133  ;;  %12149 = vrcp.f32 %v7878_v6  ;;  %v7585_v6 = vld [vmem:[#allocation5 + $0x40] sm:$0xff] }
 0xe85   : > { %7651 = vperm.xlu0 %11861, %v12100_v14   ;;  %9016 = vmatpush1.bf16.msra.mxu0 %v11939_v16  ;;  %v12136_v56 = vpop.eup %12135  ;;  %12151 = vrcp.f32 %v8039_v15  ;;  %v7883_v16 = vld [vmem:[#allocation4 + $0x160] sm:$0xff] }
 0xe86   : > { %7656 = vperm.xlu1 %11862, %v12102_v9   ;;  %9242 = vmatpush1.bf16.msra.mxu1 %v11940_v43  ;;  %v12138_v30 = vpop.eup %12137  ;;  %12153 = vrcp.f32 %v8040_v38  ;;  %v11965_v15 = vld [vmem:[#allocation14 + $0x220] ss:$16 sps:$4 sm:$0xff]  }
 0xe87   : > { %9017 = vmatprep.subr.bf16.mxu0 %v11941_v10  ;;  %9243 = vmatprep.subr.bf16.mxu1 %v11943_v0  ;;  %12155 = vrcp.f32 %v7879_v63  ;;  %v7884_v10 = vld [vmem:[#allocation4 + $0x168] sm:$0xff]  ;;  %v11973_v63 = vld [vmem:[#allocation14 + $0x244] ss:$16 sps:$4 sm:$0xff]  }
 0xe88   : > { %12157 = vrcp.f32 %v7880_v31 }
 0xe89   : > { %7821 = vperm.xlu0 %11861, %v12104_v28   ;;  %9018 = vmatpush1.bf16.msra.mxu0 %v11945_v21  ;;  %v12140_v14 = vpop.eup %12139  ;;  %v8042_v28 = vld [vmem:[#allocation4 + $0x1d8] sm:$0xff]  ;;  %12159 = vrcp.f32 %v8041_v29  ;;  %v7885_v21 = vld [vmem:[#allocation4 + $0x170] sm:$0xff] }
 0xe8a   : > { %7826 = vperm.xlu1 %11862, %v12106_v50   ;;  %9244 = vmatpush1.bf16.msra.mxu1 %v11946_v13  ;;  %v12142_v34 = vpop.eup %12141  ;;  %12161 = vrcp.f32 %v8042_v28  ;;  %v7881_v50 = vld [vmem:[#allocation4 + $0x150] sm:$0xff]  ;;  %v7748_v28 = vld [vmem:[#allocation5 + $0xa8] sm:$0xff] }
 0xe8b   : > { %9019 = vmatprep.subr.bf16.mxu0 %v11947_v35  ;;  %9245 = vmatprep.subr.bf16.mxu1 %v11949_v18  ;;  %v12144_v9 = vpop.eup %12143  ;;  %12163 = vrcp.f32 %v7881_v50  ;;  %v7886_v35 = vld [vmem:[#allocation4 + $0x178] sm:$0xff] }
 0xe8c   : > { %v12146_v45 = vpop.eup %12145  ;;  %12165 = vrcp.f32 %v7882_v42  ;;  %v11974_v50 = vld [vmem:[#allocation14 + $0x248] ss:$16 sps:$4 sm:$0xff]  }
 0xe8d   : > { %7661 = vperm.xlu0 %11861, %v12108_v22   ;;  %9020 = vmatpush1.bf16.msra.mxu0 %v11951_v33  ;;  %v12148_v4 = vpop.eup %12147  ;;  %12167 = vrcp.f32 %v8043_v46  ;;  %v11982_v46 = vld [vmem:[#allocation14 + $0x26c] ss:$16 sps:$4 sm:$0xff]  }
 0xe8e   : > { %7666 = vperm.xlu1 %11862, %v12110_v53   ;;  %9246 = vmatpush1.bf16.msra.mxu1 %v11952_v23  ;;  %v12150_v41 = vpop.eup %12149  ;;  %12169 = vrcp.f32 %v8044_v19 }
 0xe8f   : > { %9021 = vmatprep.subr.bf16.mxu0 %v11953_v47  ;;  %9247 = vmatprep.subr.bf16.mxu1 %v11955_v62  ;;  %v12152_v2 = vpop.eup %12151  ;;  %12171 = vrcp.f32 %v7883_v16  ;;  %v7587_v16 = vld [vmem:[#allocation5 + $0x80] sm:$0xff] }
 0xe90   : > { %v12154_v20 = vpop.eup %12153  ;;  %12173 = vrcp.f32 %v7884_v10  ;;  %v11977_v10 = vld [vmem:[#allocation14 + $0x260] ss:$16 sps:$4 sm:$0xff]  }
 0xe91   : > { %7831 = vperm.xlu0 %11861, %v12112_v27   ;;  %9022 = vmatpush1.bf16.msra.mxu0 %v11957_v58  ;;  %v12156_v22 = vpop.eup %12155  ;;  %12175 = vrcp.f32 %v8045_v57  ;;  %v7584_v58 = vld [vmem:[#allocation5 + $0x20] sm:$0xff] }
 0xe92   : > { %7836 = vperm.xlu1 %11862, %v12114_v48   ;;  %9248 = vmatpush1.bf16.msra.mxu1 %v11958_v61  ;;  %v12158_v53 = vpop.eup %12157  ;;  %12177 = vrcp.f32 %v8046_v60  ;;  %v11985_v60 = vld [vmem:[#allocation14 + $0x284] ss:$16 sps:$4 sm:$0xff]  }
 0xe93   : > { %9104 = vmatprep.subr.bf16.mxu0 %v11961_v51  ;;  %9330 = vmatprep.subr.bf16.mxu1 %v11964_v8  ;;  %v12160_v43 = vpop.eup %12159  ;;  %12179 = vrcp.f32 %v7885_v21 }
 0xe94   : > { %v12162_v0 = vpop.eup %12161  ;;  %12181 = vrcp.f32 %v7886_v35 }
 0xe95   : > { %7671 = vperm.xlu0 %11861, %v12116_v11   ;;  %v12164_v27 = vpop.eup %12163 }
 0xe96   : > { %7676 = vperm.xlu1 %11862, %v12118_v36   ;;  %v12166_v48 = vpop.eup %12165 }
 0xe97   : > { %v12168_v13 = vpop.eup %12167 }
 0xe98   : > { %v12170_v18 = vpop.eup %12169 }
 0xe99   : > { %8081 = vperm.xlu0 %11861, %v12120_v39   ;;  %v12172_v37 = vpop.eup %12171  ;;  %v7744_v39 = vld [vmem:[#allocation5 + $0x28] sm:$0xff] }
 0xe9a   : > { %8086 = vperm.xlu1 %11862, %v12122_v59   ;;  %v12174_v11 = vpop.eup %12173 }
 0xe9b   : > { %v12176_v7 = vpop.eup %12175 }
 0xe9c   : > { %v12178_v36 = vpop.eup %12177 }
 0xe9d   : > { %7921 = vperm.xlu0 %11861, %v12124_v52   ;;  %v12180_v33 = vpop.eup %12179 }
 0xe9e   : > { %7926 = vperm.xlu1 %11862, %v12126_v55   ;;  %v12182_v23 = vpop.eup %12181 }
 0xea1   : > { %8091 = vperm.xlu0 %11861, %v12128_v5   ;;  %v11959_v5 = vld [vmem:[#allocation14 + $0x200] ss:$16 sps:$4 sm:$0xff]  }
 0xea2   : > { %8096 = vperm.xlu1 %11862, %v12130_v25  }
 0xea5   : > { %7931 = vperm.xlu0 %11861, %v12132_v3   ;;  %v11967_v3 = vld [vmem:[#allocation14 + $0x224] ss:$16 sps:$4 sm:$0xff]  }
 0xea6   : > { %7936 = vperm.xlu1 %11862, %v12134_v49  }
 0xea9   : > { %8101 = vperm.xlu0 %11861, %v12136_v56  }
 0xeaa   : > { %8106 = vperm.xlu1 %11862, %v12138_v30   ;;  %v7586_v30 = vld [vmem:[#allocation5 + $0x60] sm:$0xff] }
 0xead   : > { %7941 = vperm.xlu0 %11861, %v12140_v14   ;;  %v11968_v14 = vld [vmem:[#allocation14 + $0x228] ss:$16 sps:$4 sm:$0xff]  }
 0xeae   : > { %7946 = vperm.xlu1 %11862, %v12142_v34  }
 0xeb1   : > { %8111 = vperm.xlu0 %11861, %v12144_v9   ;;  %v11976_v9 = vld [vmem:[#allocation14 + $0x24c] ss:$16 sps:$4 sm:$0xff]  }
 0xeb2   : > { %8116 = vperm.xlu1 %11862, %v12146_v45  }
 0xeb5   : > { %7951 = vperm.xlu0 %11861, %v12148_v4   ;;  %v7747_v4 = vld [vmem:[#allocation5 + $0x88] sm:$0xff] }
 0xeb6   : > { %7956 = vperm.xlu1 %11862, %v12150_v41   ;;  %v11971_v41 = vld [vmem:[#allocation14 + $0x240] ss:$16 sps:$4 sm:$0xff]  }
 0xeb9   : > { %8121 = vperm.xlu0 %11861, %v12152_v2  }
 0xeba   : > { %8126 = vperm.xlu1 %11862, %v12154_v20   ;;  %v11979_v20 = vld [vmem:[#allocation14 + $0x264] ss:$16 sps:$4 sm:$0xff]  }
 0xebd   : > { %7961 = vperm.xlu0 %11861, %v12156_v22  }
 0xebe   : > { %7966 = vperm.xlu1 %11862, %v12158_v53  }
 0xec1   : > { %8131 = vperm.xlu0 %11861, %v12160_v43   ;;  %v7588_v43 = vld [vmem:[#allocation5 + $0xa0] sm:$0xff] }
 0xec2   : > { %8136 = vperm.xlu1 %11862, %v12162_v0   ;;  %v11980_v0 = vld [vmem:[#allocation14 + $0x268] ss:$16 sps:$4 sm:$0xff]  }
 0xec5   : > { %7971 = vperm.xlu0 %11861, %v12164_v27  }
 0xec6   : > { %7976 = vperm.xlu1 %11862, %v12166_v48   ;;  %v11988_v48 = vld [vmem:[#allocation14 + $0x28c] ss:$16 sps:$4 sm:$0xff]  }
 0xec9   : > { %8141 = vperm.xlu0 %11861, %v12168_v13  }
 0xeca   : > { %8146 = vperm.xlu1 %11862, %v12170_v18   ;;  %v7749_v18 = vld [vmem:[#allocation5 + $0xc8] sm:$0xff] }
 0xecd   : > { %7981 = vperm.xlu0 %11861, %v12172_v37   ;;  %v7750_v37 = vld [vmem:[#allocation5 + $0xe8] sm:$0xff] }
 0xece   : > { %7986 = vperm.xlu1 %11862, %v12174_v11   ;;  %v11983_v11 = vld [vmem:[#allocation14 + $0x280] ss:$16 sps:$4 sm:$0xff]  }
 0xed1   : > { %8151 = vperm.xlu0 %11861, %v12176_v7   ;;  %v11986_v7 = vld [vmem:[#allocation14 + $0x288] ss:$16 sps:$4 sm:$0xff]  }
 0xed2   : > { %8156 = vperm.xlu1 %11862, %v12178_v36  }
 0xed5   : > { %7991 = vperm.xlu0 %11861, %v12180_v33  }
 0xed6   : > { %7996 = vperm.xlu1 %11862, %v12182_v23   ;;  %v11991_v23 = vld [vmem:[#allocation14 + $0x2a4] ss:$16 sps:$4 sm:$0xff]  }
 0xed8   : > { %v7762_v47 = vpop.permute.xlu0 %7761 }
 0xed9   : > { %v7602_v62 = vpop.permute.xlu1 %7601  ;;  %v7839_v59 = vmul.f32 %v7762_v47, %v7743_v24  ;;  %v11994_v47 = vld [vmem:[#allocation14 + $0x2ac] ss:$16 sps:$4 sm:$0xff]  }
 0xeda   : > { %v7679_v32 = vmul.f32 %v7602_v62, %v7583_v1  ;;  %v7589_v1 = vld [vmem:[#allocation5 + $0xc0] sm:$0xff] }
 0xedc   : > { %v7767_v61 = vpop.permute.xlu0 %7766 }
 0xedd   : > { %v7840_v51 = vmul.f32 %v7767_v61, %v7744_v39  ;;  %v7607_v8 = vpop.permute.xlu1 %7606  ;;  %v11989_v61 = vld [vmem:[#allocation14 + $0x2a0] ss:$16 sps:$4 sm:$0xff]  }
 0xede   : > { %v7680_v52 = vmul.f32 %v7607_v8, %v7584_v58  ;;  %v7590_v58 = vld [vmem:[#allocation5 + $0xe0] sm:$0xff] }
 0xedf   : > { %v7855_v55 = vpack.c.bf16 %v7840_v51, %v7839_v59  ;;  %v11992_v59 = vld [vmem:[#allocation14 + $0x2a8] ss:$16 sps:$4 sm:$0xff]  }
 0xee0   : > { %v7695_v25 = vpack.c.bf16 %v7680_v52, %v7679_v32  ;;  %v7772_v44 = vpop.permute.xlu0 %7771  ;;  %v11997_v32 = vld [vmem:[#allocation14 + $0x2c4] ss:$16 sps:$4 sm:$0xff]   ;;  %v12000_v52 = vld [vmem:[#allocation14 + $0x2cc] ss:$16 sps:$4 sm:$0xff]  }
 0xee1   : > { %7863 = vst [vmem:[#allocation2 + $0x8] sm:$0xff] %v7855_v55  ;;  %v7841_v49 = vmul.f32 %v7772_v44, %v7745_v54  ;;  %v7777_v26 = vpop.permute.xlu1 %7776  ;;  %9023 = vmatprep.mubr.bf16.mxu0 %v7855_v55  ;;  %9249 = vmatprep.mubr.bf16.mxu1 %v7855_v55  ;;  %v11998_v44 = vld [vmem:[#allocation14 + $0x2c8] ss:$16 sps:$4 sm:$0xff]  }
 0xee2   : > { %7703 = vst [vmem:[#allocation2] sm:$0xff] %v7695_v25  ;;  %v7842_v56 = vmul.f32 %v7777_v26, %v7746_v12  ;;  %9024 = vmatmul.mubr.bf16.vlgmr.msra.gmra.mrb[0].mxu0 %v7695_v25  ;;  %9250 = vmatmul.mubr.bf16.vlgmr.msra.gmra.mrb[0].mxu1 %v7695_v25  ;;  %v11995_v25 = vld [vmem:[#allocation14 + $0x2c0] ss:$16 sps:$4 sm:$0xff]   ;;  %v12006_v26 = vld [vmem:[#allocation14 + $0x2ec] ss:$16 sps:$4 sm:$0xff]  }
 0xee3   : > { %9105 = vmatpush1.bf16.msra.mxu0 %v11959_v5  ;;  %9331 = vmatpush1.bf16.msra.mxu1 %v11962_v40  ;;  %v7751_v5 = vld [vmem:[#allocation5 + $0x108] sm:$0xff] }
 0xee4   : > { %v7856_v38 = vpack.c.bf16 %v7842_v56, %v7841_v49  ;;  %v7612_v34 = vpop.permute.xlu0 %7611  ;;  %9106 = vmatprep.subr.bf16.mxu0 %v11967_v3  ;;  %9332 = vmatprep.subr.bf16.mxu1 %v11970_v17  ;;  %v7752_v40 = vld [vmem:[#allocation5 + $0x128] sm:$0xff]  ;;  %v12003_v49 = vld [vmem:[#allocation14 + $0x2e4] ss:$16 sps:$4 sm:$0xff]  }
 0xee5   : > { %v7681_v31 = vmul.f32 %v7612_v34, %v7585_v6  ;;  %v7617_v45 = vpop.permute.xlu1 %7616  ;;  %v12004_v34 = vld [vmem:[#allocation14 + $0x2e8] ss:$16 sps:$4 sm:$0xff]  }
 0xee6   : > { %7864 = vst [vmem:[#allocation2 + $0x28] sm:$0xff] %v7856_v38  ;;  %v7682_v29 = vmul.f32 %v7617_v45, %v7586_v30  ;;  %9033 = vmatprep.mubr.bf16.mxu0 %v7856_v38  ;;  %9259 = vmatprep.mubr.bf16.mxu1 %v7856_v38  ;;  %v12001_v38 = vld [vmem:[#allocation14 + $0x2e0] ss:$16 sps:$4 sm:$0xff]   ;;  %v12012_v45 = vld [vmem:[#allocation14 + $0x30c] ss:$16 sps:$4 sm:$0xff]  }
 0xee7   : > { %9107 = vmatpush1.bf16.msra.mxu0 %v11965_v15  ;;  %9333 = vmatpush1.bf16.msra.mxu1 %v11968_v14  ;;  %v7591_v15 = vld [vmem:[#allocation5 + $0x100] sm:$0xff] }
 0xee8   : > { %v7696_v2 = vpack.c.bf16 %v7682_v29, %v7681_v31  ;;  %v7782_v42 = vpop.permute.xlu0 %7781  ;;  %9108 = vmatprep.subr.bf16.mxu0 %v11973_v63  ;;  %9334 = vmatprep.subr.bf16.mxu1 %v11976_v9  ;;  %v7592_v14 = vld [vmem:[#allocation5 + $0x120] sm:$0xff] }
 0xee9   : > { %v7843_v22 = vmul.f32 %v7782_v42, %v7747_v4  ;;  %v7787_v19 = vpop.permute.xlu1 %7786  ;;  %v12009_v31 = vld [vmem:[#allocation14 + $0x304] ss:$16 sps:$4 sm:$0xff]   ;;  %v12010_v42 = vld [vmem:[#allocation14 + $0x308] ss:$16 sps:$4 sm:$0xff]  }
 0xeea   : > { %7704 = vst [vmem:[#allocation2 + $0x20] sm:$0xff] %v7696_v2  ;;  %v7844_v53 = vmul.f32 %v7787_v19, %v7748_v28  ;;  %9034 = vmatmul.mubr.bf16.gmra.mrb[4].mxu0 %v7696_v2  ;;  %9260 = vmatmul.mubr.bf16.gmra.mrb[4].mxu1 %v7696_v2  ;;  %v12007_v2 = vld [vmem:[#allocation14 + $0x300] ss:$16 sps:$4 sm:$0xff]   ;;  %v12018_v19 = vld [vmem:[#allocation14 + $0x32c] ss:$16 sps:$4 sm:$0xff]  }
 0xeeb   : > { %9109 = vmatpush1.bf16.msra.mxu0 %v11971_v41  ;;  %9335 = vmatpush1.bf16.msra.mxu1 %v11974_v50  ;;  %v7753_v41 = vld [vmem:[#allocation5 + $0x148] sm:$0xff] }
 0xeec   : > { %v7857_v57 = vpack.c.bf16 %v7844_v53, %v7843_v22  ;;  %v7622_v27 = vpop.permute.xlu0 %7621  ;;  %9110 = vmatprep.subr.bf16.mxu0 %v11979_v20  ;;  %9336 = vmatprep.subr.bf16.mxu1 %v11982_v46  ;;  %v7754_v50 = vld [vmem:[#allocation5 + $0x168] sm:$0xff]  ;;  %v12015_v22 = vld [vmem:[#allocation14 + $0x324] ss:$16 sps:$4 sm:$0xff]  }
 0xeed   : > { %v7683_v21 = vmul.f32 %v7622_v27, %v7587_v16  ;;  %v7627_v13 = vpop.permute.xlu1 %7626  ;;  %v12016_v27 = vld [vmem:[#allocation14 + $0x328] ss:$16 sps:$4 sm:$0xff]  }
 0xeee   : > { %7865 = vst [vmem:[#allocation2 + $0x48] sm:$0xff] %v7857_v57  ;;  %v7684_v35 = vmul.f32 %v7627_v13, %v7588_v43  ;;  %9043 = vmatprep.mubr.bf16.mxu0 %v7857_v57  ;;  %9269 = vmatprep.mubr.bf16.mxu1 %v7857_v57  ;;  %v12013_v57 = vld [vmem:[#allocation14 + $0x320] ss:$16 sps:$4 sm:$0xff]   ;;  %v12024_v13 = vld [vmem:[#allocation14 + $0x34c] ss:$16 sps:$4 sm:$0xff]  }
 0xeef   : > { %9111 = vmatpush1.bf16.msra.mxu0 %v11977_v10  ;;  %9337 = vmatpush1.bf16.msra.mxu1 %v11980_v0  ;;  %v7593_v10 = vld [vmem:[#allocation5 + $0x140] sm:$0xff] }
 0xef0   : > { %v7697_v36 = vpack.c.bf16 %v7684_v35, %v7683_v21  ;;  %v7792_v33 = vpop.permute.xlu0 %7791  ;;  %9112 = vmatprep.subr.bf16.mxu0 %v11985_v60  ;;  %9338 = vmatprep.subr.bf16.mxu1 %v11988_v48  ;;  %v7594_v0 = vld [vmem:[#allocation5 + $0x160] sm:$0xff] }
 0xef1   : > { %v7845_v62 = vmul.f32 %v7792_v33, %v7749_v18  ;;  %v7797_v24 = vpop.permute.xlu1 %7796  ;;  %v12021_v21 = vld [vmem:[#allocation14 + $0x344] ss:$16 sps:$4 sm:$0xff]   ;;  %v12022_v33 = vld [vmem:[#allocation14 + $0x348] ss:$16 sps:$4 sm:$0xff]  }
 0xef2   : > { %7705 = vst [vmem:[#allocation2 + $0x40] sm:$0xff] %v7697_v36  ;;  %v7846_v39 = vmul.f32 %v7797_v24, %v7750_v37  ;;  %9044 = vmatmul.mubr.bf16.gmra.mrb[8].mxu0 %v7697_v36  ;;  %9270 = vmatmul.mubr.bf16.gmra.mrb[8].mxu1 %v7697_v36  ;;  %v12019_v36 = vld [vmem:[#allocation14 + $0x340] ss:$16 sps:$4 sm:$0xff]   ;;  %v12030_v24 = vld [vmem:[#allocation14 + $0x36c] ss:$16 sps:$4 sm:$0xff]  }
 0xef3   : > { %9113 = vmatpush1.bf16.msra.mxu0 %v11983_v11  ;;  %9339 = vmatpush1.bf16.msra.mxu1 %v11986_v7  ;;  %v7755_v11 = vld [vmem:[#allocation5 + $0x188] sm:$0xff] }
 0xef4   : > { %v7858_v51 = vpack.c.bf16 %v7846_v39, %v7845_v62  ;;  %v7632_v8 = vpop.permute.xlu0 %7631  ;;  %9114 = vmatprep.subr.bf16.mxu0 %v11991_v23  ;;  %9340 = vmatprep.subr.bf16.mxu1 %v11994_v47  ;;  %v7756_v7 = vld [vmem:[#allocation5 + $0x1a8] sm:$0xff]  ;;  %v12027_v62 = vld [vmem:[#allocation14 + $0x364] ss:$16 sps:$4 sm:$0xff]  }
 0xef5   : > { %v7685_v54 = vmul.f32 %v7632_v8, %v7589_v1  ;;  %v7637_v55 = vpop.permute.xlu1 %7636  ;;  %v12028_v8 = vld [vmem:[#allocation14 + $0x368] ss:$16 sps:$4 sm:$0xff]  }
 0xef6   : > { %7866 = vst [vmem:[#allocation2 + $0x68] sm:$0xff] %v7858_v51  ;;  %v7686_v12 = vmul.f32 %v7637_v55, %v7590_v58  ;;  %9053 = vmatprep.mubr.bf16.mxu0 %v7858_v51  ;;  %9279 = vmatprep.mubr.bf16.mxu1 %v7858_v51  ;;  %v12025_v51 = vld [vmem:[#allocation14 + $0x360] ss:$16 sps:$4 sm:$0xff]   ;;  %v12036_v55 = vld [vmem:[#allocation14 + $0x38c] ss:$16 sps:$4 sm:$0xff]  }
 0xef7   : > { %9115 = vmatpush1.bf16.msra.mxu0 %v11989_v61  ;;  %9341 = vmatpush1.bf16.msra.mxu1 %v11992_v59  ;;  %v7595_v61 = vld [vmem:[#allocation5 + $0x180] sm:$0xff] }
 0xef8   : > { %v7698_v3 = vpack.c.bf16 %v7686_v12, %v7685_v54  ;;  %v7802_v17 = vpop.permute.xlu0 %7801  ;;  %9116 = vmatprep.subr.bf16.mxu0 %v11997_v32  ;;  %9342 = vmatprep.subr.bf16.mxu1 %v12000_v52  ;;  %v7596_v59 = vld [vmem:[#allocation5 + $0x1a0] sm:$0xff] }
 0xef9   : > { %v7847_v56 = vmul.f32 %v7802_v17, %v7751_v5  ;;  %v7807_v6 = vpop.permute.xlu1 %7806  ;;  %v12033_v54 = vld [vmem:[#allocation14 + $0x384] ss:$16 sps:$4 sm:$0xff]   ;;  %v12034_v17 = vld [vmem:[#allocation14 + $0x388] ss:$16 sps:$4 sm:$0xff]  }
 0xefa   : > { %7706 = vst [vmem:[#allocation2 + $0x60] sm:$0xff] %v7698_v3  ;;  %v7848_v30 = vmul.f32 %v7807_v6, %v7752_v40  ;;  %9054 = vmatmul.mubr.bf16.gmra.mrb[12].mxu0 %v7698_v3  ;;  %9280 = vmatmul.mubr.bf16.gmra.mrb[12].mxu1 %v7698_v3  ;;  %v12031_v3 = vld [vmem:[#allocation14 + $0x380] ss:$16 sps:$4 sm:$0xff]   ;;  %v12042_v6 = vld [vmem:[#allocation14 + $0x3ac] ss:$16 sps:$4 sm:$0xff]  }
 0xefb   : > { %9117 = vmatpush1.bf16.msra.mxu0 %v11995_v25  ;;  %9343 = vmatpush1.bf16.msra.mxu1 %v11998_v44  ;;  %v7757_v25 = vld [vmem:[#allocation5 + $0x1c8] sm:$0xff] }
 0xefc   : > { %v7859_v63 = vpack.c.bf16 %v7848_v30, %v7847_v56  ;;  %v7642_v9 = vpop.permute.xlu0 %7641  ;;  %9118 = vmatprep.subr.bf16.mxu0 %v12003_v49  ;;  %9344 = vmatprep.subr.bf16.mxu1 %v12006_v26  ;;  %v7758_v44 = vld [vmem:[#allocation5 + $0x1e8] sm:$0xff]  ;;  %v12039_v56 = vld [vmem:[#allocation14 + $0x3a4] ss:$16 sps:$4 sm:$0xff]  }
 0xefd   : > { %v7687_v29 = vmul.f32 %v7642_v9, %v7591_v15  ;;  %v7647_v4 = vpop.permute.xlu1 %7646  ;;  %v12040_v9 = vld [vmem:[#allocation14 + $0x3a8] ss:$16 sps:$4 sm:$0xff]  }
 0xefe   : > { %7867 = vst [vmem:[#allocation2 + $0x88] sm:$0xff] %v7859_v63  ;;  %v7688_v28 = vmul.f32 %v7647_v4, %v7592_v14  ;;  %9063 = vmatprep.mubr.bf16.mxu0 %v7859_v63  ;;  %9289 = vmatprep.mubr.bf16.mxu1 %v7859_v63  ;;  %v12037_v63 = vld [vmem:[#allocation14 + $0x3a0] ss:$16 sps:$4 sm:$0xff]   ;;  %v12048_v4 = vld [vmem:[#allocation14 + $0x3cc] ss:$16 sps:$4 sm:$0xff]  }
 0xeff   : > { %9119 = vmatpush1.bf16.msra.mxu0 %v12001_v38  ;;  %9345 = vmatpush1.bf16.msra.mxu1 %v12004_v34  ;;  %v7597_v38 = vld [vmem:[#allocation5 + $0x1c0] sm:$0xff] }
 0xf00   : > { %v7699_v20 = vpack.c.bf16 %v7688_v28, %v7687_v29  ;;  %v7812_v46 = vpop.permute.xlu0 %7811  ;;  %9120 = vmatprep.subr.bf16.mxu0 %v12009_v31  ;;  %9346 = vmatprep.subr.bf16.mxu1 %v12012_v45  ;;  %v7598_v34 = vld [vmem:[#allocation5 + $0x1e0] sm:$0xff] }
 0xf01   : > { %v7849_v53 = vmul.f32 %v7812_v46, %v7753_v41  ;;  %v7817_v16 = vpop.permute.xlu1 %7816  ;;  %v12045_v29 = vld [vmem:[#allocation14 + $0x3c4] ss:$16 sps:$4 sm:$0xff]   ;;  %v12046_v46 = vld [vmem:[#allocation14 + $0x3c8] ss:$16 sps:$4 sm:$0xff]  }
 0xf02   : > { %7707 = vst [vmem:[#allocation2 + $0x80] sm:$0xff] %v7699_v20  ;;  %v7850_v43 = vmul.f32 %v7817_v16, %v7754_v50  ;;  %9064 = vmatmul.mubr.bf16.gmra.mrb[16].mxu0 %v7699_v20  ;;  %9290 = vmatmul.mubr.bf16.gmra.mrb[16].mxu1 %v7699_v20  ;;  %v12043_v20 = vld [vmem:[#allocation14 + $0x3c0] ss:$16 sps:$4 sm:$0xff]   ;;  %v12054_v16 = vld [vmem:[#allocation14 + $0x3ec] ss:$16 sps:$4 sm:$0xff]  }
 0xf03   : > { %9121 = vmatpush1.bf16.msra.mxu0 %v12007_v2  ;;  %9347 = vmatpush1.bf16.msra.mxu1 %v12010_v42  ;;  %v8063_v2 = vld [vmem:[#allocation5 + $0x18] sm:$0xff] }
 0xf04   : > { %v7860_v60 = vpack.c.bf16 %v7850_v43, %v7849_v53  ;;  %v7652_v48 = vpop.permute.xlu0 %7651  ;;  %9122 = vmatprep.subr.bf16.mxu0 %v12015_v22  ;;  %9348 = vmatprep.subr.bf16.mxu1 %v12018_v19  ;;  %v8064_v42 = vld [vmem:[#allocation5 + $0x38] sm:$0xff]  ;;  %v12051_v53 = vld [vmem:[#allocation14 + $0x3e4] ss:$16 sps:$4 sm:$0xff]  }
 0xf05   : > { %v7689_v35 = vmul.f32 %v7652_v48, %v7593_v10  ;;  %v7657_v18 = vpop.permute.xlu1 %7656  ;;  %v12052_v48 = vld [vmem:[#allocation14 + $0x3e8] ss:$16 sps:$4 sm:$0xff]  }
 0xf06   : > { %7868 = vst [vmem:[#allocation2 + $0xa8] sm:$0xff] %v7860_v60  ;;  %v7690_v37 = vmul.f32 %v7657_v18, %v7594_v0  ;;  %9073 = vmatprep.mubr.bf16.mxu0 %v7860_v60  ;;  %9299 = vmatprep.mubr.bf16.mxu1 %v7860_v60  ;;  %v12049_v60 = vld [vmem:[#allocation14 + $0x3e0] ss:$16 sps:$4 sm:$0xff]  }
 0xf07   : > { %9123 = vmatpush1.bf16.msra.mxu0 %v12013_v57  ;;  %9349 = vmatpush1.bf16.msra.mxu1 %v12016_v27  ;;  %v7903_v57 = vld [vmem:[#allocation5 + $0x10] sm:$0xff] }
 0xf08   : > { %v7700_v23 = vpack.c.bf16 %v7690_v37, %v7689_v35  ;;  %v7822_v47 = vpop.permute.xlu0 %7821  ;;  %9124 = vmatprep.subr.bf16.mxu0 %v12021_v21  ;;  %9350 = vmatprep.subr.bf16.mxu1 %v12024_v13  ;;  %v7904_v27 = vld [vmem:[#allocation5 + $0x30] sm:$0xff] }
 0xf09   : > { %v7851_v39 = vmul.f32 %v7822_v47, %v7755_v11  ;;  %v7827_v1 = vpop.permute.xlu1 %7826  ;;  %v8065_v11 = vld [vmem:[#allocation5 + $0x58] sm:$0xff] }
 0xf0a   : > { %7708 = vst [vmem:[#allocation2 + $0xa0] sm:$0xff] %v7700_v23  ;;  %v7852_v58 = vmul.f32 %v7827_v1, %v7756_v7  ;;  %9074 = vmatmul.mubr.bf16.gmra.mrb[20].mxu0 %v7700_v23  ;;  %9300 = vmatmul.mubr.bf16.gmra.mrb[20].mxu1 %v7700_v23  ;;  %v8066_v7 = vld [vmem:[#allocation5 + $0x78] sm:$0xff] }
 0xf0b   : > { %9125 = vmatpush1.bf16.msra.mxu0 %v12019_v36  ;;  %9351 = vmatpush1.bf16.msra.mxu1 %v12022_v33 }
 0xf0c   : > { %v7861_v32 = vpack.c.bf16 %v7852_v58, %v7851_v39  ;;  %v7662_v52 = vpop.permute.xlu0 %7661  ;;  %9126 = vmatprep.subr.bf16.mxu0 %v12027_v62  ;;  %9352 = vmatprep.subr.bf16.mxu1 %v12030_v24  ;;  %v7905_v24 = vld [vmem:[#allocation5 + $0x50] sm:$0xff] }
 0xf0d   : > { %v7691_v12 = vmul.f32 %v7662_v52, %v7595_v61  ;;  %v7667_v5 = vpop.permute.xlu1 %7666  ;;  %v7906_v39 = vld [vmem:[#allocation5 + $0x70] sm:$0xff] }
 0xf0e   : > { %7869 = vst [vmem:[#allocation2 + $0xc8] sm:$0xff] %v7861_v32  ;;  %v7692_v40 = vmul.f32 %v7667_v5, %v7596_v59  ;;  %9083 = vmatprep.mubr.bf16.mxu0 %v7861_v32  ;;  %9309 = vmatprep.mubr.bf16.mxu1 %v7861_v32  ;;  %v8068_v32 = vld [vmem:[#allocation5 + $0xb8] sm:$0xff] }
 0xf0f   : > { %9127 = vmatpush1.bf16.msra.mxu0 %v12025_v51  ;;  %9353 = vmatpush1.bf16.msra.mxu1 %v12028_v8  ;;  %v8067_v8 = vld [vmem:[#allocation5 + $0x98] sm:$0xff] }
 0xf10   : > { %v7701_v49 = vpack.c.bf16 %v7692_v40, %v7691_v12  ;;  %v7832_v26 = vpop.permute.xlu0 %7831  ;;  %9128 = vmatprep.subr.bf16.mxu0 %v12033_v54  ;;  %9354 = vmatprep.subr.bf16.mxu1 %v12036_v55  ;;  %v7907_v40 = vld [vmem:[#allocation5 + $0x90] sm:$0xff] }
 0xf11   : > { %v7853_v30 = vmul.f32 %v7832_v26, %v7757_v25  ;;  %v7837_v15 = vpop.permute.xlu1 %7836  ;;  %v7908_v25 = vld [vmem:[#allocation5 + $0xb0] sm:$0xff] }
 0xf12   : > { %7709 = vst [vmem:[#allocation2 + $0xc0] sm:$0xff] %v7701_v49  ;;  %v7854_v14 = vmul.f32 %v7837_v15, %v7758_v44  ;;  %9084 = vmatmul.mubr.bf16.gmra.mrb[24].mxu0 %v7701_v49  ;;  %9310 = vmatmul.mubr.bf16.gmra.mrb[24].mxu1 %v7701_v49 }
 0xf13   : > { %9129 = vmatpush1.bf16.msra.mxu0 %v12031_v3  ;;  %9355 = vmatpush1.bf16.msra.mxu1 %v12034_v17 }
 0xf14   : > { %v7862_v31 = vpack.c.bf16 %v7854_v14, %v7853_v30  ;;  %v7672_v45 = vpop.permute.xlu0 %7671  ;;  %9130 = vmatprep.subr.bf16.mxu0 %v12039_v56  ;;  %9356 = vmatprep.subr.bf16.mxu1 %v12042_v6  ;;  %v8069_v56 = vld [vmem:[#allocation5 + $0xd8] sm:$0xff] }
 0xf15   : > { %v7693_v28 = vmul.f32 %v7672_v45, %v7597_v38  ;;  %v7677_v41 = vpop.permute.xlu1 %7676  ;;  %v8070_v6 = vld [vmem:[#allocation5 + $0xf8] sm:$0xff] }
 0xf16   : > { %7870 = vst [vmem:[#allocation2 + $0xe8] sm:$0xff] %v7862_v31  ;;  %v7694_v50 = vmul.f32 %v7677_v41, %v7598_v34  ;;  %9093 = vmatprep.mubr.bf16.mxu0 %v7862_v31  ;;  %9319 = vmatprep.mubr.bf16.mxu1 %v7862_v31  ;;  %v8071_v41 = vld [vmem:[#allocation5 + $0x118] sm:$0xff] }
 0xf17   : > { %9131 = vmatpush1.bf16.msra.mxu0 %v12037_v63  ;;  %9357 = vmatpush1.bf16.msra.mxu1 %v12040_v9  ;;  %v7909_v63 = vld [vmem:[#allocation5 + $0xd0] sm:$0xff] }
 0xf18   : > { %v7702_v22 = vpack.c.bf16 %v7694_v50, %v7693_v28  ;;  %v8082_v19 = vpop.permute.xlu0 %8081  ;;  %9132 = vmatprep.subr.bf16.mxu0 %v12045_v29  ;;  %9358 = vmatprep.subr.bf16.mxu1 %v12048_v4  ;;  %v7910_v9 = vld [vmem:[#allocation5 + $0xf0] sm:$0xff]  ;;  %v8072_v50 = vld [vmem:[#allocation5 + $0x138] sm:$0xff] }
 0xf19   : > { %v8159_v43 = vmul.f32 %v8082_v19, %v8063_v2  ;;  %v8087_v10 = vpop.permute.xlu1 %8086  ;;  %v7911_v19 = vld [vmem:[#allocation5 + $0x110] sm:$0xff] }
 0xf1a   : > { %7710 = vst [vmem:[#allocation2 + $0xe0] sm:$0xff] %v7702_v22  ;;  %v8160_v0 = vmul.f32 %v8087_v10, %v8064_v42  ;;  %9094 = vmatmul.mubr.bf16.gmra.mrb[28].mxu0 %v7702_v22  ;;  %9320 = vmatmul.mubr.bf16.gmra.mrb[28].mxu1 %v7702_v22 }
 0xf1b   : > { %9133 = vmatpush1.bf16.msra.mxu0 %v12043_v20  ;;  %9359 = vmatpush1.bf16.msra.mxu1 %v12046_v46 }
 0xf1c   : > { %v8175_v21 = vpack.c.bf16 %v8160_v0, %v8159_v43  ;;  %v7922_v13 = vpop.permute.xlu0 %7921  ;;  %9134 = vmatprep.subr.bf16.mxu0 %v12051_v53  ;;  %9360 = vmatprep.subr.bf16.mxu1 %v12054_v16  ;;  %v7912_v53 = vld [vmem:[#allocation5 + $0x130] sm:$0xff] }
 0xf1d   : > { %v7999_v35 = vmul.f32 %v7922_v13, %v7903_v57  ;;  %v7927_v18 = vpop.permute.xlu1 %7926 }
 0xf1e   : > { %8183 = vst [vmem:[#allocation2 + $0x18] sm:$0xff] %v8175_v21  ;;  %v8000_v37 = vmul.f32 %v7927_v18, %v7904_v27  ;;  %9136 = vmatprep.mubr.bf16.mxu0 %v8175_v21  ;;  %9362 = vmatprep.mubr.bf16.mxu1 %v8175_v21  ;;  %v8073_v27 = vld [vmem:[#allocation5 + $0x158] sm:$0xff] }
 0xf1f   : > { %9135 = vmatpush1.bf16.msra.mxu0 %v12049_v60  ;;  %9361 = vmatpush1.bf16.msra.mxu1 %v12052_v48  ;;  %v8074_v60 = vld [vmem:[#allocation5 + $0x178] sm:$0xff] }
 0xf20   : > { %v8015_v36 = vpack.c.bf16 %v8000_v37, %v7999_v35  ;;  %v8092_v33 = vpop.permute.xlu0 %8091  ;;  %v7913_v37 = vld [vmem:[#allocation5 + $0x150] sm:$0xff] }
 0xf21   : > { %v8161_v23 = vmul.f32 %v8092_v33, %v8065_v11  ;;  %v8097_v47 = vpop.permute.xlu1 %8096  ;;  %v7914_v11 = vld [vmem:[#allocation5 + $0x170] sm:$0xff] }
 0xf22   : > { %8023 = vst [vmem:[#allocation2 + $0x10] sm:$0xff] %v8015_v36  ;;  %v8162_v62 = vmul.f32 %v8097_v47, %v8066_v7  ;;  %9137 = vmatmul.mubr.bf16.vlgmr.msra.gmra.mrb[0].mxu0 %v8015_v36  ;;  %9363 = vmatmul.mubr.bf16.vlgmr.msra.gmra.mrb[0].mxu1 %v8015_v36 }
 0xf24   : > { %v8176_v1 = vpack.c.bf16 %v8162_v62, %v8161_v23  ;;  %v7932_v58 = vpop.permute.xlu0 %7931  ;;  %v8075_v62 = vld [vmem:[#allocation5 + $0x198] sm:$0xff] }
 0xf25   : > { %v8001_v61 = vmul.f32 %v7932_v58, %v7905_v24  ;;  %v7937_v59 = vpop.permute.xlu1 %7936  ;;  %v8076_v24 = vld [vmem:[#allocation5 + $0x1b8] sm:$0xff] }
 0xf26   : > { %8184 = vst [vmem:[#allocation2 + $0x38] sm:$0xff] %v8176_v1  ;;  %v8002_v51 = vmul.f32 %v7937_v59, %v7906_v39  ;;  %9146 = vmatprep.mubr.bf16.mxu0 %v8176_v1  ;;  %9372 = vmatprep.mubr.bf16.mxu1 %v8176_v1 }
 0xf28   : > { %v8016_v52 = vpack.c.bf16 %v8002_v51, %v8001_v61  ;;  %v8102_v54 = vpop.permute.xlu0 %8101  ;;  %v7915_v51 = vld [vmem:[#allocation5 + $0x190] sm:$0xff] }
 0xf29   : > { %v8163_v55 = vmul.f32 %v8102_v54, %v8067_v8  ;;  %v8107_v12 = vpop.permute.xlu1 %8106  ;;  %v7916_v8 = vld [vmem:[#allocation5 + $0x1b0] sm:$0xff] }
 0xf2a   : > { %8024 = vst [vmem:[#allocation2 + $0x30] sm:$0xff] %v8016_v52  ;;  %v8164_v5 = vmul.f32 %v8107_v12, %v8068_v32  ;;  %9147 = vmatmul.mubr.bf16.gmra.mrb[4].mxu0 %v8016_v52  ;;  %9373 = vmatmul.mubr.bf16.gmra.mrb[4].mxu1 %v8016_v52 }
 0xf2c   : > { %v8177_v44 = vpack.c.bf16 %v8164_v5, %v8163_v55  ;;  %v7942_v3 = vpop.permute.xlu0 %7941  ;;  %v8077_v5 = vld [vmem:[#allocation5 + $0x1d8] sm:$0xff] }
 0xf2d   : > { %v8003_v17 = vmul.f32 %v7942_v3, %v7907_v40  ;;  %v7947_v49 = vpop.permute.xlu1 %7946  ;;  %v8078_v40 = vld [vmem:[#allocation5 + $0x1f8] sm:$0xff] }
 0xf2e   : > { %8185 = vst [vmem:[#allocation2 + $0x58] sm:$0xff] %v8177_v44  ;;  %v8004_v26 = vmul.f32 %v7947_v49, %v7908_v25  ;;  %9156 = vmatprep.mubr.bf16.mxu0 %v8177_v44  ;;  %9382 = vmatprep.mubr.bf16.mxu1 %v8177_v44 }
 0xf30   : > { %v8017_v30 = vpack.c.bf16 %v8004_v26, %v8003_v17  ;;  %v8112_v15 = vpop.permute.xlu0 %8111  ;;  %v7917_v26 = vld [vmem:[#allocation5 + $0x1d0] sm:$0xff] }
 0xf31   : > { %v8165_v14 = vmul.f32 %v8112_v15, %v8069_v56  ;;  %v8117_v38 = vpop.permute.xlu1 %8116  ;;  %v7918_v56 = vld [vmem:[#allocation5 + $0x1f0] sm:$0xff] }
 0xf32   : > { %8025 = vst [vmem:[#allocation2 + $0x50] sm:$0xff] %v8017_v30  ;;  %v8166_v34 = vmul.f32 %v8117_v38, %v8070_v6  ;;  %9157 = vmatmul.mubr.bf16.gmra.mrb[8].mxu0 %v8017_v30  ;;  %9383 = vmatmul.mubr.bf16.gmra.mrb[8].mxu1 %v8017_v30 }
 0xf34   : > { %v8178_v31 = vpack.c.bf16 %v8166_v34, %v8165_v14  ;;  %v7952_v45 = vpop.permute.xlu0 %7951 }
 0xf35   : > { %v8005_v29 = vmul.f32 %v7952_v45, %v7909_v63  ;;  %v7957_v4 = vpop.permute.xlu1 %7956 }
 0xf36   : > { %8186 = vst [vmem:[#allocation2 + $0x78] sm:$0xff] %v8178_v31  ;;  %v8006_v28 = vmul.f32 %v7957_v4, %v7910_v9  ;;  %9166 = vmatprep.mubr.bf16.mxu0 %v8178_v31  ;;  %9392 = vmatprep.mubr.bf16.mxu1 %v8178_v31 }
 0xf38   : > { %v8018_v2 = vpack.c.bf16 %v8006_v28, %v8005_v29  ;;  %v8122_v42 = vpop.permute.xlu0 %8121 }
 0xf39   : > { %v8167_v20 = vmul.f32 %v8122_v42, %v8071_v41  ;;  %v8127_v46 = vpop.permute.xlu1 %8126 }
 0xf3a   : > { %8026 = vst [vmem:[#allocation2 + $0x70] sm:$0xff] %v8018_v2  ;;  %v8168_v22 = vmul.f32 %v8127_v46, %v8072_v50  ;;  %9167 = vmatmul.mubr.bf16.gmra.mrb[12].mxu0 %v8018_v2  ;;  %9393 = vmatmul.mubr.bf16.gmra.mrb[12].mxu1 %v8018_v2 }
 0xf3c   : > { %v8179_v16 = vpack.c.bf16 %v8168_v22, %v8167_v20  ;;  %v7962_v43 = vpop.permute.xlu0 %7961 }
 0xf3d   : > { %v8007_v10 = vmul.f32 %v7962_v43, %v7911_v19  ;;  %v7967_v0 = vpop.permute.xlu1 %7966 }
 0xf3e   : > { %8187 = vst [vmem:[#allocation2 + $0x98] sm:$0xff] %v8179_v16  ;;  %v8008_v57 = vmul.f32 %v7967_v0, %v7912_v53  ;;  %9176 = vmatprep.mubr.bf16.mxu0 %v8179_v16  ;;  %9402 = vmatprep.mubr.bf16.mxu1 %v8179_v16 }
 0xf40   : > { %v8019_v48 = vpack.c.bf16 %v8008_v57, %v8007_v10  ;;  %v8132_v21 = vpop.permute.xlu0 %8131 }
 0xf41   : > { %v8169_v13 = vmul.f32 %v8132_v21, %v8073_v27  ;;  %v8137_v35 = vpop.permute.xlu1 %8136 }
 0xf42   : > { %8027 = vst [vmem:[#allocation2 + $0x90] sm:$0xff] %v8019_v48  ;;  %v8170_v18 = vmul.f32 %v8137_v35, %v8074_v60  ;;  %9177 = vmatmul.mubr.bf16.gmra.mrb[16].mxu0 %v8019_v48  ;;  %9403 = vmatmul.mubr.bf16.gmra.mrb[16].mxu1 %v8019_v48 }
 0xf44   : > { %v8180_v7 = vpack.c.bf16 %v8170_v18, %v8169_v13  ;;  %v7972_v36 = vpop.permute.xlu0 %7971 }
 0xf45   : > { %v8009_v33 = vmul.f32 %v7972_v36, %v7913_v37  ;;  %v7977_v23 = vpop.permute.xlu1 %7976 }
 0xf46   : > { %8188 = vst [vmem:[#allocation2 + $0xb8] sm:$0xff] %v8180_v7  ;;  %v8010_v47 = vmul.f32 %v7977_v23, %v7914_v11  ;;  %9186 = vmatprep.mubr.bf16.mxu0 %v8180_v7  ;;  %9412 = vmatprep.mubr.bf16.mxu1 %v8180_v7 }
 0xf48   : > { %v8020_v39 = vpack.c.bf16 %v8010_v47, %v8009_v33  ;;  %v8142_v1 = vpop.permute.xlu0 %8141 }
 0xf49   : > { %v8171_v58 = vmul.f32 %v8142_v1, %v8075_v62  ;;  %v8147_v61 = vpop.permute.xlu1 %8146 }
 0xf4a   : > { %8028 = vst [vmem:[#allocation2 + $0xb0] sm:$0xff] %v8020_v39  ;;  %v8172_v59 = vmul.f32 %v8147_v61, %v8076_v24  ;;  %9187 = vmatmul.mubr.bf16.gmra.mrb[20].mxu0 %v8020_v39  ;;  %9413 = vmatmul.mubr.bf16.gmra.mrb[20].mxu1 %v8020_v39 }
 0xf4c   : > { %v8181_v32 = vpack.c.bf16 %v8172_v59, %v8171_v58  ;;  %v7982_v52 = vpop.permute.xlu0 %7981 }
 0xf4d   : > { %v8011_v54 = vmul.f32 %v7982_v52, %v7915_v51  ;;  %v7987_v55 = vpop.permute.xlu1 %7986 }
 0xf4e   : > { %8189 = vst [vmem:[#allocation2 + $0xd8] sm:$0xff] %v8181_v32  ;;  %v8012_v12 = vmul.f32 %v7987_v55, %v7916_v8  ;;  %9196 = vmatprep.mubr.bf16.mxu0 %v8181_v32  ;;  %9422 = vmatprep.mubr.bf16.mxu1 %v8181_v32 }
 0xf50   : > { %v8021_v25 = vpack.c.bf16 %v8012_v12, %v8011_v54  ;;  %v8152_v44 = vpop.permute.xlu0 %8151 }
 0xf51   : > { %v8173_v3 = vmul.f32 %v8152_v44, %v8077_v5  ;;  %v8157_v17 = vpop.permute.xlu1 %8156 }
 0xf52   : > { %8029 = vst [vmem:[#allocation2 + $0xd0] sm:$0xff] %v8021_v25  ;;  %v8174_v49 = vmul.f32 %v8157_v17, %v8078_v40  ;;  %9197 = vmatmul.mubr.bf16.gmra.mrb[24].mxu0 %v8021_v25  ;;  %9423 = vmatmul.mubr.bf16.gmra.mrb[24].mxu1 %v8021_v25 }
 0xf54   : > { %v8182_v6 = vpack.c.bf16 %v8174_v49, %v8173_v3  ;;  %v7992_v30 = vpop.permute.xlu0 %7991 }
 0xf55   : > { %v8013_v15 = vmul.f32 %v7992_v30, %v7917_v26  ;;  %v7997_v14 = vpop.permute.xlu1 %7996 }
 0xf56   : > { %8190 = vst [vmem:[#allocation2 + $0xf8] sm:$0xff] %v8182_v6  ;;  %v8014_v38 = vmul.f32 %v7997_v14, %v7918_v56  ;;  %9206 = vmatprep.mubr.bf16.mxu0 %v8182_v6  ;;  %9432 = vmatprep.mubr.bf16.mxu1 %v8182_v6 }
 0xf58   : > { %v8022_v34 = vpack.c.bf16 %v8014_v38, %v8013_v15 }
 0xf5a   : > { %8030 = vst [vmem:[#allocation2 + $0xf0] sm:$0xff] %v8022_v34  ;;  %9207 = vmatmul.mubr.bf16.gmra.mrb[28].mxu0 %v8022_v34  ;;  %9433 = vmatmul.mubr.bf16.gmra.mrb[28].mxu1 %v8022_v34 }
 0xff5   : > { %v9138_v63 = vpop.f32.mrb[0].mxu0  ;;  %v9364_v9 = vpop.f32.mrb[0].mxu1 }
 0xff6   : > { %9443 = vst [vmem:[%s12828_s30] sm:$0xff] %v9138_v63  ;;  %9445 = vst [vmem:[%s12828_s30 + $0x10] sm:$0xff] %v9364_v9  ;;  %v9140_v31 = vpop.f32.mrb[1].mxu0  ;;  %v9366_v45 = vpop.f32.mrb[1].mxu1 }
 0xff7   : > { %9444 = vst [vmem:[%s12828_s30 + $0x8] sm:$0xff] %v9140_v31  ;;  %9446 = vst [vmem:[%s12828_s30 + $0x18] sm:$0xff] %v9366_v45  ;;  %v9142_v29 = vpop.f32.mrb[2].mxu0  ;;  %v9368_v4 = vpop.f32.mrb[2].mxu1 }
 0xff8   : > { %9447 = vst [vmem:[%s12828_s30 + $0x20] sm:$0xff] %v9142_v29  ;;  %9449 = vst [vmem:[%s12828_s30 + $0x30] sm:$0xff] %v9368_v4  ;;  %v9144_v28 = vpop.f32.mrb[3].mxu0  ;;  %v9370_v41 = vpop.f32.mrb[3].mxu1 }
 0xff9   : > { %9448 = vst [vmem:[%s12828_s30 + $0x28] sm:$0xff] %v9144_v28  ;;  %9450 = vst [vmem:[%s12828_s30 + $0x38] sm:$0xff] %v9370_v41 }
 0xffd   : > { %v9148_v50 = vpop.f32.mrb[4].mxu0  ;;  %v9374_v2 = vpop.f32.mrb[4].mxu1 }
 0xffe   : > { %9451 = vst [vmem:[%s12828_s30 + $0x40] sm:$0xff] %v9148_v50  ;;  %9453 = vst [vmem:[%s12828_s30 + $0x50] sm:$0xff] %v9374_v2  ;;  %v9150_v42 = vpop.f32.mrb[5].mxu0  ;;  %v9376_v20 = vpop.f32.mrb[5].mxu1 }
 0xfff   : > { %9452 = vst [vmem:[%s12828_s30 + $0x48] sm:$0xff] %v9150_v42  ;;  %9454 = vst [vmem:[%s12828_s30 + $0x58] sm:$0xff] %v9376_v20  ;;  %v9152_v46 = vpop.f32.mrb[6].mxu0  ;;  %v9378_v22 = vpop.f32.mrb[6].mxu1 }
0x1000   : > { %9455 = vst [vmem:[%s12828_s30 + $0x60] sm:$0xff] %v9152_v46  ;;  %9457 = vst [vmem:[%s12828_s30 + $0x70] sm:$0xff] %v9378_v22  ;;  %v9154_v19 = vpop.f32.mrb[7].mxu0  ;;  %v9380_v53 = vpop.f32.mrb[7].mxu1 }
0x1001   : > { %9456 = vst [vmem:[%s12828_s30 + $0x68] sm:$0xff] %v9154_v19  ;;  %9458 = vst [vmem:[%s12828_s30 + $0x78] sm:$0xff] %v9380_v53 }
0x1005   : > { %v9158_v16 = vpop.f32.mrb[8].mxu0  ;;  %v9384_v43 = vpop.f32.mrb[8].mxu1 }
0x1006   : > { %9459 = vst [vmem:[%s12828_s30 + $0x80] sm:$0xff] %v9158_v16  ;;  %9461 = vst [vmem:[%s12828_s30 + $0x90] sm:$0xff] %v9384_v43  ;;  %v9160_v10 = vpop.f32.mrb[9].mxu0  ;;  %v9386_v0 = vpop.f32.mrb[9].mxu1 }
0x1007   : > { %9460 = vst [vmem:[%s12828_s30 + $0x88] sm:$0xff] %v9160_v10  ;;  %9462 = vst [vmem:[%s12828_s30 + $0x98] sm:$0xff] %v9386_v0  ;;  %v9162_v57 = vpop.f32.mrb[10].mxu0  ;;  %v9388_v27 = vpop.f32.mrb[10].mxu1 }
0x1008   : > { %9463 = vst [vmem:[%s12828_s30 + $0xa0] sm:$0xff] %v9162_v57  ;;  %9465 = vst [vmem:[%s12828_s30 + $0xb0] sm:$0xff] %v9388_v27  ;;  %v9164_v60 = vpop.f32.mrb[11].mxu0  ;;  %v9390_v48 = vpop.f32.mrb[11].mxu1 }
0x1009   : > { %9464 = vst [vmem:[%s12828_s30 + $0xa8] sm:$0xff] %v9164_v60  ;;  %9466 = vst [vmem:[%s12828_s30 + $0xb8] sm:$0xff] %v9390_v48 }
0x100d   : > { %v9168_v21 = vpop.f32.mrb[12].mxu0  ;;  %v9394_v13 = vpop.f32.mrb[12].mxu1 }
0x100e   : > { %9467 = vst [vmem:[%s12828_s30 + $0xc0] sm:$0xff] %v9168_v21  ;;  %9469 = vst [vmem:[%s12828_s30 + $0xd0] sm:$0xff] %v9394_v13  ;;  %v9170_v35 = vpop.f32.mrb[13].mxu0  ;;  %v9396_v18 = vpop.f32.mrb[13].mxu1 }
0x100f   : > { %9468 = vst [vmem:[%s12828_s30 + $0xc8] sm:$0xff] %v9170_v35  ;;  %9470 = vst [vmem:[%s12828_s30 + $0xd8] sm:$0xff] %v9396_v18  ;;  %v9172_v37 = vpop.f32.mrb[14].mxu0  ;;  %v9398_v11 = vpop.f32.mrb[14].mxu1 }
0x1010   : > { %9471 = vst [vmem:[%s12828_s30 + $0xe0] sm:$0xff] %v9172_v37  ;;  %9473 = vst [vmem:[%s12828_s30 + $0xf0] sm:$0xff] %v9398_v11  ;;  %v9174_v7 = vpop.f32.mrb[15].mxu0  ;;  %v9400_v36 = vpop.f32.mrb[15].mxu1 }
0x1011   : > { %9472 = vst [vmem:[%s12828_s30 + $0xe8] sm:$0xff] %v9174_v7  ;;  %9474 = vst [vmem:[%s12828_s30 + $0xf8] sm:$0xff] %v9400_v36 }
0x1015   : > { %v9178_v33 = vpop.f32.mrb[16].mxu0  ;;  %v9404_v23 = vpop.f32.mrb[16].mxu1 }
0x1016   : > { %9475 = vst [vmem:[%s12828_s30 + $0x100] sm:$0xff] %v9178_v33  ;;  %9477 = vst [vmem:[%s12828_s30 + $0x110] sm:$0xff] %v9404_v23  ;;  %v9180_v47 = vpop.f32.mrb[17].mxu0  ;;  %v9406_v62 = vpop.f32.mrb[17].mxu1 }
0x1017   : > { %9476 = vst [vmem:[%s12828_s30 + $0x108] sm:$0xff] %v9180_v47  ;;  %9478 = vst [vmem:[%s12828_s30 + $0x118] sm:$0xff] %v9406_v62  ;;  %v9182_v24 = vpop.f32.mrb[18].mxu0  ;;  %v9408_v39 = vpop.f32.mrb[18].mxu1 }
0x1018   : > { %9479 = vst [vmem:[%s12828_s30 + $0x120] sm:$0xff] %v9182_v24  ;;  %9481 = vst [vmem:[%s12828_s30 + $0x130] sm:$0xff] %v9408_v39  ;;  %v9184_v1 = vpop.f32.mrb[19].mxu0  ;;  %v9410_v58 = vpop.f32.mrb[19].mxu1 }
0x1019   : > { %9480 = vst [vmem:[%s12828_s30 + $0x128] sm:$0xff] %v9184_v1  ;;  %9482 = vst [vmem:[%s12828_s30 + $0x138] sm:$0xff] %v9410_v58 }
0x101d   : > { %v9188_v61 = vpop.f32.mrb[20].mxu0  ;;  %v9414_v59 = vpop.f32.mrb[20].mxu1 }
0x101e   : > { %9483 = vst [vmem:[%s12828_s30 + $0x140] sm:$0xff] %v9188_v61  ;;  %9485 = vst [vmem:[%s12828_s30 + $0x150] sm:$0xff] %v9414_v59  ;;  %v9190_v51 = vpop.f32.mrb[21].mxu0  ;;  %v9416_v8 = vpop.f32.mrb[21].mxu1 }
0x101f   : > { %9484 = vst [vmem:[%s12828_s30 + $0x148] sm:$0xff] %v9190_v51  ;;  %9486 = vst [vmem:[%s12828_s30 + $0x158] sm:$0xff] %v9416_v8  ;;  %v9192_v32 = vpop.f32.mrb[22].mxu0  ;;  %v9418_v52 = vpop.f32.mrb[22].mxu1 }
0x1020   : > { %9487 = vst [vmem:[%s12828_s30 + $0x160] sm:$0xff] %v9192_v32  ;;  %9489 = vst [vmem:[%s12828_s30 + $0x170] sm:$0xff] %v9418_v52  ;;  %v9194_v54 = vpop.f32.mrb[23].mxu0  ;;  %v9420_v55 = vpop.f32.mrb[23].mxu1 }
0x1021   : > { %9488 = vst [vmem:[%s12828_s30 + $0x168] sm:$0xff] %v9194_v54  ;;  %9490 = vst [vmem:[%s12828_s30 + $0x178] sm:$0xff] %v9420_v55 }
0x1025   : > { %v9198_v12 = vpop.f32.mrb[24].mxu0  ;;  %v9424_v5 = vpop.f32.mrb[24].mxu1 }
0x1026   : > { %9491 = vst [vmem:[%s12828_s30 + $0x180] sm:$0xff] %v9198_v12  ;;  %9493 = vst [vmem:[%s12828_s30 + $0x190] sm:$0xff] %v9424_v5  ;;  %v9200_v40 = vpop.f32.mrb[25].mxu0  ;;  %v9426_v25 = vpop.f32.mrb[25].mxu1 }
0x1027   : > { %9492 = vst [vmem:[%s12828_s30 + $0x188] sm:$0xff] %v9200_v40  ;;  %9494 = vst [vmem:[%s12828_s30 + $0x198] sm:$0xff] %v9426_v25  ;;  %v9202_v44 = vpop.f32.mrb[26].mxu0  ;;  %v9428_v3 = vpop.f32.mrb[26].mxu1 }
0x1028   : > { %9495 = vst [vmem:[%s12828_s30 + $0x1a0] sm:$0xff] %v9202_v44  ;;  %9497 = vst [vmem:[%s12828_s30 + $0x1b0] sm:$0xff] %v9428_v3  ;;  %v9204_v17 = vpop.f32.mrb[27].mxu0  ;;  %v9430_v49 = vpop.f32.mrb[27].mxu1 }
0x1029   : > { %9496 = vst [vmem:[%s12828_s30 + $0x1a8] sm:$0xff] %v9204_v17  ;;  %9498 = vst [vmem:[%s12828_s30 + $0x1b8] sm:$0xff] %v9430_v49 }
0x102d   : > { %v9208_v26 = vpop.f32.mrb[28].mxu0  ;;  %v9434_v56 = vpop.f32.mrb[28].mxu1 }
0x102e   : > { %9499 = vst [vmem:[%s12828_s30 + $0x1c0] sm:$0xff] %v9208_v26  ;;  %9501 = vst [vmem:[%s12828_s30 + $0x1d0] sm:$0xff] %v9434_v56  ;;  %v9210_v6 = vpop.f32.mrb[29].mxu0  ;;  %v9436_v30 = vpop.f32.mrb[29].mxu1 }
0x102f   : > { %9500 = vst [vmem:[%s12828_s30 + $0x1c8] sm:$0xff] %v9210_v6  ;;  %9502 = vst [vmem:[%s12828_s30 + $0x1d8] sm:$0xff] %v9436_v30  ;;  %v9212_v15 = vpop.f32.mrb[30].mxu0  ;;  %v9438_v14 = vpop.f32.mrb[30].mxu1 }
0x1030   : > { %9503 = vst [vmem:[%s12828_s30 + $0x1e0] sm:$0xff] %v9212_v15  ;;  %9505 = vst [vmem:[%s12828_s30 + $0x1f0] sm:$0xff] %v9438_v14  ;;  %v9214_v38 = vpop.f32.mrb[31].mxu0  ;;  %v9440_v34 = vpop.f32.mrb[31].mxu1 }
0x1031   : > { %9504 = vst [vmem:[%s12828_s30 + $0x1e8] sm:$0xff] %v9214_v38  ;;  %9506 = vst [vmem:[%s12828_s30 + $0x1f8] sm:$0xff] %v9440_v34 }
0x1032 PF: > { %s16197_s29 = sld [smem:[#allocation24_spill]]  ;;  %s16198_s11 = sld [smem:[#allocation25_spill]] }
0x1033   : > { %s9524_s9 = sshll.u32 %s12828_s30, 4  ;;  %s16200_s13 = sld [smem:[#allocation152_spill]]  ;;  %s15549_s9 = int_to_ptr.vmem [resolvable:$true] %s9524_s9 }
0x1034   : > { %s9508_s14 = scalar_lea.sflag [#allocation10], %s12802_s10  ;;  %s12299_s22 = scalar_lea.vmem %s15549_s9, 8192 }
0x1035   : > { %p12300_p8 = scmp.ne.s32.totalorder %s15549_s9, %s12299_s22  ;;  %s12465_s5 = smov [#allocation16]  }
0x1036   : > { %s12303_s30 = sshll.u32 %s12465_s5, 4  ;;  %s12304_s30 = int_to_ptr.vmem [resolvable:$false] %s12303_s30 }
0x1037   : > { %p12301_p10 = pnand %p12300_p8, %p12657_p12  ;;  %s12305_s7 = scalar_lea.vmem %s12304_s30, 16384 }
0x1038   : > { %s10230_s2 = sshll.u32 %s16197_s29, 6  ;;  %s10220_s28 = sshll.u32 %s16198_s11, 7 }
0x1039   : > { %s9521_s4 = sadd.s32 %s10230_s2, %s10220_s28  ;;  %p12302_p2 = pneg %p12301_p10 }
0x103a   : > { %s10221_s23 = sshll.u32 %s9521_s4, 7  ;;  %p12306_p7 = scmp.lt.s32.totalorder %s15549_s9, %s12304_s30 }
0x103b   : > { %s15554_s12 = scalar_lea.hbm %s16200_s13, %s10221_s23  ;;  %p12307_p4 = scmp.lt.s32.totalorder %s12305_s7, %s12299_s22 }
0x103d   : > { %p12308_p6 = por %p12307_p4, %p12306_p7 }
0x103f   : > { %p12309_p3 = pnand %p12308_p6, %p12302_p2 }
0x1041   : > { %12312 = shalt.err (!%p12309_p3)
}
0x1042   : > { %s12313_s18 = scalar_lea.hbm %s15554_s12, 8192  ;;  %s12317_s2 = scalar_lea.hbm %s16200_s13, 32768 }
0x1043   : > { %p12314_p13 = scmp.ne.s32.totalorder %s15554_s12, %s12313_s18  ;;  %p12318_p11 = scmp.lt.u32.totalorder %s15554_s12, %s16200_s13 }
0x1044   : > { %p12319_p5 = scmp.lt.u32.totalorder %s12317_s2, %s12313_s18  ;;  %p12321_p8 = scmp.lt.u32.totalorder %s12313_s18, %s15554_s12 }
0x1045   : > { %p12315_p9 = pnand %p12314_p13, %p12657_p12 }
0x1046   : > { %p12320_p0 = por %p12319_p5, %p12318_p11 }
0x1047   : > { %p12316_p1 = pneg %p12315_p9 }
0x1048   : > { %p12322_p10 = por %p12321_p8, %p12320_p0 }
0x104a   : > { %p12323_p2 = pnand %p12322_p10, %p12316_p1 }
0x104c   : > { %12326 = shalt.err (!%p12323_p2)
}
0x104d   : > { %s12466_s23 = smov 512   ;;  %s12467_s21 = smov 32  }
0x104e   : > { %10883 = dma.vmem_to_hbm [thread:$0]  (%p12657_p12), %s15549_s9, 8192, %s15554_s12, %s9508_s14, %s12466_s23, %s12466_s23, %s12467_s21  }
0x104f PF: > { %s16201_s24 = sld [smem:[#allocation22_spill]]  ;;  %s16202_s22 = sld [smem:[#allocation28_spill]] }
0x1050   : > { %p10908_p7 = scmp.ge.s32.totalorder %s12449_s27, 2 }
0x1055   : > { %s9539_s5 = sand.u32 1, %s16201_s24   ;;  %p16203_p4 = scmp.ne.s32.totalorder %s16202_s22, 0 }
0x1056   : > { %s9540_s30 = scalar_lea.sflag [#allocation10], %s9539_s5 }
0x1057   : > { %p10900_p6 = pnand %p10908_p7, %p16203_p4 }
0x1059   : > { %12396 = dma.done.wait (!%p10900_p6), %s9540_s30, 8192  }
0x105a   : > { %12398 = vsyncadd (!%p10900_p6), %s9540_s30, 4294959104  ;;  %s24_s27 = sadd.s32 1, %s12449_s27   ;;  %s16205_s21 = sld [smem:[#allocation26_spill]] }
0x105b   : > { %p15585_p3 = scmp.ge.s32.totalorder %s24_s27, 10   ;;  %s16206_s24 = sld [smem:[#allocation29_spill]] }
0x105c   : > { %s16207_s10 = sld [smem:[#allocation31_spill]]  ;;  %s16208_s15 = smov %s12405_s16 }
0x105d   : > { %s16209_s16 = smov %s12409_s17  ;;  %s16210_s17 = smov %s12749_s8 }
0x105e   : > { %s16211_s18 = smov %s12417_s19  ;;  %s16212_s19 = smov %s12421_s20 }
0x105f   : > { %s16213_s20 = smov %s12688_s3  ;;  %s16214_s22 = smov %s12441_s25 }
0x1060   : > { %s16215_s23 = smov %s12445_s26  ;;  %s16217_s26 = smov %s16227_s6 }
0x1061   :  { %23 = sbr.rel (!%p15585_p3) target bundleno = 17 (0x11), region = 124 }
0x1062   : > { %s16216_s25 = smov %s16207_s10 }
0x1068   :  { %9545 = vsyncpa [#allocation9], 1 }
0x1069   :  { %9547 = vsyncpa [#allocation9 + $0x1], 1 }
0x106a   :  { %9548 = vsyncpa [#allocation12], 1 }
0x106b   :  { %9550 = vsyncpa [#allocation12 + $0x1], 1 }
0x106c   :  { %9551 = vsyncpa [#allocation15], 1 }
0x106d   :  { %9552 = vsyncpa [#allocation10], 1 }
0x106e   :  { %9554 = vsyncpa [#allocation10 + $0x1], 1 }

</bundles_post_ra>
